<compile_context>
chip_gen: v5e
topology: v5e:2x2
jax: 0.10.0
libtpu: 0.0.40
codegen_flags: <defaults>
</compile_context>

<pallas_src>
from functools import partial

import jax
import jax.numpy as jnp
from jax.experimental import pallas as pl
from jax.experimental.pallas import tpu as pltpu


def _gru_encoder_kernel(idx_ref, emb_ref, h0_ref, wih0_ref, bgi0_ref,
                        wwave_ref, bwave_ref, out_ref, hn_ref, x_buf,
                        *, n_layers, hidden_size, seq_len):
    """Embedding gather + whole multi-layer GRU recurrence in one invocation."""
    H = hidden_size
    L = n_layers

    # ---- Fused embedding gather: SMEM token ids drive dynamic row loads. ----
    for t in range(seq_len):
        x_buf[t:t + 1, :] = emb_ref[pl.ds(idx_ref[t], 1), :]

    # ---- Hoisted layer-0 input projection: one (seq,H) x (H,3H) MXU matmul.
    gi0_all = jnp.dot(x_buf[...].astype(jnp.bfloat16), wih0_ref[...],
                      preferred_element_type=jnp.float32) + bgi0_ref[...]  # (seq,3H) f32

    b_wave = bwave_ref[...]                          # (1, 3H+4H*(L-1)) f32

    # Per-layer hidden state, kept as f32 (1,H) register values.
    h = [h0_ref[l:l + 1, :] for l in range(L)]

    # ---- Wavefront recurrence (static unroll; seq is small here).
    # TODO(synk): for seq >~ 32 switch this to lax.fori_loop(..., unroll=4..8)
    # with a VMEM sequence buffer to bound vreg live ranges.
    for w in range(seq_len + L - 1):
        lhs = jnp.concatenate([hl.astype(jnp.bfloat16) for hl in h], axis=1)  # (1, L*H)
        # TODO(synk): if the bundle dump shows the RHS re-streamed every
        # wavefront, drive the MXU explicitly (pltpu.matmul_push_rhs once +
        # matmul_acc_lhs/matmul_pop per wavefront) to keep it stationary.
        g = jnp.dot(lhs, wwave_ref[...],
                    preferred_element_type=jnp.float32) + b_wave             # (1, out_w)

        h_new = list(h)

        # Layer 0 at time t = w.
        if w < seq_len:
            gi = gi0_all[w:w + 1, :]
            gh = g[:, 0:3 * H]                       # b_hn_0 already in b_wave
            r = jax.nn.sigmoid(gi[:, 0:H] + gh[:, 0:H])
            z = jax.nn.sigmoid(gi[:, H:2 * H] + gh[:, H:2 * H])
            n = jnp.tanh(gi[:, 2 * H:3 * H] + r * gh[:, 2 * H:3 * H])
            h_new[0] = (1.0 - z) * n + z * h[0]
            if L == 1:
                out_ref[w:w + 1, :] = h_new[0]

        # Layers l >= 1 at time t = w - l (their input is h_{l-1} of the
        # previous wavefront, already inside `lhs` / the packed matmul).
        for l in range(1, L):
            t = w - l
            if 0 <= t < seq_len:
                base = 3 * H + 4 * H * (l - 1)
                r = jax.nn.sigmoid(g[:, base:base + H])
                z = jax.nn.sigmoid(g[:, base + H:base + 2 * H])
                n = jnp.tanh(g[:, base + 2 * H:base + 3 * H]
                             + r * g[:, base + 3 * H:base + 4 * H])
                hl = (1.0 - z) * n + z * h[l]
                h_new[l] = hl
                if l == L - 1:
                    out_ref[t:t + 1, :] = hl         # aligned 128-lane row store

        h = h_new

    for l in range(L):                               # final hiddens, row stores
        hn_ref[l:l + 1, :] = h[l]


def prepare_encoder_params(params, n_layers):
    """One-time prep: transpose, bf16 cast, bias folding, and the packed
    block-structured recurrent RHS used by the wavefront kernel."""
    H = params["embedding"].shape[1]
    L = n_layers
    out_w = 3 * H + 4 * H * (L - 1)

    w_wave = jnp.zeros((L * H, out_w), jnp.float32)
    b_wave = jnp.zeros((1, out_w), jnp.float32)

    # Layer 0: input projection stays hoisted; only its hidden-side matmul
    # goes into the packed RHS.  r/z: sigmoid(i+h) lets b_hh fold into b_ih;
    # the n-gate hidden bias folds into b_wave (the cell applies r * gh_n).
    w_ih0, w_hh0 = params["w_ih_l0"], params["w_hh_l0"]
    b_ih0, b_hh0 = params["b_ih_l0"], params["b_hh_l0"]
    bgi0 = jnp.concatenate([b_ih0[:2 * H] + b_hh0[:2 * H], b_ih0[2 * H:]])[None, :]
    w_wave = w_wave.at[0:H, 0:3 * H].set(w_hh0.T)
    b_wave = b_wave.at[0, 2 * H:3 * H].set(b_hh0[2 * H:])

    # Layers l >= 1: input (= h_{l-1}) and hidden matmuls share the packed RHS.
    for l in range(1, L):
        w_ih, w_hh = params[f"w_ih_l{l}"], params[f"w_hh_l{l}"]
        b_ih, b_hh = params[f"b_ih_l{l}"], params[f"b_hh_l{l}"]
        base = 3 * H + 4 * H * (l - 1)
        rx = slice((l - 1) * H, l * H)               # rows hit by h_{l-1} (input)
        rh = slice(l * H, (l + 1) * H)               # rows hit by h_l (hidden)
        # combined r|z gates (input + hidden sides summed inside sigmoid)
        w_wave = w_wave.at[rx, base:base + 2 * H].set(w_ih[:2 * H, :].T)
        w_wave = w_wave.at[rh, base:base + 2 * H].set(w_hh[:2 * H, :].T)
        b_wave = b_wave.at[0, base:base + 2 * H].set(b_ih[:2 * H] + b_hh[:2 * H])
        # n gate: input side and hidden side stay separate (r gates only h)
        w_wave = w_wave.at[rx, base + 2 * H:base + 3 * H].set(w_ih[2 * H:, :].T)
        b_wave = b_wave.at[0, base + 2 * H:base + 3 * H].set(b_ih[2 * H:])
        w_wave = w_wave.at[rh, base + 3 * H:base + 4 * H].set(w_hh[2 * H:, :].T)
        b_wave = b_wave.at[0, base + 3 * H:base + 4 * H].set(b_hh[2 * H:])

    return {
        # TODO(synk): for very large vocab, keep the table in HBM (pl.ANY) and
        # DMA the needed rows instead of making it VMEM-resident.
        "embedding": params["embedding"].astype(jnp.float32),   # (vocab, H)
        "wih0": w_ih0.T.astype(jnp.bfloat16),                   # (H, 3H)
        "bgi0": bgi0.astype(jnp.float32),                       # (1, 3H)
        "w_wave": w_wave.astype(jnp.bfloat16),                  # (L*H, out_w)
        "b_wave": b_wave.astype(jnp.float32),                   # (1, out_w)
    }


def _vmem_estimate_bytes(vocab, H, L, seq_len):
    out_w = 3 * H + 4 * H * (L - 1)
    return (vocab * H * 4            # embedding table
            + L * H * 4              # h0
            + H * 3 * H * 2          # wih0 (bf16)
            + 3 * H * 4              # bgi0
            + L * H * out_w * 2      # packed recurrent weights (bf16)
            + out_w * 4              # b_wave
            + seq_len * H * 4 * 2    # output slab + gather scratch
            + L * H * 4)             # hn


def encoder_rnn_forward(word_inputs, hidden, prep):
    """Mirrors EncoderRNN.forward(word_inputs, hidden) using prepared params."""
    L, B, H = hidden.shape
    assert B == 1, "EncoderRNN kernel assumes batch == 1 (as the reference module does)"
    seq_len = int(word_inputs.shape[0])
    vocab = prep["embedding"].shape[0]

    idx = word_inputs.astype(jnp.int32)
    h0 = hidden.reshape(L, H).astype(jnp.float32)

    vmem = pl.BlockSpec(memory_space=pltpu.MemorySpace.VMEM)
    smem = pl.BlockSpec(memory_space=pltpu.MemorySpace.SMEM)

    # Concrete VMEM budget: raise the scoped limit only if the all-resident
    # layout approaches the smallest default (16 MiB on v5e); stay well under
    # v7x's 64 MiB physical VMEM.
    est = _vmem_estimate_bytes(vocab, H, L, seq_len)
    vmem_limit = None
    if 2 * est > 12 * 1024 * 1024:
        vmem_limit = min(3 * est, 56 * 1024 * 1024)
    # TODO(synk): if 3*est exceeds ~56 MiB (large H on v7x), stream per-layer
    # weights via pl.ANY + double-buffered pltpu.make_async_copy instead of
    # keeping all layers resident.

    kernel = partial(_gru_encoder_kernel, n_layers=L, hidden_size=H,
                     seq_len=seq_len)

    out, hn = pl.pallas_call(
        kernel,
        out_shape=(jax.ShapeDtypeStruct((seq_len, H), jnp.float32),
                   jax.ShapeDtypeStruct((L, H), jnp.float32)),
        in_specs=[smem, vmem, vmem, vmem, vmem, vmem, vmem],
        out_specs=(vmem, vmem),
        scratch_shapes=[pltpu.VMEM((seq_len, H), jnp.float32)],
        compiler_params=pltpu.CompilerParams(vmem_limit_bytes=vmem_limit),
    )(idx, prep["embedding"], h0, prep["wih0"], prep["bgi0"],
      prep["w_wave"], prep["b_wave"])

    return out.reshape(seq_len, 1, H), hn.reshape(L, 1, H)


def reference_forward(word_inputs, hidden, params):
    """Pure-JAX f32 reference with PyTorch nn.GRU semantics."""
    emb = params["embedding"]
    L, _, H = hidden.shape
    layer_in = emb[word_inputs].astype(jnp.float32)    # (seq, H)
    h_final = []
    for l in range(L):
        wih, whh = params[f"w_ih_l{l}"], params[f"w_hh_l{l}"]
        bih, bhh = params[f"b_ih_l{l}"], params[f"b_hh_l{l}"]
        h = hidden[l, 0]
        outs = []
        for t in range(layer_in.shape[0]):
            gi = wih @ layer_in[t] + bih
            gh = whh @ h + bhh
            i_r, i_z, i_n = gi[:H], gi[H:2 * H], gi[2 * H:]
            h_r, h_z, h_n = gh[:H], gh[H:2 * H], gh[2 * H:]
            r = jax.nn.sigmoid(i_r + h_r)
            z = jax.nn.sigmoid(i_z + h_z)
            n = jnp.tanh(i_n + r * h_n)
            h = (1.0 - z) * n + z * h
            outs.append(h)
        layer_in = jnp.stack(outs)
        h_final.append(h)
    return layer_in.reshape(-1, 1, H), jnp.stack(h_final).reshape(L, 1, H)


if __name__ == "__main__":
    vocab_size, hidden_size, n_layers, seq_len = 50, 128, 2, 8

    key = jax.random.PRNGKey(0)
    keys = jax.random.split(key, 2 + 4 * n_layers)

    # Deterministic parameter init (shapes match nn.Embedding + nn.GRU).
    params = {"embedding": jax.random.normal(keys[0], (vocab_size, hidden_size),
                                             dtype=jnp.float32)}
    bound = 1.0 / float(hidden_size) ** 0.5
    ki = 1
    for l in range(n_layers):
        params[f"w_ih_l{l}"] = jax.random.uniform(
            keys[ki], (3 * hidden_size, hidden_size), jnp.float32, -bound, bound); ki += 1
        params[f"w_hh_l{l}"] = jax.random.uniform(
            keys[ki], (3 * hidden_size, hidden_size), jnp.float32, -bound, bound); ki += 1
        params[f"b_ih_l{l}"] = jax.random.uniform(
            keys[ki], (3 * hidden_size,), jnp.float32, -bound, bound); ki += 1
        params[f"b_hh_l{l}"] = jax.random.uniform(
            keys[ki], (3 * hidden_size,), jnp.float32, -bound, bound); ki += 1

    word_inputs = jax.random.randint(keys[-1], (seq_len,), 0, vocab_size)
    hidden0 = jnp.zeros((n_layers, 1, hidden_size), jnp.float32)   # init_hidden()

    prep = prepare_encoder_params(params, n_layers)                # one-time prep
    out, hn = encoder_rnn_forward(word_inputs, hidden0, prep)
    jax.block_until_ready((out, hn))

    ref_out, ref_hn = reference_forward(word_inputs, hidden0, params)
    assert out.shape == (seq_len, 1, hidden_size) and hn.shape == (n_layers, 1, hidden_size)
    # bf16 weights/activations on the MXU with f32 accumulation vs f32 reference.
    assert jnp.allclose(out, ref_out, atol=5e-2, rtol=5e-2)
    assert jnp.allclose(hn, ref_hn, atol=5e-2, rtol=5e-2)

    print("KERNEL_OK")
</pallas_src>

<mosaic_0001>
module attributes {stable_mosaic.version = 11 : i64} {
  func.func @_gru_encoder_kernel(%arg0: memref<8xi32, #tpu.memory_space<smem>>, %arg1: memref<50x128xf32, #tpu.memory_space<vmem>>, %arg2: memref<2x128xf32, #tpu.memory_space<vmem>>, %arg3: memref<128x384xbf16, #tpu.memory_space<vmem>>, %arg4: memref<1x384xf32, #tpu.memory_space<vmem>>, %arg5: memref<256x896xbf16, #tpu.memory_space<vmem>>, %arg6: memref<1x896xf32, #tpu.memory_space<vmem>>, %arg7: memref<8x128xf32, #tpu.memory_space<vmem>>, %arg8: memref<2x128xf32, #tpu.memory_space<vmem>>, %arg9: memref<8x128xf32, #tpu.memory_space<vmem>>) attributes {dimension_semantics = [], scalar_prefetch = 0 : i64, scratch_operands = 1 : i64, tpu.core_type = #tpu.core_type<tc>} {
    %c0 = arith.constant 0 : index
    %0 = memref.load %arg0[%c0] : memref<8xi32, #tpu.memory_space<smem>>
    %1 = arith.index_cast %0 : i32 to index
    %c0_0 = arith.constant 0 : index
    %2 = vector.load %arg1[%1, %c0_0] : memref<50x128xf32, #tpu.memory_space<vmem>>, vector<1x128xf32>
    %c0_1 = arith.constant 0 : index
    %c0_2 = arith.constant 0 : index
    %3 = vector.load %arg9[%c0_1, %c0_2] : memref<8x128xf32, #tpu.memory_space<vmem>>, vector<1x128xf32>
    tpu.vector_store %arg9[%c0_1, %c0_2], %2 {strides = array<i32>} : memref<8x128xf32, #tpu.memory_space<vmem>>, vector<1x128xf32>,
    %c1 = arith.constant 1 : index
    %4 = memref.load %arg0[%c1] : memref<8xi32, #tpu.memory_space<smem>>
    %5 = arith.index_cast %4 : i32 to index
    %c0_3 = arith.constant 0 : index
    %6 = vector.load %arg1[%5, %c0_3] : memref<50x128xf32, #tpu.memory_space<vmem>>, vector<1x128xf32>
    %c1_4 = arith.constant 1 : index
    %c0_5 = arith.constant 0 : index
    %7 = vector.load %arg9[%c1_4, %c0_5] : memref<8x128xf32, #tpu.memory_space<vmem>>, vector<1x128xf32>
    tpu.vector_store %arg9[%c1_4, %c0_5], %6 {strides = array<i32>} : memref<8x128xf32, #tpu.memory_space<vmem>>, vector<1x128xf32>,
    %c2 = arith.constant 2 : index
    %8 = memref.load %arg0[%c2] : memref<8xi32, #tpu.memory_space<smem>>
    %9 = arith.index_cast %8 : i32 to index
    %c0_6 = arith.constant 0 : index
    %10 = vector.load %arg1[%9, %c0_6] : memref<50x128xf32, #tpu.memory_space<vmem>>, vector<1x128xf32>
    %c2_7 = arith.constant 2 : index
    %c0_8 = arith.constant 0 : index
    %11 = vector.load %arg9[%c2_7, %c0_8] : memref<8x128xf32, #tpu.memory_space<vmem>>, vector<1x128xf32>
    tpu.vector_store %arg9[%c2_7, %c0_8], %10 {strides = array<i32>} : memref<8x128xf32, #tpu.memory_space<vmem>>, vector<1x128xf32>,
    %c3 = arith.constant 3 : index
    %12 = memref.load %arg0[%c3] : memref<8xi32, #tpu.memory_space<smem>>
    %13 = arith.index_cast %12 : i32 to index
    %c0_9 = arith.constant 0 : index
    %14 = vector.load %arg1[%13, %c0_9] : memref<50x128xf32, #tpu.memory_space<vmem>>, vector<1x128xf32>
    %c3_10 = arith.constant 3 : index
    %c0_11 = arith.constant 0 : index
    %15 = vector.load %arg9[%c3_10, %c0_11] : memref<8x128xf32, #tpu.memory_space<vmem>>, vector<1x128xf32>
    tpu.vector_store %arg9[%c3_10, %c0_11], %14 {strides = array<i32>} : memref<8x128xf32, #tpu.memory_space<vmem>>, vector<1x128xf32>,
    %c4 = arith.constant 4 : index
    %16 = memref.load %arg0[%c4] : memref<8xi32, #tpu.memory_space<smem>>
    %17 = arith.index_cast %16 : i32 to index
    %c0_12 = arith.constant 0 : index
    %18 = vector.load %arg1[%17, %c0_12] : memref<50x128xf32, #tpu.memory_space<vmem>>, vector<1x128xf32>
    %c4_13 = arith.constant 4 : index
    %c0_14 = arith.constant 0 : index
    %19 = vector.load %arg9[%c4_13, %c0_14] : memref<8x128xf32, #tpu.memory_space<vmem>>, vector<1x128xf32>
    tpu.vector_store %arg9[%c4_13, %c0_14], %18 {strides = array<i32>} : memref<8x128xf32, #tpu.memory_space<vmem>>, vector<1x128xf32>,
    %c5 = arith.constant 5 : index
    %20 = memref.load %arg0[%c5] : memref<8xi32, #tpu.memory_space<smem>>
    %21 = arith.index_cast %20 : i32 to index
    %c0_15 = arith.constant 0 : index
    %22 = vector.load %arg1[%21, %c0_15] : memref<50x128xf32, #tpu.memory_space<vmem>>, vector<1x128xf32>
    %c5_16 = arith.constant 5 : index
    %c0_17 = arith.constant 0 : index
    %23 = vector.load %arg9[%c5_16, %c0_17] : memref<8x128xf32, #tpu.memory_space<vmem>>, vector<1x128xf32>
    tpu.vector_store %arg9[%c5_16, %c0_17], %22 {strides = array<i32>} : memref<8x128xf32, #tpu.memory_space<vmem>>, vector<1x128xf32>,
    %c6 = arith.constant 6 : index
    %24 = memref.load %arg0[%c6] : memref<8xi32, #tpu.memory_space<smem>>
    %25 = arith.index_cast %24 : i32 to index
    %c0_18 = arith.constant 0 : index
    %26 = vector.load %arg1[%25, %c0_18] : memref<50x128xf32, #tpu.memory_space<vmem>>, vector<1x128xf32>
    %c6_19 = arith.constant 6 : index
    %c0_20 = arith.constant 0 : index
    %27 = vector.load %arg9[%c6_19, %c0_20] : memref<8x128xf32, #tpu.memory_space<vmem>>, vector<1x128xf32>
    tpu.vector_store %arg9[%c6_19, %c0_20], %26 {strides = array<i32>} : memref<8x128xf32, #tpu.memory_space<vmem>>, vector<1x128xf32>,
    %c7 = arith.constant 7 : index
    %28 = memref.load %arg0[%c7] : memref<8xi32, #tpu.memory_space<smem>>
    %29 = arith.index_cast %28 : i32 to index
    %c0_21 = arith.constant 0 : index
    %30 = vector.load %arg1[%29, %c0_21] : memref<50x128xf32, #tpu.memory_space<vmem>>, vector<1x128xf32>
    %c7_22 = arith.constant 7 : index
    %c0_23 = arith.constant 0 : index
    %31 = vector.load %arg9[%c7_22, %c0_23] : memref<8x128xf32, #tpu.memory_space<vmem>>, vector<1x128xf32>
    tpu.vector_store %arg9[%c7_22, %c0_23], %30 {strides = array<i32>} : memref<8x128xf32, #tpu.memory_space<vmem>>, vector<1x128xf32>,
    %c0_24 = arith.constant 0 : index
    %c0_25 = arith.constant 0 : index
    %32 = vector.load %arg9[%c0_24, %c0_25] : memref<8x128xf32, #tpu.memory_space<vmem>>, vector<8x128xf32>
    %33 = arith.truncf %32 : vector<8x128xf32> to vector<8x128xbf16>
    %c0_26 = arith.constant 0 : index
    %c0_27 = arith.constant 0 : index
    %34 = vector.load %arg3[%c0_26, %c0_27] : memref<128x384xbf16, #tpu.memory_space<vmem>>, vector<128x384xbf16>
    %cst = arith.constant dense<0.000000e+00> : vector<8x384xf32>
    %35 = tpu.matmul %33, %34, %cst {dimension_numbers = #tpu.dot_dimension_numbers<[1], [0], [0], [1], [0, 0, 1, 1], [], []>} : vector<8x128xbf16>, vector<128x384xbf16>, vector<8x384xf32> -> vector<8x384xf32>
    %c0_28 = arith.constant 0 : index
    %c0_29 = arith.constant 0 : index
    %36 = vector.load %arg4[%c0_28, %c0_29] : memref<1x384xf32, #tpu.memory_space<vmem>>, vector<1x384xf32>
    %37 = vector.broadcast %36 : vector<1x384xf32> to vector<8x384xf32>
    %38 = arith.addf %35, %37 : vector<8x384xf32>
    %c0_30 = arith.constant 0 : index
    %c0_31 = arith.constant 0 : index
    %39 = vector.load %arg6[%c0_30, %c0_31] : memref<1x896xf32, #tpu.memory_space<vmem>>, vector<1x896xf32>
    %c0_32 = arith.constant 0 : index
    %c0_33 = arith.constant 0 : index
    %40 = vector.load %arg2[%c0_32, %c0_33] : memref<2x128xf32, #tpu.memory_space<vmem>>, vector<1x128xf32>
    %c1_34 = arith.constant 1 : index
    %c0_35 = arith.constant 0 : index
    %41 = vector.load %arg2[%c1_34, %c0_35] : memref<2x128xf32, #tpu.memory_space<vmem>>, vector<1x128xf32>
    %42 = arith.truncf %40 : vector<1x128xf32> to vector<1x128xbf16>
    %43 = arith.truncf %41 : vector<1x128xf32> to vector<1x128xbf16>
    %44 = tpu.concatenate %42, %43 in 1 : vector<1x128xbf16>, vector<1x128xbf16> -> vector<1x256xbf16>
    %c0_36 = arith.constant 0 : index
    %c0_37 = arith.constant 0 : index
    %45 = vector.load %arg5[%c0_36, %c0_37] : memref<256x896xbf16, #tpu.memory_space<vmem>>, vector<256x896xbf16>
    %cst_38 = arith.constant dense<0.000000e+00> : vector<1x896xf32>
    %46 = tpu.matmul %44, %45, %cst_38 {dimension_numbers = #tpu.dot_dimension_numbers<[1], [0], [0], [1], [0, 0, 1, 1], [], []>} : vector<1x256xbf16>, vector<256x896xbf16>, vector<1x896xf32> -> vector<1x896xf32>
    %47 = arith.addf %46, %39 : vector<1x896xf32>
    %48 = vector.extract_strided_slice %38 {offsets = [0, 0], sizes = [1, 384], strides = [1, 1]} : vector<8x384xf32> to vector<1x384xf32>
    %49 = vector.extract_strided_slice %47 {offsets = [0, 0], sizes = [1, 384], strides = [1, 1]} : vector<1x896xf32> to vector<1x384xf32>
    %50 = vector.extract_strided_slice %48 {offsets = [0, 0], sizes = [1, 128], strides = [1, 1]} : vector<1x384xf32> to vector<1x128xf32>
    %51 = vector.extract_strided_slice %49 {offsets = [0, 0], sizes = [1, 128], strides = [1, 1]} : vector<1x384xf32> to vector<1x128xf32>
    %52 = arith.addf %50, %51 : vector<1x128xf32>
    %53 = arith.negf %52 : vector<1x128xf32>
    %54 = math.exp %53 : vector<1x128xf32>
    %cst_39 = arith.constant 1.000000e+00 : f32
    %55 = vector.broadcast %cst_39 : f32 to vector<1x128xf32>
    %56 = arith.addf %55, %54 : vector<1x128xf32>
    %57 = arith.divf %55, %56 : vector<1x128xf32>
    %58 = vector.extract_strided_slice %48 {offsets = [0, 128], sizes = [1, 128], strides = [1, 1]} : vector<1x384xf32> to vector<1x128xf32>
    %59 = vector.extract_strided_slice %49 {offsets = [0, 128], sizes = [1, 128], strides = [1, 1]} : vector<1x384xf32> to vector<1x128xf32>
    %60 = arith.addf %58, %59 : vector<1x128xf32>
    %61 = arith.negf %60 : vector<1x128xf32>
    %62 = math.exp %61 : vector<1x128xf32>
    %cst_40 = arith.constant 1.000000e+00 : f32
    %63 = vector.broadcast %cst_40 : f32 to vector<1x128xf32>
    %64 = arith.addf %63, %62 : vector<1x128xf32>
    %65 = arith.divf %63, %64 : vector<1x128xf32>
    %66 = vector.extract_strided_slice %48 {offsets = [0, 256], sizes = [1, 128], strides = [1, 1]} : vector<1x384xf32> to vector<1x128xf32>
    %67 = vector.extract_strided_slice %49 {offsets = [0, 256], sizes = [1, 128], strides = [1, 1]} : vector<1x384xf32> to vector<1x128xf32>
    %68 = arith.mulf %57, %67 : vector<1x128xf32>
    %69 = arith.addf %66, %68 : vector<1x128xf32>
    %70 = math.tanh %69 : vector<1x128xf32>
    %cst_41 = arith.constant 1.000000e+00 : f32
    %71 = vector.broadcast %cst_41 : f32 to vector<1x128xf32>
    %72 = arith.subf %71, %65 : vector<1x128xf32>
    %73 = arith.mulf %72, %70 : vector<1x128xf32>
    %74 = arith.mulf %65, %40 : vector<1x128xf32>
    %75 = arith.addf %73, %74 : vector<1x128xf32>
    %76 = arith.truncf %75 : vector<1x128xf32> to vector<1x128xbf16>
    %77 = arith.truncf %41 : vector<1x128xf32> to vector<1x128xbf16>
    %78 = tpu.concatenate %76, %77 in 1 : vector<1x128xbf16>, vector<1x128xbf16> -> vector<1x256xbf16>
    %c0_42 = arith.constant 0 : index
    %c0_43 = arith.constant 0 : index
    %79 = vector.load %arg5[%c0_42, %c0_43] : memref<256x896xbf16, #tpu.memory_space<vmem>>, vector<256x896xbf16>
    %cst_44 = arith.constant dense<0.000000e+00> : vector<1x896xf32>
    %80 = tpu.matmul %78, %79, %cst_44 {dimension_numbers = #tpu.dot_dimension_numbers<[1], [0], [0], [1], [0, 0, 1, 1], [], []>} : vector<1x256xbf16>, vector<256x896xbf16>, vector<1x896xf32> -> vector<1x896xf32>
    %81 = arith.addf %80, %39 : vector<1x896xf32>
    %82 = vector.extract_strided_slice %38 {offsets = [1, 0], sizes = [1, 384], strides = [1, 1]} : vector<8x384xf32> to vector<1x384xf32>
    %83 = vector.extract_strided_slice %81 {offsets = [0, 0], sizes = [1, 384], strides = [1, 1]} : vector<1x896xf32> to vector<1x384xf32>
    %84 = vector.extract_strided_slice %82 {offsets = [0, 0], sizes = [1, 128], strides = [1, 1]} : vector<1x384xf32> to vector<1x128xf32>
    %85 = vector.extract_strided_slice %83 {offsets = [0, 0], sizes = [1, 128], strides = [1, 1]} : vector<1x384xf32> to vector<1x128xf32>
    %86 = arith.addf %84, %85 : vector<1x128xf32>
    %87 = arith.negf %86 : vector<1x128xf32>
    %88 = math.exp %87 : vector<1x128xf32>
    %cst_45 = arith.constant 1.000000e+00 : f32
    %89 = vector.broadcast %cst_45 : f32 to vector<1x128xf32>
    %90 = arith.addf %89, %88 : vector<1x128xf32>
    %91 = arith.divf %89, %90 : vector<1x128xf32>
    %92 = vector.extract_strided_slice %82 {offsets = [0, 128], sizes = [1, 128], strides = [1, 1]} : vector<1x384xf32> to vector<1x128xf32>
    %93 = vector.extract_strided_slice %83 {offsets = [0, 128], sizes = [1, 128], strides = [1, 1]} : vector<1x384xf32> to vector<1x128xf32>
    %94 = arith.addf %92, %93 : vector<1x128xf32>
    %95 = arith.negf %94 : vector<1x128xf32>
    %96 = math.exp %95 : vector<1x128xf32>
    %cst_46 = arith.constant 1.000000e+00 : f32
    %97 = vector.broadcast %cst_46 : f32 to vector<1x128xf32>
    %98 = arith.addf %97, %96 : vector<1x128xf32>
    %99 = arith.divf %97, %98 : vector<1x128xf32>
    %100 = vector.extract_strided_slice %82 {offsets = [0, 256], sizes = [1, 128], strides = [1, 1]} : vector<1x384xf32> to vector<1x128xf32>
    %101 = vector.extract_strided_slice %83 {offsets = [0, 256], sizes = [1, 128], strides = [1, 1]} : vector<1x384xf32> to vector<1x128xf32>
    %102 = arith.mulf %91, %101 : vector<1x128xf32>
    %103 = arith.addf %100, %102 : vector<1x128xf32>
    %104 = math.tanh %103 : vector<1x128xf32>
    %cst_47 = arith.constant 1.000000e+00 : f32
    %105 = vector.broadcast %cst_47 : f32 to vector<1x128xf32>
    %106 = arith.subf %105, %99 : vector<1x128xf32>
    %107 = arith.mulf %106, %104 : vector<1x128xf32>
    %108 = arith.mulf %99, %75 : vector<1x128xf32>
    %109 = arith.addf %107, %108 : vector<1x128xf32>
    %110 = vector.extract_strided_slice %81 {offsets = [0, 384], sizes = [1, 128], strides = [1, 1]} : vector<1x896xf32> to vector<1x128xf32>
    %111 = arith.negf %110 : vector<1x128xf32>
    %112 = math.exp %111 : vector<1x128xf32>
    %cst_48 = arith.constant 1.000000e+00 : f32
    %113 = vector.broadcast %cst_48 : f32 to vector<1x128xf32>
    %114 = arith.addf %113, %112 : vector<1x128xf32>
    %115 = arith.divf %113, %114 : vector<1x128xf32>
    %116 = vector.extract_strided_slice %81 {offsets = [0, 512], sizes = [1, 128], strides = [1, 1]} : vector<1x896xf32> to vector<1x128xf32>
    %117 = arith.negf %116 : vector<1x128xf32>
    %118 = math.exp %117 : vector<1x128xf32>
    %cst_49 = arith.constant 1.000000e+00 : f32
    %119 = vector.broadcast %cst_49 : f32 to vector<1x128xf32>
    %120 = arith.addf %119, %118 : vector<1x128xf32>
    %121 = arith.divf %119, %120 : vector<1x128xf32>
    %122 = vector.extract_strided_slice %81 {offsets = [0, 640], sizes = [1, 128], strides = [1, 1]} : vector<1x896xf32> to vector<1x128xf32>
    %123 = vector.extract_strided_slice %81 {offsets = [0, 768], sizes = [1, 128], strides = [1, 1]} : vector<1x896xf32> to vector<1x128xf32>
    %124 = arith.mulf %115, %123 : vector<1x128xf32>
    %125 = arith.addf %122, %124 : vector<1x128xf32>
    %126 = math.tanh %125 : vector<1x128xf32>
    %cst_50 = arith.constant 1.000000e+00 : f32
    %127 = vector.broadcast %cst_50 : f32 to vector<1x128xf32>
    %128 = arith.subf %127, %121 : vector<1x128xf32>
    %129 = arith.mulf %128, %126 : vector<1x128xf32>
    %130 = arith.mulf %121, %41 : vector<1x128xf32>
    %131 = arith.addf %129, %130 : vector<1x128xf32>
    %c0_51 = arith.constant 0 : index
    %c0_52 = arith.constant 0 : index
    %132 = vector.load %arg7[%c0_51, %c0_52] : memref<8x128xf32, #tpu.memory_space<vmem>>, vector<1x128xf32>
    tpu.vector_store %arg7[%c0_51, %c0_52], %131 {strides = array<i32>} : memref<8x128xf32, #tpu.memory_space<vmem>>, vector<1x128xf32>,
    %133 = arith.truncf %109 : vector<1x128xf32> to vector<1x128xbf16>
    %134 = arith.truncf %131 : vector<1x128xf32> to vector<1x128xbf16>
    %135 = tpu.concatenate %133, %134 in 1 : vector<1x128xbf16>, vector<1x128xbf16> -> vector<1x256xbf16>
    %c0_53 = arith.constant 0 : index
    %c0_54 = arith.constant 0 : index
    %136 = vector.load %arg5[%c0_53, %c0_54] : memref<256x896xbf16, #tpu.memory_space<vmem>>, vector<256x896xbf16>
    %cst_55 = arith.constant dense<0.000000e+00> : vector<1x896xf32>
    %137 = tpu.matmul %135, %136, %cst_55 {dimension_numbers = #tpu.dot_dimension_numbers<[1], [0], [0], [1], [0, 0, 1, 1], [], []>} : vector<1x256xbf16>, vector<256x896xbf16>, vector<1x896xf32> -> vector<1x896xf32>
    %138 = arith.addf %137, %39 : vector<1x896xf32>
    %139 = vector.extract_strided_slice %38 {offsets = [2, 0], sizes = [1, 384], strides = [1, 1]} : vector<8x384xf32> to vector<1x384xf32>
    %140 = vector.extract_strided_slice %138 {offsets = [0, 0], sizes = [1, 384], strides = [1, 1]} : vector<1x896xf32> to vector<1x384xf32>
    %141 = vector.extract_strided_slice %139 {offsets = [0, 0], sizes = [1, 128], strides = [1, 1]} : vector<1x384xf32> to vector<1x128xf32>
    %142 = vector.extract_strided_slice %140 {offsets = [0, 0], sizes = [1, 128], strides = [1, 1]} : vector<1x384xf32> to vector<1x128xf32>
    %143 = arith.addf %141, %142 : vector<1x128xf32>
    %144 = arith.negf %143 : vector<1x128xf32>
    %145 = math.exp %144 : vector<1x128xf32>
    %cst_56 = arith.constant 1.000000e+00 : f32
    %146 = vector.broadcast %cst_56 : f32 to vector<1x128xf32>
    %147 = arith.addf %146, %145 : vector<1x128xf32>
    %148 = arith.divf %146, %147 : vector<1x128xf32>
    %149 = vector.extract_strided_slice %139 {offsets = [0, 128], sizes = [1, 128], strides = [1, 1]} : vector<1x384xf32> to vector<1x128xf32>
    %150 = vector.extract_strided_slice %140 {offsets = [0, 128], sizes = [1, 128], strides = [1, 1]} : vector<1x384xf32> to vector<1x128xf32>
    %151 = arith.addf %149, %150 : vector<1x128xf32>
    %152 = arith.negf %151 : vector<1x128xf32>
    %153 = math.exp %152 : vector<1x128xf32>
    %cst_57 = arith.constant 1.000000e+00 : f32
    %154 = vector.broadcast %cst_57 : f32 to vector<1x128xf32>
    %155 = arith.addf %154, %153 : vector<1x128xf32>
    %156 = arith.divf %154, %155 : vector<1x128xf32>
    %157 = vector.extract_strided_slice %139 {offsets = [0, 256], sizes = [1, 128], strides = [1, 1]} : vector<1x384xf32> to vector<1x128xf32>
    %158 = vector.extract_strided_slice %140 {offsets = [0, 256], sizes = [1, 128], strides = [1, 1]} : vector<1x384xf32> to vector<1x128xf32>
    %159 = arith.mulf %148, %158 : vector<1x128xf32>
    %160 = arith.addf %157, %159 : vector<1x128xf32>
    %161 = math.tanh %160 : vector<1x128xf32>
    %cst_58 = arith.constant 1.000000e+00 : f32
    %162 = vector.broadcast %cst_58 : f32 to vector<1x128xf32>
    %163 = arith.subf %162, %156 : vector<1x128xf32>
    %164 = arith.mulf %163, %161 : vector<1x128xf32>
    %165 = arith.mulf %156, %109 : vector<1x128xf32>
    %166 = arith.addf %164, %165 : vector<1x128xf32>
    %167 = vector.extract_strided_slice %138 {offsets = [0, 384], sizes = [1, 128], strides = [1, 1]} : vector<1x896xf32> to vector<1x128xf32>
    %168 = arith.negf %167 : vector<1x128xf32>
    %169 = math.exp %168 : vector<1x128xf32>
    %cst_59 = arith.constant 1.000000e+00 : f32
    %170 = vector.broadcast %cst_59 : f32 to vector<1x128xf32>
    %171 = arith.addf %170, %169 : vector<1x128xf32>
    %172 = arith.divf %170, %171 : vector<1x128xf32>
    %173 = vector.extract_strided_slice %138 {offsets = [0, 512], sizes = [1, 128], strides = [1, 1]} : vector<1x896xf32> to vector<1x128xf32>
    %174 = arith.negf %173 : vector<1x128xf32>
    %175 = math.exp %174 : vector<1x128xf32>
    %cst_60 = arith.constant 1.000000e+00 : f32
    %176 = vector.broadcast %cst_60 : f32 to vector<1x128xf32>
    %177 = arith.addf %176, %175 : vector<1x128xf32>
    %178 = arith.divf %176, %177 : vector<1x128xf32>
    %179 = vector.extract_strided_slice %138 {offsets = [0, 640], sizes = [1, 128], strides = [1, 1]} : vector<1x896xf32> to vector<1x128xf32>
    %180 = vector.extract_strided_slice %138 {offsets = [0, 768], sizes = [1, 128], strides = [1, 1]} : vector<1x896xf32> to vector<1x128xf32>
    %181 = arith.mulf %172, %180 : vector<1x128xf32>
    %182 = arith.addf %179, %181 : vector<1x128xf32>
    %183 = math.tanh %182 : vector<1x128xf32>
    %cst_61 = arith.constant 1.000000e+00 : f32
    %184 = vector.broadcast %cst_61 : f32 to vector<1x128xf32>
    %185 = arith.subf %184, %178 : vector<1x128xf32>
    %186 = arith.mulf %185, %183 : vector<1x128xf32>
    %187 = arith.mulf %178, %131 : vector<1x128xf32>
    %188 = arith.addf %186, %187 : vector<1x128xf32>
    %c1_62 = arith.constant 1 : index
    %c0_63 = arith.constant 0 : index
    %189 = vector.load %arg7[%c1_62, %c0_63] : memref<8x128xf32, #tpu.memory_space<vmem>>, vector<1x128xf32>
    tpu.vector_store %arg7[%c1_62, %c0_63], %188 {strides = array<i32>} : memref<8x128xf32, #tpu.memory_space<vmem>>, vector<1x128xf32>,
    %190 = arith.truncf %166 : vector<1x128xf32> to vector<1x128xbf16>
    %191 = arith.truncf %188 : vector<1x128xf32> to vector<1x128xbf16>
    %192 = tpu.concatenate %190, %191 in 1 : vector<1x128xbf16>, vector<1x128xbf16> -> vector<1x256xbf16>
    %c0_64 = arith.constant 0 : index
    %c0_65 = arith.constant 0 : index
    %193 = vector.load %arg5[%c0_64, %c0_65] : memref<256x896xbf16, #tpu.memory_space<vmem>>, vector<256x896xbf16>
    %cst_66 = arith.constant dense<0.000000e+00> : vector<1x896xf32>
    %194 = tpu.matmul %192, %193, %cst_66 {dimension_numbers = #tpu.dot_dimension_numbers<[1], [0], [0], [1], [0, 0, 1, 1], [], []>} : vector<1x256xbf16>, vector<256x896xbf16>, vector<1x896xf32> -> vector<1x896xf32>
    %195 = arith.addf %194, %39 : vector<1x896xf32>
    %196 = vector.extract_strided_slice %38 {offsets = [3, 0], sizes = [1, 384], strides = [1, 1]} : vector<8x384xf32> to vector<1x384xf32>
    %197 = vector.extract_strided_slice %195 {offsets = [0, 0], sizes = [1, 384], strides = [1, 1]} : vector<1x896xf32> to vector<1x384xf32>
    %198 = vector.extract_strided_slice %196 {offsets = [0, 0], sizes = [1, 128], strides = [1, 1]} : vector<1x384xf32> to vector<1x128xf32>
    %199 = vector.extract_strided_slice %197 {offsets = [0, 0], sizes = [1, 128], strides = [1, 1]} : vector<1x384xf32> to vector<1x128xf32>
    %200 = arith.addf %198, %199 : vector<1x128xf32>
    %201 = arith.negf %200 : vector<1x128xf32>
    %202 = math.exp %201 : vector<1x128xf32>
    %cst_67 = arith.constant 1.000000e+00 : f32
    %203 = vector.broadcast %cst_67 : f32 to vector<1x128xf32>
    %204 = arith.addf %203, %202 : vector<1x128xf32>
    %205 = arith.divf %203, %204 : vector<1x128xf32>
    %206 = vector.extract_strided_slice %196 {offsets = [0, 128], sizes = [1, 128], strides = [1, 1]} : vector<1x384xf32> to vector<1x128xf32>
    %207 = vector.extract_strided_slice %197 {offsets = [0, 128], sizes = [1, 128], strides = [1, 1]} : vector<1x384xf32> to vector<1x128xf32>
    %208 = arith.addf %206, %207 : vector<1x128xf32>
    %209 = arith.negf %208 : vector<1x128xf32>
    %210 = math.exp %209 : vector<1x128xf32>
    %cst_68 = arith.constant 1.000000e+00 : f32
    %211 = vector.broadcast %cst_68 : f32 to vector<1x128xf32>
    %212 = arith.addf %211, %210 : vector<1x128xf32>
    %213 = arith.divf %211, %212 : vector<1x128xf32>
    %214 = vector.extract_strided_slice %196 {offsets = [0, 256], sizes = [1, 128], strides = [1, 1]} : vector<1x384xf32> to vector<1x128xf32>
    %215 = vector.extract_strided_slice %197 {offsets = [0, 256], sizes = [1, 128], strides = [1, 1]} : vector<1x384xf32> to vector<1x128xf32>
    %216 = arith.mulf %205, %215 : vector<1x128xf32>
    %217 = arith.addf %214, %216 : vector<1x128xf32>
    %218 = math.tanh %217 : vector<1x128xf32>
    %cst_69 = arith.constant 1.000000e+00 : f32
    %219 = vector.broadcast %cst_69 : f32 to vector<1x128xf32>
    %220 = arith.subf %219, %213 : vector<1x128xf32>
    %221 = arith.mulf %220, %218 : vector<1x128xf32>
    %222 = arith.mulf %213, %166 : vector<1x128xf32>
    %223 = arith.addf %221, %222 : vector<1x128xf32>
    %224 = vector.extract_strided_slice %195 {offsets = [0, 384], sizes = [1, 128], strides = [1, 1]} : vector<1x896xf32> to vector<1x128xf32>
    %225 = arith.negf %224 : vector<1x128xf32>
    %226 = math.exp %225 : vector<1x128xf32>
    %cst_70 = arith.constant 1.000000e+00 : f32
    %227 = vector.broadcast %cst_70 : f32 to vector<1x128xf32>
    %228 = arith.addf %227, %226 : vector<1x128xf32>
    %229 = arith.divf %227, %228 : vector<1x128xf32>
    %230 = vector.extract_strided_slice %195 {offsets = [0, 512], sizes = [1, 128], strides = [1, 1]} : vector<1x896xf32> to vector<1x128xf32>
    %231 = arith.negf %230 : vector<1x128xf32>
    %232 = math.exp %231 : vector<1x128xf32>
    %cst_71 = arith.constant 1.000000e+00 : f32
    %233 = vector.broadcast %cst_71 : f32 to vector<1x128xf32>
    %234 = arith.addf %233, %232 : vector<1x128xf32>
    %235 = arith.divf %233, %234 : vector<1x128xf32>
    %236 = vector.extract_strided_slice %195 {offsets = [0, 640], sizes = [1, 128], strides = [1, 1]} : vector<1x896xf32> to vector<1x128xf32>
    %237 = vector.extract_strided_slice %195 {offsets = [0, 768], sizes = [1, 128], strides = [1, 1]} : vector<1x896xf32> to vector<1x128xf32>
    %238 = arith.mulf %229, %237 : vector<1x128xf32>
    %239 = arith.addf %236, %238 : vector<1x128xf32>
    %240 = math.tanh %239 : vector<1x128xf32>
    %cst_72 = arith.constant 1.000000e+00 : f32
    %241 = vector.broadcast %cst_72 : f32 to vector<1x128xf32>
    %242 = arith.subf %241, %235 : vector<1x128xf32>
    %243 = arith.mulf %242, %240 : vector<1x128xf32>
    %244 = arith.mulf %235, %188 : vector<1x128xf32>
    %245 = arith.addf %243, %244 : vector<1x128xf32>
    %c2_73 = arith.constant 2 : index
    %c0_74 = arith.constant 0 : index
    %246 = vector.load %arg7[%c2_73, %c0_74] : memref<8x128xf32, #tpu.memory_space<vmem>>, vector<1x128xf32>
    tpu.vector_store %arg7[%c2_73, %c0_74], %245 {strides = array<i32>} : memref<8x128xf32, #tpu.memory_space<vmem>>, vector<1x128xf32>,
    %247 = arith.truncf %223 : vector<1x128xf32> to vector<1x128xbf16>
    %248 = arith.truncf %245 : vector<1x128xf32> to vector<1x128xbf16>
    %249 = tpu.concatenate %247, %248 in 1 : vector<1x128xbf16>, vector<1x128xbf16> -> vector<1x256xbf16>
    %c0_75 = arith.constant 0 : index
    %c0_76 = arith.constant 0 : index
    %250 = vector.load %arg5[%c0_75, %c0_76] : memref<256x896xbf16, #tpu.memory_space<vmem>>, vector<256x896xbf16>
    %cst_77 = arith.constant dense<0.000000e+00> : vector<1x896xf32>
    %251 = tpu.matmul %249, %250, %cst_77 {dimension_numbers = #tpu.dot_dimension_numbers<[1], [0], [0], [1], [0, 0, 1, 1], [], []>} : vector<1x256xbf16>, vector<256x896xbf16>, vector<1x896xf32> -> vector<1x896xf32>
    %252 = arith.addf %251, %39 : vector<1x896xf32>
    %253 = vector.extract_strided_slice %38 {offsets = [4, 0], sizes = [1, 384], strides = [1, 1]} : vector<8x384xf32> to vector<1x384xf32>
    %254 = vector.extract_strided_slice %252 {offsets = [0, 0], sizes = [1, 384], strides = [1, 1]} : vector<1x896xf32> to vector<1x384xf32>
    %255 = vector.extract_strided_slice %253 {offsets = [0, 0], sizes = [1, 128], strides = [1, 1]} : vector<1x384xf32> to vector<1x128xf32>
    %256 = vector.extract_strided_slice %254 {offsets = [0, 0], sizes = [1, 128], strides = [1, 1]} : vector<1x384xf32> to vector<1x128xf32>
    %257 = arith.addf %255, %256 : vector<1x128xf32>
    %258 = arith.negf %257 : vector<1x128xf32>
    %259 = math.exp %258 : vector<1x128xf32>
    %cst_78 = arith.constant 1.000000e+00 : f32
    %260 = vector.broadcast %cst_78 : f32 to vector<1x128xf32>
    %261 = arith.addf %260, %259 : vector<1x128xf32>
    %262 = arith.divf %260, %261 : vector<1x128xf32>
    %263 = vector.extract_strided_slice %253 {offsets = [0, 128], sizes = [1, 128], strides = [1, 1]} : vector<1x384xf32> to vector<1x128xf32>
    %264 = vector.extract_strided_slice %254 {offsets = [0, 128], sizes = [1, 128], strides = [1, 1]} : vector<1x384xf32> to vector<1x128xf32>
    %265 = arith.addf %263, %264 : vector<1x128xf32>
    %266 = arith.negf %265 : vector<1x128xf32>
    %267 = math.exp %266 : vector<1x128xf32>
    %cst_79 = arith.constant 1.000000e+00 : f32
    %268 = vector.broadcast %cst_79 : f32 to vector<1x128xf32>
    %269 = arith.addf %268, %267 : vector<1x128xf32>
    %270 = arith.divf %268, %269 : vector<1x128xf32>
    %271 = vector.extract_strided_slice %253 {offsets = [0, 256], sizes = [1, 128], strides = [1, 1]} : vector<1x384xf32> to vector<1x128xf32>
    %272 = vector.extract_strided_slice %254 {offsets = [0, 256], sizes = [1, 128], strides = [1, 1]} : vector<1x384xf32> to vector<1x128xf32>
    %273 = arith.mulf %262, %272 : vector<1x128xf32>
    %274 = arith.addf %271, %273 : vector<1x128xf32>
    %275 = math.tanh %274 : vector<1x128xf32>
    %cst_80 = arith.constant 1.000000e+00 : f32
    %276 = vector.broadcast %cst_80 : f32 to vector<1x128xf32>
    %277 = arith.subf %276, %270 : vector<1x128xf32>
    %278 = arith.mulf %277, %275 : vector<1x128xf32>
    %279 = arith.mulf %270, %223 : vector<1x128xf32>
    %280 = arith.addf %278, %279 : vector<1x128xf32>
    %281 = vector.extract_strided_slice %252 {offsets = [0, 384], sizes = [1, 128], strides = [1, 1]} : vector<1x896xf32> to vector<1x128xf32>
    %282 = arith.negf %281 : vector<1x128xf32>
    %283 = math.exp %282 : vector<1x128xf32>
    %cst_81 = arith.constant 1.000000e+00 : f32
    %284 = vector.broadcast %cst_81 : f32 to vector<1x128xf32>
    %285 = arith.addf %284, %283 : vector<1x128xf32>
    %286 = arith.divf %284, %285 : vector<1x128xf32>
    %287 = vector.extract_strided_slice %252 {offsets = [0, 512], sizes = [1, 128], strides = [1, 1]} : vector<1x896xf32> to vector<1x128xf32>
    %288 = arith.negf %287 : vector<1x128xf32>
    %289 = math.exp %288 : vector<1x128xf32>
    %cst_82 = arith.constant 1.000000e+00 : f32
    %290 = vector.broadcast %cst_82 : f32 to vector<1x128xf32>
    %291 = arith.addf %290, %289 : vector<1x128xf32>
    %292 = arith.divf %290, %291 : vector<1x128xf32>
    %293 = vector.extract_strided_slice %252 {offsets = [0, 640], sizes = [1, 128], strides = [1, 1]} : vector<1x896xf32> to vector<1x128xf32>
    %294 = vector.extract_strided_slice %252 {offsets = [0, 768], sizes = [1, 128], strides = [1, 1]} : vector<1x896xf32> to vector<1x128xf32>
    %295 = arith.mulf %286, %294 : vector<1x128xf32>
    %296 = arith.addf %293, %295 : vector<1x128xf32>
    %297 = math.tanh %296 : vector<1x128xf32>
    %cst_83 = arith.constant 1.000000e+00 : f32
    %298 = vector.broadcast %cst_83 : f32 to vector<1x128xf32>
    %299 = arith.subf %298, %292 : vector<1x128xf32>
    %300 = arith.mulf %299, %297 : vector<1x128xf32>
    %301 = arith.mulf %292, %245 : vector<1x128xf32>
    %302 = arith.addf %300, %301 : vector<1x128xf32>
    %c3_84 = arith.constant 3 : index
    %c0_85 = arith.constant 0 : index
    %303 = vector.load %arg7[%c3_84, %c0_85] : memref<8x128xf32, #tpu.memory_space<vmem>>, vector<1x128xf32>
    tpu.vector_store %arg7[%c3_84, %c0_85], %302 {strides = array<i32>} : memref<8x128xf32, #tpu.memory_space<vmem>>, vector<1x128xf32>,
    %304 = arith.truncf %280 : vector<1x128xf32> to vector<1x128xbf16>
    %305 = arith.truncf %302 : vector<1x128xf32> to vector<1x128xbf16>
    %306 = tpu.concatenate %304, %305 in 1 : vector<1x128xbf16>, vector<1x128xbf16> -> vector<1x256xbf16>
    %c0_86 = arith.constant 0 : index
    %c0_87 = arith.constant 0 : index
    %307 = vector.load %arg5[%c0_86, %c0_87] : memref<256x896xbf16, #tpu.memory_space<vmem>>, vector<256x896xbf16>
    %cst_88 = arith.constant dense<0.000000e+00> : vector<1x896xf32>
    %308 = tpu.matmul %306, %307, %cst_88 {dimension_numbers = #tpu.dot_dimension_numbers<[1], [0], [0], [1], [0, 0, 1, 1], [], []>} : vector<1x256xbf16>, vector<256x896xbf16>, vector<1x896xf32> -> vector<1x896xf32>
    %309 = arith.addf %308, %39 : vector<1x896xf32>
    %310 = vector.extract_strided_slice %38 {offsets = [5, 0], sizes = [1, 384], strides = [1, 1]} : vector<8x384xf32> to vector<1x384xf32>
    %311 = vector.extract_strided_slice %309 {offsets = [0, 0], sizes = [1, 384], strides = [1, 1]} : vector<1x896xf32> to vector<1x384xf32>
    %312 = vector.extract_strided_slice %310 {offsets = [0, 0], sizes = [1, 128], strides = [1, 1]} : vector<1x384xf32> to vector<1x128xf32>
    %313 = vector.extract_strided_slice %311 {offsets = [0, 0], sizes = [1, 128], strides = [1, 1]} : vector<1x384xf32> to vector<1x128xf32>
    %314 = arith.addf %312, %313 : vector<1x128xf32>
    %315 = arith.negf %314 : vector<1x128xf32>
    %316 = math.exp %315 : vector<1x128xf32>
    %cst_89 = arith.constant 1.000000e+00 : f32
    %317 = vector.broadcast %cst_89 : f32 to vector<1x128xf32>
    %318 = arith.addf %317, %316 : vector<1x128xf32>
    %319 = arith.divf %317, %318 : vector<1x128xf32>
    %320 = vector.extract_strided_slice %310 {offsets = [0, 128], sizes = [1, 128], strides = [1, 1]} : vector<1x384xf32> to vector<1x128xf32>
    %321 = vector.extract_strided_slice %311 {offsets = [0, 128], sizes = [1, 128], strides = [1, 1]} : vector<1x384xf32> to vector<1x128xf32>
    %322 = arith.addf %320, %321 : vector<1x128xf32>
    %323 = arith.negf %322 : vector<1x128xf32>
    %324 = math.exp %323 : vector<1x128xf32>
    %cst_90 = arith.constant 1.000000e+00 : f32
    %325 = vector.broadcast %cst_90 : f32 to vector<1x128xf32>
    %326 = arith.addf %325, %324 : vector<1x128xf32>
    %327 = arith.divf %325, %326 : vector<1x128xf32>
    %328 = vector.extract_strided_slice %310 {offsets = [0, 256], sizes = [1, 128], strides = [1, 1]} : vector<1x384xf32> to vector<1x128xf32>
    %329 = vector.extract_strided_slice %311 {offsets = [0, 256], sizes = [1, 128], strides = [1, 1]} : vector<1x384xf32> to vector<1x128xf32>
    %330 = arith.mulf %319, %329 : vector<1x128xf32>
    %331 = arith.addf %328, %330 : vector<1x128xf32>
    %332 = math.tanh %331 : vector<1x128xf32>
    %cst_91 = arith.constant 1.000000e+00 : f32
    %333 = vector.broadcast %cst_91 : f32 to vector<1x128xf32>
    %334 = arith.subf %333, %327 : vector<1x128xf32>
    %335 = arith.mulf %334, %332 : vector<1x128xf32>
    %336 = arith.mulf %327, %280 : vector<1x128xf32>
    %337 = arith.addf %335, %336 : vector<1x128xf32>
    %338 = vector.extract_strided_slice %309 {offsets = [0, 384], sizes = [1, 128], strides = [1, 1]} : vector<1x896xf32> to vector<1x128xf32>
    %339 = arith.negf %338 : vector<1x128xf32>
    %340 = math.exp %339 : vector<1x128xf32>
    %cst_92 = arith.constant 1.000000e+00 : f32
    %341 = vector.broadcast %cst_92 : f32 to vector<1x128xf32>
    %342 = arith.addf %341, %340 : vector<1x128xf32>
    %343 = arith.divf %341, %342 : vector<1x128xf32>
    %344 = vector.extract_strided_slice %309 {offsets = [0, 512], sizes = [1, 128], strides = [1, 1]} : vector<1x896xf32> to vector<1x128xf32>
    %345 = arith.negf %344 : vector<1x128xf32>
    %346 = math.exp %345 : vector<1x128xf32>
    %cst_93 = arith.constant 1.000000e+00 : f32
    %347 = vector.broadcast %cst_93 : f32 to vector<1x128xf32>
    %348 = arith.addf %347, %346 : vector<1x128xf32>
    %349 = arith.divf %347, %348 : vector<1x128xf32>
    %350 = vector.extract_strided_slice %309 {offsets = [0, 640], sizes = [1, 128], strides = [1, 1]} : vector<1x896xf32> to vector<1x128xf32>
    %351 = vector.extract_strided_slice %309 {offsets = [0, 768], sizes = [1, 128], strides = [1, 1]} : vector<1x896xf32> to vector<1x128xf32>
    %352 = arith.mulf %343, %351 : vector<1x128xf32>
    %353 = arith.addf %350, %352 : vector<1x128xf32>
    %354 = math.tanh %353 : vector<1x128xf32>
    %cst_94 = arith.constant 1.000000e+00 : f32
    %355 = vector.broadcast %cst_94 : f32 to vector<1x128xf32>
    %356 = arith.subf %355, %349 : vector<1x128xf32>
    %357 = arith.mulf %356, %354 : vector<1x128xf32>
    %358 = arith.mulf %349, %302 : vector<1x128xf32>
    %359 = arith.addf %357, %358 : vector<1x128xf32>
    %c4_95 = arith.constant 4 : index
    %c0_96 = arith.constant 0 : index
    %360 = vector.load %arg7[%c4_95, %c0_96] : memref<8x128xf32, #tpu.memory_space<vmem>>, vector<1x128xf32>
    tpu.vector_store %arg7[%c4_95, %c0_96], %359 {strides = array<i32>} : memref<8x128xf32, #tpu.memory_space<vmem>>, vector<1x128xf32>,
    %361 = arith.truncf %337 : vector<1x128xf32> to vector<1x128xbf16>
    %362 = arith.truncf %359 : vector<1x128xf32> to vector<1x128xbf16>
    %363 = tpu.concatenate %361, %362 in 1 : vector<1x128xbf16>, vector<1x128xbf16> -> vector<1x256xbf16>
    %c0_97 = arith.constant 0 : index
    %c0_98 = arith.constant 0 : index
    %364 = vector.load %arg5[%c0_97, %c0_98] : memref<256x896xbf16, #tpu.memory_space<vmem>>, vector<256x896xbf16>
    %cst_99 = arith.constant dense<0.000000e+00> : vector<1x896xf32>
    %365 = tpu.matmul %363, %364, %cst_99 {dimension_numbers = #tpu.dot_dimension_numbers<[1], [0], [0], [1], [0, 0, 1, 1], [], []>} : vector<1x256xbf16>, vector<256x896xbf16>, vector<1x896xf32> -> vector<1x896xf32>
    %366 = arith.addf %365, %39 : vector<1x896xf32>
    %367 = vector.extract_strided_slice %38 {offsets = [6, 0], sizes = [1, 384], strides = [1, 1]} : vector<8x384xf32> to vector<1x384xf32>
    %368 = vector.extract_strided_slice %366 {offsets = [0, 0], sizes = [1, 384], strides = [1, 1]} : vector<1x896xf32> to vector<1x384xf32>
    %369 = vector.extract_strided_slice %367 {offsets = [0, 0], sizes = [1, 128], strides = [1, 1]} : vector<1x384xf32> to vector<1x128xf32>
    %370 = vector.extract_strided_slice %368 {offsets = [0, 0], sizes = [1, 128], strides = [1, 1]} : vector<1x384xf32> to vector<1x128xf32>
    %371 = arith.addf %369, %370 : vector<1x128xf32>
    %372 = arith.negf %371 : vector<1x128xf32>
    %373 = math.exp %372 : vector<1x128xf32>
    %cst_100 = arith.constant 1.000000e+00 : f32
    %374 = vector.broadcast %cst_100 : f32 to vector<1x128xf32>
    %375 = arith.addf %374, %373 : vector<1x128xf32>
    %376 = arith.divf %374, %375 : vector<1x128xf32>
    %377 = vector.extract_strided_slice %367 {offsets = [0, 128], sizes = [1, 128], strides = [1, 1]} : vector<1x384xf32> to vector<1x128xf32>
    %378 = vector.extract_strided_slice %368 {offsets = [0, 128], sizes = [1, 128], strides = [1, 1]} : vector<1x384xf32> to vector<1x128xf32>
    %379 = arith.addf %377, %378 : vector<1x128xf32>
    %380 = arith.negf %379 : vector<1x128xf32>
    %381 = math.exp %380 : vector<1x128xf32>
    %cst_101 = arith.constant 1.000000e+00 : f32
    %382 = vector.broadcast %cst_101 : f32 to vector<1x128xf32>
    %383 = arith.addf %382, %381 : vector<1x128xf32>
    %384 = arith.divf %382, %383 : vector<1x128xf32>
    %385 = vector.extract_strided_slice %367 {offsets = [0, 256], sizes = [1, 128], strides = [1, 1]} : vector<1x384xf32> to vector<1x128xf32>
    %386 = vector.extract_strided_slice %368 {offsets = [0, 256], sizes = [1, 128], strides = [1, 1]} : vector<1x384xf32> to vector<1x128xf32>
    %387 = arith.mulf %376, %386 : vector<1x128xf32>
    %388 = arith.addf %385, %387 : vector<1x128xf32>
    %389 = math.tanh %388 : vector<1x128xf32>
    %cst_102 = arith.constant 1.000000e+00 : f32
    %390 = vector.broadcast %cst_102 : f32 to vector<1x128xf32>
    %391 = arith.subf %390, %384 : vector<1x128xf32>
    %392 = arith.mulf %391, %389 : vector<1x128xf32>
    %393 = arith.mulf %384, %337 : vector<1x128xf32>
    %394 = arith.addf %392, %393 : vector<1x128xf32>
    %395 = vector.extract_strided_slice %366 {offsets = [0, 384], sizes = [1, 128], strides = [1, 1]} : vector<1x896xf32> to vector<1x128xf32>
    %396 = arith.negf %395 : vector<1x128xf32>
    %397 = math.exp %396 : vector<1x128xf32>
    %cst_103 = arith.constant 1.000000e+00 : f32
    %398 = vector.broadcast %cst_103 : f32 to vector<1x128xf32>
    %399 = arith.addf %398, %397 : vector<1x128xf32>
    %400 = arith.divf %398, %399 : vector<1x128xf32>
    %401 = vector.extract_strided_slice %366 {offsets = [0, 512], sizes = [1, 128], strides = [1, 1]} : vector<1x896xf32> to vector<1x128xf32>
    %402 = arith.negf %401 : vector<1x128xf32>
    %403 = math.exp %402 : vector<1x128xf32>
    %cst_104 = arith.constant 1.000000e+00 : f32
    %404 = vector.broadcast %cst_104 : f32 to vector<1x128xf32>
    %405 = arith.addf %404, %403 : vector<1x128xf32>
    %406 = arith.divf %404, %405 : vector<1x128xf32>
    %407 = vector.extract_strided_slice %366 {offsets = [0, 640], sizes = [1, 128], strides = [1, 1]} : vector<1x896xf32> to vector<1x128xf32>
    %408 = vector.extract_strided_slice %366 {offsets = [0, 768], sizes = [1, 128], strides = [1, 1]} : vector<1x896xf32> to vector<1x128xf32>
    %409 = arith.mulf %400, %408 : vector<1x128xf32>
    %410 = arith.addf %407, %409 : vector<1x128xf32>
    %411 = math.tanh %410 : vector<1x128xf32>
    %cst_105 = arith.constant 1.000000e+00 : f32
    %412 = vector.broadcast %cst_105 : f32 to vector<1x128xf32>
    %413 = arith.subf %412, %406 : vector<1x128xf32>
    %414 = arith.mulf %413, %411 : vector<1x128xf32>
    %415 = arith.mulf %406, %359 : vector<1x128xf32>
    %416 = arith.addf %414, %415 : vector<1x128xf32>
    %c5_106 = arith.constant 5 : index
    %c0_107 = arith.constant 0 : index
    %417 = vector.load %arg7[%c5_106, %c0_107] : memref<8x128xf32, #tpu.memory_space<vmem>>, vector<1x128xf32>
    tpu.vector_store %arg7[%c5_106, %c0_107], %416 {strides = array<i32>} : memref<8x128xf32, #tpu.memory_space<vmem>>, vector<1x128xf32>,
    %418 = arith.truncf %394 : vector<1x128xf32> to vector<1x128xbf16>
    %419 = arith.truncf %416 : vector<1x128xf32> to vector<1x128xbf16>
    %420 = tpu.concatenate %418, %419 in 1 : vector<1x128xbf16>, vector<1x128xbf16> -> vector<1x256xbf16>
    %c0_108 = arith.constant 0 : index
    %c0_109 = arith.constant 0 : index
    %421 = vector.load %arg5[%c0_108, %c0_109] : memref<256x896xbf16, #tpu.memory_space<vmem>>, vector<256x896xbf16>
    %cst_110 = arith.constant dense<0.000000e+00> : vector<1x896xf32>
    %422 = tpu.matmul %420, %421, %cst_110 {dimension_numbers = #tpu.dot_dimension_numbers<[1], [0], [0], [1], [0, 0, 1, 1], [], []>} : vector<1x256xbf16>, vector<256x896xbf16>, vector<1x896xf32> -> vector<1x896xf32>
    %423 = arith.addf %422, %39 : vector<1x896xf32>
    %424 = vector.extract_strided_slice %38 {offsets = [7, 0], sizes = [1, 384], strides = [1, 1]} : vector<8x384xf32> to vector<1x384xf32>
    %425 = vector.extract_strided_slice %423 {offsets = [0, 0], sizes = [1, 384], strides = [1, 1]} : vector<1x896xf32> to vector<1x384xf32>
    %426 = vector.extract_strided_slice %424 {offsets = [0, 0], sizes = [1, 128], strides = [1, 1]} : vector<1x384xf32> to vector<1x128xf32>
    %427 = vector.extract_strided_slice %425 {offsets = [0, 0], sizes = [1, 128], strides = [1, 1]} : vector<1x384xf32> to vector<1x128xf32>
    %428 = arith.addf %426, %427 : vector<1x128xf32>
    %429 = arith.negf %428 : vector<1x128xf32>
    %430 = math.exp %429 : vector<1x128xf32>
    %cst_111 = arith.constant 1.000000e+00 : f32
    %431 = vector.broadcast %cst_111 : f32 to vector<1x128xf32>
    %432 = arith.addf %431, %430 : vector<1x128xf32>
    %433 = arith.divf %431, %432 : vector<1x128xf32>
    %434 = vector.extract_strided_slice %424 {offsets = [0, 128], sizes = [1, 128], strides = [1, 1]} : vector<1x384xf32> to vector<1x128xf32>
    %435 = vector.extract_strided_slice %425 {offsets = [0, 128], sizes = [1, 128], strides = [1, 1]} : vector<1x384xf32> to vector<1x128xf32>
    %436 = arith.addf %434, %435 : vector<1x128xf32>
    %437 = arith.negf %436 : vector<1x128xf32>
    %438 = math.exp %437 : vector<1x128xf32>
    %cst_112 = arith.constant 1.000000e+00 : f32
    %439 = vector.broadcast %cst_112 : f32 to vector<1x128xf32>
    %440 = arith.addf %439, %438 : vector<1x128xf32>
    %441 = arith.divf %439, %440 : vector<1x128xf32>
    %442 = vector.extract_strided_slice %424 {offsets = [0, 256], sizes = [1, 128], strides = [1, 1]} : vector<1x384xf32> to vector<1x128xf32>
    %443 = vector.extract_strided_slice %425 {offsets = [0, 256], sizes = [1, 128], strides = [1, 1]} : vector<1x384xf32> to vector<1x128xf32>
    %444 = arith.mulf %433, %443 : vector<1x128xf32>
    %445 = arith.addf %442, %444 : vector<1x128xf32>
    %446 = math.tanh %445 : vector<1x128xf32>
    %cst_113 = arith.constant 1.000000e+00 : f32
    %447 = vector.broadcast %cst_113 : f32 to vector<1x128xf32>
    %448 = arith.subf %447, %441 : vector<1x128xf32>
    %449 = arith.mulf %448, %446 : vector<1x128xf32>
    %450 = arith.mulf %441, %394 : vector<1x128xf32>
    %451 = arith.addf %449, %450 : vector<1x128xf32>
    %452 = vector.extract_strided_slice %423 {offsets = [0, 384], sizes = [1, 128], strides = [1, 1]} : vector<1x896xf32> to vector<1x128xf32>
    %453 = arith.negf %452 : vector<1x128xf32>
    %454 = math.exp %453 : vector<1x128xf32>
    %cst_114 = arith.constant 1.000000e+00 : f32
    %455 = vector.broadcast %cst_114 : f32 to vector<1x128xf32>
    %456 = arith.addf %455, %454 : vector<1x128xf32>
    %457 = arith.divf %455, %456 : vector<1x128xf32>
    %458 = vector.extract_strided_slice %423 {offsets = [0, 512], sizes = [1, 128], strides = [1, 1]} : vector<1x896xf32> to vector<1x128xf32>
    %459 = arith.negf %458 : vector<1x128xf32>
    %460 = math.exp %459 : vector<1x128xf32>
    %cst_115 = arith.constant 1.000000e+00 : f32
    %461 = vector.broadcast %cst_115 : f32 to vector<1x128xf32>
    %462 = arith.addf %461, %460 : vector<1x128xf32>
    %463 = arith.divf %461, %462 : vector<1x128xf32>
    %464 = vector.extract_strided_slice %423 {offsets = [0, 640], sizes = [1, 128], strides = [1, 1]} : vector<1x896xf32> to vector<1x128xf32>
    %465 = vector.extract_strided_slice %423 {offsets = [0, 768], sizes = [1, 128], strides = [1, 1]} : vector<1x896xf32> to vector<1x128xf32>
    %466 = arith.mulf %457, %465 : vector<1x128xf32>
    %467 = arith.addf %464, %466 : vector<1x128xf32>
    %468 = math.tanh %467 : vector<1x128xf32>
    %cst_116 = arith.constant 1.000000e+00 : f32
    %469 = vector.broadcast %cst_116 : f32 to vector<1x128xf32>
    %470 = arith.subf %469, %463 : vector<1x128xf32>
    %471 = arith.mulf %470, %468 : vector<1x128xf32>
    %472 = arith.mulf %463, %416 : vector<1x128xf32>
    %473 = arith.addf %471, %472 : vector<1x128xf32>
    %c6_117 = arith.constant 6 : index
    %c0_118 = arith.constant 0 : index
    %474 = vector.load %arg7[%c6_117, %c0_118] : memref<8x128xf32, #tpu.memory_space<vmem>>, vector<1x128xf32>
    tpu.vector_store %arg7[%c6_117, %c0_118], %473 {strides = array<i32>} : memref<8x128xf32, #tpu.memory_space<vmem>>, vector<1x128xf32>,
    %475 = arith.truncf %451 : vector<1x128xf32> to vector<1x128xbf16>
    %476 = arith.truncf %473 : vector<1x128xf32> to vector<1x128xbf16>
    %477 = tpu.concatenate %475, %476 in 1 : vector<1x128xbf16>, vector<1x128xbf16> -> vector<1x256xbf16>
    %c0_119 = arith.constant 0 : index
    %c0_120 = arith.constant 0 : index
    %478 = vector.load %arg5[%c0_119, %c0_120] : memref<256x896xbf16, #tpu.memory_space<vmem>>, vector<256x896xbf16>
    %cst_121 = arith.constant dense<0.000000e+00> : vector<1x896xf32>
    %479 = tpu.matmul %477, %478, %cst_121 {dimension_numbers = #tpu.dot_dimension_numbers<[1], [0], [0], [1], [0, 0, 1, 1], [], []>} : vector<1x256xbf16>, vector<256x896xbf16>, vector<1x896xf32> -> vector<1x896xf32>
    %480 = arith.addf %479, %39 : vector<1x896xf32>
    %481 = vector.extract_strided_slice %480 {offsets = [0, 384], sizes = [1, 128], strides = [1, 1]} : vector<1x896xf32> to vector<1x128xf32>
    %482 = arith.negf %481 : vector<1x128xf32>
    %483 = math.exp %482 : vector<1x128xf32>
    %cst_122 = arith.constant 1.000000e+00 : f32
    %484 = vector.broadcast %cst_122 : f32 to vector<1x128xf32>
    %485 = arith.addf %484, %483 : vector<1x128xf32>
    %486 = arith.divf %484, %485 : vector<1x128xf32>
    %487 = vector.extract_strided_slice %480 {offsets = [0, 512], sizes = [1, 128], strides = [1, 1]} : vector<1x896xf32> to vector<1x128xf32>
    %488 = arith.negf %487 : vector<1x128xf32>
    %489 = math.exp %488 : vector<1x128xf32>
    %cst_123 = arith.constant 1.000000e+00 : f32
    %490 = vector.broadcast %cst_123 : f32 to vector<1x128xf32>
    %491 = arith.addf %490, %489 : vector<1x128xf32>
    %492 = arith.divf %490, %491 : vector<1x128xf32>
    %493 = vector.extract_strided_slice %480 {offsets = [0, 640], sizes = [1, 128], strides = [1, 1]} : vector<1x896xf32> to vector<1x128xf32>
    %494 = vector.extract_strided_slice %480 {offsets = [0, 768], sizes = [1, 128], strides = [1, 1]} : vector<1x896xf32> to vector<1x128xf32>
    %495 = arith.mulf %486, %494 : vector<1x128xf32>
    %496 = arith.addf %493, %495 : vector<1x128xf32>
    %497 = math.tanh %496 : vector<1x128xf32>
    %cst_124 = arith.constant 1.000000e+00 : f32
    %498 = vector.broadcast %cst_124 : f32 to vector<1x128xf32>
    %499 = arith.subf %498, %492 : vector<1x128xf32>
    %500 = arith.mulf %499, %497 : vector<1x128xf32>
    %501 = arith.mulf %492, %473 : vector<1x128xf32>
    %502 = arith.addf %500, %501 : vector<1x128xf32>
    %c7_125 = arith.constant 7 : index
    %c0_126 = arith.constant 0 : index
    %503 = vector.load %arg7[%c7_125, %c0_126] : memref<8x128xf32, #tpu.memory_space<vmem>>, vector<1x128xf32>
    tpu.vector_store %arg7[%c7_125, %c0_126], %502 {strides = array<i32>} : memref<8x128xf32, #tpu.memory_space<vmem>>, vector<1x128xf32>,
    %c0_127 = arith.constant 0 : index
    %c0_128 = arith.constant 0 : index
    %504 = vector.load %arg8[%c0_127, %c0_128] : memref<2x128xf32, #tpu.memory_space<vmem>>, vector<1x128xf32>
    tpu.vector_store %arg8[%c0_127, %c0_128], %451 {strides = array<i32>} : memref<2x128xf32, #tpu.memory_space<vmem>>, vector<1x128xf32>,
    %c1_129 = arith.constant 1 : index
    %c0_130 = arith.constant 0 : index
    %505 = vector.load %arg8[%c1_129, %c0_130] : memref<2x128xf32, #tpu.memory_space<vmem>>, vector<1x128xf32>
    tpu.vector_store %arg8[%c1_129, %c0_130], %502 {strides = array<i32>} : memref<2x128xf32, #tpu.memory_space<vmem>>, vector<1x128xf32>,
    return
  }
}

</mosaic_0001>

<bundles_post_ra>
// kernel: tpu_custom_call.1
= control target key start
LH: loop header
LB: loop body
LE: loop exit
PB: predicated region body
PF: predicated region fallthrough
CT: control target
= control target key end

     0   :  { %14 = vsyncpa [#allocation6], 0  ;;  %s14378_s0 = inlined_call_operand.hbm [shape: s32[8], index: 0, kind: input, shape index: {}]   ;;  %s14379_s1 = inlined_call_operand.hbm [shape: f32[50,128], index: 1, kind: input, shape index: {}]   ;;  %s14380_s2 = inlined_call_operand.hbm [shape: f32[2,128], index: 2, kind: input, shape index: {}]   ;;  %s14381_s3 = inlined_call_operand.hbm [shape: bf16[128,384], index: 3, kind: input, shape index: {}]   ;;  %s14382_s4 = inlined_call_operand.vmem [shape: f32[1,384], index: 4, kind: input, shape index: {}]   ;;  %s14383_s5 = inlined_call_operand.hbm [shape: bf16[256,896], index: 5, kind: input, shape index: {}]   ;;  %s14384_s6 = inlined_call_operand.hbm [shape: f32[1,896], index: 6, kind: input, shape index: {}]   ;;  %s14385_s7 = inlined_call_operand.hbm [shape: f32[8,128], index: 7, kind: output, shape index: {0}]   ;;  %s14386_s8 = inlined_call_operand.hbm [shape: f32[2,128], index: 8, kind: output, shape index: {1}]  }
   0x1   :  { %15 = vsyncpa [#allocation4], 0 }
   0x2   :  { %16 = vsyncpa [#allocation9], 0 }
   0x3   :  { %17 = vsyncpa [#allocation12], 0 }
   0x4   :  { %18 = vsyncpa [#allocation5], 0  ;;  %s47_s29 = sshll.u32 %s14380_s2, 4  ;;  %s48_s29 = int_to_ptr.hbm [resolvable:$true] %s47_s29 }
   0x5   :  { %19 = vsyncpa [#allocation16], 0  ;;  %s12958_s30 = smov [#allocation8]   ;;  %s72_s12 = sshll.u32 %s14383_s5, 4  ;;  %s73_s12 = int_to_ptr.hbm [resolvable:$true] %s72_s12 }
   0x6   :  { %s49_s9 = sshll.u32 %s12958_s30, 4  ;;  %s12959_s13 = smov [#allocation11]   ;;  %s50_s9 = int_to_ptr.vmem [resolvable:$true] %s49_s9 }
   0x7   :  { %52 = dma.hbm_to_vmem [thread:$0]  %s48_s29, 32, %s50_s9, [#allocation9]  }
   0x8   :  { %s74_s14 = sshll.u32 %s12959_s13, 4  ;;  %s12960_s15 = smov 448   ;;  %s75_s14 = int_to_ptr.vmem [resolvable:$true] %s74_s14 }
   0x9   :  { %s12961_s16 = smov 28   ;;  %s25_s2 = sshll.u32 %s14378_s0, 4  ;;  %s26_s2 = int_to_ptr.hbm [resolvable:$true] %s25_s2 }
   0xa   :  { %80 = dma.hbm_to_vmem [thread:$0]  %s73_s12, 14336, %s75_s14, [#allocation12], %s12960_s15, %s12960_s15, %s12961_s16  }
   0xb   :  { %s33_s21 = sshll.u32 %s14379_s1, 4  ;;  %s12962_s22 = smov [#allocation3]   ;;  %s34_s21 = int_to_ptr.hbm [resolvable:$true] %s33_s21 }
   0xc   :  { %28 = dma.hbm_to_smem %s26_s2, 16, %s12962_s22, [#allocation6]  }
   0xd   :  { %s12963_s5 = smov [#allocation7]   ;;  %s12964_s24 = smov 128  }
   0xe   :  { %s35_s23 = sshll.u32 %s12963_s5, 4  ;;  %s12965_s25 = smov 8   ;;  %s36_s23 = int_to_ptr.vmem [resolvable:$true] %s35_s23 }
   0xf   :  { %41 = dma.hbm_to_vmem [thread:$0]  %s34_s21, 896, %s36_s23, [#allocation4], %s12964_s24, %s12964_s24, %s12965_s25  }
  0x10   :  { %s57_s28 = sshll.u32 %s14381_s3, 4  ;;  %s12966_s0 = smov [#allocation10]   ;;  %s58_s28 = int_to_ptr.hbm [resolvable:$true] %s57_s28 }
  0x11   :  { %s59_s29 = sshll.u32 %s12966_s0, 4  ;;  %s86_s1 = sshll.u32 %s14384_s6, 4  ;;  %s60_s29 = int_to_ptr.vmem [resolvable:$true] %s59_s29  ;;  %s87_s1 = int_to_ptr.hbm [resolvable:$true] %s86_s1 }
  0x12   :  { %s12967_s10 = smov 192   ;;  %s12968_s11 = smov 12  }
  0x13   :  { %65 = dma.hbm_to_vmem [thread:$0]  %s58_s28, 3072, %s60_s29, [#allocation9], %s12967_s10, %s12967_s10, %s12968_s11  }
  0x14   :  { %s12969_s12 = smov [#allocation13]  }
  0x15   :  { %s88_s13 = sshll.u32 %s12969_s12, 4  ;;  %s89_s13 = int_to_ptr.vmem [resolvable:$true] %s88_s13 }
  0x16   :  { %91 = dma.hbm_to_vmem [thread:$0]  %s87_s1, 112, %s89_s13, [#allocation12]  }
  0x17   :  { %12946 = dma.done.wait [#allocation6], 16  }
  0x18   :  { %12947 = vsyncadd [#allocation6], 4294967280 }
  0x19   :  { %12948 = dma.done.wait [#allocation4], 896  }
  0x1a   :  { %12949 = vsyncadd [#allocation4], 4294966400 }
  0x1b   :  { %12950 = dma.done.wait [#allocation9], 3104  }
  0x1c   :  { %12951 = vsyncadd [#allocation9], 4294964192 }
  0x1d   :  { %12952 = dma.done.wait [#allocation12], 14448  }
  0x1e   :  { %12953 = vsyncadd [#allocation12], 4294952848 }
  0x1f   :  { %116 = sfence }
  0x20   :  { %v8284_v0 = vld [vmem:[#allocation10 + $0xa8] sm:$0xf]  ;;  %v11740_v1 = vld [vmem:[#allocation10 + $0xb0] sm:$0xf0]  ;;  %v11739_v2 = vld [vmem:[#allocation10 + $0xac] sm:$0xf] }
  0x21   :  { %v8285_v3 = vor.u32 %v11740_v1, %v8284_v0  ;;  %v8286_v4 = vld [vmem:[#allocation10 + $0xb4] sm:$0xf0]  ;;  %v8292_v5 = vld [vmem:[#allocation10 + $0xb0] sm:$0xf]  ;;  %v11741_v6 = vld [vmem:[#allocation10 + $0xb8] sm:$0xf0] }
  0x22   :  { %v8289_v7 = vor.u32 %v11739_v2, %v8286_v4  ;;  %v8293_v8 = vor.u32 %v11741_v6, %v8292_v5  ;;  %v8272_v9 = vld [vmem:[#allocation10 + $0x90] sm:$0xf]  ;;  %v11737_v10 = vld [vmem:[#allocation10 + $0x98] sm:$0xf0]  ;;  %v11736_v11 = vld [vmem:[#allocation10 + $0x94] sm:$0xf] }
  0x23   :  { %319 = vmatpush.bf16.msra.mxu0 %v8285_v3  ;;  %v8273_v12 = vor.u32 %v11737_v10, %v8272_v9  ;;  %v8274_v13 = vld [vmem:[#allocation10 + $0x9c] sm:$0xf0]  ;;  %v8280_v14 = vld [vmem:[#allocation10 + $0x98] sm:$0xf]  ;;  %v11738_v15 = vld [vmem:[#allocation10 + $0xa0] sm:$0xf0] }
  0x24   :  { %332 = vmatpush.bf16.msra.mxu1 %v8289_v7  ;;  %345 = vmatpush.bf16.msra.mxu2 %v8293_v8  ;;  %v8277_v16 = vor.u32 %v11736_v11, %v8274_v13  ;;  %v8281_v17 = vor.u32 %v11738_v15, %v8280_v14  ;;  %v8260_v18 = vld [vmem:[#allocation10 + $0x78] sm:$0xf]  ;;  %v11734_v19 = vld [vmem:[#allocation10 + $0x80] sm:$0xf0]  ;;  %v11733_v20 = vld [vmem:[#allocation10 + $0x7c] sm:$0xf] }
  0x25   :  { %v8262_v21 = vld [vmem:[#allocation10 + $0x84] sm:$0xf0]  ;;  %v8268_v22 = vld [vmem:[#allocation10 + $0x80] sm:$0xf]  ;;  %v11735_v23 = vld [vmem:[#allocation10 + $0x88] sm:$0xf0]  ;;  %v8261_v24 = vor.u32 %v11734_v19, %v8260_v18 }
  0x26   :  { %v8248_v25 = vld [vmem:[#allocation10 + $0x60] sm:$0xf]  ;;  %v11731_v26 = vld [vmem:[#allocation10 + $0x68] sm:$0xf0]  ;;  %v8265_v27 = vor.u32 %v11733_v20, %v8262_v21  ;;  %v8269_v28 = vor.u32 %v11735_v23, %v8268_v22  ;;  %v11730_v29 = vld [vmem:[#allocation10 + $0x64] sm:$0xf] }
  0x27   :  { %320 = vmatpush.bf16.msra.mxu0 %v8273_v12  ;;  %v8380_v30 = vld [vmem:[#allocation11 + $0x188] sm:$0xf]  ;;  %v11794_v31 = vld [vmem:[#allocation11 + $0x1a0] sm:$0xf0]  ;;  %v8250_v32 = vld [vmem:[#allocation10 + $0x6c] sm:$0xf0]  ;;  %v8249_v37 = vor.u32 %v11731_v26, %v8248_v25 }
  0x28   :  { %333 = vmatpush.bf16.msra.mxu1 %v8277_v16  ;;  %346 = vmatpush.bf16.msra.mxu2 %v8281_v17  ;;  %v8256_v33 = vld [vmem:[#allocation10 + $0x68] sm:$0xf]  ;;  %v11732_v34 = vld [vmem:[#allocation10 + $0x70] sm:$0xf0]  ;;  %v13035_v35 = vor.u32 %v11794_v31, %v8380_v30  ;;  %v8368_v36 = vld [vmem:[#allocation11 + $0x150] sm:$0xf]  ;;  %v8253_v41 = vor.u32 %v11730_v29, %v8250_v32 }
  0x29   :  { %v8236_v38 = vld [vmem:[#allocation10 + $0x48] sm:$0xf]  ;;  %v11728_v39 = vld [vmem:[#allocation10 + $0x50] sm:$0xf0]  ;;  %v11787_v40 = vld [vmem:[#allocation11 + $0x168] sm:$0xf0]  ;;  %v8257_v42 = vor.u32 %v11732_v34, %v8256_v33 }
  0x2a   :  { %754 = vmatpush.bf16.msra.mxu3 %v13035_v35  ;;  %v11727_v43 = vld [vmem:[#allocation10 + $0x4c] sm:$0xf]  ;;  %v8238_v44 = vld [vmem:[#allocation10 + $0x54] sm:$0xf0]  ;;  %v8244_v45 = vld [vmem:[#allocation10 + $0x50] sm:$0xf]  ;;  %v13038_v46 = vor.u32 %v11787_v40, %v8368_v36  ;;  %v8237_v50 = vor.u32 %v11728_v39, %v8236_v38 }
  0x2b   :  { %321 = vmatpush.bf16.msra.mxu0 %v8261_v24  ;;  %v11729_v47 = vld [vmem:[#allocation10 + $0x58] sm:$0xf0]  ;;  %v8356_v48 = vld [vmem:[#allocation11 + $0x118] sm:$0xf]  ;;  %v11780_v49 = vld [vmem:[#allocation11 + $0x130] sm:$0xf0]  ;;  %v8241_v54 = vor.u32 %v11727_v43, %v8238_v44 }
  0x2c   :  { %334 = vmatpush.bf16.msra.mxu1 %v8265_v27  ;;  %347 = vmatpush.bf16.msra.mxu2 %v8269_v28  ;;  %v8224_v51 = vld [vmem:[#allocation10 + $0x30] sm:$0xf]  ;;  %v11725_v52 = vld [vmem:[#allocation10 + $0x38] sm:$0xf0]  ;;  %v13041_v53 = vor.u32 %v11780_v49, %v8356_v48  ;;  %v8245_v55 = vor.u32 %v11729_v47, %v8244_v45  ;;  %v11724_v56 = vld [vmem:[#allocation10 + $0x34] sm:$0xf] }
  0x2d   :  { %v8344_v57 = vld [vmem:[#allocation11 + $0xe0] sm:$0xf]  ;;  %v11773_v58 = vld [vmem:[#allocation11 + $0xf8] sm:$0xf0]  ;;  %v8232_v60 = vld [vmem:[#allocation10 + $0x38] sm:$0xf]  ;;  %v8225_v62 = vor.u32 %v11725_v52, %v8224_v51 }
  0x2e   :  { %755 = vmatpush.bf16.msra.mxu3 %v13038_v46  ;;  %v8226_v59 = vld [vmem:[#allocation10 + $0x3c] sm:$0xf0]  ;;  %v11726_v61 = vld [vmem:[#allocation10 + $0x40] sm:$0xf0]  ;;  %v8212_v63 = vld [vmem:[#allocation10 + $0x18] sm:$0xf]  ;;  %v13044_v1 = vor.u32 %v11773_v58, %v8344_v57 }
  0x2f   :  { %322 = vmatpush.bf16.msra.mxu0 %v8249_v37  ;;  %v11722_v0 = vld [vmem:[#allocation10 + $0x20] sm:$0xf0]  ;;  %v8229_v2 = vor.u32 %v11724_v56, %v8226_v59  ;;  %v8233_v3 = vor.u32 %v11726_v61, %v8232_v60  ;;  %v11721_v4 = vld [vmem:[#allocation10 + $0x1c] sm:$0xf]  ;;  %v8332_v5 = vld [vmem:[#allocation11 + $0xa8] sm:$0xf] }
  0x30   :  { %335 = vmatpush.bf16.msra.mxu1 %v8253_v41  ;;  %348 = vmatpush.bf16.msra.mxu2 %v8257_v42  ;;  %v11766_v6 = vld [vmem:[#allocation11 + $0xc0] sm:$0xf0]  ;;  %v8214_v7 = vld [vmem:[#allocation10 + $0x24] sm:$0xf0]  ;;  %v8220_v8 = vld [vmem:[#allocation10 + $0x20] sm:$0xf]  ;;  %v8213_v12 = vor.u32 %v11722_v0, %v8212_v63 }
  0x31   :  { %v11723_v9 = vld [vmem:[#allocation10 + $0x28] sm:$0xf0]  ;;  %v8200_v10 = vld [vmem:[#allocation10] sm:$0xf]  ;;  %v11718_v13 = vld [vmem:[#allocation10 + $0x4] sm:$0xf]  ;;  %v13047_v17 = vor.u32 %v11766_v6, %v8332_v5  ;;  %v8217_v18 = vor.u32 %v11721_v4, %v8214_v7 }
  0x32   :  { %756 = vmatpush.bf16.msra.mxu3 %v13041_v53  ;;  %v11719_v11 = vld [vmem:[#allocation10 + $0x8] sm:$0xf0]  ;;  %v8202_v14 = vld [vmem:[#allocation10 + $0xc] sm:$0xf0]  ;;  %v8208_v15 = vld [vmem:[#allocation10 + $0x8] sm:$0xf]  ;;  %v8221_v19 = vor.u32 %v11723_v9, %v8220_v8 }
  0x33   :  { %323 = vmatpush.bf16.msra.mxu0 %v8237_v50  ;;  %v11720_v16 = vld [vmem:[#allocation10 + $0x10] sm:$0xf0]  ;;  %v8320_v20 = vld [vmem:[#allocation11 + $0x70] sm:$0xf]  ;;  %v11759_v21 = vld [vmem:[#allocation11 + $0x88] sm:$0xf0]  ;;  %v8201_v26 = vor.u32 %v11719_v11, %v8200_v10  ;;  %v8205_v30 = vor.u32 %v11718_v13, %v8202_v14 }
  0x34   :  { %336 = vmatpush.bf16.msra.mxu1 %v8241_v54  ;;  %349 = vmatpush.bf16.msra.mxu2 %v8245_v55  ;;  %s13049_s3 = sld [smem:[#allocation3]]  ;;  %v8476_v22 = vld [vmem:[#allocation11 + $0x348] sm:$0xf]  ;;  %v11850_v23 = vld [vmem:[#allocation11 + $0x360] sm:$0xf0]  ;;  %v13056_v29 = vor.u32 %v11759_v21, %v8320_v20  ;;  %v8209_v31 = vor.u32 %v11720_v16, %v8208_v15  ;;  %s8154_s30 = sshll.u32 %s14385_s7, 4  ;;  %s8155_s30 = int_to_ptr.hbm [resolvable:$true] %s8154_s30 }
  0x35   :  { %s13051_s6 = sld [smem:[#allocation3 + $0x1]]  ;;  %v11791_v24 = vld [vmem:[#allocation11 + $0x18c] sm:$0xf]  ;;  %v8382_v25 = vld [vmem:[#allocation11 + $0x1a4] sm:$0xf0]  ;;  %v13062_v39 = vor.u32 %v11850_v23, %v8476_v22  ;;  %s12971_s9 = smov [#allocation15]  }
  0x36   :  { %757 = vmatpush.bf16.msra.mxu3 %v13044_v1  ;;  %s13053_s14 = sld [smem:[#allocation3 + $0x2]]  ;;  %v11847_v27 = vld [vmem:[#allocation11 + $0x34c] sm:$0xf]  ;;  %v8478_v28 = vld [vmem:[#allocation11 + $0x364] sm:$0xf0]  ;;  %v13064_v40 = vor.u32 %v11791_v24, %v8382_v25  ;;  %s8163_s1 = sshll.u32 %s12971_s9, 4  ;;  %s8164_s1 = int_to_ptr.vmem [resolvable:$true] %s8163_s1 }
  0x37   :  { %324 = vmatpush.bf16.msra.mxu0 %v8225_v62  ;;  %s13058_s15 = sld [smem:[#allocation3 + $0x3]]  ;;  %v8464_v32 = vld [vmem:[#allocation11 + $0x310] sm:$0xf]  ;;  %v11843_v33 = vld [vmem:[#allocation11 + $0x328] sm:$0xf0]  ;;  %v13068_v43 = vor.u32 %v11847_v27, %v8478_v28  ;;  %s8165_s12 = sshll.u32 %s14386_s8, 4  ;;  %s8166_s12 = int_to_ptr.hbm [resolvable:$true] %s8165_s12 }
  0x38   :  { %337 = vmatpush.bf16.msra.mxu1 %v8229_v2  ;;  %350 = vmatpush.bf16.msra.mxu2 %v8233_v3  ;;  %v11784_v34 = vld [vmem:[#allocation11 + $0x154] sm:$0xf]  ;;  %v8370_v36 = vld [vmem:[#allocation11 + $0x16c] sm:$0xf0]  ;;  %s13060_s16 = sld [smem:[#allocation3 + $0x4]]  ;;  %v13081_v55 = vor.u32 %v11843_v33, %v8464_v32 }
  0x39   :  { %v8308_v37 = vld [vmem:[#allocation11 + $0x38] sm:$0xf]  ;;  %v11752_v38 = vld [vmem:[#allocation11 + $0x50] sm:$0xf0]  ;;  %v8466_v42 = vld [vmem:[#allocation11 + $0x32c] sm:$0xf0]  ;;  %v13083_v56 = vor.u32 %v11784_v34, %v8370_v36 }
  0x3a   :  { %758 = vmatpush.bf16.msra.mxu3 %v13047_v17  ;;  %v11840_v41 = vld [vmem:[#allocation11 + $0x314] sm:$0xf]  ;;  %s13066_s17 = sld [smem:[#allocation3 + $0x5]]  ;;  %v8296_v44 = vld [vmem:[#allocation11] sm:$0xf]  ;;  %s118_s2 = scalar_lea.vmem [#allocation7], %s13049_s3  ;;  %v13076_v48 = vor.u32 %v11752_v38, %v8308_v37 }
  0x3b   :  { %325 = vmatpush.bf16.msra.mxu0 %v8213_v12  ;;  %s13070_s18 = sld [smem:[#allocation3 + $0x6]]  ;;  %v11745_v45 = vld [vmem:[#allocation11 + $0x18] sm:$0xf0]  ;;  %s122_s20 = scalar_lea.vmem [#allocation7], %s13051_s6  ;;  %v8452_v50 = vld [vmem:[#allocation11 + $0x2d8] sm:$0xf]  ;;  %v13087_v60 = vor.u32 %v11840_v41, %v8466_v42 }
  0x3c   :  { %338 = vmatpush.bf16.msra.mxu1 %v8217_v18  ;;  %351 = vmatpush.bf16.msra.mxu2 %v8221_v19  ;;  %v119_v47 = vld [vmem:[%s118_s2] sm:$0x1]  ;;  %s13074_s19 = sld [smem:[#allocation3 + $0x7]]  ;;  %v11836_v51 = vld [vmem:[#allocation11 + $0x2f0] sm:$0xf0]  ;;  %s126_s21 = scalar_lea.vmem [#allocation7], %s13053_s14  ;;  %v13092_v63 = vor.u32 %v11745_v45, %v8296_v44 }
  0x3d   :  { %120 = vst [vmem:[#allocation2] sm:$0x1] %v119_v47  ;;  %v123_v49 = vld [vmem:[%s122_s20] sm:$0x1]  ;;  %v8358_v54 = vld [vmem:[#allocation11 + $0x134] sm:$0xf0]  ;;  %v13098_v6 = vor.u32 %v11836_v51, %v8452_v50 }
  0x3e   :  { %759 = vmatpush.bf16.msra.mxu3 %v13056_v29  ;;  %v11777_v52 = vld [vmem:[#allocation11 + $0x11c] sm:$0xf]  ;;  %124 = vst [vmem:[#allocation2 + $0x1] sm:$0x1] %v123_v49  ;;  %v8454_v59 = vld [vmem:[#allocation11 + $0x2f4] sm:$0xf0] }
  0x3f   :  { %326 = vmatpush.bf16.msra.mxu0 %v8201_v26  ;;  %v127_v57 = vld [vmem:[%s126_s21] sm:$0x1]  ;;  %s130_s22 = scalar_lea.vmem [#allocation7], %s13058_s15  ;;  %s134_s5 = scalar_lea.vmem [#allocation7], %s13060_s16  ;;  %v8440_v0 = vld [vmem:[#allocation11 + $0x2a0] sm:$0xf]  ;;  %v13100_v7 = vor.u32 %v11777_v52, %v8358_v54 }
  0x40   :  { %339 = vmatpush.bf16.msra.mxu1 %v8205_v30  ;;  %352 = vmatpush.bf16.msra.mxu2 %v8209_v31  ;;  %v11833_v58 = vld [vmem:[#allocation11 + $0x2dc] sm:$0xf]  ;;  %128 = vst [vmem:[#allocation2 + $0x2] sm:$0x1] %v127_v57  ;;  %s138_s23 = scalar_lea.vmem [#allocation7], %s13066_s17 }
  0x41   :  { %v131_v61 = vld [vmem:[%s130_s22] sm:$0x1]  ;;  %v11770_v4 = vld [vmem:[#allocation11 + $0xe4] sm:$0xf]  ;;  %s142_s24 = scalar_lea.vmem [#allocation7], %s13070_s18  ;;  %v13104_v9 = vor.u32 %v11833_v58, %v8454_v59 }
  0x42   :  { %132 = vst [vmem:[#allocation2 + $0x3] sm:$0x1] %v131_v61  ;;  %v135_v62 = vld [vmem:[%s134_s5] sm:$0x1]  ;;  %760 = vmatpush.bf16.msra.mxu3 %v13076_v48  ;;  %s146_s25 = scalar_lea.vmem [#allocation7], %s13074_s19 }
  0x43   :  { %767 = vmatpush.bf16.msrb.mxu0 %v13062_v39  ;;  %v11829_v2 = vld [vmem:[#allocation11 + $0x2b8] sm:$0xf0]  ;;  %136 = vst [vmem:[#allocation2 + $0x4] sm:$0x1] %v135_v62  ;;  %v8346_v10 = vld [vmem:[#allocation11 + $0xfc] sm:$0xf0] }
  0x44   :  { %780 = vmatpush.bf16.msrb.mxu1 %v13064_v40  ;;  %793 = vmatpush.bf16.msrb.mxu2 %v13068_v43  ;;  %v139_v3 = vld [vmem:[%s138_s23] sm:$0x1]  ;;  %v11826_v11 = vld [vmem:[#allocation11 + $0x2a4] sm:$0xf]  ;;  %v8442_v12 = vld [vmem:[#allocation11 + $0x2bc] sm:$0xf0]  ;;  %v13107_v13 = vor.u32 %v11829_v2, %v8440_v0  ;;  %v13113_v18 = vor.u32 %v11770_v4, %v8346_v10 }
  0x45   :  { %140 = vst [vmem:[#allocation2 + $0x5] sm:$0x1] %v139_v3  ;;  %v143_v5 = vld [vmem:[%s142_s24] sm:$0x1]  ;;  %v8388_v14 = vld [vmem:[#allocation11 + $0x190] sm:$0xf]  ;;  %v13122_v21 = vor.u32 %v11826_v11, %v8442_v12 }
  0x46   :  { %144 = vst [vmem:[#allocation2 + $0x6] sm:$0x1] %v143_v5  ;;  %v147_v8 = vld [vmem:[%s146_s25] sm:$0x1]  ;;  %761 = vmatpush.bf16.msra.mxu3 %v13092_v63  ;;  %v11795_v15 = vld [vmem:[#allocation11 + $0x1a8] sm:$0xf0] }
  0x47   :  { %768 = vmatpush.bf16.msrb.mxu0 %v13081_v55  ;;  %148 = vst [vmem:[#allocation2 + $0x7] sm:$0x1] %v147_v8  ;;  %v13109_v16 = vld [vmem:[#allocation8] sm:$0x1]  ;;  %v13115_v19 = vor.u32 %v11795_v15, %v8388_v14  ;;  %v8428_v22 = vld [vmem:[#allocation11 + $0x268] sm:$0xf] }
  0x48   :  { %781 = vmatpush.bf16.msrb.mxu1 %v13083_v56  ;;  %794 = vmatpush.bf16.msrb.mxu2 %v13087_v60  ;;  %v13119_v20 = vpack.c.bf16 %v13109_v16, %v13109_v16  ;;  %v11822_v23 = vld [vmem:[#allocation11 + $0x280] sm:$0xf0]  ;;  %v11763_v24 = vld [vmem:[#allocation11 + $0xac] sm:$0xf]  ;;  %v8376_v25 = vld [vmem:[#allocation11 + $0x158] sm:$0xf] }
  0x49   :  { %v11788_v26 = vld [vmem:[#allocation11 + $0x170] sm:$0xf0]  ;;  %v8334_v27 = vld [vmem:[#allocation11 + $0xc4] sm:$0xf0]  ;;  %v11819_v28 = vld [vmem:[#allocation11 + $0x26c] sm:$0xf]  ;;  %v13131_v34 = vor.u32 %v11822_v23, %v8428_v22 }
  0x4a   :  { %806 = vmatpush.bf16.msrb.mxu3 %v13115_v19  ;;  %v8430_v30 = vld [vmem:[#allocation11 + $0x284] sm:$0xf0]  ;;  %v13126_v31 = vor.u32 %v11788_v26, %v8376_v25  ;;  %v8364_v32 = vld [vmem:[#allocation11 + $0x120] sm:$0xf]  ;;  %v11781_v36 = vld [vmem:[#allocation11 + $0x138] sm:$0xf0]  ;;  %v13133_v38 = vor.u32 %v11763_v24, %v8334_v27 }
  0x4b   :  { %769 = vmatpush.bf16.msrb.mxu0 %v13098_v6  ;;  %762 = vmatmul.bf16.vlgmr.msra.gmra.mxu3 %v13119_v20  ;;  %v13135_v41 = vor.u32 %v11819_v28, %v8430_v30  ;;  %v8416_v42 = vld [vmem:[#allocation11 + $0x230] sm:$0xf]  ;;  %v11815_v44 = vld [vmem:[#allocation11 + $0x248] sm:$0xf0]  ;;  %v11756_v45 = vld [vmem:[#allocation11 + $0x74] sm:$0xf]  ;;  %v13138_v51 = vor.u32 %v11781_v36, %v8364_v32 }
  0x4c   :  { %782 = vmatpush.bf16.msrb.mxu1 %v13100_v7  ;;  %795 = vmatpush.bf16.msrb.mxu2 %v13104_v9  ;;  %v8322_v47 = vld [vmem:[#allocation11 + $0x8c] sm:$0xf0]  ;;  %v11812_v49 = vld [vmem:[#allocation11 + $0x234] sm:$0xf]  ;;  %v8352_v52 = vld [vmem:[#allocation11 + $0xe8] sm:$0xf]  ;;  %v13141_v57 = vor.u32 %v11815_v44, %v8416_v42 }
  0x4d   :  { %v8418_v50 = vld [vmem:[#allocation11 + $0x24c] sm:$0xf0]  ;;  %v11774_v54 = vld [vmem:[#allocation11 + $0x100] sm:$0xf0]  ;;  %v13145_v58 = vor.u32 %v11756_v45, %v8322_v47  ;;  %v8404_v61 = vld [vmem:[#allocation11 + $0x1f8] sm:$0xf] }
  0x4e   :  { %v149_v33 = vld [vmem:[#allocation2] sm:$0xff]  ;;  %807 = vmatpush.bf16.msrb.mxu3 %v13126_v31  ;;  %v13147_v59 = vor.u32 %v11812_v49, %v8418_v50  ;;  %v11808_v62 = vld [vmem:[#allocation11 + $0x210] sm:$0xf0]  ;;  %v8310_v2 = vld [vmem:[#allocation11 + $0x54] sm:$0xf0]  ;;  %v13150_v5 = vor.u32 %v11774_v54, %v8352_v52 }
  0x4f   :  { %770 = vmatpush.bf16.msrb.mxu0 %v13107_v13  ;;  %v150_v37 = vpack.c.bf16 %v149_v33, %v149_v33  ;;  %v11749_v0 = vld [vmem:[#allocation11 + $0x3c] sm:$0xf]  ;;  %v8406_v4 = vld [vmem:[#allocation11 + $0x214] sm:$0xf0]  ;;  %v8340_v8 = vld [vmem:[#allocation11 + $0xb0] sm:$0xf]  ;;  %v13153_v11 = vor.u32 %v11808_v62, %v8404_v61 }
  0x50   :  { %783 = vmatpush.bf16.msrb.mxu1 %v13113_v18  ;;  %796 = vmatpush.bf16.msrb.mxu2 %v13122_v21  ;;  %v11805_v3 = vld [vmem:[#allocation11 + $0x1fc] sm:$0xf]  ;;  %v11767_v10 = vld [vmem:[#allocation11 + $0xc8] sm:$0xf0]  ;;  %v8392_v12 = vld [vmem:[#allocation11 + $0x1c0] sm:$0xf]  ;;  %v13157_v14 = vor.u32 %v11749_v0, %v8310_v2 }
  0x51   :  { %327 = vmatmul.bf16.vlgmr.msra.gmra.mxu0 %v150_v37  ;;  %353 = vmatmul.bf16.vlgmr.msra.gmra.mxu2 %v150_v37  ;;  %v13159_v15 = vor.u32 %v11805_v3, %v8406_v4  ;;  %v11801_v22 = vld [vmem:[#allocation11 + $0x1d8] sm:$0xf0]  ;;  %v11742_v23 = vld [vmem:[#allocation11 + $0x4] sm:$0xf]  ;;  %v8298_v24 = vld [vmem:[#allocation11 + $0x1c] sm:$0xf0]  ;;  %v13162_v28 = vor.u32 %v11767_v10, %v8340_v8 }
  0x52   :  { %340 = vmatmul.bf16.vlgmr.msra.gmra.mxu1 %v150_v37  ;;  %808 = vmatpush.bf16.msrb.mxu3 %v13138_v51  ;;  %v11798_v25 = vld [vmem:[#allocation11 + $0x1c4] sm:$0xf]  ;;  %v8394_v26 = vld [vmem:[#allocation11 + $0x1dc] sm:$0xf0]  ;;  %v8484_v27 = vld [vmem:[#allocation11 + $0x350] sm:$0xf]  ;;  %v13165_v36 = vor.u32 %v11801_v22, %v8392_v12  ;;  %v13169_v42 = vor.u32 %v11742_v23, %v8298_v24 }
  0x53   :  { %771 = vmatpush.bf16.msrb.mxu0 %v13131_v34  ;;  %v11851_v30 = vld [vmem:[#allocation11 + $0x368] sm:$0xf0]  ;;  %v8328_v32 = vld [vmem:[#allocation11 + $0x78] sm:$0xf]  ;;  %v11760_v33 = vld [vmem:[#allocation11 + $0x90] sm:$0xf0]  ;;  %v13171_v44 = vor.u32 %v11798_v25, %v8394_v26 }
  0x54   :  { %784 = vmatpush.bf16.msrb.mxu1 %v13133_v38  ;;  %797 = vmatpush.bf16.msrb.mxu2 %v13135_v41  ;;  %v360_v37 = vld [vmem:[#allocation8 + $0x1] sm:$0x1]  ;;  %v13173_v45 = vor.u32 %v11851_v30, %v8484_v27  ;;  %v8472_v47 = vld [vmem:[#allocation11 + $0x318] sm:$0xf]  ;;  %v13176_v49 = vor.u32 %v11760_v33, %v8328_v32  ;;  %v11844_v52 = vld [vmem:[#allocation11 + $0x330] sm:$0xf0] }
  0x55   :  { %v13178_v50 = vpack.c.bf16 %v360_v37, %v360_v37  ;;  %v8316_v54 = vld [vmem:[#allocation11 + $0x40] sm:$0xf]  ;;  %v11753_v61 = vld [vmem:[#allocation11 + $0x58] sm:$0xf0]  ;;  %v13184_v62 = vor.u32 %v11844_v52, %v8472_v47  ;;  %v8304_v4 = vld [vmem:[#allocation11 + $0x8] sm:$0xf] }
  0x56   :  { %809 = vmatpush.bf16.msrb.mxu3 %v13150_v5  ;;  %v8460_v0 = vld [vmem:[#allocation11 + $0x2e0] sm:$0xf]  ;;  %v13187_v2 = vor.u32 %v11753_v61, %v8316_v54  ;;  %v11837_v3 = vld [vmem:[#allocation11 + $0x2f8] sm:$0xf0]  ;;  %v11746_v8 = vld [vmem:[#allocation11 + $0x20] sm:$0xf0] }
  0x57   :  { %772 = vmatpush.bf16.msrb.mxu0 %v13141_v57  ;;  %v8461_v10 = vor.u32 %v11837_v3, %v8460_v0  ;;  %v13196_v12 = vor.u32 %v11746_v8, %v8304_v4  ;;  %v8448_v22 = vld [vmem:[#allocation11 + $0x2a8] sm:$0xf]  ;;  %v11830_v23 = vld [vmem:[#allocation11 + $0x2c0] sm:$0xf0]  ;;  %v8436_v24 = vld [vmem:[#allocation11 + $0x270] sm:$0xf] }
  0x58   :  { %785 = vmatpush.bf16.msrb.mxu1 %v13145_v58  ;;  %798 = vmatpush.bf16.msrb.mxu2 %v13147_v59  ;;  %v11823_v25 = vld [vmem:[#allocation11 + $0x288] sm:$0xf0]  ;;  %v8424_v26 = vld [vmem:[#allocation11 + $0x238] sm:$0xf]  ;;  %v8412_v27 = vld [vmem:[#allocation11 + $0x200] sm:$0xf] }
  0x59   :  { %v8568_v30 = vld [vmem:[#allocation11 + $0x13c] sm:$0xf0]  ;;  %v11848_v32 = vld [vmem:[#allocation11 + $0x354] sm:$0xf]  ;;  %v8552_v52 = vld [vmem:[#allocation11 + $0x104] sm:$0xf0] }
  0x5a   :  { %810 = vmatpush.bf16.msrb.mxu3 %v13162_v28  ;;  %v11841_v54 = vld [vmem:[#allocation11 + $0x31c] sm:$0xf]  ;;  %v8712_v3 = vld [vmem:[#allocation11 + $0x334] sm:$0xf0] }
  0x5b   :  { %773 = vmatpush.bf16.msrb.mxu0 %v13153_v11  ;;  %v8715_v8 = vor.u32 %v11841_v54, %v8712_v3  ;;  %v11806_v54 = vld [vmem:[#allocation11 + $0x204] sm:$0xf] }
  0x5c   :  { %786 = vmatpush.bf16.msrb.mxu1 %v13157_v14  ;;  %799 = vmatpush.bf16.msrb.mxu2 %v13159_v15 }
  0x5e   :  { %811 = vmatpush.bf16.msrb.mxu3 %v13176_v49 }
  0x5f   :  { %774 = vmatpush.bf16.msrb.mxu0 %v13165_v36 }
  0x60   :  { %787 = vmatpush.bf16.msrb.mxu1 %v13169_v42  ;;  %800 = vmatpush.bf16.msrb.mxu2 %v13171_v44 }
  0x62   :  { %775 = vmatmul.bf16.vlgmr.msrb.gmra.mxu0 %v13178_v50  ;;  %812 = vmatpush.bf16.msrb.mxu3 %v13187_v2 }
  0x63   :  { %819 = vmatpush.bf16.msra.mxu0 %v13173_v45  ;;  %788 = vmatmul.bf16.vlgmr.msrb.gmra.mxu1 %v13119_v20 }
  0x64   :  { %1221 = vmatpush.bf16.msra.mxu2 %v13062_v39  ;;  %1208 = vmatpush.bf16.msra.mxu1 %v13035_v35  ;;  %v8449_v39 = vor.u32 %v11830_v23, %v8448_v22  ;;  %v8437_v35 = vor.u32 %v11823_v25, %v8436_v24  ;;  %v8536_v22 = vld [vmem:[#allocation11 + $0xcc] sm:$0xf0]  ;;  %v11834_v23 = vld [vmem:[#allocation11 + $0x2e4] sm:$0xf]  ;;  %v8696_v25 = vld [vmem:[#allocation11 + $0x2fc] sm:$0xf0] }
  0x65   :  { %801 = vmatmul.bf16.vlgmr.msrb.gmra.mxu2 %v13178_v50 }
  0x66   :  { %813 = vmatpush.bf16.msrb.mxu3 %v13196_v12 }
  0x67   :  { %820 = vmatpush.bf16.msra.mxu0 %v13184_v62 }
  0x68   :  { %1222 = vmatpush.bf16.msra.mxu2 %v13081_v55  ;;  %1209 = vmatpush.bf16.msra.mxu1 %v13038_v46  ;;  %v11816_v55 = vld [vmem:[#allocation11 + $0x250] sm:$0xf0] }
  0x69   :  { %814 = vmatmul.bf16.vlgmr.msrb.gmra.mxu3 %v13119_v20  ;;  %v8425_v46 = vor.u32 %v11816_v55, %v8424_v26  ;;  %v11802_v20 = vld [vmem:[#allocation11 + $0x1e0] sm:$0xf0]  ;;  %v8699_v55 = vor.u32 %v11834_v23, %v8696_v25 }
  0x6a   :  { %1234 = vmatpush.bf16.msra.mxu3 %v13064_v40  ;;  %v8400_v40 = vld [vmem:[#allocation11 + $0x1c8] sm:$0xf] }
  0x6b   :  { %821 = vmatpush.bf16.msra.mxu0 %v8461_v10 }
  0x6c   :  { %1223 = vmatpush.bf16.msra.mxu2 %v13098_v6  ;;  %1210 = vmatpush.bf16.msra.mxu1 %v13041_v53  ;;  %v11809_v6 = vld [vmem:[#allocation11 + $0x218] sm:$0xf0] }
  0x6d   :  { %v8413_v53 = vor.u32 %v11809_v6, %v8412_v27 }
  0x6e   :  { %1235 = vmatpush.bf16.msra.mxu3 %v13083_v56  ;;  %v13246_v56 = vld [vmem:[#allocation13] sm:$0xff] }
  0x6f   :  { %822 = vmatpush.bf16.msra.mxu0 %v8449_v39 }
  0x70   :  { %1224 = vmatpush.bf16.msra.mxu2 %v13107_v13  ;;  %1211 = vmatpush.bf16.msra.mxu1 %v13044_v1  ;;  %v8401_v1 = vor.u32 %v11802_v20, %v8400_v40  ;;  %v13254_v13 = vld [vmem:[%s14382_s4] sm:$0x7]  ;;  %v8520_v20 = vld [vmem:[#allocation11 + $0x94] sm:$0xf0]  ;;  %s12970_s4 = smov [#allocation14]  }
  0x71   :  { %v186_v33 = vperm.slane %v13254_v13, 1  ;;  %v11757_v40 = vld [vmem:[#allocation11 + $0x7c] sm:$0xf]  ;;  %s8152_s28 = sshll.u32 %s12970_s4, 4  ;;  %s8153_s28 = int_to_ptr.vmem [resolvable:$true] %s8152_s28 }
  0x72   :  { %1236 = vmatpush.bf16.msra.mxu3 %v13100_v7 }
  0x73   :  { %823 = vmatpush.bf16.msra.mxu0 %v8437_v35 }
  0x74   :  { %1225 = vmatpush.bf16.msra.mxu2 %v13131_v34  ;;  %1212 = vmatpush.bf16.msra.mxu1 %v13047_v17 }
  0x76   :  { %1237 = vmatpush.bf16.msra.mxu3 %v13113_v18  ;;  %v11792_v18 = vld [vmem:[#allocation11 + $0x194] sm:$0xf] }
  0x77   :  { %824 = vmatpush.bf16.msra.mxu0 %v8425_v46 }
  0x78   :  { %1226 = vmatpush.bf16.msra.mxu2 %v13141_v57  ;;  %1213 = vmatpush.bf16.msra.mxu1 %v13056_v29 }
  0x7a   :  { %1238 = vmatpush.bf16.msra.mxu3 %v13133_v38 }
  0x7b   :  { %825 = vmatpush.bf16.msra.mxu0 %v8413_v53 }
  0x7c   :  { %1227 = vmatpush.bf16.msra.mxu2 %v13153_v11  ;;  %1214 = vmatpush.bf16.msra.mxu1 %v13076_v48 }
  0x7e   :  { %1239 = vmatpush.bf16.msra.mxu3 %v13145_v58  ;;  %v13259_v58 = vperm.slane %v13246_v56, 1 }
  0x7f   :  { %826 = vmatpush.bf16.msra.mxu0 %v8401_v1 }
  0x80   :  { %1228 = vmatpush.bf16.msra.mxu2 %v13165_v36  ;;  %1215 = vmatpush.bf16.msra.mxu1 %v13092_v63  ;;  %v13249_v63 = vperm.slane %v13246_v56, 0 }
  0x82   :  { %827 = vmatmul.bf16.vlgmr.msra.gmra.mxu0 %v13178_v50  ;;  %1240 = vmatpush.bf16.msra.mxu3 %v13157_v14 }
  0x83   :  { %1247 = vmatpush.bf16.msrb.mxu0 %v13068_v43  ;;  %1229 = vmatmul.bf16.vlgmr.msra.gmra.mxu2 %v13178_v50 }
  0x84   :  { %1273 = vmatpush.bf16.msrb.mxu2 %v13173_v45  ;;  %1260 = vmatpush.bf16.msrb.mxu1 %v13115_v19  ;;  %v8600_v19 = vld [vmem:[#allocation11 + $0x1ac] sm:$0xf0] }
  0x86   :  { %1241 = vmatpush.bf16.msra.mxu3 %v13169_v42  ;;  %v8728_v42 = vld [vmem:[#allocation11 + $0x36c] sm:$0xf0] }
  0x87   :  { %1248 = vmatpush.bf16.msrb.mxu0 %v13087_v60  ;;  %v8731_v45 = vor.u32 %v11848_v32, %v8728_v42  ;;  %v8648_v32 = vld [vmem:[#allocation11 + $0x254] sm:$0xf0]  ;;  %v11831_v42 = vld [vmem:[#allocation11 + $0x2c8] sm:$0xf0] }
  0x88   :  { %1274 = vmatpush.bf16.msrb.mxu2 %v13184_v62  ;;  %1261 = vmatpush.bf16.msrb.mxu1 %v13126_v31  ;;  %v185_v31 = vperm.slane %v13254_v13, 0 }
  0x8b   :  { %1249 = vmatpush.bf16.msrb.mxu0 %v13104_v9 }
  0x8c   :  { %1275 = vmatpush.bf16.msrb.mxu2 %v8461_v10  ;;  %1262 = vmatpush.bf16.msrb.mxu1 %v13138_v51  ;;  %v8584_v51 = vld [vmem:[#allocation11 + $0x174] sm:$0xf0] }
  0x8f   :  { %1250 = vmatpush.bf16.msrb.mxu0 %v13122_v21  ;;  %v8603_v21 = vor.u32 %v11792_v18, %v8600_v19  ;;  %v11750_v18 = vld [vmem:[#allocation11 + $0x44] sm:$0xf] }
  0x90   :  { %1276 = vmatpush.bf16.msrb.mxu2 %v8449_v39  ;;  %1263 = vmatpush.bf16.msrb.mxu1 %v13150_v5 }
  0x91   :  { %1286 = vmatpush.bf16.msrb.mxu3 %v8603_v21  ;;  %v8504_v21 = vld [vmem:[#allocation11 + $0x5c] sm:$0xf0] }
  0x93   :  { %1251 = vmatpush.bf16.msrb.mxu0 %v13135_v41  ;;  %v11785_v41 = vld [vmem:[#allocation11 + $0x15c] sm:$0xf] }
  0x94   :  { %1277 = vmatpush.bf16.msrb.mxu2 %v8437_v35  ;;  %1264 = vmatpush.bf16.msrb.mxu1 %v13162_v28  ;;  %v11778_v28 = vld [vmem:[#allocation11 + $0x124] sm:$0xf]  ;;  %v8734_v35 = vld [vmem:[#allocation11 + $0x358] sm:$0xf] }
  0x95   :  { %v8571_v37 = vor.u32 %v11778_v28, %v8568_v30  ;;  %v11813_v28 = vld [vmem:[#allocation11 + $0x23c] sm:$0xf] }
  0x97   :  { %1252 = vmatpush.bf16.msrb.mxu0 %v13147_v59  ;;  %v8587_v59 = vor.u32 %v11785_v41, %v8584_v51  ;;  %v8702_v41 = vld [vmem:[#allocation11 + $0x2e8] sm:$0xf]  ;;  %v11838_v51 = vld [vmem:[#allocation11 + $0x300] sm:$0xf0] }
  0x98   :  { %1278 = vmatpush.bf16.msrb.mxu2 %v8425_v46  ;;  %1265 = vmatpush.bf16.msrb.mxu1 %v13176_v49  ;;  %v11771_v49 = vld [vmem:[#allocation11 + $0xec] sm:$0xf]  ;;  %v11852_v46 = vld [vmem:[#allocation11 + $0x370] sm:$0xf0] }
  0x99   :  { %1287 = vmatpush.bf16.msrb.mxu3 %v8587_v59  ;;  %v8735_v6 = vor.u32 %v11852_v46, %v8734_v35  ;;  %v187_v35 = vperm.slane %v13254_v13, 2  ;;  %v11817_v46 = vld [vmem:[#allocation11 + $0x258] sm:$0xf0] }
  0x9b   :  { %1253 = vmatpush.bf16.msrb.mxu0 %v13159_v15 }
  0x9c   :  { %1279 = vmatpush.bf16.msrb.mxu2 %v8413_v53  ;;  %1266 = vmatpush.bf16.msrb.mxu1 %v13187_v2  ;;  %v8555_v2 = vor.u32 %v11771_v49, %v8552_v52 }
  0x9d   :  { %1288 = vmatpush.bf16.msrb.mxu3 %v8571_v37  ;;  %v8686_v37 = vld [vmem:[#allocation11 + $0x2b0] sm:$0xf] }
  0x9e   :  { %v8687_v52 = vor.u32 %v11831_v42, %v8686_v37  ;;  %v8704_v37 = vld [vmem:[#allocation11 + $0x304] sm:$0xf0] }
  0x9f   :  { %1254 = vmatpush.bf16.msrb.mxu0 %v13171_v44 }
  0xa0   :  { %1280 = vmatpush.bf16.msrb.mxu2 %v8401_v1  ;;  %1267 = vmatpush.bf16.msrb.mxu1 %v13196_v12  ;;  %v11764_v12 = vld [vmem:[#allocation11 + $0xb4] sm:$0xf]  ;;  %v11827_v1 = vld [vmem:[#allocation11 + $0x2ac] sm:$0xf] }
  0xa1   :  { %1289 = vmatpush.bf16.msrb.mxu3 %v8555_v2  ;;  %v8539_v24 = vor.u32 %v11764_v12, %v8536_v22 }
  0xa2   :  { %1255 = vmatmul.bf16.vlgmr.msrb.gmra.mxu0 %v13178_v50 }
  0xa3   :  { %1281 = vmatmul.bf16.vlgmr.msrb.gmra.mxu2 %v13178_v50  ;;  %1299 = vmatpush.bf16.msra.mxu0 %v8731_v45 }
  0xa4   :  { %1325 = vmatpush.bf16.msra.mxu2 %v8735_v6 }
  0xa5   :  { %1290 = vmatpush.bf16.msrb.mxu3 %v8539_v24  ;;  %v8616_v24 = vld [vmem:[#allocation11 + $0x1e4] sm:$0xf0] }
  0xa7   :  { %1300 = vmatpush.bf16.msra.mxu0 %v8715_v8  ;;  %v11824_v8 = vld [vmem:[#allocation11 + $0x290] sm:$0xf0] }
  0xab   :  { %1301 = vmatpush.bf16.msra.mxu0 %v8699_v55  ;;  %v8654_v55 = vld [vmem:[#allocation11 + $0x240] sm:$0xf] }
  0xce   :  { %v328_v17 = vpop.f32.mrf.mxu0  ;;  %v763_v43 = vpop.f32.mrf.mxu3 }
  0xcf   :  { %v341_v29 = vpop.f32.mrf.mxu1  ;;  %v764_v34 = vadd.f32 %v763_v43, %v13249_v63  ;;  %v13261_v5 = vadd.f32 %v328_v17, %v185_v31  ;;  %v8523_v43 = vor.u32 %v11757_v40, %v8520_v20  ;;  %v11820_v31 = vld [vmem:[#allocation11 + $0x274] sm:$0xf]  ;;  %v11849_v20 = vld [vmem:[#allocation11 + $0x35c] sm:$0xf] }
  0xd0   :  { %v13266_v61 = vadd.f32 %v341_v29, %v186_v33  ;;  %v8680_v29 = vld [vmem:[#allocation11 + $0x2c4] sm:$0xf0] }
  0xd1   :  { %1291 = vmatpush.bf16.msrb.mxu3 %v8523_v43 }
  0xd4   :  { %v13244_v48 = vpop.f32.mrf.mxu2 }
  0xd6   :  { %v330_v60 = vpop.f32.mrf.mxu0  ;;  %v765_v9 = vpop.f32.mrf.mxu3 }
  0xd7   :  { %v343_v7 = vpop.f32.mrf.mxu1  ;;  %v8683_v60 = vor.u32 %v11827_v1, %v8680_v29  ;;  %v11845_v9 = vld [vmem:[#allocation11 + $0x338] sm:$0xf0]  ;;  %v8736_v1 = vld [vmem:[#allocation11 + $0x374] sm:$0xf0] }
  0xd8   :  { %v8718_v7 = vld [vmem:[#allocation11 + $0x320] sm:$0xf] }
  0xd9   :  { %v8719_v19 = vor.u32 %v11845_v9, %v8718_v7  ;;  %1302 = vmatpush.bf16.msra.mxu0 %v8683_v60  ;;  %v8739_v9 = vor.u32 %v11849_v20, %v8736_v1  ;;  %v8590_v1 = vld [vmem:[#allocation11 + $0x160] sm:$0xf] }
  0xdb   :  { %1326 = vmatpush.bf16.msra.mxu2 %v8719_v19 }
  0xdc   :  { %v356_v38 = vpop.f32.mrf.mxu2 }
  0xdd   :  { %v8664_v38 = vld [vmem:[#allocation11 + $0x28c] sm:$0xf0] }
  0xde   :  { %v8667_v59 = vor.u32 %v11820_v31, %v8664_v38  ;;  %v11810_v31 = vld [vmem:[#allocation11 + $0x220] sm:$0xf0] }
  0xdf   :  { %v776_v57 = vpop.f32.mrf.mxu0 }
  0xe0   :  { %v777_v11 = vadd.f32 %v776_v57, %v764_v34  ;;  %v789_v14 = vpop.f32.mrf.mxu1  ;;  %v8507_v34 = vor.u32 %v11750_v18, %v8504_v21  ;;  %1303 = vmatpush.bf16.msra.mxu0 %v8667_v59  ;;  %v13288_v18 = vadd.f32 %v13244_v48, %v187_v35  ;;  %v8638_v21 = vld [vmem:[#allocation11 + $0x208] sm:$0xf] }
  0xe1   :  { %v790_v36 = vadd.f32 %v789_v14, %v13259_v58  ;;  %v11743_v14 = vld [vmem:[#allocation11 + $0xc] sm:$0xf] }
  0xe2   :  { %v832_v15 = vadd.f32 %v777_v11, %v13261_v5  ;;  %v8703_v11 = vor.u32 %v11838_v51, %v8702_v41  ;;  %1292 = vmatpush.bf16.msrb.mxu3 %v8507_v34  ;;  %v11842_v34 = vld [vmem:[#allocation11 + $0x324] sm:$0xf]  ;;  %v8720_v51 = vld [vmem:[#allocation11 + $0x33c] sm:$0xf0] }
  0xe4   :  { %v8486_v44 = vmul.f32 -1.442695, %v832_v15  ;;  %v8488_v15 = vld [vmem:[#allocation11 + $0x24] sm:$0xf0]  ;;  %1327 = vmatpush.bf16.msra.mxu2 %v8703_v11 }
  0xe5   :  { %v8491_v45 = vor.u32 %v11743_v14, %v8488_v15  ;;  %v8639_v14 = vor.u32 %v11810_v31, %v8638_v21  ;;  %v8723_v15 = vor.u32 %v11842_v34, %v8720_v51  ;;  %v8574_v34 = vld [vmem:[#allocation11 + $0x128] sm:$0xf] }
  0xe6   :  { %12604 = vpow2.f32 %v8486_v44  ;;  %v8576_v51 = vld [vmem:[#allocation11 + $0x144] sm:$0xf0] }
  0xe7   :  { %v778_v0 = vpop.f32.mrf.mxu0  ;;  %1293 = vmatpush.bf16.msrb.mxu3 %v8491_v45  ;;  %v11853_v45 = vld [vmem:[#allocation11 + $0x378] sm:$0xf0] }
  0xe8   :  { %v802_v47 = vpop.f32.mrf.mxu2  ;;  %v791_v4 = vpop.f32.mrf.mxu1  ;;  %1328 = vmatpush.bf16.msra.mxu2 %v8687_v52 }
  0xe9   :  { %v803_v62 = vadd.f32 %v802_v47, %v790_v36  ;;  %v13275_v36 = vperm.slane %v13246_v56, 2  ;;  %v8651_v47 = vor.u32 %v11813_v28, %v8648_v32  ;;  %v8670_v4 = vld [vmem:[#allocation11 + $0x278] sm:$0xf]  ;;  %v8622_v28 = vld [vmem:[#allocation11 + $0x1d0] sm:$0xf] }
  0xea   :  { %v8671_v23 = vor.u32 %v11824_v8, %v8670_v4  ;;  %v11803_v32 = vld [vmem:[#allocation11 + $0x1e8] sm:$0xf0]  ;;  %v11846_v4 = vld [vmem:[#allocation11 + $0x340] sm:$0xf0] }
  0xeb   :  { %v852_v10 = vadd.f32 %v803_v62, %v13266_v61  ;;  %v8632_v62 = vld [vmem:[#allocation11 + $0x21c] sm:$0xf0]  ;;  %1304 = vmatpush.bf16.msra.mxu0 %v8651_v47 }
  0xec   :  { %v12605_v26 = vpop.eup %12604  ;;  %v815_v17 = vpop.f32.mrf.mxu3  ;;  %v8635_v22 = vor.u32 %v11806_v54, %v8632_v62  ;;  %1329 = vmatpush.bf16.msra.mxu2 %v8671_v23  ;;  %v11828_v62 = vld [vmem:[#allocation11 + $0x2b4] sm:$0xf] }
  0xed   :  { %v8487_v39 = vmul.f32 -1.442695, %v852_v10  ;;  %v13269_v27 = vadd.f32 1.0, %v12605_v26  ;;  %v816_v10 = vadd.f32 %v815_v17, %v13275_v36  ;;  %v11796_v23 = vld [vmem:[#allocation11 + $0x1b0] sm:$0xf0] }
  0xef   :  { %12606 = vpow2.f32 %v8487_v39  ;;  %v846_v2 = vand.u32 2147483647, %v13269_v27  ;;  %v848_v3 = vand.u32 2147483648, %v13269_v27  ;;  %v11799_v39 = vld [vmem:[#allocation11 + $0x1cc] sm:$0xf]  ;;  %vm842_vm1 = vweird.f32 %v13269_v27  ;;  %1305 = vmatpush.bf16.msra.mxu0 %v8635_v22 }
  0xf0   :  { %v804_v53 = vpop.f32.mrf.mxu2  ;;  %12608 = vrcp.f32 %v13269_v27  ;;  %v8619_v13 = vor.u32 %v11799_v39, %v8616_v24  ;;  %v11793_v39 = vld [vmem:[#allocation11 + $0x19c] sm:$0xf]  ;;  %v8608_v24 = vld [vmem:[#allocation11 + $0x1b4] sm:$0xf0] }
  0xf1   :  { %vm847_vm3 = vcmp.eq.f32.partialorder %v846_v2, 8.507059e+37  ;;  %v849_v40 = vor.u32 1.1754944e-38, %v848_v3  ;;  %v8726_v3 = vld [vmem:[#allocation11 + $0x328] sm:$0xf]  ;;  %v8611_v20 = vor.u32 %v11793_v39, %v8608_v24 }
  0xf2   :  { %v8727_v35 = vor.u32 %v11846_v4, %v8726_v3  ;;  %v11768_v3 = vld [vmem:[#allocation11 + $0xd0] sm:$0xf0]  ;;  %v11765_v4 = vld [vmem:[#allocation11 + $0xbc] sm:$0xf] }
  0xf3   :  { %1306 = vmatpush.bf16.msra.mxu0 %v8619_v13 }
  0xf4   :  { %v817_v49 = vpop.f32.mrf.mxu3 }
  0xf5   :  { %v12607_v57 = vpop.eup %12606  ;;  %v8623_v49 = vor.u32 %v11803_v32, %v8622_v28 }
  0xf6   :  { %v13272_v30 = vadd.f32 1.0, %v12607_v57  ;;  %v12609_v33 = vpop.eup %12608  ;;  %1307 = vmatmul.bf16.vlgmr.msra.gmra.mxu0 %v13178_v50 }
  0xf7   :  { %v838_v44 = vmul.f32 %v12609_v33, %v13269_v27  ;;  %vm843_vm0 = vweird.f32 %v12609_v33  ;;  %v8655_v27 = vor.u32 %v11817_v46, %v8654_v55  ;;  %1351 = vmatpush.bf16.msrb.mxu0 %v8739_v9  ;;  %v8672_v55 = vld [vmem:[#allocation11 + $0x294] sm:$0xf0] }
  0xf8   :  { %12610 = vrcp.f32 %v13272_v30  ;;  %vm844_vm2 = vmor %vm842_vm1, %vm843_vm0  ;;  %v868_v17 = vand.u32 2147483648, %v13272_v30  ;;  %v866_v41 = vand.u32 2147483647, %v13272_v30  ;;  %vm862_vm5 = vweird.f32 %v13272_v30  ;;  %v8694_v9 = vld [vmem:[#allocation11 + $0x2b8] sm:$0xf] }
  0xf9   :  { %v839_v0 = vsub.f32 1.0, %v838_v44  ;;  %1330 = vmatpush.bf16.msra.mxu2 %v8655_v27  ;;  %v8742_v44 = vld [vmem:[#allocation11 + $0x360] sm:$0xf] }
  0xfa   :  { %v869_v48 = vor.u32 1.1754944e-38, %v868_v17  ;;  %vm867_vm7 = vcmp.eq.f32.partialorder %v866_v41, 8.507059e+37  ;;  %v8743_v54 = vor.u32 %v11853_v45, %v8742_v44  ;;  %v11789_v17 = vld [vmem:[#allocation11 + $0x178] sm:$0xf0]  ;;  %v8656_v27 = vld [vmem:[#allocation11 + $0x25c] sm:$0xf0] }
  0xfb   :  { %v840_v12 = vmul.f32 %v12609_v33, %v839_v0  ;;  %1352 = vmatpush.bf16.msrb.mxu0 %v8723_v15  ;;  %v8688_v0 = vld [vmem:[#allocation11 + $0x2cc] sm:$0xf0]  ;;  %v8591_v21 = vor.u32 %v11789_v17, %v8590_v1  ;;  %v11779_v41 = vld [vmem:[#allocation11 + $0x12c] sm:$0xf]  ;;  %v11825_v15 = vld [vmem:[#allocation11 + $0x298] sm:$0xf0] }
  0xfc   :  { %v8579_v32 = vor.u32 %v11779_v41, %v8576_v51  ;;  %v8510_v17 = vld [vmem:[#allocation11 + $0x48] sm:$0xf] }
  0xfd   :  { %v841_v26 = vadd.f32 %v12609_v33, %v840_v12  ;;  %1331 = vmatpush.bf16.msra.mxu2 %v8639_v14  ;;  %v8678_v14 = vld [vmem:[#allocation11 + $0x280] sm:$0xf] }
  0xfe   :  { %v12611_v25 = vpop.eup %12610  ;;  %v8679_v45 = vor.u32 %v11825_v15, %v8678_v14  ;;  %v8946_v14 = vld [vmem:[#allocation11 + $0x188] sm:$0xf]  ;;  %v11906_v15 = vld [vmem:[#allocation11 + $0x1a0] sm:$0xf0] }
  0xff   :  { %v858_v6 = vmul.f32 %v12611_v25, %v13272_v30  ;;  %v828_v53 = vpop.f32.mrf.mxu0  ;;  %v845_v43 = vsel %vm844_vm2, %v12609_v33, %v841_v26  ;;  %vm863_vm4 = vweird.f32 %v12611_v25  ;;  %v11835_v33 = vld [vmem:[#allocation11 + $0x2ec] sm:$0xf]  ;;  %v11821_v26 = vld [vmem:[#allocation11 + $0x27c] sm:$0xf] }
 0x100   :  { %v829_v29 = vadd.f32 %v828_v53, %v816_v10  ;;  %v850_v7 = vsel %vm847_vm3, %v849_v40, %v845_v43  ;;  %vm13293_vm6 = vmor %vm862_vm5, %vm863_vm4  ;;  %v8707_v52 = vor.u32 %v11835_v33, %v8704_v37  ;;  %v8606_v10 = vld [vmem:[#allocation11 + $0x198] sm:$0xf]  ;;  %v11839_v53 = vld [vmem:[#allocation11 + $0x308] sm:$0xf0]  ;;  %v8675_v13 = vor.u32 %v11821_v26, %v8672_v55 }
 0x101   :  { %v859_v60 = vsub.f32 1.0, %v858_v6  ;;  %1332 = vmatpush.bf16.msra.mxu2 %v8623_v49  ;;  %v8710_v6 = vld [vmem:[#allocation11 + $0x2f0] sm:$0xf]  ;;  %v8607_v40 = vor.u32 %v11796_v23, %v8606_v10  ;;  %v8592_v43 = vld [vmem:[#allocation11 + $0x17c] sm:$0xf0] }
 0x102   :  { %v872_v19 = vmul.f32 %v850_v7, %v829_v29  ;;  %1353 = vmatpush.bf16.msrb.mxu0 %v8707_v52  ;;  %v11786_v29 = vld [vmem:[#allocation11 + $0x164] sm:$0xf]  ;;  %v8558_v33 = vld [vmem:[#allocation11 + $0xf0] sm:$0xf]  ;;  %v11775_v37 = vld [vmem:[#allocation11 + $0x108] sm:$0xf0] }
 0x103   :  { %v860_v38 = vmul.f32 %v12611_v25, %v859_v60  ;;  %v8711_v60 = vor.u32 %v11839_v53, %v8710_v6  ;;  %v11814_v7 = vld [vmem:[#allocation11 + $0x244] sm:$0xf]  ;;  %v8595_v31 = vor.u32 %v11786_v29, %v8592_v43  ;;  %v8624_v49 = vld [vmem:[#allocation11 + $0x1ec] sm:$0xf0]  ;;  %v8662_v52 = vld [vmem:[#allocation11 + $0x248] sm:$0xf] }
 0x104   :  { %v873_v57 = vadd.f32 %v872_v19, %v13288_v18  ;;  %1333 = vmatmul.bf16.vlgmr.msra.gmra.mxu2 %v13178_v50  ;;  %v11832_v19 = vld [vmem:[#allocation11 + $0x2d0] sm:$0xf0]  ;;  %v11811_v23 = vld [vmem:[#allocation11 + $0x228] sm:$0xf0]  ;;  %v11758_v26 = vld [vmem:[#allocation11 + $0x84] sm:$0xf] }
 0x105   :  { %v861_v11 = vadd.f32 %v12611_v25, %v860_v38  ;;  %1377 = vmatpush.bf16.msrb.mxu2 %v8743_v54  ;;  %v11782_v38 = vld [vmem:[#allocation11 + $0x140] sm:$0xf0]  ;;  %v8695_v59 = vor.u32 %v11832_v19, %v8694_v9  ;;  %v8528_v55 = vld [vmem:[#allocation11 + $0x9c] sm:$0xf0]  ;;  %v8630_v53 = vld [vmem:[#allocation11 + $0x1d8] sm:$0xf] }
 0x106   :  { %12612 = vtanh.f32 %v873_v57  ;;  %v8659_v57 = vor.u32 %v11814_v7, %v8656_v27  ;;  %v8575_v28 = vor.u32 %v11782_v38, %v8574_v34  ;;  %v11818_v54 = vld [vmem:[#allocation11 + $0x260] sm:$0xf0]  ;;  %v8531_v1 = vor.u32 %v11758_v26, %v8528_v55  ;;  %v11751_v43 = vld [vmem:[#allocation11 + $0x4c] sm:$0xf]  ;;  %v8494_v9 = vld [vmem:[#allocation11 + $0x10] sm:$0xf] }
 0x107   :  { %v865_v30 = vsel %vm13293_vm6, %v12611_v25, %v861_v11  ;;  %v830_v42 = vpop.f32.mrf.mxu0  ;;  %v8691_v25 = vor.u32 %v11828_v62, %v8688_v0  ;;  %v8640_v11 = vld [vmem:[#allocation11 + $0x224] sm:$0xf0]  ;;  %v8559_v62 = vor.u32 %v11775_v37, %v8558_v33  ;;  %v11754_v29 = vld [vmem:[#allocation11 + $0x60] sm:$0xf0]  ;;  %v11747_v19 = vld [vmem:[#allocation11 + $0x28] sm:$0xf0] }
 0x108   :  { %v870_v47 = vsel %vm867_vm7, %v869_v48, %v865_v30  ;;  %v11807_v48 = vld [vmem:[#allocation11 + $0x20c] sm:$0xf]  ;;  %v11772_v30 = vld [vmem:[#allocation11 + $0xf4] sm:$0xf]  ;;  %v8560_v42 = vld [vmem:[#allocation11 + $0x10c] sm:$0xf0]  ;;  %v8511_v7 = vor.u32 %v11754_v29, %v8510_v17  ;;  %v8495_v41 = vor.u32 %v11747_v19, %v8494_v9 }
 0x109   :  { %v875_v2 = vsub.f32 1.0, %v870_v47  ;;  %v877_v22 = vmul.f32 %v870_v47, %v13109_v16  ;;  %1354 = vmatpush.bf16.msrb.mxu0 %v8691_v25  ;;  %1378 = vmatpush.bf16.msrb.mxu2 %v8727_v35  ;;  %v8643_v44 = vor.u32 %v11807_v48, %v8640_v11  ;;  %v11800_v47 = vld [vmem:[#allocation11 + $0x1d4] sm:$0xf]  ;;  %v8563_v0 = vor.u32 %v11772_v30, %v8560_v42  ;;  %v8526_v25 = vld [vmem:[#allocation11 + $0x80] sm:$0xf]  ;;  %v13314_v11 = vpop.f32.mrf.mxu2 }
 0x10a   :  { %v8627_v10 = vor.u32 %v11800_v47, %v8624_v49  ;;  %v11761_v35 = vld [vmem:[#allocation11 + $0x98] sm:$0xf0]  ;;  %v8614_v34 = vld [vmem:[#allocation11 + $0x1a0] sm:$0xf]  ;;  %v11790_v48 = vld [vmem:[#allocation11 + $0x180] sm:$0xf0] }
 0x10b   :  { %v11797_v38 = vld [vmem:[#allocation11 + $0x1b8] sm:$0xf0]  ;;  %v8582_v33 = vld [vmem:[#allocation11 + $0x130] sm:$0xf]  ;;  %v11783_v37 = vld [vmem:[#allocation11 + $0x148] sm:$0xf0] }
 0x10c   :  { %v12613_v8 = vpop.eup %12612  ;;  %v8566_v30 = vld [vmem:[#allocation11 + $0xf8] sm:$0xf]  ;;  %v11776_v42 = vld [vmem:[#allocation11 + $0x110] sm:$0xf0]  ;;  %v8550_v47 = vld [vmem:[#allocation11 + $0xc0] sm:$0xf] }
 0x10d   :  { %v876_v12 = vmul.f32 %v12613_v8, %v875_v2  ;;  %1355 = vmatpush.bf16.msrb.mxu0 %v8675_v13  ;;  %1379 = vmatpush.bf16.msrb.mxu2 %v8711_v60  ;;  %v8542_v2 = vld [vmem:[#allocation11 + $0xb8] sm:$0xf]  ;;  %v8512_v13 = vld [vmem:[#allocation11 + $0x64] sm:$0xf0]  ;;  %v11769_v49 = vld [vmem:[#allocation11 + $0xd8] sm:$0xf0] }
 0x10e   :  { %v8544_v8 = vld [vmem:[#allocation11 + $0xd4] sm:$0xf0]  ;;  %v8543_v39 = vor.u32 %v11768_v3, %v8542_v2  ;;  %v8515_v27 = vor.u32 %v11751_v43, %v8512_v13  ;;  %v8518_v2 = vld [vmem:[#allocation11 + $0x50] sm:$0xf]  ;;  %v11755_v3 = vld [vmem:[#allocation11 + $0x68] sm:$0xf0] }
 0x10f   :  { %v13301_v46 = vadd.f32 %v877_v22, %v876_v12  ;;  %v8663_v12 = vor.u32 %v11818_v54, %v8662_v52  ;;  %v8646_v22 = vld [vmem:[#allocation11 + $0x210] sm:$0xf]  ;;  %v8547_v24 = vor.u32 %v11765_v4, %v8544_v8  ;;  %v8551_v52 = vor.u32 %v11769_v49, %v8550_v47  ;;  %v8534_v54 = vld [vmem:[#allocation11 + $0x88] sm:$0xf]  ;;  %v8502_v8 = vld [vmem:[#allocation11 + $0x18] sm:$0xf] }
 0x110   :  { %v8647_v6 = vor.u32 %v11811_v23, %v8646_v22  ;;  %v8519_v4 = vor.u32 %v11755_v3, %v8518_v2  ;;  %v8948_v22 = vld [vmem:[#allocation11 + $0x1a4] sm:$0xf0]  ;;  %v11896_v26 = vld [vmem:[#allocation11 + $0x154] sm:$0xf]  ;;  %v8920_v55 = vld [vmem:[#allocation11 + $0x16c] sm:$0xf0] }
 0x111   :  { %v13306_v16 = vpack.c.bf16 %v13301_v46, %v13301_v46  ;;  %1356 = vmatpush.bf16.msrb.mxu0 %v8659_v57  ;;  %1380 = vmatpush.bf16.msrb.mxu2 %v8695_v59  ;;  %v8615_v57 = vor.u32 %v11797_v38, %v8614_v34  ;;  %v8598_v59 = vld [vmem:[#allocation11 + $0x168] sm:$0xf]  ;;  %v8892_v17 = vld [vmem:[#allocation11 + $0x134] sm:$0xf0]  ;;  %v8862_v43 = vld [vmem:[#allocation11 + $0xe0] sm:$0xf] }
 0x112   :  { %v11885_v13 = vld [vmem:[#allocation11 + $0xf8] sm:$0xf0]  ;;  %v8834_v19 = vld [vmem:[#allocation11 + $0xa8] sm:$0xf]  ;;  %v11875_v34 = vld [vmem:[#allocation11 + $0xac] sm:$0xf] }
 0x113   :  { %1216 = vmatmul.bf16.vlgmr.msra.gmra.mxu1 %v13306_v16  ;;  %1242 = vmatmul.bf16.vlgmr.msra.gmra.mxu3 %v13306_v16  ;;  %v8836_v38 = vld [vmem:[#allocation11 + $0xc4] sm:$0xf0]  ;;  %v11857_v47 = vld [vmem:[#allocation11 + $0x18] sm:$0xf0]  ;;  %v8954_v2 = vld [vmem:[#allocation11 + $0x190] sm:$0xf] }
 0x114   :  { %1312 = vmatpush.bf16.msra.mxu1 %v8607_v40  ;;  %1338 = vmatpush.bf16.msra.mxu3 %v8611_v20  ;;  %v11804_v40 = vld [vmem:[#allocation11 + $0x1f0] sm:$0xf0]  ;;  %v8527_v20 = vor.u32 %v11761_v35, %v8526_v25  ;;  %v11899_v25 = vld [vmem:[#allocation11 + $0x168] sm:$0xf0] }
 0x115   :  { %1357 = vmatpush.bf16.msrb.mxu0 %v8643_v44  ;;  %1381 = vmatpush.bf16.msrb.mxu2 %v8679_v45  ;;  %v8631_v60 = vor.u32 %v11804_v40, %v8630_v53  ;;  %v1232_v44 = vpop.f32.mrf.mxu2  ;;  %v8567_v45 = vor.u32 %v11776_v42, %v8566_v30  ;;  %v8890_v53 = vld [vmem:[#allocation11 + $0x118] sm:$0xf]  ;;  %v11892_v40 = vld [vmem:[#allocation11 + $0x130] sm:$0xf0]  ;;  %v11861_v30 = vld [vmem:[#allocation11 + $0x3c] sm:$0xf] }
 0x116   :  { %v8780_v42 = vld [vmem:[#allocation11 + $0x54] sm:$0xf0] }
 0x117   :  { %v8783_v44 = vor.u32 %v11861_v30, %v8780_v42  ;;  %v8870_v30 = vld [vmem:[#allocation11 + $0xe8] sm:$0xf] }
 0x118   :  { %1313 = vmatpush.bf16.msra.mxu1 %v8591_v21  ;;  %1339 = vmatpush.bf16.msra.mxu3 %v8595_v31  ;;  %v11744_v21 = vld [vmem:[#allocation11 + $0x14] sm:$0xf]  ;;  %v8496_v31 = vld [vmem:[#allocation11 + $0x2c] sm:$0xf0] }
 0x119   :  { %1358 = vmatpush.bf16.msrb.mxu0 %v8627_v10  ;;  %1382 = vmatpush.bf16.msrb.mxu2 %v8663_v12  ;;  %v8499_v51 = vor.u32 %v11744_v21, %v8496_v31  ;;  %v11748_v10 = vld [vmem:[#allocation11 + $0x30] sm:$0xf0]  ;;  %v11903_v12 = vld [vmem:[#allocation11 + $0x18c] sm:$0xf]  ;;  %v11878_v21 = vld [vmem:[#allocation11 + $0xc0] sm:$0xf0] }
 0x11a   :  { %v8503_v23 = vor.u32 %v11748_v10, %v8502_v8  ;;  %v8835_v31 = vor.u32 %v11878_v21, %v8834_v19  ;;  %v11907_v8 = vld [vmem:[#allocation11 + $0x1a8] sm:$0xf0]  ;;  %v11904_v10 = vld [vmem:[#allocation11 + $0x194] sm:$0xf]  ;;  %v8898_v19 = vld [vmem:[#allocation11 + $0x120] sm:$0xf] }
 0x11b   :  { %v11893_v21 = vld [vmem:[#allocation11 + $0x138] sm:$0xf0] }
 0x11c   :  { %1314 = vmatpush.bf16.msra.mxu1 %v8575_v28  ;;  %1340 = vmatpush.bf16.msra.mxu3 %v8579_v32  ;;  %v8599_v28 = vor.u32 %v11790_v48, %v8598_v59  ;;  %v8947_v32 = vor.u32 %v11906_v15, %v8946_v14  ;;  %v11868_v14 = vld [vmem:[#allocation11 + $0x74] sm:$0xf]  ;;  %v8808_v15 = vld [vmem:[#allocation11 + $0x8c] sm:$0xf0] }
 0x11d   :  { %1359 = vmatmul.bf16.vlgmr.msrb.gmra.mxu0 %v13178_v50  ;;  %1383 = vmatpush.bf16.msrb.mxu2 %v8647_v6  ;;  %v8923_v6 = vor.u32 %v11896_v26, %v8920_v55 }
 0x120   :  { %1315 = vmatpush.bf16.msra.mxu1 %v8559_v62  ;;  %1341 = vmatpush.bf16.msra.mxu3 %v8563_v0  ;;  %v11762_v62 = vld [vmem:[#allocation11 + $0xa0] sm:$0xf0] }
 0x121   :  { %1384 = vmatpush.bf16.msrb.mxu2 %v8631_v60  ;;  %v8535_v0 = vor.u32 %v11762_v62, %v8534_v54  ;;  %v13319_v60 = vpop.f32.mrf.mxu0  ;;  %v11854_v62 = vld [vmem:[#allocation11 + $0x4] sm:$0xf] }
 0x123   :  { %1268 = vmatmul.bf16.vlgmr.msrb.gmra.mxu1 %v13306_v16  ;;  %1294 = vmatmul.bf16.vlgmr.msrb.gmra.mxu3 %v13306_v16 }
 0x124   :  { %1316 = vmatpush.bf16.msra.mxu1 %v8543_v39  ;;  %1342 = vmatpush.bf16.msra.mxu3 %v8547_v24  ;;  %v8951_v39 = vor.u32 %v11903_v12, %v8948_v22  ;;  %v8918_v24 = vld [vmem:[#allocation11 + $0x150] sm:$0xf] }
 0x125   :  { %1385 = vmatmul.bf16.vlgmr.msrb.gmra.mxu2 %v13178_v50  ;;  %v8583_v50 = vor.u32 %v11783_v37, %v8582_v33  ;;  %v8919_v35 = vor.u32 %v11899_v25, %v8918_v24  ;;  %v8778_v33 = vld [vmem:[#allocation11 + $0x38] sm:$0xf]  ;;  %v11864_v37 = vld [vmem:[#allocation11 + $0x50] sm:$0xf0]  ;;  %v8956_v12 = vld [vmem:[#allocation11 + $0x1ac] sm:$0xf0] }
 0x126   :  { %v8926_v25 = vld [vmem:[#allocation11 + $0x158] sm:$0xf] }
 0x128   :  { %1317 = vmatpush.bf16.msra.mxu1 %v8527_v20  ;;  %1343 = vmatpush.bf16.msra.mxu3 %v8531_v1  ;;  %v8891_v20 = vor.u32 %v11892_v40, %v8890_v53  ;;  %v11889_v1 = vld [vmem:[#allocation11 + $0x11c] sm:$0xf]  ;;  %v11962_v53 = vld [vmem:[#allocation11 + $0x360] sm:$0xf0] }
 0x129   :  { %v8895_v29 = vor.u32 %v11889_v1, %v8892_v17  ;;  %v1258_v59 = vpop.f32.mrf.mxu0  ;;  %v11897_v1 = vld [vmem:[#allocation11 + $0x15c] sm:$0xf]  ;;  %v8928_v17 = vld [vmem:[#allocation11 + $0x174] sm:$0xf0] }
 0x12c   :  { %1318 = vmatpush.bf16.msra.mxu1 %v8511_v7  ;;  %1344 = vmatpush.bf16.msra.mxu3 %v8515_v27  ;;  %v11882_v7 = vld [vmem:[#allocation11 + $0xe4] sm:$0xf]  ;;  %v8864_v27 = vld [vmem:[#allocation11 + $0xfc] sm:$0xf0] }
 0x12d   :  { %v8867_v9 = vor.u32 %v11882_v7, %v8864_v27 }
 0x130   :  { %1319 = vmatpush.bf16.msra.mxu1 %v8495_v41  ;;  %1345 = vmatpush.bf16.msra.mxu3 %v8499_v51  ;;  %v8839_v41 = vor.u32 %v11875_v34, %v8836_v38  ;;  %v8806_v51 = vld [vmem:[#allocation11 + $0x70] sm:$0xf]  ;;  %v8899_v38 = vor.u32 %v11893_v21, %v8898_v19  ;;  %v11934_v19 = vld [vmem:[#allocation11 + $0x280] sm:$0xf0]  ;;  %v11869_v21 = vld [vmem:[#allocation11 + $0x7c] sm:$0xf] }
 0x133   :  { %1320 = vmatmul.bf16.vlgmr.msra.gmra.mxu1 %v13306_v16  ;;  %1346 = vmatmul.bf16.vlgmr.msra.gmra.mxu3 %v13306_v16 }
 0x134   :  { %1364 = vmatpush.bf16.msrb.mxu1 %v8615_v57  ;;  %2215 = vmatpush.bf16.msrb.mxu3 %v8947_v32  ;;  %v11871_v57 = vld [vmem:[#allocation11 + $0x88] sm:$0xf0]  ;;  %v13321_v32 = vpop.f32.mrf.mxu2 }
 0x135   :  { %v8807_v48 = vor.u32 %v11871_v57, %v8806_v51  ;;  %v11955_v51 = vld [vmem:[#allocation11 + $0x328] sm:$0xf0] }
 0x138   :  { %1365 = vmatpush.bf16.msrb.mxu1 %v8599_v28  ;;  %2216 = vmatpush.bf16.msrb.mxu3 %v8919_v35  ;;  %v8811_v28 = vor.u32 %v11868_v14, %v8808_v15  ;;  %v11900_v35 = vld [vmem:[#allocation11 + $0x170] sm:$0xf0]  ;;  %v8900_v14 = vld [vmem:[#allocation11 + $0x13c] sm:$0xf0] }
 0x139   :  { %v8927_v55 = vor.u32 %v11900_v35, %v8926_v25  ;;  %v11952_v15 = vld [vmem:[#allocation11 + $0x314] sm:$0xf]  ;;  %v9086_v25 = vld [vmem:[#allocation11 + $0x2a0] sm:$0xf]  ;;  %v11941_v35 = vld [vmem:[#allocation11 + $0x2b8] sm:$0xf0] }
 0x13c   :  { %1366 = vmatpush.bf16.msrb.mxu1 %v8583_v50  ;;  %2217 = vmatpush.bf16.msrb.mxu3 %v8891_v20  ;;  %v8779_v50 = vor.u32 %v11864_v37, %v8778_v33  ;;  %v1284_v22 = vpop.f32.mrf.mxu2  ;;  %v9144_v37 = vld [vmem:[#allocation11 + $0x32c] sm:$0xf0] }
 0x13d   :  { %v8842_v22 = vld [vmem:[#allocation11 + $0xb0] sm:$0xf] }
 0x140   :  { %1367 = vmatpush.bf16.msrb.mxu1 %v8567_v45  ;;  %v8750_v45 = vld [vmem:[#allocation11] sm:$0xf] }
 0x141   :  { %v8751_v54 = vor.u32 %v11857_v47, %v8750_v45  ;;  %v9114_v45 = vld [vmem:[#allocation11 + $0x2d8] sm:$0xf]  ;;  %v11948_v47 = vld [vmem:[#allocation11 + $0x2f0] sm:$0xf0] }
 0x144   :  { %1368 = vmatpush.bf16.msrb.mxu1 %v8551_v52 }
 0x148   :  { %1369 = vmatpush.bf16.msrb.mxu1 %v8535_v0  ;;  %v8752_v0 = vld [vmem:[#allocation11 + $0x1c] sm:$0xf0] }
 0x14c   :  { %1370 = vmatpush.bf16.msrb.mxu1 %v8519_v4  ;;  %v8755_v4 = vor.u32 %v11854_v62, %v8752_v0  ;;  %v11883_v62 = vld [vmem:[#allocation11 + $0xec] sm:$0xf]  ;;  %v8872_v0 = vld [vmem:[#allocation11 + $0x104] sm:$0xf0] }
 0x150   :  { %1371 = vmatpush.bf16.msrb.mxu1 %v8503_v23  ;;  %v8955_v23 = vor.u32 %v11907_v8, %v8954_v2  ;;  %v11945_v2 = vld [vmem:[#allocation11 + $0x2dc] sm:$0xf]  ;;  %v9116_v8 = vld [vmem:[#allocation11 + $0x2f4] sm:$0xf0] }
 0x153   :  { %1372 = vmatmul.bf16.vlgmr.msrb.gmra.mxu1 %v13306_v16  ;;  %v8863_v16 = vor.u32 %v11885_v13, %v8862_v43 }
 0x154   :  { %2241 = vmatpush.bf16.msra.mxu1 %v8951_v39  ;;  %v8959_v39 = vor.u32 %v11904_v10, %v8956_v12  ;;  %v9119_v12 = vor.u32 %v11945_v2, %v9116_v8  ;;  %v9032_v2 = vld [vmem:[#allocation11 + $0x24c] sm:$0xf0] }
 0x155   :  { %2218 = vmatpush.bf16.msrb.mxu3 %v8863_v16  ;;  %v8931_v16 = vor.u32 %v11897_v1, %v8928_v17  ;;  %v11938_v1 = vld [vmem:[#allocation11 + $0x2a4] sm:$0xf]  ;;  %v13338_v17 = vperm.slane %v13246_v56, 3 }
 0x158   :  { %2242 = vmatpush.bf16.msra.mxu1 %v8923_v6  ;;  %v9170_v6 = vld [vmem:[#allocation11 + $0x348] sm:$0xf] }
 0x159   :  { %2219 = vmatpush.bf16.msrb.mxu3 %v8835_v31  ;;  %v9171_v20 = vor.u32 %v11962_v53, %v9170_v6 }
 0x15b   :  { %2228 = vmatpush.bf16.msra.mxu0 %v9171_v20  ;;  %v8844_v20 = vld [vmem:[#allocation11 + $0xcc] sm:$0xf0] }
 0x15c   :  { %2243 = vmatpush.bf16.msra.mxu1 %v8895_v29  ;;  %v11959_v29 = vld [vmem:[#allocation11 + $0x34c] sm:$0xf] }
 0x15d   :  { %2220 = vmatpush.bf16.msrb.mxu3 %v8807_v48  ;;  %v11890_v48 = vld [vmem:[#allocation11 + $0x124] sm:$0xf] }
 0x15e   :  { %v8903_v33 = vor.u32 %v11890_v48, %v8900_v14 }
 0x160   :  { %2244 = vmatpush.bf16.msra.mxu1 %v8867_v9 }
 0x161   :  { %2221 = vmatpush.bf16.msrb.mxu3 %v8779_v50  ;;  %v9147_v50 = vor.u32 %v11952_v15, %v9144_v37 }
 0x164   :  { %2245 = vmatpush.bf16.msra.mxu1 %v8839_v41  ;;  %v9142_v41 = vld [vmem:[#allocation11 + $0x310] sm:$0xf] }
 0x165   :  { %2222 = vmatpush.bf16.msrb.mxu3 %v8751_v54  ;;  %v9143_v59 = vor.u32 %v11955_v51, %v9142_v41  ;;  %v9115_v54 = vor.u32 %v11948_v47, %v9114_v45  ;;  %v11931_v41 = vld [vmem:[#allocation11 + $0x26c] sm:$0xf]  ;;  %v9060_v51 = vld [vmem:[#allocation11 + $0x284] sm:$0xf0]  ;;  %v8788_v47 = vld [vmem:[#allocation11 + $0x5c] sm:$0xf0] }
 0x166   :  { %v9063_v15 = vor.u32 %v11931_v41, %v9060_v51 }
 0x167   :  { %2229 = vmatpush.bf16.msra.mxu0 %v9143_v59 }
 0x168   :  { %2246 = vmatpush.bf16.msra.mxu1 %v8811_v28 }
 0x169   :  { %2267 = vmatpush.bf16.msra.mxu3 %v8955_v23  ;;  %v11879_v23 = vld [vmem:[#allocation11 + $0xc8] sm:$0xf0] }
 0x16b   :  { %2230 = vmatpush.bf16.msra.mxu0 %v9115_v54 }
 0x16c   :  { %2247 = vmatpush.bf16.msra.mxu1 %v8783_v44 }
 0x16d   :  { %2268 = vmatpush.bf16.msra.mxu3 %v8927_v55 }
 0x170   :  { %2248 = vmatpush.bf16.msra.mxu1 %v8755_v4  ;;  %v8875_v4 = vor.u32 %v11883_v62, %v8872_v0  ;;  %v11924_v0 = vld [vmem:[#allocation11 + $0x234] sm:$0xf] }
 0x171   :  { %2269 = vmatpush.bf16.msra.mxu3 %v8899_v38  ;;  %v8816_v38 = vld [vmem:[#allocation11 + $0x94] sm:$0xf0]  ;;  %v9035_v8 = vor.u32 %v11924_v0, %v9032_v2  ;;  %v11960_v0 = vld [vmem:[#allocation11 + $0x354] sm:$0xf]  ;;  %v9180_v2 = vld [vmem:[#allocation11 + $0x36c] sm:$0xf0] }
 0x172   :  { %v8819_v14 = vor.u32 %v11869_v21, %v8816_v38  ;;  %v9094_v38 = vld [vmem:[#allocation11 + $0x2a8] sm:$0xf] }
 0x173   :  { %v13323_v52 = vpop.f32.mrf.mxu0 }
 0x174   :  { %2293 = vmatpush.bf16.msrb.mxu1 %v8959_v39 }
 0x178   :  { %2294 = vmatpush.bf16.msrb.mxu1 %v8931_v16 }
 0x17b   :  { %v1310_v27 = vpop.f32.mrf.mxu0 }
 0x17c   :  { %2295 = vmatpush.bf16.msrb.mxu1 %v8903_v33  ;;  %v11865_v33 = vld [vmem:[#allocation11 + $0x58] sm:$0xf0] }
 0x180   :  { %2296 = vmatpush.bf16.msrb.mxu1 %v8875_v4 }
 0x187   :  { %v13330_v57 = vpop.f32.mrf.mxu2 }
 0x18f   :  { %v1336_v53 = vpop.f32.mrf.mxu2 }
 0x190   :  { %v1217_v49 = vpop.f32.mrf.mxu1 }
 0x191   :  { %v1218_v3 = vadd.f32 %v1217_v49, %v13249_v63 }
 0x193   :  { %v1231_v24 = vadd.f32 %v13314_v11, %v1218_v3  ;;  %v9172_v11 = vld [vmem:[#allocation11 + $0x364] sm:$0xf0] }
 0x194   :  { %v9175_v9 = vor.u32 %v11959_v29, %v9172_v11  ;;  %v11872_v11 = vld [vmem:[#allocation11 + $0x90] sm:$0xf0] }
 0x195   :  { %v1391_v26 = vrot.slane %v1231_v24, 7  ;;  %v8843_v24 = vor.u32 %v11879_v23, %v8842_v22  ;;  %v11858_v22 = vld [vmem:[#allocation11 + $0x20] sm:$0xf0] }
 0x196   :  { %v1243_v40 = vpop.f32.mrf.mxu3  ;;  %2254 = vmatpush.bf16.msra.mxu2 %v9175_v9 }
 0x197   :  { %v1393_v43 = vadd.f32 %v1391_v26, %v13261_v5  ;;  %v1244_v13 = vadd.f32 %v1243_v40, %v13259_v58  ;;  %v11876_v26 = vld [vmem:[#allocation11 + $0xb4] sm:$0xf]  ;;  %v9087_v40 = vor.u32 %v11941_v35, %v9086_v25  ;;  %v9002_v25 = vld [vmem:[#allocation11 + $0x1f8] sm:$0xf] }
 0x198   :  { %v1219_v7 = vpop.f32.mrf.mxu1  ;;  %v8847_v29 = vor.u32 %v11876_v26, %v8844_v20  ;;  %v11920_v35 = vld [vmem:[#allocation11 + $0x210] sm:$0xf0] }
 0x199   :  { %v8744_v31 = vmul.f32 -1.442695, %v1393_v43  ;;  %v1257_v34 = vadd.f32 %v13319_v60, %v1244_v13  ;;  %v11886_v60 = vld [vmem:[#allocation11 + $0x100] sm:$0xf0]  ;;  %v9088_v43 = vld [vmem:[#allocation11 + $0x2bc] sm:$0xf0]  ;;  %2231 = vmatpush.bf16.msra.mxu0 %v9087_v40  ;;  %v9003_v20 = vor.u32 %v11920_v35, %v9002_v25 }
 0x19a   :  { %v8871_v44 = vor.u32 %v11886_v60, %v8870_v30  ;;  %2255 = vmatpush.bf16.msra.mxu2 %v9147_v50  ;;  %v13335_v6 = vpop.f32.mrf.mxu0  ;;  %v8814_v13 = vld [vmem:[#allocation11 + $0x78] sm:$0xf]  ;;  %2297 = vmatpush.bf16.msrb.mxu1 %v8847_v29  ;;  %v9091_v16 = vor.u32 %v11938_v1, %v9088_v43  ;;  %v9058_v7 = vld [vmem:[#allocation11 + $0x268] sm:$0xf]  ;;  %v9030_v30 = vld [vmem:[#allocation11 + $0x230] sm:$0xf] }
 0x19b   :  { %12614 = vpow2.f32 %v8744_v31  ;;  %v1414_v28 = vrot.slane %v1257_v34, 7  ;;  %v8815_v9 = vor.u32 %v11872_v11, %v8814_v13  ;;  %v9059_v56 = vor.u32 %v11934_v19, %v9058_v7  ;;  %v11927_v60 = vld [vmem:[#allocation11 + $0x248] sm:$0xf0]  ;;  %v8760_v29 = vld [vmem:[#allocation11 + $0x24] sm:$0xf0] }
 0x19c   :  { %2270 = vmatpush.bf16.msra.mxu3 %v8871_v44  ;;  %v11855_v1 = vld [vmem:[#allocation11 + $0xc] sm:$0xf]  ;;  %v9004_v11 = vld [vmem:[#allocation11 + $0x214] sm:$0xf0]  ;;  %v11956_v25 = vld [vmem:[#allocation11 + $0x330] sm:$0xf0] }
 0x19d   :  { %v1416_v42 = vadd.f32 %v1414_v28, %v13266_v61  ;;  %v8786_v28 = vld [vmem:[#allocation11 + $0x40] sm:$0xf]  ;;  %2232 = vmatpush.bf16.msra.mxu0 %v9059_v56  ;;  %v8763_v13 = vor.u32 %v11855_v1, %v8760_v29  ;;  %v11913_v56 = vld [vmem:[#allocation11 + $0x1d8] sm:$0xf0] }
 0x19e   :  { %v1245_v49 = vpop.f32.mrf.mxu3  ;;  %2256 = vmatpush.bf16.msra.mxu2 %v9119_v12  ;;  %v8787_v50 = vor.u32 %v11865_v33, %v8786_v28  ;;  %2298 = vmatpush.bf16.msrb.mxu1 %v8819_v14  ;;  %v8758_v12 = vld [vmem:[#allocation11 + $0x8] sm:$0xf]  ;;  %v11910_v14 = vld [vmem:[#allocation11 + $0x1c4] sm:$0xf]  ;;  %v9122_v1 = vld [vmem:[#allocation11 + $0x2e0] sm:$0xf] }
 0x19f   :  { %v8745_v3 = vmul.f32 -1.442695, %v1416_v42  ;;  %v11862_v42 = vld [vmem:[#allocation11 + $0x44] sm:$0xf] }
 0x1a0   :  { %v1269_v10 = vpop.f32.mrf.mxu1  ;;  %2271 = vmatpush.bf16.msra.mxu3 %v8843_v24  ;;  %v8791_v4 = vor.u32 %v11862_v42, %v8788_v47  ;;  %v8759_v24 = vor.u32 %v11858_v22, %v8758_v12  ;;  %v11963_v47 = vld [vmem:[#allocation11 + $0x368] sm:$0xf0] }
 0x1a1   :  { %v12615_v39 = vpop.eup %12614  ;;  %12616 = vpow2.f32 %v8745_v3  ;;  %v1270_v45 = vadd.f32 %v1269_v10, %v13275_v36  ;;  %v13352_v10 = vld [vmem:[#allocation13] sm:$0xff] }
 0x1a2   :  { %v13333_v55 = vadd.f32 1.0, %v12615_v39  ;;  %2257 = vmatpush.bf16.msra.mxu2 %v9091_v16  ;;  %v1362_v49 = vpop.f32.mrf.mxu0  ;;  %v13355_v39 = vperm.slane %v13352_v10, 4  ;;  %2299 = vmatpush.bf16.msrb.mxu1 %v8791_v4  ;;  %v11917_v16 = vld [vmem:[#allocation11 + $0x1fc] sm:$0xf] }
 0x1a3   :  { %v1283_v26 = vadd.f32 %v13321_v32, %v1270_v45  ;;  %v9007_v32 = vor.u32 %v11917_v16, %v9004_v11  ;;  %v11946_v11 = vld [vmem:[#allocation11 + $0x2e4] sm:$0xf] }
 0x1a4   :  { %12618 = vrcp.f32 %v13333_v55  ;;  %2272 = vmatpush.bf16.msra.mxu3 %v8815_v9  ;;  %v1407_v3 = vand.u32 2147483647, %v13333_v55  ;;  %v1409_v53 = vand.u32 2147483648, %v13333_v55  ;;  %vm1403_vm9 = vweird.f32 %v13333_v55 }
 0x1a5   :  { %v1437_v51 = vrot.slane %v1283_v26, 7  ;;  %v11953_v26 = vld [vmem:[#allocation11 + $0x31c] sm:$0xf] }
 0x1a6   :  { %v1295_v27 = vpop.f32.mrf.mxu3  ;;  %2258 = vmatpush.bf16.msra.mxu2 %v9063_v15  ;;  %vm1408_vm11 = vcmp.eq.f32.partialorder %v1407_v3, 8.507059e+37  ;;  %v1410_v41 = vor.u32 1.1754944e-38, %v1409_v53  ;;  %2300 = vmatpush.bf16.msrb.mxu1 %v8763_v13  ;;  %v9152_v53 = vld [vmem:[#allocation11 + $0x334] sm:$0xf0] }
 0x1a7   :  { %v12617_v31 = vpop.eup %12616  ;;  %v1296_v34 = vadd.f32 %v1295_v27, %v13338_v17 }
 0x1a8   :  { %v13342_v59 = vadd.f32 1.0, %v12617_v31  ;;  %v1271_v48 = vpop.f32.mrf.mxu1  ;;  %2273 = vmatpush.bf16.msra.mxu3 %v8787_v50  ;;  %v13363_v9 = vpop.f32.mrf.mxu2  ;;  %v8976_v50 = vld [vmem:[#allocation11 + $0x1dc] sm:$0xf0] }
 0x1a9   :  { %v1309_v37 = vadd.f32 %v13323_v52, %v1296_v34  ;;  %v9031_v52 = vor.u32 %v11927_v60, %v9030_v30  ;;  %v8974_v34 = vld [vmem:[#allocation11 + $0x1c0] sm:$0xf]  ;;  %v9178_v30 = vld [vmem:[#allocation11 + $0x350] sm:$0xf]  ;;  %v8979_v45 = vor.u32 %v11910_v14, %v8976_v50  ;;  %v11908_v50 = vld [vmem:[#allocation11 + $0x1b0] sm:$0xf0] }
 0x1aa   :  { %v13345_v44 = vpop.eup %12618  ;;  %12620 = vrcp.f32 %v13342_v59  ;;  %2259 = vmatpush.bf16.msra.mxu2 %v9035_v8  ;;  %v8975_v48 = vor.u32 %v11913_v56, %v8974_v34  ;;  %vm1426_vm13 = vweird.f32 %v13342_v59  ;;  %v9150_v8 = vld [vmem:[#allocation11 + $0x318] sm:$0xf] }
 0x1ab   :  { %v1399_v54 = vmul.f32 %v13345_v44, %v13333_v55  ;;  %v8746_v62 = vmul.f32 -1.442695, %v1309_v37  ;;  %2233 = vmatpush.bf16.msra.mxu0 %v9031_v52  ;;  %vm1404_vm8 = vweird.f32 %v13345_v44  ;;  %v1432_v55 = vand.u32 2147483648, %v13342_v59 }
 0x1ac   :  { %2274 = vmatpush.bf16.msra.mxu3 %v8759_v24  ;;  %vm13372_vm10 = vmor %vm1403_vm9, %vm1404_vm8  ;;  %v9179_v52 = vor.u32 %v11963_v47, %v9178_v30  ;;  %v9183_v24 = vor.u32 %v11960_v0, %v9180_v2  ;;  %v11905_v30 = vld [vmem:[#allocation11 + $0x19c] sm:$0xf]  ;;  %v9066_v47 = vld [vmem:[#allocation11 + $0x270] sm:$0xf] }
 0x1ad   :  { %v1400_v23 = vsub.f32 1.0, %v1399_v54  ;;  %12622 = vpow2.f32 %v8746_v62  ;;  %v1433_v35 = vor.u32 1.1754944e-38, %v1432_v55  ;;  %v8962_v55 = vld [vmem:[#allocation11 + $0x198] sm:$0xf] }
 0x1ae   :  { %v1297_v40 = vpop.f32.mrf.mxu3  ;;  %2260 = vmatpush.bf16.msra.mxu2 %v9007_v32  ;;  %v8963_v0 = vor.u32 %v11908_v50, %v8962_v55 }
 0x1af   :  { %v1401_v43 = vmul.f32 %v13345_v44, %v1400_v23  ;;  %2234 = vmatpush.bf16.msra.mxu0 %v9003_v20  ;;  %v9151_v40 = vor.u32 %v11956_v25, %v9150_v8  ;;  %v9155_v20 = vor.u32 %v11953_v26, %v9152_v53  ;;  %v11928_v26 = vld [vmem:[#allocation11 + $0x250] sm:$0xf0]  ;;  %v11925_v53 = vld [vmem:[#allocation11 + $0x23c] sm:$0xf] }
 0x1b0   :  { %v13361_v7 = vpop.eup %12620  ;;  %v1321_v27 = vpop.f32.mrf.mxu1 }
 0x1b1   :  { %v1422_v19 = vmul.f32 %v13361_v7, %v13342_v59  ;;  %v1402_v21 = vadd.f32 %v13345_v44, %v1401_v43  ;;  %v1322_v31 = vadd.f32 %v1321_v27, %v13355_v39  ;;  %vm1427_vm12 = vweird.f32 %v13361_v7  ;;  %v1388_v23 = vpop.f32.mrf.mxu2  ;;  %v11949_v43 = vld [vmem:[#allocation11 + $0x2f8] sm:$0xf0]  ;;  %v9124_v27 = vld [vmem:[#allocation11 + $0x2fc] sm:$0xf0] }
 0x1b2   :  { %2261 = vmatpush.bf16.msra.mxu2 %v8979_v45  ;;  %vm13394_vm14 = vmor %vm1426_vm13, %vm1427_vm12  ;;  %v9123_v16 = vor.u32 %v11949_v43, %v9122_v1  ;;  %v9127_v56 = vor.u32 %v11946_v11, %v9124_v27  ;;  %v8936_v23 = vld [vmem:[#allocation11 + $0x17c] sm:$0xf0]  ;;  %v8906_v27 = vld [vmem:[#allocation11 + $0x128] sm:$0xf] }
 0x1b3   :  { %v12623_v15 = vpop.eup %12622  ;;  %v1423_v28 = vsub.f32 1.0, %v1422_v19  ;;  %v1406_v33 = vsel %vm13372_vm10, %v13345_v44, %v1402_v21  ;;  %v1335_v37 = vadd.f32 %v13330_v57, %v1322_v31  ;;  %2235 = vmatpush.bf16.msra.mxu0 %v8975_v48  ;;  %v1430_v44 = vand.u32 2147483647, %v13342_v59 }
 0x1b4   :  { %v1411_v60 = vsel %vm1408_vm11, %v1410_v41, %v1406_v33  ;;  %v13382_v42 = vadd.f32 1.0, %v12623_v15  ;;  %v1445_v19 = vrot.slane %v13301_v46, 7  ;;  %v11942_v41 = vld [vmem:[#allocation11 + $0x2c0] sm:$0xf0]  ;;  %v9096_v46 = vld [vmem:[#allocation11 + $0x2c4] sm:$0xf0] }
 0x1b5   :  { %v1424_v49 = vmul.f32 %v13361_v7, %v1423_v28  ;;  %v1439_v54 = vmul.f32 %v1437_v51, %v1411_v60  ;;  %v8747_v62 = vmul.f32 -1.442695, %v1335_v37  ;;  %vm1431_vm15 = vcmp.eq.f32.partialorder %v1430_v44, 8.507059e+37  ;;  %v11939_v28 = vld [vmem:[#allocation11 + $0x2ac] sm:$0xf] }
 0x1b6   :  { %12624 = vrcp.f32 %v13382_v42  ;;  %v13387_v57 = vpop.f32.mrf.mxu3  ;;  %2306 = vmatpush.bf16.msrb.mxu2 %v9183_v24  ;;  %v9095_v15 = vor.u32 %v11942_v41, %v9094_v38  ;;  %v8964_v60 = vld [vmem:[#allocation11 + $0x1b4] sm:$0xf0]  ;;  %v9099_v45 = vor.u32 %v11939_v28, %v9096_v46  ;;  %vm1458_vm1 = vweird.f32 %v13382_v42  ;;  %v9010_v38 = vld [vmem:[#allocation11 + $0x200] sm:$0xf]  ;;  %v11921_v41 = vld [vmem:[#allocation11 + $0x218] sm:$0xf0] }
 0x1b7   :  { %v1425_v3 = vadd.f32 %v13361_v7, %v1424_v49  ;;  %v1440_v4 = vadd.f32 %v1439_v54, %v13288_v18  ;;  %12626 = vpow2.f32 %v8747_v62  ;;  %2280 = vmatpush.bf16.msrb.mxu0 %v9179_v52  ;;  %v11935_v49 = vld [vmem:[#allocation11 + $0x288] sm:$0xf0]  ;;  %v11932_v62 = vld [vmem:[#allocation11 + $0x274] sm:$0xf]  ;;  %v9068_v52 = vld [vmem:[#allocation11 + $0x28c] sm:$0xf0]  ;;  %v8967_v44 = vor.u32 %v11905_v30, %v8964_v60 }
 0x1b8   :  { %v1323_v22 = vpop.f32.mrf.mxu1  ;;  %v9067_v24 = vor.u32 %v11935_v49, %v9066_v47  ;;  %v9071_v25 = vor.u32 %v11932_v62, %v9068_v52  ;;  %v9012_v28 = vld [vmem:[#allocation11 + $0x21c] sm:$0xf0]  ;;  %v8878_v30 = vld [vmem:[#allocation11 + $0xf0] sm:$0xf]  ;;  %v11887_v60 = vld [vmem:[#allocation11 + $0x108] sm:$0xf0]  ;;  %v9011_v49 = vor.u32 %v11921_v41, %v9010_v38 }
 0x1b9   :  { %v1429_v59 = vsel %vm13394_vm14, %v13361_v7, %v1425_v3  ;;  %12628 = vtanh.f32 %v1440_v4  ;;  %v8934_v3 = vld [vmem:[#allocation11 + $0x160] sm:$0xf]  ;;  %v11901_v4 = vld [vmem:[#allocation11 + $0x178] sm:$0xf0]  ;;  %v11898_v22 = vld [vmem:[#allocation11 + $0x164] sm:$0xf] }
 0x1ba   :  { %v1434_v29 = vsel %vm1431_vm15, %v1433_v35, %v1429_v59  ;;  %2307 = vmatpush.bf16.msrb.mxu2 %v9155_v20  ;;  %v9038_v59 = vld [vmem:[#allocation11 + $0x238] sm:$0xf]  ;;  %v1464_v20 = vand.u32 2147483648, %v13382_v42  ;;  %v8935_v1 = vor.u32 %v11901_v4, %v8934_v3  ;;  %v8939_v11 = vor.u32 %v11898_v22, %v8936_v23  ;;  %v11884_v47 = vld [vmem:[#allocation11 + $0xf4] sm:$0xf] }
 0x1bb   :  { %2281 = vmatpush.bf16.msrb.mxu0 %v9151_v40  ;;  %v1442_v21 = vsub.f32 1.0, %v1434_v29  ;;  %v1447_v14 = vmul.f32 %v1445_v19, %v1434_v29  ;;  %v13421_v40 = vperm.slane %v13352_v10, 5  ;;  %v9040_v29 = vld [vmem:[#allocation11 + $0x254] sm:$0xf0]  ;;  %v13429_v19 = vperm.slane %v13352_v10, 6 }
 0x1bc   :  { %v13401_v13 = vpop.eup %12624  ;;  %v1462_v10 = vand.u32 2147483647, %v13382_v42  ;;  %v1465_v50 = vor.u32 1.1754944e-38, %v1464_v20  ;;  %v8982_v62 = vld [vmem:[#allocation11 + $0x1c8] sm:$0xf]  ;;  %v8879_v3 = vor.u32 %v11887_v60, %v8878_v30 }
 0x1bd   :  { %v12627_v32 = vpop.eup %12626  ;;  %v1454_v7 = vmul.f32 %v13401_v13, %v13382_v42  ;;  %vm1459_vm0 = vweird.f32 %v13401_v13  ;;  %v8880_v42 = vld [vmem:[#allocation11 + $0x10c] sm:$0xf0]  ;;  %v11914_v52 = vld [vmem:[#allocation11 + $0x1e0] sm:$0xf0]  ;;  %v8794_v41 = vld [vmem:[#allocation11 + $0x48] sm:$0xf] }
 0x1be   :  { %v13406_v31 = vadd.f32 1.0, %v12627_v32  ;;  %v1349_v34 = vpop.f32.mrf.mxu3  ;;  %2308 = vmatpush.bf16.msrb.mxu2 %v9127_v56  ;;  %v11894_v32 = vld [vmem:[#allocation11 + $0x140] sm:$0xf0]  ;;  %v9043_v56 = vor.u32 %v11925_v53, %v9040_v29  ;;  %vm13436_vm2 = vmor %vm1458_vm1, %vm1459_vm0  ;;  %vm1463_vm3 = vcmp.eq.f32.partialorder %v1462_v10, 8.507059e+37  ;;  %v8883_v23 = vor.u32 %v11884_v47, %v8880_v42  ;;  %v8852_v53 = vld [vmem:[#allocation11 + $0xd4] sm:$0xf0] }
 0x1bf   :  { %v12629_v51 = vpop.eup %12628  ;;  %2282 = vmatpush.bf16.msrb.mxu0 %v9123_v16  ;;  %v1455_v33 = vsub.f32 1.0, %v1454_v7  ;;  %v11891_v7 = vld [vmem:[#allocation11 + $0x12c] sm:$0xf]  ;;  %v9039_v34 = vor.u32 %v11928_v26, %v9038_v59  ;;  %v11877_v26 = vld [vmem:[#allocation11 + $0xbc] sm:$0xf] }
 0x1c0   :  { %v1443_v48 = vmul.f32 %v12629_v51, %v1442_v21  ;;  %12630 = vrcp.f32 %v13406_v31  ;;  %v8908_v21 = vld [vmem:[#allocation11 + $0x144] sm:$0xf0]  ;;  %v1348_v51 = vadd.f32 %v13387_v57, %v13421_v40  ;;  %vm1477_vm5 = vweird.f32 %v13406_v31  ;;  %v11859_v30 = vld [vmem:[#allocation11 + $0x28] sm:$0xf0]  ;;  %v11856_v60 = vld [vmem:[#allocation11 + $0x14] sm:$0xf] }
 0x1c1   :  { %v1456_v2 = vmul.f32 %v13401_v13, %v1455_v33  ;;  %v8911_v57 = vor.u32 %v11891_v7, %v8908_v21  ;;  %v1481_v20 = vand.u32 2147483647, %v13406_v31  ;;  %v11873_v7 = vld [vmem:[#allocation11 + $0x98] sm:$0xf0]  ;;  %v8796_v10 = vld [vmem:[#allocation11 + $0x64] sm:$0xf0] }
 0x1c2   :  { %v13409_v37 = vadd.f32 %v1447_v14, %v1443_v48  ;;  %2309 = vmatpush.bf16.msrb.mxu2 %v9099_v45  ;;  %v8907_v14 = vor.u32 %v11894_v32, %v8906_v27  ;;  %v8855_v27 = vor.u32 %v11877_v26, %v8852_v53  ;;  %v8822_v32 = vld [vmem:[#allocation11 + $0x80] sm:$0xf]  ;;  %v11863_v48 = vld [vmem:[#allocation11 + $0x4c] sm:$0xf] }
 0x1c3   :  { %2283 = vmatpush.bf16.msrb.mxu0 %v9095_v15  ;;  %v1457_v16 = vadd.f32 %v13401_v13, %v1456_v2  ;;  %v11918_v15 = vld [vmem:[#allocation11 + $0x204] sm:$0xf]  ;;  %vm1482_vm7 = vcmp.eq.f32.partialorder %v1481_v20, 8.507059e+37  ;;  %v8970_v42 = vld [vmem:[#allocation11 + $0x1a0] sm:$0xf] }
 0x1c4   :  { %v1495_v54 = vpack.c.bf16 %v13409_v37, %v13409_v37  ;;  %v11895_v26 = vld [vmem:[#allocation11 + $0x148] sm:$0xf0]  ;;  %v11957_v20 = vld [vmem:[#allocation11 + $0x338] sm:$0xf0] }
 0x1c5   :  { %v1461_v33 = vsel %vm13436_vm2, %v13401_v13, %v1457_v16  ;;  %v1361_v13 = vadd.f32 %v13335_v6, %v1348_v51  ;;  %v8983_v6 = vor.u32 %v11914_v52, %v8982_v62  ;;  %v11866_v51 = vld [vmem:[#allocation11 + $0x60] sm:$0xf0] }
 0x1c6   :  { %v13414_v8 = vpop.eup %12630  ;;  %v13416_v12 = vshrl.u32 %v1495_v54, 16  ;;  %2310 = vmatpush.bf16.msrb.mxu2 %v9071_v25  ;;  %v9015_v54 = vor.u32 %v11918_v15, %v9012_v28  ;;  %v1466_v22 = vsel %vm1463_vm3, %v1465_v50, %v1461_v33  ;;  %v11880_v25 = vld [vmem:[#allocation11 + $0xd0] sm:$0xf0]  ;;  %v8795_v28 = vor.u32 %v11866_v51, %v8794_v41  ;;  %v11881_v41 = vld [vmem:[#allocation11 + $0xd8] sm:$0xf0] }
 0x1c7   :  { %v1473_v35 = vmul.f32 %v13414_v8, %v13406_v31  ;;  %2284 = vmatpush.bf16.msrb.mxu0 %v9067_v24  ;;  %vm1478_vm4 = vweird.f32 %v13414_v8  ;;  %v8850_v24 = vld [vmem:[#allocation11 + $0xb8] sm:$0xf]  ;;  %v8799_v50 = vor.u32 %v11863_v48, %v8796_v10  ;;  %v9102_v10 = vld [vmem:[#allocation11 + $0x2b0] sm:$0xf] }
 0x1c8   :  { %2223 = vmatmul.bf16.vlgmr.msrb.gmra.mxu3 %v13416_v12  ;;  %2249 = vmatmul.bf16.vlgmr.msra.gmra.mxu1 %v13416_v12  ;;  %vm13455_vm6 = vmor %vm1477_vm5, %vm1478_vm4 }
 0x1c9   :  { %v1474_v43 = vsub.f32 1.0, %v1473_v35  ;;  %2319 = vmatpush.bf16.msrb.mxu3 %v8963_v0  ;;  %2345 = vmatpush.bf16.msra.mxu1 %v8967_v44  ;;  %v11911_v0 = vld [vmem:[#allocation11 + $0x1cc] sm:$0xf]  ;;  %v8984_v44 = vld [vmem:[#allocation11 + $0x1e4] sm:$0xf0]  ;;  %v1483_v35 = vand.u32 2147483648, %v13406_v31 }
 0x1ca   :  { %2311 = vmatpush.bf16.msrb.mxu2 %v9043_v56  ;;  %v11870_v31 = vld [vmem:[#allocation11 + $0x84] sm:$0xf] }
 0x1cb   :  { %v1475_v46 = vmul.f32 %v13414_v8, %v1474_v43  ;;  %2285 = vmatpush.bf16.msrb.mxu0 %v9039_v34  ;;  %v1484_v21 = vor.u32 1.1754944e-38, %v1483_v35  ;;  %v8824_v34 = vld [vmem:[#allocation11 + $0x9c] sm:$0xf0] }
 0x1cc   :  { %v8827_v38 = vor.u32 %v11870_v31, %v8824_v34  ;;  %v11950_v31 = vld [vmem:[#allocation11 + $0x300] sm:$0xf0]  ;;  %v11947_v34 = vld [vmem:[#allocation11 + $0x2ec] sm:$0xf] }
 0x1cd   :  { %2320 = vmatpush.bf16.msrb.mxu3 %v8935_v1  ;;  %2346 = vmatpush.bf16.msra.mxu1 %v8939_v11  ;;  %v1476_v4 = vadd.f32 %v13414_v8, %v1475_v46  ;;  %v8851_v11 = vor.u32 %v11880_v25, %v8850_v24  ;;  %v9188_v24 = vld [vmem:[#allocation11 + $0x374] sm:$0xf0] }
 0x1ce   :  { %2312 = vmatpush.bf16.msrb.mxu2 %v9015_v54 }
 0x1cf   :  { %2286 = vmatpush.bf16.msrb.mxu0 %v9011_v49  ;;  %v1480_v43 = vsel %vm13455_vm6, %v13414_v8, %v1476_v4  ;;  %v8823_v8 = vor.u32 %v11873_v7, %v8822_v32  ;;  %v11909_v49 = vld [vmem:[#allocation11 + $0x1b8] sm:$0xf0] }
 0x1d0   :  { %v1373_v55 = vpop.f32.mrf.mxu1  ;;  %v1485_v56 = vsel %vm1482_vm7, %v1484_v21, %v1480_v43  ;;  %v9160_v43 = vld [vmem:[#allocation11 + $0x33c] sm:$0xf0]  ;;  %v9130_v21 = vld [vmem:[#allocation11 + $0x2e8] sm:$0xf] }
 0x1d1   :  { %v1374_v45 = vadd.f32 %v1373_v55, %v13429_v19  ;;  %2321 = vmatpush.bf16.msrb.mxu3 %v8907_v14  ;;  %2347 = vmatpush.bf16.msra.mxu1 %v8911_v57  ;;  %v1490_v14 = vsub.f32 1.0, %v1485_v56  ;;  %v12765_v55 = vld [vmem:[#allocation8 + $0x1] sm:$0x1]  ;;  %v8766_v57 = vld [vmem:[#allocation11 + $0x10] sm:$0xf]  ;;  %v9131_v51 = vor.u32 %v11950_v31, %v9130_v21 }
 0x1d2   :  { %v1492_v33 = vmul.f32 %v12765_v55, %v1485_v56  ;;  %v8767_v62 = vor.u32 %v11859_v30, %v8766_v57  ;;  %v9132_v56 = vld [vmem:[#allocation11 + $0x304] sm:$0xf0]  ;;  %v9074_v30 = vld [vmem:[#allocation11 + $0x278] sm:$0xf] }
 0x1d3   :  { %v1387_v2 = vadd.f32 %v13363_v9, %v1374_v45  ;;  %v8987_v9 = vor.u32 %v11911_v0, %v8984_v44  ;;  %2287 = vmatpush.bf16.msrb.mxu0 %v8983_v6  ;;  %v8768_v45 = vld [vmem:[#allocation11 + $0x2c] sm:$0xf0]  ;;  %v8971_v0 = vor.u32 %v11909_v49, %v8970_v42  ;;  %v9135_v48 = vor.u32 %v11947_v34, %v9132_v56  ;;  %v8830_v55 = vld [vmem:[#allocation11 + $0x88] sm:$0xf]  ;;  %v9076_v42 = vld [vmem:[#allocation11 + $0x294] sm:$0xf0] }
 0x1d4   :  { %v8771_v52 = vor.u32 %v11856_v60, %v8768_v45  ;;  %v11936_v60 = vld [vmem:[#allocation11 + $0x290] sm:$0xf0]  ;;  %v11933_v45 = vld [vmem:[#allocation11 + $0x27c] sm:$0xf]  ;;  %v9166_v34 = vld [vmem:[#allocation11 + $0x328] sm:$0xf] }
 0x1d5   :  { %v1487_v59 = vmul.f32 %v1466_v22, %v1387_v2  ;;  %2322 = vmatpush.bf16.msrb.mxu3 %v8879_v3  ;;  %2348 = vmatpush.bf16.msra.mxu1 %v8883_v23  ;;  %v11902_v2 = vld [vmem:[#allocation11 + $0x180] sm:$0xf0]  ;;  %v9186_v3 = vld [vmem:[#allocation11 + $0x358] sm:$0xf]  ;;  %v11964_v22 = vld [vmem:[#allocation11 + $0x370] sm:$0xf0] }
 0x1d6   :  { %2313 = vmatpush.bf16.msrb.mxu2 %v8987_v9  ;;  %v11961_v23 = vld [vmem:[#allocation11 + $0x35c] sm:$0xf]  ;;  %v9187_v53 = vor.u32 %v11964_v22, %v9186_v3  ;;  %v9158_v9 = vld [vmem:[#allocation11 + $0x320] sm:$0xf]  ;;  %v8774_v22 = vld [vmem:[#allocation11 + $0x18] sm:$0xf] }
 0x1d7   :  { %v1488_v29 = vadd.f32 %v1487_v59, %v1361_v13  ;;  %v8942_v13 = vld [vmem:[#allocation11 + $0x168] sm:$0xf]  ;;  %v8914_v59 = vld [vmem:[#allocation11 + $0x130] sm:$0xf]  ;;  %v9191_v6 = vor.u32 %v11961_v23, %v9188_v24  ;;  %v9159_v32 = vor.u32 %v11957_v20, %v9158_v9  ;;  %v9048_v3 = vld [vmem:[#allocation11 + $0x25c] sm:$0xf0] }
 0x1d8   :  { %v1375_v16 = vpop.f32.mrf.mxu1  ;;  %2275 = vmatmul.bf16.vlgmr.msra.gmra.mxu3 %v13416_v12  ;;  %2301 = vmatmul.bf16.vlgmr.msrb.gmra.mxu1 %v13416_v12  ;;  %v8943_v25 = vor.u32 %v11902_v2, %v8942_v13  ;;  %v11929_v13 = vld [vmem:[#allocation11 + $0x258] sm:$0xf0]  ;;  %v11926_v2 = vld [vmem:[#allocation11 + $0x244] sm:$0xf]  ;;  %v11860_v23 = vld [vmem:[#allocation11 + $0x30] sm:$0xf0] }
 0x1d9   :  { %12632 = vtanh.f32 %v1488_v29  ;;  %2323 = vmatpush.bf16.msrb.mxu3 %v8851_v11  ;;  %2349 = vmatpush.bf16.msra.mxu1 %v8855_v27  ;;  %v11954_v29 = vld [vmem:[#allocation11 + $0x324] sm:$0xf]  ;;  %v8915_v16 = vor.u32 %v11895_v26, %v8914_v59  ;;  %v8886_v11 = vld [vmem:[#allocation11 + $0xf8] sm:$0xf]  ;;  %v11888_v27 = vld [vmem:[#allocation11 + $0x110] sm:$0xf0] }
 0x1da   :  { %v9163_v7 = vor.u32 %v11954_v29, %v9160_v43  ;;  %v11922_v59 = vld [vmem:[#allocation11 + $0x220] sm:$0xf0]  ;;  %v11919_v26 = vld [vmem:[#allocation11 + $0x20c] sm:$0xf]  ;;  %v8990_v29 = vld [vmem:[#allocation11 + $0x1d0] sm:$0xf] }
 0x1db   :  { %v11915_v43 = vld [vmem:[#allocation11 + $0x1e8] sm:$0xf0]  ;;  %v11958_v56 = vld [vmem:[#allocation11 + $0x340] sm:$0xf0] }
 0x1dd   :  { %2324 = vmatpush.bf16.msrb.mxu3 %v8823_v8  ;;  %2350 = vmatpush.bf16.msra.mxu1 %v8827_v38  ;;  %v8887_v8 = vor.u32 %v11888_v27, %v8886_v11  ;;  %v8858_v38 = vld [vmem:[#allocation11 + $0xc0] sm:$0xf]  ;;  %v8992_v11 = vld [vmem:[#allocation11 + $0x1ec] sm:$0xf0] }
 0x1de   :  { %v9194_v27 = vld [vmem:[#allocation11 + $0x360] sm:$0xf] }
 0x1df   :  { %v12633_v15 = vpop.eup %12632 }
 0x1e0   :  { %v1491_v46 = vmul.f32 %v12633_v15, %v1490_v14  ;;  %v11943_v14 = vld [vmem:[#allocation11 + $0x2c8] sm:$0xf0]  ;;  %v11940_v15 = vld [vmem:[#allocation11 + $0x2b4] sm:$0xf] }
 0x1e1   :  { %2325 = vmatpush.bf16.msrb.mxu3 %v8795_v28  ;;  %2351 = vmatpush.bf16.msra.mxu1 %v8799_v50  ;;  %v9104_v28 = vld [vmem:[#allocation11 + $0x2cc] sm:$0xf0]  ;;  %v9103_v50 = vor.u32 %v11943_v14, %v9102_v10  ;;  %v11944_v10 = vld [vmem:[#allocation11 + $0x2d0] sm:$0xf0] }
 0x1e2   :  { %v13464_v47 = vadd.f32 %v1492_v33, %v1491_v46  ;;  %v8859_v46 = vor.u32 %v11881_v41, %v8858_v38  ;;  %v11874_v33 = vld [vmem:[#allocation11 + $0xa0] sm:$0xf0]  ;;  %v9107_v57 = vor.u32 %v11940_v15, %v9104_v28  ;;  %v9138_v38 = vld [vmem:[#allocation11 + $0x2f0] sm:$0xf]  ;;  %v11951_v41 = vld [vmem:[#allocation11 + $0x308] sm:$0xf0] }
 0x1e3   :  { %v8831_v49 = vor.u32 %v11874_v33, %v8830_v55  ;;  %v11937_v15 = vld [vmem:[#allocation11 + $0x298] sm:$0xf0]  ;;  %v11930_v55 = vld [vmem:[#allocation11 + $0x260] sm:$0xf0] }
 0x1e4   :  { %1494 = vst [vmem:[#allocation14] sm:$0x1] %v13464_v47  ;;  %v1496_v54 = vpack.c.bf16 %v13464_v47, %v13464_v47 }
 0x1e5   :  { %2326 = vmatpush.bf16.msrb.mxu3 %v8767_v62  ;;  %2352 = vmatpush.bf16.msra.mxu1 %v8771_v52  ;;  %v11867_v62 = vld [vmem:[#allocation11 + $0x68] sm:$0xf0]  ;;  %v9075_v52 = vor.u32 %v11936_v60, %v9074_v30  ;;  %v8998_v60 = vld [vmem:[#allocation11 + $0x1d8] sm:$0xf] }
 0x1e6   :  { %v1498_v44 = vunpack.c.l.b16 %v1496_v54  ;;  %v8802_v54 = vld [vmem:[#allocation11 + $0x50] sm:$0xf] }
 0x1e8   :  { %v1499_v4 = vpack.c.b16 %v1498_v44, %v1498_v44  ;;  %2327 = vmatmul.bf16.vlgmr.msrb.gmra.mxu3 %v13416_v12  ;;  %2353 = vmatmul.bf16.vlgmr.msra.gmra.mxu1 %v13416_v12  ;;  %v9046_v44 = vld [vmem:[#allocation11 + $0x240] sm:$0xf] }
 0x1e9   :  { %2371 = vmatpush.bf16.msra.mxu3 %v8971_v0  ;;  %v9079_v0 = vor.u32 %v11933_v45, %v9076_v42  ;;  %v9047_v24 = vor.u32 %v11929_v13, %v9046_v44  ;;  %v11916_v45 = vld [vmem:[#allocation11 + $0x1f0] sm:$0xf0] }
 0x1ea   :  { %v1501_v35 = vshll.u32 %v1499_v4, 16  ;;  %v8803_v4 = vor.u32 %v11867_v62, %v8802_v54  ;;  %v8999_v42 = vor.u32 %v11916_v45, %v8998_v60  ;;  %v12018_v54 = vld [vmem:[#allocation11 + $0x1a0] sm:$0xf0]  ;;  %v12015_v62 = vld [vmem:[#allocation11 + $0x18c] sm:$0xf] }
 0x1eb   :  { %v9202_v45 = vld [vmem:[#allocation11] sm:$0xf] }
 0x1ec   :  { %v13471_v1 = vshrl.u32 %v1501_v35, 16  ;;  %v9018_v35 = vld [vmem:[#allocation11 + $0x208] sm:$0xf] }
 0x1ed   :  { %2372 = vmatpush.bf16.msra.mxu3 %v8943_v25  ;;  %v9051_v25 = vor.u32 %v11926_v2, %v9048_v3  ;;  %v9019_v9 = vor.u32 %v11922_v59, %v9018_v35  ;;  %v9370_v3 = vld [vmem:[#allocation11 + $0x150] sm:$0xf]  ;;  %v12004_v59 = vld [vmem:[#allocation11 + $0x130] sm:$0xf0] }
 0x1ee   :  { %2236 = vmatmul.bf16.vlgmr.msra.gmra.mxu0 %v13471_v1  ;;  %2262 = vmatmul.bf16.vlgmr.msra.gmra.mxu2 %v13471_v1 }
 0x1ef   :  { %2332 = vmatpush.bf16.msra.mxu0 %v9187_v53  ;;  %2358 = vmatpush.bf16.msra.mxu2 %v9191_v6  ;;  %v9020_v53 = vld [vmem:[#allocation11 + $0x224] sm:$0xf0]  ;;  %v8775_v6 = vor.u32 %v11860_v23, %v8774_v22 }
 0x1f0   :  { %v9023_v20 = vor.u32 %v11919_v26, %v9020_v53  ;;  %v12001_v53 = vld [vmem:[#allocation11 + $0x11c] sm:$0xf] }
 0x1f1   :  { %2373 = vmatpush.bf16.msra.mxu3 %v8915_v16  ;;  %v11912_v16 = vld [vmem:[#allocation11 + $0x1d4] sm:$0xf] }
 0x1f2   :  { %v8995_v21 = vor.u32 %v11912_v16, %v8992_v11 }
 0x1f3   :  { %2333 = vmatpush.bf16.msra.mxu0 %v9159_v32  ;;  %2359 = vmatpush.bf16.msra.mxu2 %v9163_v7  ;;  %v11965_v32 = vld [vmem:[#allocation11 + $0x378] sm:$0xf0]  ;;  %v8991_v7 = vor.u32 %v11915_v43, %v8990_v29  ;;  %v9314_v29 = vld [vmem:[#allocation11 + $0xe0] sm:$0xf] }
 0x1f4   :  { %v9195_v31 = vor.u32 %v11965_v32, %v9194_v27  ;;  %v11997_v43 = vld [vmem:[#allocation11 + $0xf8] sm:$0xf0]  ;;  %v11994_v27 = vld [vmem:[#allocation11 + $0xe4] sm:$0xf]  ;;  %v9316_v32 = vld [vmem:[#allocation11 + $0xfc] sm:$0xf0] }
 0x1f5   :  { %2374 = vmatpush.bf16.msra.mxu3 %v8887_v8  ;;  %v9167_v8 = vor.u32 %v11958_v56, %v9166_v34  ;;  %v9315_v11 = vor.u32 %v11997_v43, %v9314_v29  ;;  %v11987_v56 = vld [vmem:[#allocation11 + $0xac] sm:$0xf] }
 0x1f7   :  { %2334 = vmatpush.bf16.msra.mxu0 %v9131_v51  ;;  %2360 = vmatpush.bf16.msra.mxu2 %v9135_v48  ;;  %v9139_v51 = vor.u32 %v11951_v41, %v9138_v38  ;;  %v9110_v48 = vld [vmem:[#allocation11 + $0x2b8] sm:$0xf] }
 0x1f8   :  { %v9111_v14 = vor.u32 %v11944_v10, %v9110_v48  ;;  %v11983_v48 = vld [vmem:[#allocation11 + $0x88] sm:$0xf0] }
 0x1f9   :  { %2375 = vmatpush.bf16.msra.mxu3 %v8859_v46  ;;  %v9054_v46 = vld [vmem:[#allocation11 + $0x248] sm:$0xf] }
 0x1fa   :  { %v9055_v33 = vor.u32 %v11930_v55, %v9054_v46  ;;  %v9230_v46 = vld [vmem:[#allocation11 + $0x38] sm:$0xf]  ;;  %v11976_v55 = vld [vmem:[#allocation11 + $0x50] sm:$0xf0] }
 0x1fb   :  { %2335 = vmatpush.bf16.msra.mxu0 %v9103_v50  ;;  %2361 = vmatpush.bf16.msra.mxu2 %v9107_v57  ;;  %v9026_v50 = vld [vmem:[#allocation11 + $0x210] sm:$0xf]  ;;  %v11923_v57 = vld [vmem:[#allocation11 + $0x228] sm:$0xf0] }
 0x1fc   :  { %v9027_v30 = vor.u32 %v11923_v57, %v9026_v50  ;;  %v11973_v50 = vld [vmem:[#allocation11 + $0x3c] sm:$0xf]  ;;  %v9232_v57 = vld [vmem:[#allocation11 + $0x54] sm:$0xf0] }
 0x1fd   :  { %2376 = vmatpush.bf16.msra.mxu3 %v8831_v49  ;;  %v9398_v49 = vld [vmem:[#allocation11 + $0x188] sm:$0xf] }
 0x1fe   :  { %2288 = vmatmul.bf16.vlgmr.msrb.gmra.mxu0 %v13471_v1  ;;  %2314 = vmatmul.bf16.vlgmr.msrb.gmra.mxu2 %v13471_v1 }
 0x1ff   :  { %2336 = vmatpush.bf16.msra.mxu0 %v9075_v52  ;;  %2362 = vmatpush.bf16.msra.mxu2 %v9079_v0  ;;  %v9399_v52 = vor.u32 %v12018_v54, %v9398_v49  ;;  %v9400_v0 = vld [vmem:[#allocation11 + $0x1a4] sm:$0xf0] }
 0x200   :  { %v9403_v13 = vor.u32 %v12015_v62, %v9400_v0  ;;  %v11966_v62 = vld [vmem:[#allocation11 + $0x4] sm:$0xf]  ;;  %v9406_v0 = vld [vmem:[#allocation11 + $0x190] sm:$0xf] }
 0x201   :  { %2377 = vmatpush.bf16.msra.mxu3 %v8803_v4  ;;  %3217 = vmatpush.bf16.msrb.mxu1 %v9399_v52  ;;  %v12011_v4 = vld [vmem:[#allocation11 + $0x168] sm:$0xf0]  ;;  %v9204_v52 = vld [vmem:[#allocation11 + $0x1c] sm:$0xf0] }
 0x202   :  { %v9371_v23 = vor.u32 %v12011_v4, %v9370_v3  ;;  %v12019_v3 = vld [vmem:[#allocation11 + $0x1a8] sm:$0xf0]  ;;  %v12016_v4 = vld [vmem:[#allocation11 + $0x194] sm:$0xf] }
 0x203   :  { %2337 = vmatpush.bf16.msra.mxu0 %v9047_v24  ;;  %2363 = vmatpush.bf16.msra.mxu2 %v9051_v25  ;;  %v12008_v24 = vld [vmem:[#allocation11 + $0x154] sm:$0xf]  ;;  %v9372_v25 = vld [vmem:[#allocation11 + $0x16c] sm:$0xf0] }
 0x204   :  { %v9375_v35 = vor.u32 %v12008_v24, %v9372_v25  ;;  %v9407_v24 = vor.u32 %v12019_v3, %v9406_v0  ;;  %v11995_v0 = vld [vmem:[#allocation11 + $0xec] sm:$0xf] }
 0x205   :  { %2378 = vmatpush.bf16.msra.mxu3 %v8775_v6  ;;  %3218 = vmatpush.bf16.msrb.mxu1 %v9371_v23  ;;  %v9344_v6 = vld [vmem:[#allocation11 + $0x134] sm:$0xf0] }
 0x207   :  { %2338 = vmatpush.bf16.msra.mxu0 %v9019_v9  ;;  %2364 = vmatpush.bf16.msra.mxu2 %v9023_v20  ;;  %v9347_v9 = vor.u32 %v12001_v53, %v9344_v6  ;;  %v9622_v6 = vld [vmem:[#allocation11 + $0x348] sm:$0xf] }
 0x208   :  { %2379 = vmatmul.bf16.vlgmr.msra.gmra.mxu3 %v13416_v12  ;;  %v9082_v12 = vld [vmem:[#allocation11 + $0x280] sm:$0xf] }
 0x209   :  { %v9083_v28 = vor.u32 %v11937_v15, %v9082_v12  ;;  %3243 = vmatpush.bf16.msrb.mxu3 %v9403_v13  ;;  %v11980_v12 = vld [vmem:[#allocation11 + $0x74] sm:$0xf]  ;;  %v9260_v15 = vld [vmem:[#allocation11 + $0x8c] sm:$0xf0]  ;;  %v9207_v13 = vor.u32 %v11966_v62, %v9204_v52  ;;  %v9566_v62 = vld [vmem:[#allocation11 + $0x2d8] sm:$0xf] }
 0x20a   :  { %v12060_v52 = vld [vmem:[#allocation11 + $0x2f0] sm:$0xf0] }
 0x20b   :  { %2339 = vmatpush.bf16.msra.mxu0 %v8991_v7  ;;  %2365 = vmatpush.bf16.msra.mxu2 %v8995_v21  ;;  %v9319_v7 = vor.u32 %v11994_v27, %v9316_v32  ;;  %v9286_v21 = vld [vmem:[#allocation11 + $0xa8] sm:$0xf]  ;;  %v9380_v27 = vld [vmem:[#allocation11 + $0x174] sm:$0xf0] }
 0x20d   :  { %3244 = vmatpush.bf16.msrb.mxu3 %v9375_v35 }
 0x20e   :  { %2340 = vmatmul.bf16.vlgmr.msra.gmra.mxu0 %v13471_v1  ;;  %2366 = vmatmul.bf16.vlgmr.msra.gmra.mxu2 %v13471_v1 }
 0x20f   :  { %2384 = vmatpush.bf16.msrb.mxu0 %v9195_v31  ;;  %v11990_v31 = vld [vmem:[#allocation11 + $0xc0] sm:$0xf0] }
 0x210   :  { %v9287_v34 = vor.u32 %v11990_v31, %v9286_v21 }
 0x211   :  { %3245 = vmatpush.bf16.msrb.mxu3 %v9347_v9  ;;  %v12074_v9 = vld [vmem:[#allocation11 + $0x360] sm:$0xf0] }
 0x213   :  { %2385 = vmatpush.bf16.msrb.mxu0 %v9167_v8  ;;  %v9288_v8 = vld [vmem:[#allocation11 + $0xc4] sm:$0xf0] }
 0x214   :  { %v9291_v38 = vor.u32 %v11987_v56, %v9288_v8  ;;  %v9350_v8 = vld [vmem:[#allocation11 + $0x120] sm:$0xf] }
 0x215   :  { %3246 = vmatpush.bf16.msrb.mxu3 %v9319_v7  ;;  %v9624_v7 = vld [vmem:[#allocation11 + $0x364] sm:$0xf0] }
 0x217   :  { %2386 = vmatpush.bf16.msrb.mxu0 %v9139_v51  ;;  %v9258_v51 = vld [vmem:[#allocation11 + $0x70] sm:$0xf] }
 0x219   :  { %3247 = vmatpush.bf16.msrb.mxu3 %v9291_v38  ;;  %v12005_v38 = vld [vmem:[#allocation11 + $0x138] sm:$0xf0] }
 0x21b   :  { %2387 = vmatpush.bf16.msrb.mxu0 %v9111_v14  ;;  %v9259_v14 = vor.u32 %v11983_v48, %v9258_v51  ;;  %v9351_v48 = vor.u32 %v12005_v38, %v9350_v8  ;;  %v9266_v8 = vld [vmem:[#allocation11 + $0x78] sm:$0xf]  ;;  %v11984_v38 = vld [vmem:[#allocation11 + $0x90] sm:$0xf0] }
 0x21f   :  { %2388 = vmatpush.bf16.msrb.mxu0 %v9083_v28  ;;  %v9263_v28 = vor.u32 %v11980_v12, %v9260_v15  ;;  %v12002_v12 = vld [vmem:[#allocation11 + $0x124] sm:$0xf] }
 0x221   :  { %3248 = vmatpush.bf16.msrb.mxu3 %v9263_v28 }
 0x223   :  { %2389 = vmatpush.bf16.msrb.mxu0 %v9055_v33  ;;  %v9231_v33 = vor.u32 %v11976_v55, %v9230_v46  ;;  %v9352_v55 = vld [vmem:[#allocation11 + $0x13c] sm:$0xf0] }
 0x227   :  { %2390 = vmatpush.bf16.msrb.mxu0 %v9027_v30  ;;  %v9235_v30 = vor.u32 %v11973_v50, %v9232_v57  ;;  %v9355_v50 = vor.u32 %v12002_v12, %v9352_v55  ;;  %v9596_v57 = vld [vmem:[#allocation11 + $0x32c] sm:$0xf0] }
 0x229   :  { %3249 = vmatpush.bf16.msrb.mxu3 %v9235_v30 }
 0x22b   :  { %2391 = vmatpush.bf16.msrb.mxu0 %v8999_v42  ;;  %v11969_v42 = vld [vmem:[#allocation11 + $0x18] sm:$0xf0] }
 0x22c   :  { %v9203_v54 = vor.u32 %v11969_v42, %v9202_v45  ;;  %v9322_v45 = vld [vmem:[#allocation11 + $0xe8] sm:$0xf]  ;;  %v11998_v42 = vld [vmem:[#allocation11 + $0x100] sm:$0xf0] }
 0x22d   :  { %3250 = vmatpush.bf16.msrb.mxu3 %v9207_v13 }
 0x22e   :  { %2392 = vmatmul.bf16.vlgmr.msrb.gmra.mxu0 %v13471_v1  ;;  %v9342_v1 = vld [vmem:[#allocation11 + $0x118] sm:$0xf] }
 0x22f   :  { %v9343_v26 = vor.u32 %v12004_v59, %v9342_v1  ;;  %v9378_v59 = vld [vmem:[#allocation11 + $0x158] sm:$0xf] }
 0x231   :  { %3219 = vmatpush.bf16.msrb.mxu1 %v9343_v26  ;;  %v12012_v26 = vld [vmem:[#allocation11 + $0x170] sm:$0xf0] }
 0x232   :  { %v9379_v53 = vor.u32 %v12012_v26, %v9378_v59  ;;  %v9294_v59 = vld [vmem:[#allocation11 + $0xb0] sm:$0xf]  ;;  %v11991_v26 = vld [vmem:[#allocation11 + $0xc8] sm:$0xf0] }
 0x235   :  { %3220 = vmatpush.bf16.msrb.mxu1 %v9315_v11  ;;  %v9623_v11 = vor.u32 %v12074_v9, %v9622_v6  ;;  %v9295_v6 = vor.u32 %v11991_v26, %v9294_v59  ;;  %v9538_v9 = vld [vmem:[#allocation11 + $0x2a0] sm:$0xf]  ;;  %v9210_v59 = vld [vmem:[#allocation11 + $0x8] sm:$0xf]  ;;  %v11970_v26 = vld [vmem:[#allocation11 + $0x20] sm:$0xf0] }
 0x237   :  { %3230 = vmatpush.bf16.msrb.mxu2 %v9623_v11 }
 0x239   :  { %3221 = vmatpush.bf16.msrb.mxu1 %v9287_v34 }
 0x23d   :  { %3222 = vmatpush.bf16.msrb.mxu1 %v9259_v14  ;;  %v12067_v14 = vld [vmem:[#allocation11 + $0x328] sm:$0xf0] }
 0x241   :  { %3223 = vmatpush.bf16.msrb.mxu1 %v9231_v33 }
 0x245   :  { %v13481_v44 = vpop.f32.mrf.mxu1  ;;  %3224 = vmatpush.bf16.msrb.mxu1 %v9203_v54  ;;  %v9323_v54 = vor.u32 %v11998_v42, %v9322_v45 }
 0x246   :  { %v2251_v21 = vadd.f32 %v13481_v44, %v13259_v58  ;;  %v12064_v44 = vld [vmem:[#allocation11 + $0x314] sm:$0xf] }
 0x249   :  { %3269 = vmatpush.bf16.msra.mxu1 %v9407_v24  ;;  %v9568_v24 = vld [vmem:[#allocation11 + $0x2f4] sm:$0xf0] }
 0x24b   :  { %v13483_v2 = vpop.f32.mrf.mxu3 }
 0x24c   :  { %v2225_v23 = vadd.f32 %v13483_v2, %v13249_v63  ;;  %v12071_v2 = vld [vmem:[#allocation11 + $0x34c] sm:$0xf] }
 0x24d   :  { %v2252_v22 = vpop.f32.mrf.mxu1  ;;  %3270 = vmatpush.bf16.msra.mxu1 %v9379_v53  ;;  %v9627_v56 = vor.u32 %v12071_v2, %v9624_v7  ;;  %v9296_v2 = vld [vmem:[#allocation11 + $0xcc] sm:$0xf0]  ;;  %v9540_v7 = vld [vmem:[#allocation11 + $0x2bc] sm:$0xf0] }
 0x24e   :  { %v9408_v22 = vld [vmem:[#allocation11 + $0x1ac] sm:$0xf0] }
 0x24f   :  { %v9411_v25 = vor.u32 %v12016_v4, %v9408_v22  ;;  %3256 = vmatpush.bf16.msra.mxu0 %v9627_v56  ;;  %v9567_v4 = vor.u32 %v12060_v52, %v9566_v62  ;;  %v9324_v22 = vld [vmem:[#allocation11 + $0x104] sm:$0xf0]  ;;  %v12039_v62 = vld [vmem:[#allocation11 + $0x248] sm:$0xf0] }
 0x251   :  { %3295 = vmatpush.bf16.msra.mxu3 %v9411_v25  ;;  %3271 = vmatpush.bf16.msra.mxu1 %v9351_v48  ;;  %v9327_v25 = vor.u32 %v11995_v0, %v9324_v22  ;;  %v9267_v48 = vor.u32 %v11984_v38, %v9266_v8  ;;  %v9456_v38 = vld [vmem:[#allocation11 + $0x214] sm:$0xf0] }
 0x253   :  { %v2226_v20 = vpop.f32.mrf.mxu3 }
 0x254   :  { %v12009_v20 = vld [vmem:[#allocation11 + $0x15c] sm:$0xf] }
 0x255   :  { %v13485_v16 = vpop.f32.mrf.mxu1  ;;  %v9383_v32 = vor.u32 %v12009_v20, %v9380_v27  ;;  %3272 = vmatpush.bf16.msra.mxu1 %v9323_v54  ;;  %v12053_v20 = vld [vmem:[#allocation11 + $0x2b8] sm:$0xf0]  ;;  %v9482_v54 = vld [vmem:[#allocation11 + $0x230] sm:$0xf] }
 0x256   :  { %v9539_v27 = vor.u32 %v12053_v20, %v9538_v9  ;;  %v2303_v55 = vadd.f32 %v13485_v16, %v13338_v17  ;;  %v9483_v0 = vor.u32 %v12039_v62, %v9482_v54  ;;  %v9454_v9 = vld [vmem:[#allocation11 + $0x1f8] sm:$0xf]  ;;  %v12032_v20 = vld [vmem:[#allocation11 + $0x210] sm:$0xf0] }
 0x257   :  { %3296 = vmatpush.bf16.msra.mxu3 %v9383_v32  ;;  %v12050_v32 = vld [vmem:[#allocation11 + $0x2a4] sm:$0xf] }
 0x258   :  { %v9543_v56 = vor.u32 %v12050_v32, %v9540_v7 }
 0x259   :  { %3273 = vmatpush.bf16.msra.mxu1 %v9295_v6  ;;  %v9211_v6 = vor.u32 %v11970_v26, %v9210_v59 }
 0x25b   :  { %v13487_v41 = vpop.f32.mrf.mxu3  ;;  %3297 = vmatpush.bf16.msra.mxu3 %v9355_v50  ;;  %v9238_v50 = vld [vmem:[#allocation11 + $0x40] sm:$0xf] }
 0x25d   :  { %v2304_v10 = vpop.f32.mrf.mxu1  ;;  %3274 = vmatpush.bf16.msra.mxu1 %v9267_v48 }
 0x25e   :  { %v9594_v10 = vld [vmem:[#allocation11 + $0x310] sm:$0xf] }
 0x25f   :  { %v9595_v46 = vor.u32 %v12067_v14, %v9594_v10  ;;  %3298 = vmatpush.bf16.msra.mxu3 %v9327_v25  ;;  %v12046_v10 = vld [vmem:[#allocation11 + $0x280] sm:$0xf0]  ;;  %v11981_v14 = vld [vmem:[#allocation11 + $0x7c] sm:$0xf] }
 0x261   :  { %3231 = vmatpush.bf16.msrb.mxu2 %v9595_v46 }
 0x263   :  { %v2278_v60 = vpop.f32.mrf.mxu3 }
 0x264   :  { %v9599_v60 = vor.u32 %v12064_v44, %v9596_v57  ;;  %v11977_v57 = vld [vmem:[#allocation11 + $0x58] sm:$0xf0] }
 0x265   :  { %v13489_v49 = vpop.f32.mrf.mxu1  ;;  %3232 = vmatpush.bf16.msrb.mxu2 %v9567_v4  ;;  %v9239_v42 = vor.u32 %v11977_v57, %v9238_v50  ;;  %v12036_v4 = vld [vmem:[#allocation11 + $0x234] sm:$0xf] }
 0x266   :  { %3257 = vmatpush.bf16.msra.mxu0 %v9599_v60 }
 0x267   :  { %3275 = vmatpush.bf16.msra.mxu1 %v9239_v42  ;;  %v12075_v42 = vld [vmem:[#allocation11 + $0x368] sm:$0xf0] }
 0x269   :  { %3233 = vmatpush.bf16.msrb.mxu2 %v9539_v27  ;;  %v9455_v27 = vor.u32 %v12032_v20, %v9454_v9  ;;  %v12068_v9 = vld [vmem:[#allocation11 + $0x330] sm:$0xf0]  ;;  %v12010_v20 = vld [vmem:[#allocation11 + $0x164] sm:$0xf] }
 0x26b   :  { %v2237_v35 = vpop.f32.mrf.mxu0  ;;  %v13493_v43 = vpop.f32.mrf.mxu3  ;;  %3276 = vmatpush.bf16.msra.mxu1 %v9211_v6 }
 0x26c   :  { %v2238_v1 = vadd.f32 %v2237_v35, %v2225_v23  ;;  %v12057_v23 = vld [vmem:[#allocation11 + $0x2dc] sm:$0xf] }
 0x26d   :  { %v2356_v34 = vpop.f32.mrf.mxu1  ;;  %v9571_v35 = vor.u32 %v12057_v23, %v9568_v24  ;;  %v9484_v23 = vld [vmem:[#allocation11 + $0x24c] sm:$0xf0]  ;;  %v2277_v24 = vadd.f32 %v13487_v41, %v13275_v36  ;;  %v9212_v41 = vld [vmem:[#allocation11 + $0x24] sm:$0xf0] }
 0x26e   :  { %v2398_v29 = vrot.slane %v2238_v1, 6 }
 0x26f   :  { %3258 = vmatpush.bf16.msra.mxu0 %v9571_v35 }
 0x270   :  { %v2400_v31 = vadd.f32 %v2398_v29, %v13261_v5  ;;  %v11988_v29 = vld [vmem:[#allocation11 + $0xb4] sm:$0xf] }
 0x271   :  { %v2263_v51 = vpop.f32.mrf.mxu2  ;;  %v9299_v34 = vor.u32 %v11988_v29, %v9296_v2  ;;  %v11967_v2 = vld [vmem:[#allocation11 + $0xc] sm:$0xf] }
 0x272   :  { %v9196_v15 = vmul.f32 -1.442695, %v2400_v31  ;;  %v2264_v28 = vadd.f32 %v2263_v51, %v2251_v21  ;;  %v9510_v51 = vld [vmem:[#allocation11 + $0x268] sm:$0xf] }
 0x273   :  { %v2239_v33 = vpop.f32.mrf.mxu0  ;;  %v2330_v3 = vpop.f32.mrf.mxu3  ;;  %3299 = vmatpush.bf16.msra.mxu3 %v9299_v34  ;;  %3259 = vmatpush.bf16.msra.mxu0 %v9543_v56  ;;  %v9511_v12 = vor.u32 %v12046_v10, %v9510_v51  ;;  %v9215_v34 = vor.u32 %v11967_v2, %v9212_v41  ;;  %v12029_v56 = vld [vmem:[#allocation11 + $0x1fc] sm:$0xf]  ;;  %v2329_v51 = vadd.f32 %v13493_v43, %v13355_v39  ;;  %v9604_v2 = vld [vmem:[#allocation11 + $0x334] sm:$0xf0] }
 0x274   :  { %12634 = vpow2.f32 %v9196_v15  ;;  %v2421_v30 = vrot.slane %v2264_v28, 6  ;;  %v9268_v15 = vld [vmem:[#allocation11 + $0x94] sm:$0xf0]  ;;  %v12043_v28 = vld [vmem:[#allocation11 + $0x26c] sm:$0xf]  ;;  %v9459_v10 = vor.u32 %v12029_v56, %v9456_v38 }
 0x275   :  { %v9271_v44 = vor.u32 %v11981_v14, %v9268_v15  ;;  %v9512_v33 = vld [vmem:[#allocation11 + $0x284] sm:$0xf0]  ;;  %3234 = vmatpush.bf16.msrb.mxu2 %v9511_v12  ;;  %v9240_v3 = vld [vmem:[#allocation11 + $0x5c] sm:$0xf0]  ;;  %v12025_v12 = vld [vmem:[#allocation11 + $0x1d8] sm:$0xf0] }
 0x276   :  { %v2423_v13 = vadd.f32 %v2421_v30, %v13266_v61  ;;  %v9515_v45 = vor.u32 %v12043_v28, %v9512_v33  ;;  %v9426_v14 = vld [vmem:[#allocation11 + $0x1c0] sm:$0xf] }
 0x277   :  { %3300 = vmatpush.bf16.msra.mxu3 %v9271_v44  ;;  %v12022_v44 = vld [vmem:[#allocation11 + $0x1c4] sm:$0xf]  ;;  %v9428_v33 = vld [vmem:[#allocation11 + $0x1dc] sm:$0xf0] }
 0x278   :  { %v9197_v1 = vmul.f32 -1.442695, %v2423_v13  ;;  %v11974_v13 = vld [vmem:[#allocation11 + $0x44] sm:$0xf]  ;;  %3260 = vmatpush.bf16.msra.mxu0 %v9515_v45  ;;  %v9630_v45 = vld [vmem:[#allocation11 + $0x350] sm:$0xf] }
 0x279   :  { %v2265_v53 = vpop.f32.mrf.mxu2  ;;  %3235 = vmatpush.bf16.msrb.mxu2 %v9483_v0 }
 0x27a   :  { %v12635_v11 = vpop.eup %12634  ;;  %12636 = vpow2.f32 %v9197_v1  ;;  %v9243_v1 = vor.u32 %v11974_v13, %v9240_v3  ;;  %v9487_v53 = vor.u32 %v12036_v4, %v9484_v23  ;;  %v12072_v23 = vld [vmem:[#allocation11 + $0x354] sm:$0xf] }
 0x27b   :  { %v13499_v21 = vadd.f32 1.0, %v12635_v11  ;;  %v2289_v31 = vpop.f32.mrf.mxu0 }
 0x27c   :  { %v2290_v29 = vadd.f32 %v2289_v31, %v2277_v24  ;;  %3301 = vmatpush.bf16.msra.mxu3 %v9243_v1  ;;  %3261 = vmatpush.bf16.msra.mxu0 %v9487_v53  ;;  %v9632_v24 = vld [vmem:[#allocation11 + $0x36c] sm:$0xf0] }
 0x27d   :  { %12638 = vrcp.f32 %v13499_v21  ;;  %v2414_v32 = vand.u32 2147483647, %v13499_v21  ;;  %v2416_v7 = vand.u32 2147483648, %v13499_v21  ;;  %vm2410_vm9 = vweird.f32 %v13499_v21  ;;  %3236 = vmatpush.bf16.msrb.mxu2 %v9455_v27  ;;  %v12065_v27 = vld [vmem:[#allocation11 + $0x31c] sm:$0xf] }
 0x27e   :  { %v9635_v59 = vor.u32 %v12072_v23, %v9632_v24  ;;  %v9416_v23 = vld [vmem:[#allocation11 + $0x1b4] sm:$0xf0] }
 0x27f   :  { %vm2415_vm11 = vcmp.eq.f32.partialorder %v2414_v32, 8.507059e+37  ;;  %v9607_v32 = vor.u32 %v12065_v27, %v9604_v2  ;;  %v12040_v27 = vld [vmem:[#allocation11 + $0x250] sm:$0xf0] }
 0x280   :  { %v12637_v46 = vpop.eup %12636  ;;  %3302 = vmatpush.bf16.msra.mxu3 %v9215_v34  ;;  %3262 = vmatpush.bf16.msra.mxu0 %v9459_v10  ;;  %v9576_v10 = vld [vmem:[#allocation11 + $0x2fc] sm:$0xf0] }
 0x281   :  { %v13504_v30 = vadd.f32 1.0, %v12637_v46  ;;  %v2315_v60 = vpop.f32.mrf.mxu2  ;;  %v2444_v46 = vrot.slane %v2290_v29, 6 }
 0x282   :  { %v2316_v52 = vadd.f32 %v2315_v60, %v2303_v55  ;;  %v9427_v55 = vor.u32 %v12025_v12, %v9426_v14  ;;  %v9431_v60 = vor.u32 %v12022_v44, %v9428_v33 }
 0x283   :  { %v13506_v16 = vpop.eup %12638  ;;  %12640 = vrcp.f32 %v13504_v30  ;;  %v2291_v22 = vpop.f32.mrf.mxu0  ;;  %v2437_v26 = vand.u32 2147483647, %v13504_v30  ;;  %vm2433_vm13 = vweird.f32 %v13504_v30 }
 0x284   :  { %v2406_v25 = vmul.f32 %v13506_v16, %v13499_v21  ;;  %v9198_v35 = vmul.f32 -1.442695, %v2316_v52  ;;  %vm2411_vm8 = vweird.f32 %v13506_v16  ;;  %v2417_v21 = vor.u32 1.1754944e-38, %v2416_v7  ;;  %3237 = vmatpush.bf16.msrb.mxu2 %v9427_v55  ;;  %3263 = vmatpush.bf16.msra.mxu0 %v9431_v60  ;;  %v9574_v7 = vld [vmem:[#allocation11 + $0x2e0] sm:$0xf] }
 0x285   :  { %vm13527_vm10 = vmor %vm2410_vm9, %vm2411_vm8  ;;  %v2439_v52 = vand.u32 2147483648, %v13504_v30  ;;  %v9631_v22 = vor.u32 %v12075_v42, %v9630_v45  ;;  %vm2438_vm15 = vcmp.eq.f32.partialorder %v2437_v26, 8.507059e+37  ;;  %v9548_v60 = vld [vmem:[#allocation11 + $0x2c4] sm:$0xf0]  ;;  %v9386_v26 = vld [vmem:[#allocation11 + $0x160] sm:$0xf] }
 0x286   :  { %v2407_v11 = vsub.f32 1.0, %v2406_v25  ;;  %12642 = vpow2.f32 %v9198_v35 }
 0x287   :  { %v2440_v41 = vor.u32 1.1754944e-38, %v2439_v52 }
 0x288   :  { %v2408_v8 = vmul.f32 %v13506_v16, %v2407_v11  ;;  %3282 = vmatpush.bf16.msra.mxu2 %v9631_v22  ;;  %3308 = vmatpush.bf16.msrb.mxu0 %v9635_v59  ;;  %v12017_v22 = vld [vmem:[#allocation11 + $0x19c] sm:$0xf] }
 0x289   :  { %v13517_v31 = vpop.eup %12640  ;;  %v2317_v48 = vpop.f32.mrf.mxu2 }
 0x28a   :  { %v2429_v15 = vmul.f32 %v13517_v31, %v13504_v30  ;;  %v2409_v28 = vadd.f32 %v13506_v16, %v2408_v8  ;;  %vm2434_vm12 = vweird.f32 %v13517_v31  ;;  %v12061_v8 = vld [vmem:[#allocation11 + $0x2f8] sm:$0xf0]  ;;  %v12058_v48 = vld [vmem:[#allocation11 + $0x2e4] sm:$0xf] }
 0x28b   :  { %v2341_v50 = vpop.f32.mrf.mxu0  ;;  %v13531_v57 = vpop.f32.mrf.mxu3  ;;  %vm13548_vm14 = vmor %vm2433_vm13, %vm2434_vm12  ;;  %v9579_v12 = vor.u32 %v12058_v48, %v9576_v10  ;;  %v12006_v48 = vld [vmem:[#allocation11 + $0x140] sm:$0xf0] }
 0x28c   :  { %v12643_v54 = vpop.eup %12642  ;;  %v2430_v62 = vsub.f32 1.0, %v2429_v15  ;;  %v2413_v0 = vsel %vm13527_vm10, %v13506_v16, %v2409_v28  ;;  %v2342_v13 = vadd.f32 %v2341_v50, %v2329_v51  ;;  %v9602_v16 = vld [vmem:[#allocation11 + $0x318] sm:$0xf]  ;;  %3309 = vmatpush.bf16.msrb.mxu0 %v9607_v32  ;;  %v9575_v51 = vor.u32 %v12061_v8, %v9574_v7 }
 0x28d   :  { %v2418_v3 = vsel %vm2415_vm11, %v2417_v21, %v2413_v0  ;;  %v13538_v4 = vadd.f32 1.0, %v12643_v54  ;;  %v9603_v11 = vor.u32 %v12068_v9, %v9602_v16  ;;  %v2452_v28 = vrot.slane %v13409_v37, 7  ;;  %v12051_v21 = vld [vmem:[#allocation11 + $0x2ac] sm:$0xf]  ;;  %v9414_v37 = vld [vmem:[#allocation11 + $0x198] sm:$0xf] }
 0x28e   :  { %v2431_v25 = vmul.f32 %v13517_v31, %v2430_v62  ;;  %v2446_v35 = vmul.f32 %v2444_v46, %v2418_v3  ;;  %v9199_v1 = vmul.f32 -1.442695, %v2342_v13  ;;  %v12054_v46 = vld [vmem:[#allocation11 + $0x2c0] sm:$0xf0]  ;;  %v12020_v62 = vld [vmem:[#allocation11 + $0x1b0] sm:$0xf0]  ;;  %v9551_v52 = vor.u32 %v12051_v21, %v9548_v60 }
 0x28f   :  { %12644 = vrcp.f32 %v13538_v4  ;;  %3283 = vmatpush.bf16.msra.mxu2 %v9603_v11  ;;  %v9518_v0 = vld [vmem:[#allocation11 + $0x270] sm:$0xf]  ;;  %v12047_v13 = vld [vmem:[#allocation11 + $0x288] sm:$0xf0]  ;;  %v12013_v16 = vld [vmem:[#allocation11 + $0x178] sm:$0xf0]  ;;  %v9419_v9 = vor.u32 %v12017_v22, %v9416_v23  ;;  %vm2465_vm1 = vweird.f32 %v13538_v4 }
 0x290   :  { %v2432_v53 = vadd.f32 %v13517_v31, %v2431_v25  ;;  %v2447_v6 = vadd.f32 %v2446_v35, %v13288_v18  ;;  %12646 = vpow2.f32 %v9199_v1  ;;  %3310 = vmatpush.bf16.msrb.mxu0 %v9579_v12  ;;  %v9519_v25 = vor.u32 %v12047_v13, %v9518_v0  ;;  %v12044_v35 = vld [vmem:[#allocation11 + $0x274] sm:$0xf]  ;;  %v9520_v1 = vld [vmem:[#allocation11 + $0x28c] sm:$0xf0]  ;;  %v9490_v11 = vld [vmem:[#allocation11 + $0x238] sm:$0xf] }
 0x291   :  { %v13552_v29 = vpop.f32.mrf.mxu2  ;;  %v9491_v7 = vor.u32 %v12040_v27, %v9490_v11  ;;  %v9492_v8 = vld [vmem:[#allocation11 + $0x254] sm:$0xf0]  ;;  %v9360_v21 = vld [vmem:[#allocation11 + $0x144] sm:$0xf0]  ;;  %v9330_v60 = vld [vmem:[#allocation11 + $0xf0] sm:$0xf] }
 0x292   :  { %v2436_v30 = vsel %vm13548_vm14, %v13517_v31, %v2432_v53  ;;  %12648 = vtanh.f32 %v2447_v6  ;;  %v9546_v31 = vld [vmem:[#allocation11 + $0x2a8] sm:$0xf]  ;;  %v9523_v53 = vor.u32 %v12044_v35, %v9520_v1  ;;  %v9415_v6 = vor.u32 %v12020_v62, %v9414_v37  ;;  %v11996_v1 = vld [vmem:[#allocation11 + $0xf4] sm:$0xf]  ;;  %v9218_v13 = vld [vmem:[#allocation11 + $0x10] sm:$0xf] }
 0x293   :  { %v2343_v34 = vpop.f32.mrf.mxu0  ;;  %v2382_v56 = vpop.f32.mrf.mxu3  ;;  %v2441_v38 = vsel %vm2438_vm15, %v2440_v41, %v2436_v30  ;;  %3284 = vmatpush.bf16.msra.mxu2 %v9575_v51  ;;  %v9547_v43 = vor.u32 %v12054_v46, %v9546_v31  ;;  %v9388_v30 = vld [vmem:[#allocation11 + $0x17c] sm:$0xf0]  ;;  %v9358_v51 = vld [vmem:[#allocation11 + $0x128] sm:$0xf]  ;;  %v12033_v46 = vld [vmem:[#allocation11 + $0x218] sm:$0xf0] }
 0x294   :  { %v2449_v55 = vsub.f32 1.0, %v2441_v38  ;;  %v2454_v42 = vmul.f32 %v2452_v28, %v2441_v38  ;;  %3311 = vmatpush.bf16.msrb.mxu0 %v9551_v52  ;;  %v12037_v34 = vld [vmem:[#allocation11 + $0x23c] sm:$0xf]  ;;  %v2469_v38 = vand.u32 2147483647, %v13538_v4  ;;  %v9391_v28 = vor.u32 %v12010_v20, %v9388_v30 }
 0x295   :  { %v13557_v14 = vpop.eup %12644  ;;  %v9495_v10 = vor.u32 %v12037_v34, %v9492_v8  ;;  %v9462_v31 = vld [vmem:[#allocation11 + $0x200] sm:$0xf]  ;;  %v9434_v62 = vld [vmem:[#allocation11 + $0x1c8] sm:$0xf]  ;;  %v12026_v52 = vld [vmem:[#allocation11 + $0x1e0] sm:$0xf0]  ;;  %v9359_v22 = vor.u32 %v12006_v48, %v9358_v51 }
 0x296   :  { %v12647_v15 = vpop.eup %12646  ;;  %v2461_v33 = vmul.f32 %v13557_v14, %v13538_v4  ;;  %vm2466_vm0 = vweird.f32 %v13557_v14  ;;  %vm2470_vm3 = vcmp.eq.f32.partialorder %v2469_v38, 8.507059e+37  ;;  %v9302_v30 = vld [vmem:[#allocation11 + $0xb8] sm:$0xf]  ;;  %v11989_v8 = vld [vmem:[#allocation11 + $0xbc] sm:$0xf] }
 0x297   :  { %v13560_v44 = vadd.f32 1.0, %v12647_v15  ;;  %3285 = vmatpush.bf16.msra.mxu2 %v9547_v43  ;;  %v9387_v15 = vor.u32 %v12013_v16, %v9386_v26  ;;  %v12003_v43 = vld [vmem:[#allocation11 + $0x12c] sm:$0xf]  ;;  %vm13586_vm2 = vmor %vm2465_vm1, %vm2466_vm0  ;;  %v9435_v26 = vor.u32 %v12026_v52, %v9434_v62  ;;  %v12066_v51 = vld [vmem:[#allocation11 + $0x324] sm:$0xf] }
 0x298   :  { %v12649_v50 = vpop.eup %12648  ;;  %v2462_v24 = vsub.f32 1.0, %v2461_v33  ;;  %3312 = vmatpush.bf16.msrb.mxu0 %v9523_v53  ;;  %v2471_v33 = vand.u32 2147483648, %v13538_v4  ;;  %v9363_v23 = vor.u32 %v12003_v43, %v9360_v21  ;;  %v2381_v4 = vadd.f32 %v13531_v57, %v13429_v19  ;;  %v9246_v21 = vld [vmem:[#allocation11 + $0x48] sm:$0xf] }
 0x299   :  { %v2450_v45 = vmul.f32 %v12649_v50, %v2449_v55  ;;  %12650 = vrcp.f32 %v13560_v44  ;;  %v2369_v54 = vpop.f32.mrf.mxu2  ;;  %v9463_v50 = vor.u32 %v12033_v46, %v9462_v31  ;;  %vm2484_vm5 = vweird.f32 %v13560_v44  ;;  %v9276_v46 = vld [vmem:[#allocation11 + $0x9c] sm:$0xf0] }
 0x29a   :  { %v2463_v32 = vmul.f32 %v13557_v14, %v2462_v24  ;;  %v11999_v54 = vld [vmem:[#allocation11 + $0x108] sm:$0xf0]  ;;  %v2472_v53 = vor.u32 1.1754944e-38, %v2471_v33  ;;  %v2488_v38 = vand.u32 2147483647, %v13560_v44 }
 0x29b   :  { %v13565_v3 = vadd.f32 %v2454_v42, %v2450_v45  ;;  %3286 = vmatpush.bf16.msra.mxu2 %v9519_v25  ;;  %v12030_v45 = vld [vmem:[#allocation11 + $0x204] sm:$0xf]  ;;  %v9464_v42 = vld [vmem:[#allocation11 + $0x21c] sm:$0xf0]  ;;  %v12023_v24 = vld [vmem:[#allocation11 + $0x1cc] sm:$0xf]  ;;  %v9331_v11 = vor.u32 %v11999_v54, %v9330_v60 }
 0x29c   :  { %v2464_v55 = vadd.f32 %v13557_v14, %v2463_v32  ;;  %3313 = vmatpush.bf16.msrb.mxu0 %v9495_v10  ;;  %v9467_v37 = vor.u32 %v12030_v45, %v9464_v42  ;;  %v9436_v25 = vld [vmem:[#allocation11 + $0x1e4] sm:$0xf0]  ;;  %v11992_v32 = vld [vmem:[#allocation11 + $0xd0] sm:$0xf0]  ;;  %vm2489_vm7 = vcmp.eq.f32.partialorder %v2488_v38, 8.507059e+37 }
 0x29d   :  { %v2502_v59 = vpack.c.bf16 %v13565_v3, %v13565_v3  ;;  %v9303_v10 = vor.u32 %v11992_v32, %v9302_v30  ;;  %v11975_v60 = vld [vmem:[#allocation11 + $0x4c] sm:$0xf]  ;;  %v9248_v45 = vld [vmem:[#allocation11 + $0x64] sm:$0xf0]  ;;  %v9366_v32 = vld [vmem:[#allocation11 + $0x130] sm:$0xf] }
 0x29e   :  { %v2468_v35 = vsel %vm13586_vm2, %v13557_v14, %v2464_v55 }
 0x29f   :  { %v13569_v2 = vpop.eup %12650  ;;  %v13571_v41 = vrot.slane %v2502_v59, 1  ;;  %3287 = vmatpush.bf16.msra.mxu2 %v9491_v7  ;;  %v9332_v59 = vld [vmem:[#allocation11 + $0x10c] sm:$0xf0]  ;;  %v2473_v27 = vsel %vm2470_vm3, %v2472_v53, %v2468_v35  ;;  %v2490_v7 = vand.u32 2147483648, %v13560_v44  ;;  %v12021_v35 = vld [vmem:[#allocation11 + $0x1b8] sm:$0xf0] }
 0x2a0   :  { %v2480_v56 = vmul.f32 %v13569_v2, %v13560_v44  ;;  %3314 = vmatpush.bf16.msrb.mxu0 %v9467_v37  ;;  %vm2485_vm4 = vweird.f32 %v13569_v2  ;;  %v9335_v14 = vor.u32 %v11996_v1, %v9332_v59  ;;  %v11982_v44 = vld [vmem:[#allocation11 + $0x84] sm:$0xf]  ;;  %v9394_v53 = vld [vmem:[#allocation11 + $0x168] sm:$0xf] }
 0x2a1   :  { %3225 = vmatmul.bf16.vlgmr.msrb.gmra.mxu1 %v13571_v41  ;;  %3251 = vmatmul.bf16.vlgmr.msrb.gmra.mxu3 %v13571_v41  ;;  %vm13605_vm6 = vmor %vm2484_vm5, %vm2485_vm4  ;;  %v2491_v31 = vor.u32 1.1754944e-38, %v2490_v7  ;;  %v9279_v43 = vor.u32 %v11982_v44, %v9276_v46  ;;  %v12007_v7 = vld [vmem:[#allocation11 + $0x148] sm:$0xf0]  ;;  %v12062_v44 = vld [vmem:[#allocation11 + $0x300] sm:$0xf0] }
 0x2a2   :  { %v2481_v12 = vsub.f32 1.0, %v2480_v56  ;;  %3321 = vmatpush.bf16.msrb.mxu1 %v9415_v6  ;;  %3347 = vmatpush.bf16.msrb.mxu3 %v9419_v9  ;;  %v9439_v6 = vor.u32 %v12023_v24, %v9436_v25  ;;  %v2355_v9 = vadd.f32 %v13489_v49, %v13421_v40  ;;  %v9304_v49 = vld [vmem:[#allocation11 + $0xd4] sm:$0xf0]  ;;  %v9220_v24 = vld [vmem:[#allocation11 + $0x2c] sm:$0xf0] }
 0x2a3   :  { %3288 = vmatpush.bf16.msra.mxu2 %v9463_v50  ;;  %v11978_v50 = vld [vmem:[#allocation11 + $0x60] sm:$0xf0]  ;;  %v12059_v46 = vld [vmem:[#allocation11 + $0x2ec] sm:$0xf] }
 0x2a4   :  { %v2482_v0 = vmul.f32 %v13569_v2, %v2481_v12  ;;  %v2368_v34 = vadd.f32 %v13552_v29, %v2355_v9  ;;  %3315 = vmatpush.bf16.msrb.mxu0 %v9439_v6  ;;  %v9307_v12 = vor.u32 %v11989_v8, %v9304_v49  ;;  %v9247_v37 = vor.u32 %v11978_v50, %v9246_v21  ;;  %v12014_v6 = vld [vmem:[#allocation11 + $0x180] sm:$0xf0]  ;;  %v9638_v9 = vld [vmem:[#allocation11 + $0x358] sm:$0xf]  ;;  %v9610_v8 = vld [vmem:[#allocation11 + $0x320] sm:$0xf] }
 0x2a5   :  { %v12069_v49 = vld [vmem:[#allocation11 + $0x338] sm:$0xf0] }
 0x2a6   :  { %3322 = vmatpush.bf16.msrb.mxu1 %v9387_v15  ;;  %3348 = vmatpush.bf16.msrb.mxu3 %v9391_v28  ;;  %v2483_v57 = vadd.f32 %v13569_v2, %v2482_v0  ;;  %v9274_v15 = vld [vmem:[#allocation11 + $0x80] sm:$0xf]  ;;  %v11985_v28 = vld [vmem:[#allocation11 + $0x98] sm:$0xf0]  ;;  %v9251_v0 = vor.u32 %v11975_v60, %v9248_v45  ;;  %v9554_v60 = vld [vmem:[#allocation11 + $0x2b0] sm:$0xf] }
 0x2a7   :  { %3289 = vmatpush.bf16.msra.mxu2 %v9435_v26  ;;  %v12055_v45 = vld [vmem:[#allocation11 + $0x2c8] sm:$0xf0] }
 0x2a8   :  { %v2487_v29 = vsel %vm13605_vm6, %v13569_v2, %v2483_v57  ;;  %v9275_v2 = vor.u32 %v11985_v28, %v9274_v15  ;;  %v12073_v57 = vld [vmem:[#allocation11 + $0x35c] sm:$0xf]  ;;  %v9611_v15 = vor.u32 %v12069_v49, %v9610_v8 }
 0x2a9   :  { %v2492_v33 = vsel %vm2489_vm7, %v2491_v31, %v2487_v29  ;;  %v9367_v29 = vor.u32 %v12007_v7, %v9366_v32  ;;  %v9582_v31 = vld [vmem:[#allocation11 + $0x2e8] sm:$0xf]  ;;  %v12034_v32 = vld [vmem:[#allocation11 + $0x220] sm:$0xf0]  ;;  %v12031_v7 = vld [vmem:[#allocation11 + $0x20c] sm:$0xf] }
 0x2aa   :  { %3323 = vmatpush.bf16.msrb.mxu1 %v9359_v22  ;;  %3349 = vmatpush.bf16.msrb.mxu3 %v9363_v23  ;;  %v2497_v42 = vsub.f32 1.0, %v2492_v33  ;;  %v2499_v52 = vmul.f32 %v2492_v33, %v13464_v47  ;;  %v11971_v22 = vld [vmem:[#allocation11 + $0x28] sm:$0xf0]  ;;  %v11968_v23 = vld [vmem:[#allocation11 + $0x14] sm:$0xf]  ;;  %v9583_v21 = vor.u32 %v12062_v44, %v9582_v31 }
 0x2ab   :  { %v2393_v16 = vpop.f32.mrf.mxu0  ;;  %v9219_v59 = vor.u32 %v11971_v22, %v9218_v13  ;;  %v9223_v47 = vor.u32 %v11968_v23, %v9220_v24  ;;  %v9526_v22 = vld [vmem:[#allocation11 + $0x278] sm:$0xf]  ;;  %v12048_v23 = vld [vmem:[#allocation11 + $0x290] sm:$0xf0]  ;;  %v12045_v24 = vld [vmem:[#allocation11 + $0x27c] sm:$0xf] }
 0x2ac   :  { %v2394_v20 = vadd.f32 %v2393_v16, %v2381_v4  ;;  %v9422_v4 = vld [vmem:[#allocation11 + $0x1a0] sm:$0xf] }
 0x2ad   :  { %v9423_v26 = vor.u32 %v12021_v35, %v9422_v4  ;;  %v9528_v4 = vld [vmem:[#allocation11 + $0x294] sm:$0xf0] }
 0x2ae   :  { %v2494_v56 = vmul.f32 %v2473_v27, %v2394_v20  ;;  %3324 = vmatpush.bf16.msrb.mxu1 %v9331_v11  ;;  %3350 = vmatpush.bf16.msrb.mxu3 %v9335_v14  ;;  %v12076_v11 = vld [vmem:[#allocation11 + $0x370] sm:$0xf0]  ;;  %v9640_v27 = vld [vmem:[#allocation11 + $0x374] sm:$0xf0]  ;;  %v9395_v14 = vor.u32 %v12014_v6, %v9394_v53  ;;  %v12041_v53 = vld [vmem:[#allocation11 + $0x258] sm:$0xf0] }
 0x2af   :  { %v12038_v6 = vld [vmem:[#allocation11 + $0x244] sm:$0xf] }
 0x2b0   :  { %v2495_v48 = vadd.f32 %v2494_v56, %v2368_v34  ;;  %v9639_v34 = vor.u32 %v12076_v11, %v9638_v9  ;;  %v9643_v56 = vor.u32 %v12073_v57, %v9640_v27  ;;  %v9500_v9 = vld [vmem:[#allocation11 + $0x25c] sm:$0xf0]  ;;  %v9226_v11 = vld [vmem:[#allocation11 + $0x18] sm:$0xf]  ;;  %v11972_v57 = vld [vmem:[#allocation11 + $0x30] sm:$0xf0] }
 0x2b1   :  { %3277 = vmatmul.bf16.vlgmr.msra.gmra.mxu1 %v13571_v41  ;;  %3303 = vmatmul.bf16.vlgmr.msra.gmra.mxu3 %v13571_v41 }
 0x2b2   :  { %12652 = vtanh.f32 %v2495_v48  ;;  %3325 = vmatpush.bf16.msrb.mxu1 %v9303_v10  ;;  %3351 = vmatpush.bf16.msrb.mxu3 %v9307_v12  ;;  %v9612_v48 = vld [vmem:[#allocation11 + $0x33c] sm:$0xf0]  ;;  %v9338_v10 = vld [vmem:[#allocation11 + $0xf8] sm:$0xf]  ;;  %v12000_v12 = vld [vmem:[#allocation11 + $0x110] sm:$0xf0] }
 0x2b3   :  { %v2395_v55 = vpop.f32.mrf.mxu0  ;;  %v9615_v28 = vor.u32 %v12066_v51, %v9612_v48  ;;  %v9339_v33 = vor.u32 %v12000_v12, %v9338_v10  ;;  %v9442_v51 = vld [vmem:[#allocation11 + $0x1d0] sm:$0xf]  ;;  %v12027_v48 = vld [vmem:[#allocation11 + $0x1e8] sm:$0xf0]  ;;  %v9646_v12 = vld [vmem:[#allocation11 + $0x360] sm:$0xf] }
 0x2b4   :  { %v9584_v55 = vld [vmem:[#allocation11 + $0x304] sm:$0xf0]  ;;  %v9444_v10 = vld [vmem:[#allocation11 + $0x1ec] sm:$0xf0] }
 0x2b5   :  { %v9587_v50 = vor.u32 %v12059_v46, %v9584_v55  ;;  %v9618_v46 = vld [vmem:[#allocation11 + $0x328] sm:$0xf]  ;;  %v12070_v55 = vld [vmem:[#allocation11 + $0x340] sm:$0xf0] }
 0x2b6   :  { %3326 = vmatpush.bf16.msrb.mxu1 %v9275_v2  ;;  %3352 = vmatpush.bf16.msrb.mxu3 %v9279_v43  ;;  %v9310_v2 = vld [vmem:[#allocation11 + $0xc0] sm:$0xf]  ;;  %v11993_v43 = vld [vmem:[#allocation11 + $0xd8] sm:$0xf0] }
 0x2b8   :  { %v12653_v54 = vpop.eup %12652 }
 0x2b9   :  { %v2498_v62 = vmul.f32 %v12653_v54, %v2497_v42  ;;  %v12052_v42 = vld [vmem:[#allocation11 + $0x2b4] sm:$0xf]  ;;  %v9556_v54 = vld [vmem:[#allocation11 + $0x2cc] sm:$0xf0] }
 0x2ba   :  { %3327 = vmatpush.bf16.msrb.mxu1 %v9247_v37  ;;  %3353 = vmatpush.bf16.msrb.mxu3 %v9251_v0  ;;  %v9311_v37 = vor.u32 %v11993_v43, %v9310_v2  ;;  %v9555_v0 = vor.u32 %v12055_v45, %v9554_v60  ;;  %v9559_v13 = vor.u32 %v12052_v42, %v9556_v54  ;;  %v9590_v2 = vld [vmem:[#allocation11 + $0x2f0] sm:$0xf]  ;;  %v12063_v43 = vld [vmem:[#allocation11 + $0x308] sm:$0xf0]  ;;  %v12056_v60 = vld [vmem:[#allocation11 + $0x2d0] sm:$0xf0] }
 0x2bb   :  { %v13615_v25 = vadd.f32 %v2499_v52, %v2498_v62  ;;  %v9282_v62 = vld [vmem:[#allocation11 + $0x88] sm:$0xf]  ;;  %v11986_v52 = vld [vmem:[#allocation11 + $0xa0] sm:$0xf0]  ;;  %v12049_v42 = vld [vmem:[#allocation11 + $0x298] sm:$0xf0] }
 0x2bc   :  { %v9283_v35 = vor.u32 %v11986_v52, %v9282_v62  ;;  %v12042_v62 = vld [vmem:[#allocation11 + $0x260] sm:$0xf0] }
 0x2bd   :  { %2501 = vst [vmem:[#allocation14 + $0x1] sm:$0x1] %v13615_v25  ;;  %v2503_v1 = vpack.c.bf16 %v13615_v25, %v13615_v25 }
 0x2be   :  { %3328 = vmatpush.bf16.msrb.mxu1 %v9219_v59  ;;  %3354 = vmatpush.bf16.msrb.mxu3 %v9223_v47  ;;  %v11979_v59 = vld [vmem:[#allocation11 + $0x68] sm:$0xf0]  ;;  %v9527_v47 = vor.u32 %v12048_v23, %v9526_v22  ;;  %v9450_v23 = vld [vmem:[#allocation11 + $0x1d8] sm:$0xf] }
 0x2bf   :  { %v2505_v16 = vunpack.c.l.b16 %v2503_v1  ;;  %v9254_v1 = vld [vmem:[#allocation11 + $0x50] sm:$0xf] }
 0x2c1   :  { %v2506_v20 = vpack.c.b16 %v2505_v16, %v2505_v16  ;;  %3329 = vmatmul.bf16.vlgmr.msrb.gmra.mxu1 %v13571_v41  ;;  %3355 = vmatmul.bf16.vlgmr.msrb.gmra.mxu3 %v13571_v41  ;;  %v9498_v16 = vld [vmem:[#allocation11 + $0x240] sm:$0xf] }
 0x2c2   :  { %3373 = vmatpush.bf16.msra.mxu1 %v9423_v26  ;;  %v9531_v26 = vor.u32 %v12045_v24, %v9528_v4  ;;  %v9499_v27 = vor.u32 %v12041_v53, %v9498_v16  ;;  %v12028_v24 = vld [vmem:[#allocation11 + $0x1f0] sm:$0xf0]  ;;  %v12127_v53 = vld [vmem:[#allocation11 + $0x18c] sm:$0xf] }
 0x2c3   :  { %v2507_v30 = vrot.slane %v2506_v20, 7  ;;  %v9255_v20 = vor.u32 %v11979_v59, %v9254_v1  ;;  %v9451_v4 = vor.u32 %v12028_v24, %v9450_v23  ;;  %v12085_v24 = vld [vmem:[#allocation11 + $0x3c] sm:$0xf] }
 0x2c5   :  { %v13622_v38 = vrot.slane %v2507_v30, 1  ;;  %v9470_v30 = vld [vmem:[#allocation11 + $0x208] sm:$0xf] }
 0x2c6   :  { %3374 = vmatpush.bf16.msra.mxu1 %v9395_v14  ;;  %v9503_v14 = vor.u32 %v12038_v6, %v9500_v9  ;;  %v9471_v8 = vor.u32 %v12034_v32, %v9470_v30  ;;  %v9852_v6 = vld [vmem:[#allocation11 + $0x1a4] sm:$0xf0]  ;;  %v9824_v30 = vld [vmem:[#allocation11 + $0x16c] sm:$0xf0] }
 0x2c7   :  { %3238 = vmatmul.bf16.vlgmr.msrb.gmra.mxu2 %v13622_v38  ;;  %3264 = vmatmul.bf16.vlgmr.msra.gmra.mxu0 %v13622_v38  ;;  %v9855_v9 = vor.u32 %v12127_v53, %v9852_v6  ;;  %v9654_v53 = vld [vmem:[#allocation11] sm:$0xf]  ;;  %v12081_v6 = vld [vmem:[#allocation11 + $0x18] sm:$0xf0] }
 0x2c8   :  { %3334 = vmatpush.bf16.msrb.mxu2 %v9639_v34  ;;  %3360 = vmatpush.bf16.msra.mxu0 %v9643_v56  ;;  %v9472_v34 = vld [vmem:[#allocation11 + $0x224] sm:$0xf0]  ;;  %v9227_v56 = vor.u32 %v11972_v57, %v9226_v11  ;;  %v9822_v11 = vld [vmem:[#allocation11 + $0x150] sm:$0xf]  ;;  %v12123_v57 = vld [vmem:[#allocation11 + $0x168] sm:$0xf0] }
 0x2c9   :  { %v9475_v49 = vor.u32 %v12031_v7, %v9472_v34  ;;  %v9794_v7 = vld [vmem:[#allocation11 + $0x118] sm:$0xf]  ;;  %v12116_v34 = vld [vmem:[#allocation11 + $0x130] sm:$0xf0] }
 0x2ca   :  { %3375 = vmatpush.bf16.msra.mxu1 %v9367_v29  ;;  %v12024_v29 = vld [vmem:[#allocation11 + $0x1d4] sm:$0xf] }
 0x2cb   :  { %v9447_v31 = vor.u32 %v12024_v29, %v9444_v10  ;;  %v9766_v29 = vld [vmem:[#allocation11 + $0xe0] sm:$0xf]  ;;  %v12109_v10 = vld [vmem:[#allocation11 + $0xf8] sm:$0xf0] }
 0x2cc   :  { %3335 = vmatpush.bf16.msrb.mxu2 %v9611_v15  ;;  %3361 = vmatpush.bf16.msra.mxu0 %v9615_v28  ;;  %v12077_v15 = vld [vmem:[#allocation11 + $0x378] sm:$0xf0]  ;;  %v9443_v28 = vor.u32 %v12027_v48, %v9442_v51 }
 0x2cd   :  { %v9647_v44 = vor.u32 %v12077_v15, %v9646_v12  ;;  %v9767_v12 = vor.u32 %v12109_v10, %v9766_v29  ;;  %v12106_v15 = vld [vmem:[#allocation11 + $0xe4] sm:$0xf] }
 0x2ce   :  { %3376 = vmatpush.bf16.msra.mxu1 %v9339_v33  ;;  %v9619_v33 = vor.u32 %v12070_v55, %v9618_v46  ;;  %v9738_v46 = vld [vmem:[#allocation11 + $0xa8] sm:$0xf]  ;;  %v12102_v55 = vld [vmem:[#allocation11 + $0xc0] sm:$0xf0] }
 0x2d0   :  { %3336 = vmatpush.bf16.msrb.mxu2 %v9583_v21  ;;  %3362 = vmatpush.bf16.msra.mxu0 %v9587_v50  ;;  %v9591_v21 = vor.u32 %v12063_v43, %v9590_v2  ;;  %v9562_v50 = vld [vmem:[#allocation11 + $0x2b8] sm:$0xf]  ;;  %v12099_v2 = vld [vmem:[#allocation11 + $0xac] sm:$0xf]  ;;  %v9740_v43 = vld [vmem:[#allocation11 + $0xc4] sm:$0xf0] }
 0x2d1   :  { %v9563_v45 = vor.u32 %v12056_v60, %v9562_v50  ;;  %v9710_v60 = vld [vmem:[#allocation11 + $0x70] sm:$0xf] }
 0x2d2   :  { %3377 = vmatpush.bf16.msra.mxu1 %v9311_v37  ;;  %v9506_v37 = vld [vmem:[#allocation11 + $0x248] sm:$0xf] }
 0x2d3   :  { %v9507_v52 = vor.u32 %v12042_v62, %v9506_v37 }
 0x2d4   :  { %3337 = vmatpush.bf16.msrb.mxu2 %v9555_v0  ;;  %3363 = vmatpush.bf16.msra.mxu0 %v9559_v13  ;;  %v9478_v0 = vld [vmem:[#allocation11 + $0x210] sm:$0xf]  ;;  %v12035_v13 = vld [vmem:[#allocation11 + $0x228] sm:$0xf0] }
 0x2d5   :  { %v9479_v22 = vor.u32 %v12035_v13, %v9478_v0  ;;  %v9682_v0 = vld [vmem:[#allocation11 + $0x38] sm:$0xf]  ;;  %v12088_v13 = vld [vmem:[#allocation11 + $0x50] sm:$0xf0] }
 0x2d6   :  { %3378 = vmatpush.bf16.msra.mxu1 %v9283_v35  ;;  %v9683_v23 = vor.u32 %v12088_v13, %v9682_v0  ;;  %v9804_v13 = vld [vmem:[#allocation11 + $0x13c] sm:$0xf0] }
 0x2d7   :  { %3290 = vmatmul.bf16.vlgmr.msra.gmra.mxu2 %v13622_v38  ;;  %3316 = vmatmul.bf16.vlgmr.msrb.gmra.mxu0 %v13622_v38 }
 0x2d8   :  { %3338 = vmatpush.bf16.msrb.mxu2 %v9527_v47  ;;  %3364 = vmatpush.bf16.msra.mxu0 %v9531_v26  ;;  %v9850_v47 = vld [vmem:[#allocation11 + $0x188] sm:$0xf]  ;;  %v12130_v26 = vld [vmem:[#allocation11 + $0x1a0] sm:$0xf0] }
 0x2d9   :  { %v9851_v16 = vor.u32 %v12130_v26, %v9850_v47 }
 0x2da   :  { %3379 = vmatpush.bf16.msra.mxu1 %v9255_v20 }
 0x2db   :  { %4227 = vmatpush.bf16.msra.mxu3 %v9851_v16 }
 0x2dc   :  { %3339 = vmatpush.bf16.msrb.mxu2 %v9499_v27  ;;  %3365 = vmatpush.bf16.msra.mxu0 %v9503_v14  ;;  %v9823_v27 = vor.u32 %v12123_v57, %v9822_v11  ;;  %v12120_v14 = vld [vmem:[#allocation11 + $0x154] sm:$0xf]  ;;  %v9656_v11 = vld [vmem:[#allocation11 + $0x1c] sm:$0xf0] }
 0x2de   :  { %3380 = vmatpush.bf16.msra.mxu1 %v9227_v56  ;;  %v9795_v56 = vor.u32 %v12116_v34, %v9794_v7  ;;  %v12128_v7 = vld [vmem:[#allocation11 + $0x194] sm:$0xf]  ;;  %v9860_v34 = vld [vmem:[#allocation11 + $0x1ac] sm:$0xf0] }
 0x2df   :  { %4228 = vmatpush.bf16.msra.mxu3 %v9823_v27 }
 0x2e0   :  { %3340 = vmatpush.bf16.msrb.mxu2 %v9471_v8  ;;  %3366 = vmatpush.bf16.msra.mxu0 %v9475_v49  ;;  %v12113_v8 = vld [vmem:[#allocation11 + $0x11c] sm:$0xf]  ;;  %v9796_v49 = vld [vmem:[#allocation11 + $0x134] sm:$0xf0] }
 0x2e1   :  { %3381 = vmatmul.bf16.vlgmr.msra.gmra.mxu1 %v13571_v41  ;;  %v9534_v41 = vld [vmem:[#allocation11 + $0x280] sm:$0xf]  ;;  %v9799_v51 = vor.u32 %v12113_v8, %v9796_v49  ;;  %v9863_v49 = vor.u32 %v12128_v7, %v9860_v34  ;;  %v12172_v7 = vld [vmem:[#allocation11 + $0x2f0] sm:$0xf0] }
 0x2e2   :  { %v9535_v54 = vor.u32 %v12049_v42, %v9534_v41  ;;  %4253 = vmatpush.bf16.msrb.mxu1 %v9855_v9  ;;  %v12092_v42 = vld [vmem:[#allocation11 + $0x74] sm:$0xf]  ;;  %v9655_v9 = vor.u32 %v12081_v6, %v9654_v53  ;;  %v10048_v6 = vld [vmem:[#allocation11 + $0x32c] sm:$0xf0] }
 0x2e3   :  { %4229 = vmatpush.bf16.msra.mxu3 %v9795_v56  ;;  %v12176_v53 = vld [vmem:[#allocation11 + $0x314] sm:$0xf] }
 0x2e4   :  { %3341 = vmatpush.bf16.msrb.mxu2 %v9443_v28  ;;  %3367 = vmatpush.bf16.msra.mxu0 %v9447_v31  ;;  %v9768_v28 = vld [vmem:[#allocation11 + $0xfc] sm:$0xf0] }
 0x2e7   :  { %3342 = vmatmul.bf16.vlgmr.msrb.gmra.mxu2 %v13622_v38  ;;  %3368 = vmatmul.bf16.vlgmr.msra.gmra.mxu0 %v13622_v38 }
 0x2e8   :  { %3386 = vmatpush.bf16.msra.mxu2 %v9647_v44  ;;  %v9771_v44 = vor.u32 %v12106_v15, %v9768_v28  ;;  %4230 = vmatpush.bf16.msra.mxu3 %v9767_v12  ;;  %v9830_v12 = vld [vmem:[#allocation11 + $0x158] sm:$0xf]  ;;  %v12124_v15 = vld [vmem:[#allocation11 + $0x170] sm:$0xf0] }
 0x2e9   :  { %v9831_v28 = vor.u32 %v12124_v15, %v9830_v12  ;;  %v12103_v12 = vld [vmem:[#allocation11 + $0xc8] sm:$0xf0] }
 0x2ec   :  { %3387 = vmatpush.bf16.msra.mxu2 %v9619_v33  ;;  %v9739_v33 = vor.u32 %v12102_v55, %v9738_v46 }
 0x2ee   :  { %4231 = vmatpush.bf16.msra.mxu3 %v9739_v33 }
 0x2f0   :  { %3388 = vmatpush.bf16.msra.mxu2 %v9591_v21  ;;  %v9743_v21 = vor.u32 %v12099_v2, %v9740_v43  ;;  %v10074_v2 = vld [vmem:[#allocation11 + $0x348] sm:$0xf]  ;;  %v12186_v43 = vld [vmem:[#allocation11 + $0x360] sm:$0xf0] }
 0x2f4   :  { %3389 = vmatpush.bf16.msra.mxu2 %v9563_v45  ;;  %v12095_v45 = vld [vmem:[#allocation11 + $0x88] sm:$0xf0] }
 0x2f5   :  { %v9711_v41 = vor.u32 %v12095_v45, %v9710_v60  ;;  %v10076_v60 = vld [vmem:[#allocation11 + $0x364] sm:$0xf0]  ;;  %v9802_v45 = vld [vmem:[#allocation11 + $0x120] sm:$0xf] }
 0x2f7   :  { %4232 = vmatpush.bf16.msra.mxu3 %v9711_v41 }
 0x2f8   :  { %3390 = vmatpush.bf16.msra.mxu2 %v9535_v54  ;;  %v9712_v54 = vld [vmem:[#allocation11 + $0x8c] sm:$0xf0] }
 0x2f9   :  { %v9715_v62 = vor.u32 %v12092_v42, %v9712_v54  ;;  %v12117_v54 = vld [vmem:[#allocation11 + $0x138] sm:$0xf0] }
 0x2fa   :  { %v9803_v0 = vor.u32 %v12117_v54, %v9802_v45  ;;  %v9718_v45 = vld [vmem:[#allocation11 + $0x78] sm:$0xf]  ;;  %v12096_v54 = vld [vmem:[#allocation11 + $0x90] sm:$0xf0] }
 0x2fb   :  { %4233 = vmatpush.bf16.msra.mxu3 %v9683_v23 }
 0x2fc   :  { %3391 = vmatpush.bf16.msra.mxu2 %v9507_v52 }
 0x2ff   :  { %4234 = vmatpush.bf16.msra.mxu3 %v9655_v9  ;;  %v10051_v9 = vor.u32 %v12176_v53, %v10048_v6  ;;  %v9690_v53 = vld [vmem:[#allocation11 + $0x40] sm:$0xf]  ;;  %v12089_v6 = vld [vmem:[#allocation11 + $0x58] sm:$0xf0] }
 0x300   :  { %3392 = vmatpush.bf16.msra.mxu2 %v9479_v22 }
 0x304   :  { %3393 = vmatpush.bf16.msra.mxu2 %v9451_v4  ;;  %v9684_v4 = vld [vmem:[#allocation11 + $0x54] sm:$0xf0] }
 0x305   :  { %v9687_v47 = vor.u32 %v12085_v24, %v9684_v4  ;;  %v10046_v24 = vld [vmem:[#allocation11 + $0x310] sm:$0xf]  ;;  %v12179_v4 = vld [vmem:[#allocation11 + $0x328] sm:$0xf0] }
 0x307   :  { %3394 = vmatmul.bf16.vlgmr.msra.gmra.mxu2 %v13622_v38  ;;  %v9827_v38 = vor.u32 %v12120_v14, %v9824_v30 }
 0x309   :  { %4254 = vmatpush.bf16.msrb.mxu1 %v9827_v38  ;;  %v12131_v38 = vld [vmem:[#allocation11 + $0x1a8] sm:$0xf0] }
 0x30d   :  { %4255 = vmatpush.bf16.msrb.mxu1 %v9799_v51 }
 0x311   :  { %4256 = vmatpush.bf16.msrb.mxu1 %v9771_v44  ;;  %v9832_v44 = vld [vmem:[#allocation11 + $0x174] sm:$0xf0] }
 0x315   :  { %4257 = vmatpush.bf16.msrb.mxu1 %v9743_v21  ;;  %v10075_v21 = vor.u32 %v12186_v43, %v10074_v2  ;;  %v12162_v43 = vld [vmem:[#allocation11 + $0x2a4] sm:$0xf] }
 0x317   :  { %4240 = vmatpush.bf16.msrb.mxu0 %v10075_v21 }
 0x319   :  { %4258 = vmatpush.bf16.msrb.mxu1 %v9715_v62  ;;  %v12114_v62 = vld [vmem:[#allocation11 + $0x124] sm:$0xf] }
 0x31a   :  { %v9807_v23 = vor.u32 %v12114_v62, %v9804_v13  ;;  %v12093_v62 = vld [vmem:[#allocation11 + $0x7c] sm:$0xf]  ;;  %v9962_v13 = vld [vmem:[#allocation11 + $0x268] sm:$0xf] }
 0x31d   :  { %4259 = vmatpush.bf16.msrb.mxu1 %v9687_v47 }
 0x31e   :  { %v13632_v35 = vpop.f32.mrf.mxu1 }
 0x31f   :  { %v3227_v57 = vadd.f32 %v13632_v35, %v13249_v63 }
 0x324   :  { %v3252_v1 = vpop.f32.mrf.mxu3 }
 0x325   :  { %v3253_v52 = vadd.f32 %v3252_v1, %v13259_v58  ;;  %v9858_v1 = vld [vmem:[#allocation11 + $0x190] sm:$0xf] }
 0x326   :  { %v3228_v59 = vpop.f32.mrf.mxu1  ;;  %v9859_v8 = vor.u32 %v12131_v38, %v9858_v1  ;;  %v12107_v1 = vld [vmem:[#allocation11 + $0xec] sm:$0xf]  ;;  %v10018_v38 = vld [vmem:[#allocation11 + $0x2d8] sm:$0xf] }
 0x328   :  { %4279 = vmatpush.bf16.msrb.mxu3 %v9859_v8  ;;  %v12169_v8 = vld [vmem:[#allocation11 + $0x2dc] sm:$0xf] }
 0x32c   :  { %v3254_v20 = vpop.f32.mrf.mxu3  ;;  %4280 = vmatpush.bf16.msrb.mxu3 %v9831_v28 }
 0x32d   :  { %v12078_v20 = vld [vmem:[#allocation11 + $0x4] sm:$0xf] }
 0x32e   :  { %v13634_v32 = vpop.f32.mrf.mxu1  ;;  %v9659_v30 = vor.u32 %v12078_v20, %v9656_v11  ;;  %v9774_v20 = vld [vmem:[#allocation11 + $0xe8] sm:$0xf]  ;;  %v12110_v11 = vld [vmem:[#allocation11 + $0x100] sm:$0xf0] }
 0x330   :  { %4260 = vmatpush.bf16.msrb.mxu1 %v9659_v30  ;;  %4281 = vmatpush.bf16.msrb.mxu3 %v9803_v0  ;;  %v9720_v0 = vld [vmem:[#allocation11 + $0x94] sm:$0xf0] }
 0x334   :  { %v13636_v48 = vpop.f32.mrf.mxu3  ;;  %4305 = vmatpush.bf16.msra.mxu1 %v9863_v49  ;;  %v10020_v49 = vld [vmem:[#allocation11 + $0x2f4] sm:$0xf0] }
 0x336   :  { %v3280_v31 = vpop.f32.mrf.mxu1 }
 0x337   :  { %v12121_v31 = vld [vmem:[#allocation11 + $0x15c] sm:$0xf] }
 0x338   :  { %v9835_v46 = vor.u32 %v12121_v31, %v9832_v44  ;;  %v9748_v31 = vld [vmem:[#allocation11 + $0xcc] sm:$0xf0] }
 0x33a   :  { %4306 = vmatpush.bf16.msra.mxu1 %v9835_v46  ;;  %v9990_v46 = vld [vmem:[#allocation11 + $0x2a0] sm:$0xf] }
 0x33c   :  { %v3306_v50 = vpop.f32.mrf.mxu3 }
 0x33d   :  { %v12183_v50 = vld [vmem:[#allocation11 + $0x34c] sm:$0xf] }
 0x33e   :  { %v13638_v37 = vpop.f32.mrf.mxu1  ;;  %v10079_v42 = vor.u32 %v12183_v50, %v10076_v60  ;;  %4307 = vmatpush.bf16.msra.mxu1 %v9807_v23  ;;  %v9992_v60 = vld [vmem:[#allocation11 + $0x2bc] sm:$0xf0]  ;;  %v9723_v23 = vor.u32 %v12093_v62, %v9720_v0 }
 0x340   :  { %4266 = vmatpush.bf16.msrb.mxu2 %v10079_v42  ;;  %v9995_v42 = vor.u32 %v12162_v43, %v9992_v60 }
 0x344   :  { %v3265_v22 = vpop.f32.mrf.mxu0  ;;  %v13641_v16 = vpop.f32.mrf.mxu3  ;;  %4267 = vmatpush.bf16.msrb.mxu2 %v10051_v9 }
 0x345   :  { %v3266_v59 = vadd.f32 %v3265_v22, %v3253_v52 }
 0x346   :  { %v3332_v14 = vpop.f32.mrf.mxu1 }
 0x347   :  { %v3423_v26 = vrot.slane %v3266_v59, 5  ;;  %v9775_v14 = vor.u32 %v12110_v11, %v9774_v20 }
 0x349   :  { %v3425_v27 = vadd.f32 %v3423_v26, %v13266_v61  ;;  %v10047_v26 = vor.u32 %v12179_v4, %v10046_v24  ;;  %4282 = vmatpush.bf16.msrb.mxu3 %v9775_v14  ;;  %v12158_v24 = vld [vmem:[#allocation11 + $0x280] sm:$0xf0]  ;;  %v12155_v4 = vld [vmem:[#allocation11 + $0x26c] sm:$0xf] }
 0x34a   :  { %v3239_v56 = vpop.f32.mrf.mxu2 }
 0x34b   :  { %v9649_v51 = vmul.f32 -1.442695, %v3425_v27  ;;  %v3240_v29 = vadd.f32 %v3239_v56, %v3227_v57  ;;  %v3305_v57 = vadd.f32 %v13636_v48, %v13338_v17  ;;  %4241 = vmatpush.bf16.msrb.mxu0 %v10047_v26  ;;  %v9776_v27 = vld [vmem:[#allocation11 + $0x104] sm:$0xf0]  ;;  %v10019_v56 = vor.u32 %v12172_v7, %v10018_v38  ;;  %v12100_v48 = vld [vmem:[#allocation11 + $0xb4] sm:$0xf] }
 0x34c   :  { %v3267_v10 = vpop.f32.mrf.mxu0  ;;  %v3358_v33 = vpop.f32.mrf.mxu3  ;;  %v9779_v30 = vor.u32 %v12107_v1, %v9776_v27  ;;  %v9751_v44 = vor.u32 %v12100_v48, %v9748_v31  ;;  %v9964_v26 = vld [vmem:[#allocation11 + $0x284] sm:$0xf0]  ;;  %v9691_v1 = vor.u32 %v12089_v6, %v9690_v53  ;;  %v9692_v27 = vld [vmem:[#allocation11 + $0x5c] sm:$0xf0]  ;;  %v9934_v38 = vld [vmem:[#allocation11 + $0x230] sm:$0xf] }
 0x34d   :  { %12654 = vpow2.f32 %v9649_v51  ;;  %v3400_v35 = vrot.slane %v3240_v29, 5  ;;  %v10023_v29 = vor.u32 %v12169_v8, %v10020_v49  ;;  %v9746_v10 = vld [vmem:[#allocation11 + $0xb0] sm:$0xf]  ;;  %v9967_v11 = vor.u32 %v12155_v4, %v9964_v26  ;;  %v12151_v7 = vld [vmem:[#allocation11 + $0x248] sm:$0xf0] }
 0x34e   :  { %4308 = vmatpush.bf16.msra.mxu1 %v9779_v30  ;;  %v9747_v28 = vor.u32 %v12103_v12, %v9746_v10  ;;  %v9935_v49 = vor.u32 %v12151_v7, %v9934_v38  ;;  %v9662_v48 = vld [vmem:[#allocation11 + $0x8] sm:$0xf]  ;;  %v12134_v38 = vld [vmem:[#allocation11 + $0x1c4] sm:$0xf]  ;;  %v9880_v7 = vld [vmem:[#allocation11 + $0x1dc] sm:$0xf0] }
 0x34f   :  { %v3402_v55 = vadd.f32 %v3400_v35, %v13261_v5  ;;  %4242 = vmatpush.bf16.msrb.mxu0 %v10019_v56  ;;  %4268 = vmatpush.bf16.msrb.mxu2 %v10023_v29  ;;  %v9936_v29 = vld [vmem:[#allocation11 + $0x24c] sm:$0xf0] }
 0x350   :  { %4283 = vmatpush.bf16.msrb.mxu3 %v9747_v28  ;;  %v12082_v28 = vld [vmem:[#allocation11 + $0x20] sm:$0xf0] }
 0x351   :  { %v9648_v41 = vmul.f32 -1.442695, %v3402_v55  ;;  %v12165_v55 = vld [vmem:[#allocation11 + $0x2b8] sm:$0xf0] }
 0x352   :  { %v3241_v52 = vpop.f32.mrf.mxu2  ;;  %4309 = vmatpush.bf16.msra.mxu1 %v9751_v44  ;;  %v9991_v50 = vor.u32 %v12165_v55, %v9990_v46 }
 0x353   :  { %v12655_v22 = vpop.eup %12654  ;;  %12656 = vpow2.f32 %v9648_v41  ;;  %v9719_v52 = vor.u32 %v12096_v54, %v9718_v45  ;;  %4269 = vmatpush.bf16.msrb.mxu2 %v9995_v42  ;;  %v3331_v45 = vadd.f32 %v13638_v37, %v13355_v39  ;;  %v9906_v42 = vld [vmem:[#allocation11 + $0x1f8] sm:$0xf]  ;;  %v12144_v54 = vld [vmem:[#allocation11 + $0x210] sm:$0xf0] }
 0x354   :  { %v13647_v59 = vadd.f32 1.0, %v12655_v22  ;;  %v3317_v47 = vpop.f32.mrf.mxu0  ;;  %4243 = vmatpush.bf16.msrb.mxu0 %v9991_v50  ;;  %v9907_v0 = vor.u32 %v12144_v54, %v9906_v42  ;;  %v10026_v54 = vld [vmem:[#allocation11 + $0x2e0] sm:$0xf] }
 0x355   :  { %v3318_v34 = vadd.f32 %v3317_v47, %v3305_v57  ;;  %4284 = vmatpush.bf16.msrb.mxu3 %v9719_v52  ;;  %v9963_v47 = vor.u32 %v12158_v24, %v9962_v13  ;;  %v12086_v57 = vld [vmem:[#allocation11 + $0x44] sm:$0xf]  ;;  %v12141_v13 = vld [vmem:[#allocation11 + $0x1fc] sm:$0xf] }
 0x356   :  { %12658 = vrcp.f32 %v13647_v59  ;;  %4310 = vmatpush.bf16.msra.mxu1 %v9723_v23  ;;  %v9695_v30 = vor.u32 %v12086_v57, %v9692_v27  ;;  %vm3435_vm10 = vweird.f32 %v13647_v59  ;;  %v3441_v26 = vand.u32 2147483648, %v13647_v59  ;;  %v9878_v27 = vld [vmem:[#allocation11 + $0x1c0] sm:$0xf] }
 0x357   :  { %v9650_v33 = vmul.f32 -1.442695, %v3318_v34  ;;  %v3279_v34 = vadd.f32 %v13634_v32, %v13275_v36  ;;  %4270 = vmatpush.bf16.msrb.mxu2 %v9967_v11  ;;  %v12079_v32 = vld [vmem:[#allocation11 + $0xc] sm:$0xf] }
 0x358   :  { %4244 = vmatpush.bf16.msrb.mxu0 %v9963_v47 }
 0x359   :  { %v12657_v51 = vpop.eup %12656  ;;  %4285 = vmatpush.bf16.msrb.mxu3 %v9691_v1 }
 0x35a   :  { %v13652_v15 = vadd.f32 1.0, %v12657_v51  ;;  %v3291_v35 = vpop.f32.mrf.mxu2  ;;  %v12148_v51 = vld [vmem:[#allocation11 + $0x234] sm:$0xf]  ;;  %4311 = vmatpush.bf16.msra.mxu1 %v9695_v30 }
 0x35b   :  { %v9939_v12 = vor.u32 %v12148_v51, %v9936_v29  ;;  %v3292_v44 = vadd.f32 %v3291_v35, %v3279_v34  ;;  %v10082_v34 = vld [vmem:[#allocation11 + $0x350] sm:$0xf]  ;;  %v12187_v51 = vld [vmem:[#allocation11 + $0x368] sm:$0xf0] }
 0x35c   :  { %12660 = vrcp.f32 %v13652_v15  ;;  %v3319_v2 = vpop.f32.mrf.mxu0  ;;  %v13655_v21 = vpop.eup %12658  ;;  %v3418_v46 = vand.u32 2147483648, %v13652_v15  ;;  %v3416_v50 = vand.u32 2147483647, %v13652_v15  ;;  %4245 = vmatpush.bf16.msrb.mxu0 %v9935_v49  ;;  %vm3412_vm9 = vweird.f32 %v13652_v15  ;;  %v10084_v29 = vld [vmem:[#allocation11 + $0x36c] sm:$0xf0] }
 0x35d   :  { %v3431_v22 = vmul.f32 %v13655_v21, %v13647_v59  ;;  %12662 = vpow2.f32 %v9650_v33  ;;  %v9663_v33 = vor.u32 %v12082_v28, %v9662_v48  ;;  %v9664_v2 = vld [vmem:[#allocation11 + $0x24] sm:$0xf0]  ;;  %4271 = vmatpush.bf16.msrb.mxu2 %v9939_v12  ;;  %vm3436_vm11 = vweird.f32 %v13655_v21 }
 0x35e   :  { %v13657_v41 = vpop.f32.mrf.mxu1  ;;  %v9667_v60 = vor.u32 %v12079_v32, %v9664_v2  ;;  %v3419_v37 = vor.u32 1.1754944e-38, %v3418_v46  ;;  %vm3417_vm13 = vcmp.eq.f32.partialorder %v3416_v50, 8.507059e+37  ;;  %v3446_v47 = vrot.slane %v3292_v44, 5  ;;  %vm13692_vm14 = vmor %vm3435_vm10, %vm3436_vm11  ;;  %v10054_v44 = vld [vmem:[#allocation11 + $0x318] sm:$0xf] }
 0x35f   :  { %v3432_v56 = vsub.f32 1.0, %v3431_v22  ;;  %4286 = vmatpush.bf16.msrb.mxu3 %v9663_v33  ;;  %v9908_v22 = vld [vmem:[#allocation11 + $0x214] sm:$0xf0]  ;;  %v9883_v49 = vor.u32 %v12134_v38, %v9880_v7  ;;  %v10083_v12 = vor.u32 %v12187_v51, %v10082_v34  ;;  %v3442_v28 = vor.u32 1.1754944e-38, %v3441_v26  ;;  %v12180_v46 = vld [vmem:[#allocation11 + $0x330] sm:$0xf0] }
 0x360   :  { %4312 = vmatpush.bf16.msra.mxu1 %v9667_v60  ;;  %v9911_v24 = vor.u32 %v12141_v13, %v9908_v22  ;;  %4246 = vmatpush.bf16.msrb.mxu0 %v9907_v0  ;;  %v10055_v32 = vor.u32 %v12180_v46, %v10054_v44  ;;  %v12177_v2 = vld [vmem:[#allocation11 + $0x31c] sm:$0xf]  ;;  %v3454_v60 = vrot.slane %v13565_v3, 7  ;;  %v12170_v22 = vld [vmem:[#allocation11 + $0x2e4] sm:$0xf] }
 0x361   :  { %v3433_v35 = vmul.f32 %v13655_v21, %v3432_v56  ;;  %v12166_v26 = vld [vmem:[#allocation11 + $0x2c0] sm:$0xf0]  ;;  %v9838_v34 = vld [vmem:[#allocation11 + $0x160] sm:$0xf] }
 0x362   :  { %v13661_v9 = vpop.eup %12660  ;;  %v3293_v20 = vpop.f32.mrf.mxu2  ;;  %4272 = vmatpush.bf16.msrb.mxu2 %v9911_v24  ;;  %v9840_v44 = vld [vmem:[#allocation11 + $0x17c] sm:$0xf0] }
 0x363   :  { %v3408_v14 = vmul.f32 %v13661_v9, %v13652_v15  ;;  %v12663_v31 = vpop.eup %12662  ;;  %vm3413_vm8 = vweird.f32 %v13661_v9  ;;  %v3434_v6 = vadd.f32 %v13655_v21, %v3433_v35  ;;  %v3439_v20 = vand.u32 2147483647, %v13647_v59  ;;  %v12184_v59 = vld [vmem:[#allocation11 + $0x354] sm:$0xf] }
 0x364   :  { %v13667_v8 = vpop.f32.mrf.mxu0  ;;  %v13676_v62 = vadd.f32 1.0, %v12663_v31  ;;  %vm3414_vm12 = vmor %vm3412_vm9, %vm3413_vm8  ;;  %v10087_v48 = vor.u32 %v12184_v59, %v10084_v29 }
 0x365   :  { %v3409_v10 = vsub.f32 1.0, %v3408_v14  ;;  %v12137_v14 = vld [vmem:[#allocation11 + $0x1d8] sm:$0xf0]  ;;  %vm3440_vm15 = vcmp.eq.f32.partialorder %v3439_v20, 8.507059e+37  ;;  %v12163_v20 = vld [vmem:[#allocation11 + $0x2ac] sm:$0xf] }
 0x366   :  { %v3384_v55 = vpop.f32.mrf.mxu1  ;;  %12664 = vrcp.f32 %v13676_v62  ;;  %v9879_v30 = vor.u32 %v12137_v14, %v9878_v27  ;;  %4273 = vmatpush.bf16.msrb.mxu2 %v9883_v49  ;;  %v9868_v27 = vld [vmem:[#allocation11 + $0x1b4] sm:$0xf0]  ;;  %v12159_v49 = vld [vmem:[#allocation11 + $0x288] sm:$0xf0]  ;;  %vm3467_vm1 = vweird.f32 %v13676_v62 }
 0x367   :  { %v3410_v43 = vmul.f32 %v13661_v9, %v3409_v10  ;;  %v3438_v10 = vsel %vm13692_vm14, %v13655_v21, %v3434_v6 }
 0x368   :  { %4247 = vmatpush.bf16.msrb.mxu0 %v9879_v30  ;;  %v3443_v33 = vsel %vm3440_vm15, %v3442_v28, %v3438_v10  ;;  %v12125_v10 = vld [vmem:[#allocation11 + $0x178] sm:$0xf0] }
 0x369   :  { %v3411_v52 = vadd.f32 %v13661_v9, %v3410_v43  ;;  %v10056_v43 = vld [vmem:[#allocation11 + $0x334] sm:$0xf0]  ;;  %v3456_v24 = vmul.f32 %v3454_v60, %v3443_v33  ;;  %v12152_v60 = vld [vmem:[#allocation11 + $0x250] sm:$0xf0] }
 0x36a   :  { %v3343_v23 = vpop.f32.mrf.mxu2  ;;  %4318 = vmatpush.bf16.msra.mxu2 %v10087_v48  ;;  %v10059_v50 = vor.u32 %v12177_v2, %v10056_v43  ;;  %v9972_v48 = vld [vmem:[#allocation11 + $0x28c] sm:$0xf0]  ;;  %v3471_v2 = vand.u32 2147483647, %v13676_v62 }
 0x36b   :  { %v3415_v4 = vsel %vm3414_vm12, %v13661_v9, %v3411_v52  ;;  %v3344_v15 = vadd.f32 %v3343_v23, %v3331_v45  ;;  %v3451_v45 = vsub.f32 1.0, %v3443_v33  ;;  %v12173_v52 = vld [vmem:[#allocation11 + $0x2f8] sm:$0xf0] }
 0x36c   :  { %v3420_v53 = vsel %vm3417_vm13, %v3419_v37, %v3415_v4  ;;  %v3371_v11 = vpop.f32.mrf.mxu0  ;;  %4292 = vmatpush.bf16.msra.mxu0 %v10083_v12  ;;  %v13701_v55 = vpop.eup %12664  ;;  %v10027_v13 = vor.u32 %v12173_v52, %v10026_v54  ;;  %v10028_v37 = vld [vmem:[#allocation11 + $0x2fc] sm:$0xf0]  ;;  %v12156_v12 = vld [vmem:[#allocation11 + $0x274] sm:$0xf]  ;;  %v9810_v54 = vld [vmem:[#allocation11 + $0x128] sm:$0xf] }
 0x36d   :  { %v3448_v9 = vmul.f32 %v3446_v47, %v3420_v53  ;;  %v9651_v57 = vmul.f32 -1.442695, %v3344_v15  ;;  %v3463_v42 = vmul.f32 %v13701_v55, %v13676_v62  ;;  %v10031_v4 = vor.u32 %v12170_v22, %v10028_v37  ;;  %v9998_v15 = vld [vmem:[#allocation11 + $0x2a8] sm:$0xf]  ;;  %v9866_v53 = vld [vmem:[#allocation11 + $0x198] sm:$0xf] }
 0x36e   :  { %4319 = vmatpush.bf16.msra.mxu2 %v10059_v50  ;;  %v9999_v6 = vor.u32 %v12166_v26, %v9998_v15  ;;  %v10000_v11 = vld [vmem:[#allocation11 + $0x2c4] sm:$0xf0]  ;;  %v9975_v33 = vor.u32 %v12156_v12, %v9972_v48  ;;  %vm3468_vm0 = vweird.f32 %v13701_v55  ;;  %v3473_v50 = vand.u32 2147483648, %v13676_v62  ;;  %v12149_v52 = vld [vmem:[#allocation11 + $0x23c] sm:$0xf] }
 0x36f   :  { %v3449_v56 = vadd.f32 %v3448_v9, %v13288_v18  ;;  %12666 = vpow2.f32 %v9651_v57  ;;  %v3464_v47 = vsub.f32 1.0, %v3463_v42  ;;  %v12132_v9 = vld [vmem:[#allocation11 + $0x1b0] sm:$0xf0]  ;;  %v12129_v57 = vld [vmem:[#allocation11 + $0x19c] sm:$0xf]  ;;  %v10003_v14 = vor.u32 %v12163_v20, %v10000_v11  ;;  %vm13730_vm2 = vmor %vm3467_vm1, %vm3468_vm0 }
 0x370   :  { %4293 = vmatpush.bf16.msra.mxu0 %v10055_v32  ;;  %v9867_v59 = vor.u32 %v12132_v9, %v9866_v53  ;;  %v9871_v29 = vor.u32 %v12129_v57, %v9868_v27  ;;  %v12115_v22 = vld [vmem:[#allocation11 + $0x12c] sm:$0xf]  ;;  %v9812_v37 = vld [vmem:[#allocation11 + $0x144] sm:$0xf0]  ;;  %v9914_v15 = vld [vmem:[#allocation11 + $0x200] sm:$0xf]  ;;  %v3357_v26 = vadd.f32 %v13641_v16, %v13421_v40  ;;  %v3383_v62 = vadd.f32 %v13657_v41, %v13429_v19 }
 0x371   :  { %12668 = vtanh.f32 %v3449_v56  ;;  %v3465_v7 = vmul.f32 %v13701_v55, %v3464_v47  ;;  %v9970_v56 = vld [vmem:[#allocation11 + $0x270] sm:$0xf]  ;;  %v12142_v20 = vld [vmem:[#allocation11 + $0x204] sm:$0xf]  ;;  %v9916_v11 = vld [vmem:[#allocation11 + $0x21c] sm:$0xf0]  ;;  %v9815_v16 = vor.u32 %v12115_v22, %v9812_v37 }
 0x372   :  { %v3345_v31 = vpop.f32.mrf.mxu2  ;;  %4320 = vmatpush.bf16.msra.mxu2 %v10031_v4  ;;  %v9971_v46 = vor.u32 %v12159_v49, %v9970_v56  ;;  %vm13741_vm3 = vcmp.eq.f32.partialorder %v3471_v2, 8.507059e+37  ;;  %v3474_v57 = vor.u32 1.1754944e-38, %v3473_v50  ;;  %v9919_v56 = vor.u32 %v12142_v20, %v9916_v11  ;;  %v9886_v49 = vld [vmem:[#allocation11 + $0x1c8] sm:$0xf]  ;;  %v9754_v2 = vld [vmem:[#allocation11 + $0xb8] sm:$0xf] }
 0x373   :  { %v12122_v31 = vld [vmem:[#allocation11 + $0x164] sm:$0xf]  ;;  %v3466_v43 = vadd.f32 %v13701_v55, %v3465_v7  ;;  %v12108_v7 = vld [vmem:[#allocation11 + $0xf4] sm:$0xf]  ;;  %v9888_v12 = vld [vmem:[#allocation11 + $0x1e4] sm:$0xf0]  ;;  %v3370_v48 = vadd.f32 %v13667_v8, %v3357_v26 }
 0x374   :  { %4294 = vmatpush.bf16.msra.mxu0 %v10027_v13  ;;  %v9843_v42 = vor.u32 %v12122_v31, %v9840_v44  ;;  %v12118_v13 = vld [vmem:[#allocation11 + $0x140] sm:$0xf0]  ;;  %v9726_v22 = vld [vmem:[#allocation11 + $0x80] sm:$0xf]  ;;  %v9698_v26 = vld [vmem:[#allocation11 + $0x48] sm:$0xf] }
 0x375   :  { %v12667_v21 = vpop.eup %12666  ;;  %v3470_v53 = vsel %vm13730_vm2, %v13701_v55, %v3466_v43  ;;  %v9811_v27 = vor.u32 %v12118_v13, %v9810_v54  ;;  %v12104_v43 = vld [vmem:[#allocation11 + $0xd0] sm:$0xf0]  ;;  %v9700_v20 = vld [vmem:[#allocation11 + $0x64] sm:$0xf0] }
 0x376   :  { %v13704_v35 = vadd.f32 1.0, %v12667_v21  ;;  %4321 = vmatpush.bf16.msra.mxu2 %v10003_v14  ;;  %v9942_v21 = vld [vmem:[#allocation11 + $0x238] sm:$0xf]  ;;  %v9782_v14 = vld [vmem:[#allocation11 + $0xf0] sm:$0xf] }
 0x377   :  { %v12669_v0 = vpop.eup %12668 }
 0x378   :  { %v3452_v23 = vmul.f32 %v12669_v0, %v3451_v45  ;;  %12670 = vrcp.f32 %v13704_v35  ;;  %4295 = vmatpush.bf16.msra.mxu0 %v9999_v6  ;;  %v9839_v45 = vor.u32 %v12125_v10, %v9838_v34  ;;  %v9944_v0 = vld [vmem:[#allocation11 + $0x254] sm:$0xf0]  ;;  %v12145_v6 = vld [vmem:[#allocation11 + $0x218] sm:$0xf0]  ;;  %v9784_v34 = vld [vmem:[#allocation11 + $0x10c] sm:$0xf0]  ;;  %vm3486_vm5 = vweird.f32 %v13704_v35 }
 0x379   :  { %v9915_v55 = vor.u32 %v12145_v6, %v9914_v15  ;;  %v12135_v10 = vld [vmem:[#allocation11 + $0x1cc] sm:$0xf]  ;;  %v3492_v31 = vand.u32 2147483648, %v13704_v35 }
 0x37a   :  { %v13709_v3 = vadd.f32 %v3456_v24, %v3452_v23  ;;  %4322 = vmatpush.bf16.msra.mxu2 %v9975_v33  ;;  %v9943_v23 = vor.u32 %v12152_v60, %v9942_v21  ;;  %v9947_v24 = vor.u32 %v12149_v52, %v9944_v0  ;;  %v12101_v21 = vld [vmem:[#allocation11 + $0xbc] sm:$0xf]  ;;  %v9756_v60 = vld [vmem:[#allocation11 + $0xd4] sm:$0xf0]  ;;  %v9755_v0 = vor.u32 %v12104_v43, %v9754_v2  ;;  %v12087_v6 = vld [vmem:[#allocation11 + $0x4c] sm:$0xf] }
 0x37b   :  { %v3493_v54 = vor.u32 1.1754944e-38, %v3492_v31  ;;  %v9759_v13 = vor.u32 %v12101_v21, %v9756_v60  ;;  %v10090_v31 = vld [vmem:[#allocation11 + $0x358] sm:$0xf]  ;;  %v9818_v2 = vld [vmem:[#allocation11 + $0x130] sm:$0xf] }
 0x37c   :  { %v3504_v1 = vpack.c.bf16 %v13709_v3, %v13709_v3  ;;  %4296 = vmatpush.bf16.msra.mxu0 %v9971_v46  ;;  %v3490_v46 = vand.u32 2147483647, %v13704_v35  ;;  %v12119_v43 = vld [vmem:[#allocation11 + $0x148] sm:$0xf0]  ;;  %v10062_v60 = vld [vmem:[#allocation11 + $0x320] sm:$0xf] }
 0x37e   :  { %v13713_v30 = vpop.eup %12670  ;;  %v3642_v38 = vshrl.u32 %v3504_v1, 16  ;;  %4323 = vmatpush.bf16.msra.mxu2 %v9947_v24  ;;  %vm3491_vm7 = vcmp.eq.f32.partialorder %v3490_v46, 8.507059e+37  ;;  %v12094_v24 = vld [vmem:[#allocation11 + $0x84] sm:$0xf] }
 0x37f   :  { %v3482_v51 = vmul.f32 %v13713_v30, %v13704_v35  ;;  %vm3487_vm4 = vweird.f32 %v13713_v30 }
 0x380   :  { %v13718_v28 = vrot.slane %v3642_v38, 1  ;;  %v12111_v38 = vld [vmem:[#allocation11 + $0x108] sm:$0xf0]  ;;  %4297 = vmatpush.bf16.msra.mxu0 %v9943_v23  ;;  %vm13755_vm6 = vmor %vm3486_vm5, %vm3487_vm4  ;;  %v12097_v23 = vld [vmem:[#allocation11 + $0x98] sm:$0xf0] }
 0x381   :  { %v3483_v32 = vsub.f32 1.0, %v3482_v51  ;;  %v9783_v33 = vor.u32 %v12111_v38, %v9782_v14  ;;  %v9727_v47 = vor.u32 %v12097_v23, %v9726_v22  ;;  %v12083_v14 = vld [vmem:[#allocation11 + $0x28] sm:$0xf0]  ;;  %v12080_v38 = vld [vmem:[#allocation11 + $0x14] sm:$0xf] }
 0x382   :  { %4235 = vmatmul.bf16.vlgmr.msra.gmra.mxu3 %v13718_v28  ;;  %4261 = vmatmul.bf16.vlgmr.msrb.gmra.mxu1 %v13718_v28  ;;  %v10034_v23 = vld [vmem:[#allocation11 + $0x2e8] sm:$0xf] }
 0x383   :  { %4331 = vmatpush.bf16.msra.mxu3 %v9867_v59  ;;  %4357 = vmatpush.bf16.msrb.mxu1 %v9871_v29  ;;  %v3484_v4 = vmul.f32 %v13713_v30, %v3483_v32  ;;  %v3475_v59 = vsel %vm13741_vm3, %v3474_v57, %v3470_v53  ;;  %v12138_v29 = vld [vmem:[#allocation11 + $0x1e0] sm:$0xf0]  ;;  %v9787_v32 = vor.u32 %v12108_v7, %v9784_v34  ;;  %v9874_v34 = vld [vmem:[#allocation11 + $0x1a0] sm:$0xf] }
 0x384   :  { %4298 = vmatpush.bf16.msra.mxu0 %v9915_v55  ;;  %4324 = vmatpush.bf16.msra.mxu2 %v9919_v56  ;;  %v12090_v53 = vld [vmem:[#allocation11 + $0x60] sm:$0xf0]  ;;  %v12133_v55 = vld [vmem:[#allocation11 + $0x1b8] sm:$0xf0] }
 0x385   :  { %v3485_v51 = vadd.f32 %v13713_v30, %v3484_v4  ;;  %v9728_v4 = vld [vmem:[#allocation11 + $0x9c] sm:$0xf0]  ;;  %v9699_v57 = vor.u32 %v12090_v53, %v9698_v26  ;;  %v12105_v26 = vld [vmem:[#allocation11 + $0xd8] sm:$0xf0] }
 0x386   :  { %v9731_v15 = vor.u32 %v12094_v24, %v9728_v4  ;;  %v12174_v4 = vld [vmem:[#allocation11 + $0x300] sm:$0xf0] }
 0x387   :  { %4332 = vmatpush.bf16.msra.mxu3 %v9839_v45  ;;  %4358 = vmatpush.bf16.msrb.mxu1 %v9843_v42  ;;  %v9887_v45 = vor.u32 %v12138_v29, %v9886_v49  ;;  %v9891_v42 = vor.u32 %v12135_v10, %v9888_v12  ;;  %v3489_v35 = vsel %vm13755_vm6, %v13713_v30, %v3485_v51  ;;  %v9846_v29 = vld [vmem:[#allocation11 + $0x168] sm:$0xf]  ;;  %v12126_v10 = vld [vmem:[#allocation11 + $0x180] sm:$0xf0] }
 0x388   :  { %v3494_v37 = vsel %vm3491_vm7, %v3493_v54, %v3489_v35  ;;  %v9875_v51 = vor.u32 %v12133_v55, %v9874_v34  ;;  %v9819_v35 = vor.u32 %v12119_v43, %v9818_v2  ;;  %v12178_v54 = vld [vmem:[#allocation11 + $0x324] sm:$0xf]  ;;  %v12160_v34 = vld [vmem:[#allocation11 + $0x290] sm:$0xf0]  ;;  %v12157_v55 = vld [vmem:[#allocation11 + $0x27c] sm:$0xf] }
 0x389   :  { %4299 = vmatpush.bf16.msra.mxu0 %v9887_v45  ;;  %4325 = vmatpush.bf16.msra.mxu2 %v9891_v42  ;;  %v3499_v30 = vsub.f32 1.0, %v3494_v37  ;;  %v12181_v45 = vld [vmem:[#allocation11 + $0x338] sm:$0xf0]  ;;  %v9922_v43 = vld [vmem:[#allocation11 + $0x208] sm:$0xf] }
 0x38a   :  { %v3395_v1 = vpop.f32.mrf.mxu2  ;;  %v10063_v22 = vor.u32 %v12181_v45, %v10062_v60 }
 0x38b   :  { %v3396_v41 = vadd.f32 %v3395_v1, %v3383_v62  ;;  %4333 = vmatpush.bf16.msra.mxu3 %v9811_v27  ;;  %4359 = vmatpush.bf16.msrb.mxu1 %v9815_v16  ;;  %v3501_v1 = vmul.f32 %v3494_v37, %v13615_v25  ;;  %v9703_v27 = vor.u32 %v12087_v6, %v9700_v20  ;;  %v9670_v16 = vld [vmem:[#allocation11 + $0x10] sm:$0xf] }
 0x38c   :  { %v9671_v25 = vor.u32 %v12083_v14, %v9670_v16  ;;  %v10006_v6 = vld [vmem:[#allocation11 + $0x2b0] sm:$0xf]  ;;  %v12098_v16 = vld [vmem:[#allocation11 + $0xa0] sm:$0xf0] }
 0x38d   :  { %v3496_v44 = vmul.f32 %v3475_v59, %v3396_v41  ;;  %v9672_v41 = vld [vmem:[#allocation11 + $0x2c] sm:$0xf0] }
 0x38e   :  { %v9675_v49 = vor.u32 %v12080_v38, %v9672_v41  ;;  %v9978_v41 = vld [vmem:[#allocation11 + $0x278] sm:$0xf] }
 0x38f   :  { %v3497_v8 = vadd.f32 %v3496_v44, %v3370_v48  ;;  %4334 = vmatpush.bf16.msra.mxu3 %v9783_v33  ;;  %4360 = vmatpush.bf16.msrb.mxu1 %v9787_v32  ;;  %v9847_v48 = vor.u32 %v12126_v10, %v9846_v29  ;;  %v12188_v44 = vld [vmem:[#allocation11 + $0x370] sm:$0xf0]  ;;  %v12185_v33 = vld [vmem:[#allocation11 + $0x35c] sm:$0xf]  ;;  %v10092_v32 = vld [vmem:[#allocation11 + $0x374] sm:$0xf0] }
 0x390   :  { %v10095_v21 = vor.u32 %v12185_v33, %v10092_v32  ;;  %v9950_v29 = vld [vmem:[#allocation11 + $0x240] sm:$0xf] }
 0x391   :  { %12672 = vtanh.f32 %v3497_v8  ;;  %v10091_v8 = vor.u32 %v12188_v44, %v10090_v31  ;;  %v9952_v31 = vld [vmem:[#allocation11 + $0x25c] sm:$0xf0]  ;;  %v9678_v44 = vld [vmem:[#allocation11 + $0x18] sm:$0xf] }
 0x392   :  { %v3397_v52 = vpop.f32.mrf.mxu2  ;;  %4287 = vmatmul.bf16.vlgmr.msrb.gmra.mxu3 %v13718_v28  ;;  %4313 = vmatmul.bf16.vlgmr.msra.gmra.mxu1 %v13718_v28 }
 0x393   :  { %4335 = vmatpush.bf16.msra.mxu3 %v9755_v0  ;;  %4361 = vmatpush.bf16.msrb.mxu1 %v9759_v13  ;;  %v10064_v52 = vld [vmem:[#allocation11 + $0x33c] sm:$0xf0]  ;;  %v9790_v0 = vld [vmem:[#allocation11 + $0xf8] sm:$0xf]  ;;  %v12112_v13 = vld [vmem:[#allocation11 + $0x110] sm:$0xf0] }
 0x394   :  { %v10067_v37 = vor.u32 %v12178_v54, %v10064_v52  ;;  %v9791_v24 = vor.u32 %v12112_v13, %v9790_v0  ;;  %v12139_v54 = vld [vmem:[#allocation11 + $0x1e8] sm:$0xf0]  ;;  %v12136_v52 = vld [vmem:[#allocation11 + $0x1d4] sm:$0xf]  ;;  %v9896_v0 = vld [vmem:[#allocation11 + $0x1ec] sm:$0xf0] }
 0x395   :  { %v10098_v13 = vld [vmem:[#allocation11 + $0x360] sm:$0xf] }
 0x397   :  { %v12673_v62 = vpop.eup %12672  ;;  %4336 = vmatpush.bf16.msra.mxu3 %v9727_v47  ;;  %4362 = vmatpush.bf16.msrb.mxu1 %v9731_v15  ;;  %v10036_v47 = vld [vmem:[#allocation11 + $0x304] sm:$0xf0]  ;;  %v9762_v15 = vld [vmem:[#allocation11 + $0xc0] sm:$0xf] }
 0x398   :  { %v3500_v11 = vmul.f32 %v12673_v62, %v3499_v30  ;;  %v12171_v30 = vld [vmem:[#allocation11 + $0x2ec] sm:$0xf]  ;;  %v10035_v62 = vor.u32 %v12174_v4, %v10034_v23  ;;  %v9763_v20 = vor.u32 %v12105_v26, %v9762_v15  ;;  %v9899_v23 = vor.u32 %v12136_v52, %v9896_v0  ;;  %v10070_v4 = vld [vmem:[#allocation11 + $0x328] sm:$0xf]  ;;  %v10042_v15 = vld [vmem:[#allocation11 + $0x2f0] sm:$0xf] }
 0x399   :  { %v10039_v53 = vor.u32 %v12171_v30, %v10036_v47  ;;  %v12182_v30 = vld [vmem:[#allocation11 + $0x340] sm:$0xf0]  ;;  %v12175_v26 = vld [vmem:[#allocation11 + $0x308] sm:$0xf0]  ;;  %v12221_v52 = vld [vmem:[#allocation11 + $0xf8] sm:$0xf0] }
 0x39a   :  { %v13765_v9 = vadd.f32 %v3501_v1, %v3500_v11  ;;  %v12167_v11 = vld [vmem:[#allocation11 + $0x2c8] sm:$0xf0]  ;;  %v12164_v1 = vld [vmem:[#allocation11 + $0x2b4] sm:$0xf]  ;;  %v10071_v47 = vor.u32 %v12182_v30, %v10070_v4 }
 0x39b   :  { %4337 = vmatpush.bf16.msra.mxu3 %v9699_v57  ;;  %4363 = vmatpush.bf16.msrb.mxu1 %v9703_v27  ;;  %v10008_v57 = vld [vmem:[#allocation11 + $0x2cc] sm:$0xf0]  ;;  %v9734_v27 = vld [vmem:[#allocation11 + $0x88] sm:$0xf]  ;;  %v10007_v14 = vor.u32 %v12167_v11, %v10006_v6  ;;  %v12161_v11 = vld [vmem:[#allocation11 + $0x298] sm:$0xf0] }
 0x39c   :  { %3503 = vst [vmem:[#allocation14 + $0x2] sm:$0x1] %v13765_v9  ;;  %v3505_v7 = vpack.c.bf16 %v13765_v9, %v13765_v9  ;;  %v10011_v38 = vor.u32 %v12164_v1, %v10008_v57  ;;  %v9958_v57 = vld [vmem:[#allocation11 + $0x248] sm:$0xf] }
 0x39e   :  { %v3507_v56 = vunpack.c.l.b16 %v3505_v7  ;;  %v9735_v7 = vor.u32 %v12098_v16, %v9734_v27  ;;  %v12154_v27 = vld [vmem:[#allocation11 + $0x260] sm:$0xf0] }
 0x39f   :  { %4338 = vmatpush.bf16.msra.mxu3 %v9671_v25  ;;  %4364 = vmatpush.bf16.msrb.mxu1 %v9675_v49  ;;  %v9706_v25 = vld [vmem:[#allocation11 + $0x50] sm:$0xf]  ;;  %v12091_v49 = vld [vmem:[#allocation11 + $0x68] sm:$0xf0]  ;;  %v9959_v16 = vor.u32 %v12154_v27, %v9958_v57  ;;  %v10134_v57 = vld [vmem:[#allocation11 + $0x38] sm:$0xf] }
 0x3a0   :  { %v3508_v59 = vpack.c.b16 %v3507_v56, %v3507_v56  ;;  %v9980_v56 = vld [vmem:[#allocation11 + $0x294] sm:$0xf0]  ;;  %v9707_v10 = vor.u32 %v12091_v49, %v9706_v25  ;;  %v10302_v25 = vld [vmem:[#allocation11 + $0x188] sm:$0xf]  ;;  %v12242_v49 = vld [vmem:[#allocation11 + $0x1a0] sm:$0xf0] }
 0x3a1   :  { %v12200_v27 = vld [vmem:[#allocation11 + $0x50] sm:$0xf0] }
 0x3a2   :  { %v3510_v12 = vshll.u32 %v3508_v59, 16  ;;  %4339 = vmatmul.bf16.vlgmr.msra.gmra.mxu3 %v13718_v28  ;;  %4365 = vmatmul.bf16.vlgmr.msrb.gmra.mxu1 %v13718_v28  ;;  %v9983_v59 = vor.u32 %v12157_v55, %v9980_v56 }
 0x3a3   :  { %4383 = vmatpush.bf16.msrb.mxu3 %v9875_v51  ;;  %v9979_v51 = vor.u32 %v12160_v34, %v9978_v41  ;;  %v12140_v34 = vld [vmem:[#allocation11 + $0x1f0] sm:$0xf0] }
 0x3a4   :  { %v3512_v46 = vrot.slane %v3510_v12, 7  ;;  %v12153_v12 = vld [vmem:[#allocation11 + $0x258] sm:$0xf0] }
 0x3a5   :  { %v9951_v33 = vor.u32 %v12153_v12, %v9950_v29  ;;  %v10304_v29 = vld [vmem:[#allocation11 + $0x1a4] sm:$0xf0] }
 0x3a6   :  { %v3646_v50 = vshrl.u32 %v3512_v46, 16  ;;  %v12084_v46 = vld [vmem:[#allocation11 + $0x30] sm:$0xf0] }
 0x3a7   :  { %4384 = vmatpush.bf16.msrb.mxu3 %v9847_v48  ;;  %v12150_v48 = vld [vmem:[#allocation11 + $0x244] sm:$0xf]  ;;  %v9679_v2 = vor.u32 %v12084_v46, %v9678_v44  ;;  %v12235_v44 = vld [vmem:[#allocation11 + $0x168] sm:$0xf0] }
 0x3a8   :  { %v13772_v42 = vrot.slane %v3646_v50, 1  ;;  %v9955_v32 = vor.u32 %v12150_v48, %v9952_v31  ;;  %v12146_v50 = vld [vmem:[#allocation11 + $0x220] sm:$0xf0]  ;;  %v10274_v31 = vld [vmem:[#allocation11 + $0x150] sm:$0xf] }
 0x3a9   :  { %v9923_v60 = vor.u32 %v12146_v50, %v9922_v43  ;;  %v10275_v46 = vor.u32 %v12235_v44, %v10274_v31  ;;  %v12228_v43 = vld [vmem:[#allocation11 + $0x130] sm:$0xf0]  ;;  %v10312_v44 = vld [vmem:[#allocation11 + $0x1ac] sm:$0xf0] }
 0x3aa   :  { %4248 = vmatmul.bf16.vlgmr.msrb.gmra.mxu0 %v13772_v42  ;;  %4274 = vmatmul.bf16.vlgmr.msrb.gmra.mxu2 %v13772_v42  ;;  %v12240_v31 = vld [vmem:[#allocation11 + $0x194] sm:$0xf] }
 0x3ab   :  { %4344 = vmatpush.bf16.msrb.mxu0 %v10091_v8  ;;  %4370 = vmatpush.bf16.msrb.mxu2 %v10095_v21  ;;  %v12143_v8 = vld [vmem:[#allocation11 + $0x20c] sm:$0xf]  ;;  %v9924_v21 = vld [vmem:[#allocation11 + $0x224] sm:$0xf0] }
 0x3ac   :  { %4385 = vmatpush.bf16.msrb.mxu3 %v9819_v35  ;;  %v9927_v45 = vor.u32 %v12143_v8, %v9924_v21  ;;  %v9894_v35 = vld [vmem:[#allocation11 + $0x1d0] sm:$0xf]  ;;  %v12225_v21 = vld [vmem:[#allocation11 + $0x11c] sm:$0xf] }
 0x3af   :  { %4345 = vmatpush.bf16.msrb.mxu0 %v10063_v22  ;;  %4371 = vmatpush.bf16.msrb.mxu2 %v10067_v37  ;;  %v12189_v22 = vld [vmem:[#allocation11 + $0x378] sm:$0xf0]  ;;  %v9895_v37 = vor.u32 %v12139_v54, %v9894_v35  ;;  %v10218_v54 = vld [vmem:[#allocation11 + $0xe0] sm:$0xf] }
 0x3b0   :  { %4386 = vmatpush.bf16.msrb.mxu3 %v9791_v24  ;;  %v10099_v24 = vor.u32 %v12189_v22, %v10098_v13  ;;  %v10219_v0 = vor.u32 %v12221_v52, %v10218_v54  ;;  %v12218_v13 = vld [vmem:[#allocation11 + $0xe4] sm:$0xf]  ;;  %v10220_v22 = vld [vmem:[#allocation11 + $0xfc] sm:$0xf0]  ;;  %v12233_v54 = vld [vmem:[#allocation11 + $0x15c] sm:$0xf] }
 0x3b3   :  { %4346 = vmatpush.bf16.msrb.mxu0 %v10035_v62  ;;  %4372 = vmatpush.bf16.msrb.mxu2 %v10039_v53  ;;  %v10043_v62 = vor.u32 %v12175_v26, %v10042_v15  ;;  %v10014_v53 = vld [vmem:[#allocation11 + $0x2b8] sm:$0xf]  ;;  %v10192_v15 = vld [vmem:[#allocation11 + $0xc4] sm:$0xf0] }
 0x3b4   :  { %4387 = vmatpush.bf16.msrb.mxu3 %v9763_v20  ;;  %v9986_v20 = vld [vmem:[#allocation11 + $0x280] sm:$0xf] }
 0x3b5   :  { %v9987_v1 = vor.u32 %v12161_v11, %v9986_v20  ;;  %v12204_v20 = vld [vmem:[#allocation11 + $0x74] sm:$0xf]  ;;  %v10164_v11 = vld [vmem:[#allocation11 + $0x8c] sm:$0xf0] }
 0x3b7   :  { %4347 = vmatpush.bf16.msrb.mxu0 %v10007_v14  ;;  %4373 = vmatpush.bf16.msrb.mxu2 %v10011_v38  ;;  %v9930_v14 = vld [vmem:[#allocation11 + $0x210] sm:$0xf]  ;;  %v12147_v38 = vld [vmem:[#allocation11 + $0x228] sm:$0xf0] }
 0x3b8   :  { %4388 = vmatpush.bf16.msrb.mxu3 %v9735_v7  ;;  %v9931_v41 = vor.u32 %v12147_v38, %v9930_v14  ;;  %v9902_v7 = vld [vmem:[#allocation11 + $0x1d8] sm:$0xf]  ;;  %v10135_v14 = vor.u32 %v12200_v27, %v10134_v57  ;;  %v12197_v38 = vld [vmem:[#allocation11 + $0x3c] sm:$0xf]  ;;  %v10256_v27 = vld [vmem:[#allocation11 + $0x13c] sm:$0xf0] }
 0x3b9   :  { %v9903_v55 = vor.u32 %v12140_v34, %v9902_v7 }
 0x3ba   :  { %4300 = vmatmul.bf16.vlgmr.msra.gmra.mxu0 %v13772_v42  ;;  %4326 = vmatmul.bf16.vlgmr.msra.gmra.mxu2 %v13772_v42 }
 0x3bb   :  { %4348 = vmatpush.bf16.msrb.mxu0 %v9979_v51  ;;  %4374 = vmatpush.bf16.msrb.mxu2 %v9983_v59  ;;  %v12239_v51 = vld [vmem:[#allocation11 + $0x18c] sm:$0xf]  ;;  %v10303_v59 = vor.u32 %v12242_v49, %v10302_v25  ;;  %v12193_v25 = vld [vmem:[#allocation11 + $0x18] sm:$0xf0] }
 0x3bc   :  { %4389 = vmatpush.bf16.msrb.mxu3 %v9707_v10  ;;  %v10307_v10 = vor.u32 %v12239_v51, %v10304_v29  ;;  %v12190_v51 = vld [vmem:[#allocation11 + $0x4] sm:$0xf]  ;;  %v10310_v29 = vld [vmem:[#allocation11 + $0x190] sm:$0xf] }
 0x3bd   :  { %5229 = vmatpush.bf16.msra.mxu1 %v10303_v59  ;;  %v10108_v59 = vld [vmem:[#allocation11 + $0x1c] sm:$0xf0] }
 0x3bf   :  { %4349 = vmatpush.bf16.msrb.mxu0 %v9951_v33  ;;  %4375 = vmatpush.bf16.msrb.mxu2 %v9955_v32  ;;  %v12232_v33 = vld [vmem:[#allocation11 + $0x154] sm:$0xf]  ;;  %v10276_v32 = vld [vmem:[#allocation11 + $0x16c] sm:$0xf0] }
 0x3c0   :  { %4390 = vmatpush.bf16.msrb.mxu3 %v9679_v2  ;;  %v10279_v2 = vor.u32 %v12232_v33, %v10276_v32  ;;  %v10315_v32 = vor.u32 %v12240_v31, %v10312_v44  ;;  %v10228_v44 = vld [vmem:[#allocation11 + $0x104] sm:$0xf0] }
 0x3c1   :  { %5230 = vmatpush.bf16.msra.mxu1 %v10275_v46 }
 0x3c3   :  { %4350 = vmatpush.bf16.msrb.mxu0 %v9923_v60  ;;  %4391 = vmatmul.bf16.vlgmr.msrb.gmra.mxu3 %v13718_v28  ;;  %v12168_v28 = vld [vmem:[#allocation11 + $0x2d0] sm:$0xf0]  ;;  %v10248_v60 = vld [vmem:[#allocation11 + $0x134] sm:$0xf0] }
 0x3c4   :  { %4376 = vmatpush.bf16.msrb.mxu2 %v9927_v45  ;;  %v10015_v6 = vor.u32 %v12168_v28, %v10014_v53  ;;  %5255 = vmatpush.bf16.msra.mxu3 %v10307_v10  ;;  %v10251_v45 = vor.u32 %v12225_v21, %v10248_v60  ;;  %v10162_v53 = vld [vmem:[#allocation11 + $0x70] sm:$0xf]  ;;  %v12207_v28 = vld [vmem:[#allocation11 + $0x88] sm:$0xf0]  ;;  %v10111_v10 = vor.u32 %v12190_v51, %v10108_v59  ;;  %v10526_v60 = vld [vmem:[#allocation11 + $0x348] sm:$0xf] }
 0x3c5   :  { %v10470_v59 = vld [vmem:[#allocation11 + $0x2d8] sm:$0xf] }
 0x3c7   :  { %4351 = vmatpush.bf16.msrb.mxu0 %v9895_v37  ;;  %v10223_v37 = vor.u32 %v12218_v13, %v10220_v22  ;;  %v12295_v22 = vld [vmem:[#allocation11 + $0x34c] sm:$0xf] }
 0x3c8   :  { %4377 = vmatpush.bf16.msrb.mxu2 %v9899_v23  ;;  %5256 = vmatpush.bf16.msra.mxu3 %v10279_v2  ;;  %v10190_v23 = vld [vmem:[#allocation11 + $0xa8] sm:$0xf] }
 0x3ca   :  { %4352 = vmatmul.bf16.vlgmr.msrb.gmra.mxu0 %v13772_v42 }
 0x3cb   :  { %4396 = vmatpush.bf16.msra.mxu0 %v10099_v24  ;;  %4378 = vmatmul.bf16.vlgmr.msrb.gmra.mxu2 %v13772_v42  ;;  %v12214_v24 = vld [vmem:[#allocation11 + $0xc0] sm:$0xf0] }
 0x3cc   :  { %5257 = vmatpush.bf16.msra.mxu3 %v10251_v45  ;;  %v10191_v30 = vor.u32 %v12214_v24, %v10190_v23  ;;  %v12298_v45 = vld [vmem:[#allocation11 + $0x360] sm:$0xf0]  ;;  %v10528_v23 = vld [vmem:[#allocation11 + $0x364] sm:$0xf0] }
 0x3cd   :  { %v10527_v13 = vor.u32 %v12298_v45, %v10526_v60  ;;  %v10442_v45 = vld [vmem:[#allocation11 + $0x2a0] sm:$0xf] }
 0x3cf   :  { %4397 = vmatpush.bf16.msra.mxu0 %v10071_v47  ;;  %v12211_v47 = vld [vmem:[#allocation11 + $0xac] sm:$0xf]  ;;  %5242 = vmatpush.bf16.msra.mxu2 %v10527_v13 }
 0x3d0   :  { %5258 = vmatpush.bf16.msra.mxu3 %v10223_v37  ;;  %v10195_v26 = vor.u32 %v12211_v47, %v10192_v15  ;;  %v10531_v47 = vor.u32 %v12295_v22, %v10528_v23  ;;  %v10254_v15 = vld [vmem:[#allocation11 + $0x120] sm:$0xf]  ;;  %v12274_v22 = vld [vmem:[#allocation11 + $0x2a4] sm:$0xf] }
 0x3d3   :  { %4398 = vmatpush.bf16.msra.mxu0 %v10043_v62 }
 0x3d4   :  { %5259 = vmatpush.bf16.msra.mxu3 %v10195_v26  ;;  %v12229_v26 = vld [vmem:[#allocation11 + $0x138] sm:$0xf0] }
 0x3d7   :  { %4399 = vmatpush.bf16.msra.mxu0 %v10015_v6  ;;  %v10163_v6 = vor.u32 %v12207_v28, %v10162_v53  ;;  %v10255_v53 = vor.u32 %v12229_v26, %v10254_v15  ;;  %v10498_v28 = vld [vmem:[#allocation11 + $0x310] sm:$0xf]  ;;  %v10170_v15 = vld [vmem:[#allocation11 + $0x78] sm:$0xf]  ;;  %v12208_v26 = vld [vmem:[#allocation11 + $0x90] sm:$0xf0] }
 0x3db   :  { %4400 = vmatpush.bf16.msra.mxu0 %v9987_v1  ;;  %v10167_v1 = vor.u32 %v12204_v20, %v10164_v11  ;;  %v12226_v20 = vld [vmem:[#allocation11 + $0x124] sm:$0xf] }
 0x3dd   :  { %5260 = vmatpush.bf16.msra.mxu3 %v10167_v1 }
 0x3df   :  { %4401 = vmatpush.bf16.msra.mxu0 %v9959_v16 }
 0x3e3   :  { %4402 = vmatpush.bf16.msra.mxu0 %v9931_v41  ;;  %v10136_v41 = vld [vmem:[#allocation11 + $0x54] sm:$0xf0] }
 0x3e4   :  { %v10139_v7 = vor.u32 %v12197_v38, %v10136_v41  ;;  %v10500_v38 = vld [vmem:[#allocation11 + $0x32c] sm:$0xf0] }
 0x3e6   :  { %5261 = vmatpush.bf16.msra.mxu3 %v10139_v7 }
 0x3e7   :  { %4403 = vmatpush.bf16.msra.mxu0 %v9903_v55  ;;  %v10106_v55 = vld [vmem:[#allocation11] sm:$0xf] }
 0x3e8   :  { %v10107_v49 = vor.u32 %v12193_v25, %v10106_v55  ;;  %v10226_v25 = vld [vmem:[#allocation11 + $0xe8] sm:$0xf] }
 0x3ea   :  { %4404 = vmatmul.bf16.vlgmr.msra.gmra.mxu0 %v13772_v42  ;;  %v10246_v42 = vld [vmem:[#allocation11 + $0x118] sm:$0xf]  ;;  %5262 = vmatpush.bf16.msra.mxu3 %v10111_v10  ;;  %v12219_v10 = vld [vmem:[#allocation11 + $0xec] sm:$0xf] }
 0x3eb   :  { %v10247_v8 = vor.u32 %v12228_v43, %v10246_v42  ;;  %5268 = vmatpush.bf16.msrb.mxu0 %v10531_v47 }
 0x3ed   :  { %5231 = vmatpush.bf16.msra.mxu1 %v10247_v8  ;;  %v12236_v8 = vld [vmem:[#allocation11 + $0x170] sm:$0xf0] }
 0x3ee   :  { %5307 = vmatpush.bf16.msrb.mxu3 %v10315_v32  ;;  %v10231_v32 = vor.u32 %v12219_v10, %v10228_v44  ;;  %v12198_v10 = vld [vmem:[#allocation11 + $0x44] sm:$0xf] }
 0x3f1   :  { %5232 = vmatpush.bf16.msra.mxu1 %v10219_v0 }
 0x3f5   :  { %5233 = vmatpush.bf16.msra.mxu1 %v10191_v30 }
 0x3f9   :  { %5234 = vmatpush.bf16.msra.mxu1 %v10163_v6  ;;  %v12291_v6 = vld [vmem:[#allocation11 + $0x328] sm:$0xf0] }
 0x3fa   :  { %v10499_v57 = vor.u32 %v12291_v6, %v10498_v28  ;;  %v12270_v28 = vld [vmem:[#allocation11 + $0x280] sm:$0xf0]  ;;  %v12205_v6 = vld [vmem:[#allocation11 + $0x7c] sm:$0xf] }
 0x3fc   :  { %5243 = vmatpush.bf16.msra.mxu2 %v10499_v57 }
 0x3fd   :  { %5235 = vmatpush.bf16.msra.mxu1 %v10135_v14  ;;  %v10259_v14 = vor.u32 %v12226_v20, %v10256_v27 }
 0x3ff   :  { %v13782_v56 = vpop.f32.mrf.mxu1 }
 0x400   :  { %v4263_v24 = vadd.f32 %v13782_v56, %v13259_v58 }
 0x401   :  { %5236 = vmatpush.bf16.msra.mxu1 %v10107_v49  ;;  %v12222_v49 = vld [vmem:[#allocation11 + $0x100] sm:$0xf0] }
 0x402   :  { %v10227_v51 = vor.u32 %v12222_v49, %v10226_v25  ;;  %v10386_v49 = vld [vmem:[#allocation11 + $0x230] sm:$0xf] }
 0x405   :  { %v13784_v12 = vpop.f32.mrf.mxu3 }
 0x406   :  { %v4237_v46 = vadd.f32 %v13784_v12, %v13249_v63  ;;  %v10284_v12 = vld [vmem:[#allocation11 + $0x174] sm:$0xf0] }
 0x407   :  { %v4264_v48 = vpop.f32.mrf.mxu1  ;;  %v10287_v37 = vor.u32 %v12233_v54, %v10284_v12  ;;  %v12277_v54 = vld [vmem:[#allocation11 + $0x2b8] sm:$0xf0]  ;;  %v10200_v12 = vld [vmem:[#allocation11 + $0xcc] sm:$0xf0] }
 0x408   :  { %v12243_v48 = vld [vmem:[#allocation11 + $0x1a8] sm:$0xf0]  ;;  %v10443_v13 = vor.u32 %v12277_v54, %v10442_v45  ;;  %v10358_v45 = vld [vmem:[#allocation11 + $0x1f8] sm:$0xf]  ;;  %v12256_v54 = vld [vmem:[#allocation11 + $0x210] sm:$0xf0] }
 0x409   :  { %v10311_v33 = vor.u32 %v12243_v48, %v10310_v29  ;;  %5308 = vmatpush.bf16.msrb.mxu3 %v10287_v37  ;;  %v12284_v29 = vld [vmem:[#allocation11 + $0x2f0] sm:$0xf0]  ;;  %v10444_v37 = vld [vmem:[#allocation11 + $0x2bc] sm:$0xf0] }
 0x40a   :  { %v10471_v31 = vor.u32 %v12284_v29, %v10470_v59  ;;  %v10447_v47 = vor.u32 %v12274_v22, %v10444_v37 }
 0x40b   :  { %5281 = vmatpush.bf16.msrb.mxu1 %v10311_v33  ;;  %v10472_v33 = vld [vmem:[#allocation11 + $0x2f4] sm:$0xf0] }
 0x40c   :  { %5244 = vmatpush.bf16.msra.mxu2 %v10471_v31  ;;  %v12260_v31 = vld [vmem:[#allocation11 + $0x234] sm:$0xf] }
 0x40d   :  { %v4238_v50 = vpop.f32.mrf.mxu3  ;;  %5309 = vmatpush.bf16.msrb.mxu3 %v10259_v14  ;;  %v10142_v14 = vld [vmem:[#allocation11 + $0x40] sm:$0xf] }
 0x40e   :  { %v10282_v50 = vld [vmem:[#allocation11 + $0x158] sm:$0xf] }
 0x40f   :  { %v13786_v35 = vpop.f32.mrf.mxu1  ;;  %v10283_v21 = vor.u32 %v12236_v8, %v10282_v50  ;;  %v10198_v50 = vld [vmem:[#allocation11 + $0xb0] sm:$0xf]  ;;  %v12215_v8 = vld [vmem:[#allocation11 + $0xc8] sm:$0xf0] }
 0x410   :  { %v10199_v60 = vor.u32 %v12215_v8, %v10198_v50  ;;  %5245 = vmatpush.bf16.msra.mxu2 %v10443_v13  ;;  %v4315_v27 = vadd.f32 %v13786_v35, %v13338_v17  ;;  %v10114_v50 = vld [vmem:[#allocation11 + $0x8] sm:$0xf]  ;;  %v12194_v8 = vld [vmem:[#allocation11 + $0x20] sm:$0xf0]  ;;  %v10359_v13 = vor.u32 %v12256_v54, %v10358_v45  ;;  %v12292_v45 = vld [vmem:[#allocation11 + $0x330] sm:$0xf0] }
 0x411   :  { %5282 = vmatpush.bf16.msrb.mxu1 %v10283_v21  ;;  %5310 = vmatpush.bf16.msrb.mxu3 %v10231_v32  ;;  %v12234_v54 = vld [vmem:[#allocation11 + $0x164] sm:$0xf] }
 0x415   :  { %v13788_v4 = vpop.f32.mrf.mxu3  ;;  %5283 = vmatpush.bf16.msrb.mxu1 %v10255_v53  ;;  %v10171_v53 = vor.u32 %v12208_v26, %v10170_v15  ;;  %v10360_v26 = vld [vmem:[#allocation11 + $0x214] sm:$0xf0] }
 0x417   :  { %v4316_v62 = vpop.f32.mrf.mxu1 }
 0x419   :  { %5284 = vmatpush.bf16.msrb.mxu1 %v10227_v51  ;;  %v12263_v51 = vld [vmem:[#allocation11 + $0x248] sm:$0xf0] }
 0x41a   :  { %v10387_v29 = vor.u32 %v12263_v51, %v10386_v49 }
 0x41d   :  { %v4290_v16 = vpop.f32.mrf.mxu3  ;;  %5285 = vmatpush.bf16.msrb.mxu1 %v10199_v60  ;;  %v10115_v60 = vor.u32 %v12194_v8, %v10114_v50  ;;  %v10506_v8 = vld [vmem:[#allocation11 + $0x318] sm:$0xf] }
 0x41e   :  { %v12288_v16 = vld [vmem:[#allocation11 + $0x314] sm:$0xf] }
 0x41f   :  { %v13790_v34 = vpop.f32.mrf.mxu1  ;;  %v10503_v55 = vor.u32 %v12288_v16, %v10500_v38  ;;  %v12201_v38 = vld [vmem:[#allocation11 + $0x58] sm:$0xf0] }
 0x420   :  { %v10143_v25 = vor.u32 %v12201_v38, %v10142_v14  ;;  %v10332_v14 = vld [vmem:[#allocation11 + $0x1dc] sm:$0xf0] }
 0x421   :  { %5269 = vmatpush.bf16.msrb.mxu0 %v10503_v55  ;;  %5286 = vmatpush.bf16.msrb.mxu1 %v10171_v53 }
 0x425   :  { %v13794_v43 = vpop.f32.mrf.mxu3  ;;  %5287 = vmatpush.bf16.msrb.mxu1 %v10143_v25  ;;  %v12299_v25 = vld [vmem:[#allocation11 + $0x368] sm:$0xf0] }
 0x427   :  { %v4249_v2 = vpop.f32.mrf.mxu0  ;;  %v4368_v0 = vpop.f32.mrf.mxu1 }
 0x428   :  { %v4250_v42 = vadd.f32 %v4249_v2, %v4237_v46  ;;  %v12281_v46 = vld [vmem:[#allocation11 + $0x2dc] sm:$0xf] }
 0x429   :  { %v10475_v2 = vor.u32 %v12281_v46, %v10472_v33  ;;  %v10388_v46 = vld [vmem:[#allocation11 + $0x24c] sm:$0xf0]  ;;  %v4289_v33 = vadd.f32 %v13788_v4, %v13275_v36  ;;  %v10116_v4 = vld [vmem:[#allocation11 + $0x24] sm:$0xf0]  ;;  %5288 = vmatpush.bf16.msrb.mxu1 %v10115_v60 }
 0x42a   :  { %v4410_v52 = vrot.slane %v4250_v42, 4 }
 0x42b   :  { %5270 = vmatpush.bf16.msrb.mxu0 %v10475_v2 }
 0x42c   :  { %v4412_v30 = vadd.f32 %v4410_v52, %v13261_v5  ;;  %v12212_v52 = vld [vmem:[#allocation11 + $0xb4] sm:$0xf] }
 0x42d   :  { %v4275_v62 = vpop.f32.mrf.mxu2  ;;  %v4342_v7 = vpop.f32.mrf.mxu3 }
 0x42e   :  { %v10100_v11 = vmul.f32 -1.442695, %v4412_v30  ;;  %v4276_v1 = vadd.f32 %v4275_v62, %v4263_v24  ;;  %v10203_v30 = vor.u32 %v12212_v52, %v10200_v12  ;;  %v10414_v62 = vld [vmem:[#allocation11 + $0x268] sm:$0xf]  ;;  %v12191_v12 = vld [vmem:[#allocation11 + $0xc] sm:$0xf] }
 0x42f   :  { %v4251_v56 = vpop.f32.mrf.mxu0  ;;  %5271 = vmatpush.bf16.msrb.mxu0 %v10447_v47  ;;  %v10415_v20 = vor.u32 %v12270_v28, %v10414_v62  ;;  %v12253_v47 = vld [vmem:[#allocation11 + $0x1fc] sm:$0xf]  ;;  %v4341_v62 = vadd.f32 %v13794_v43, %v13355_v39 }
 0x430   :  { %12674 = vpow2.f32 %v10100_v11  ;;  %v4433_v41 = vrot.slane %v4276_v1, 4  ;;  %5311 = vmatpush.bf16.msrb.mxu3 %v10203_v30  ;;  %v10172_v11 = vld [vmem:[#allocation11 + $0x94] sm:$0xf0]  ;;  %v12267_v1 = vld [vmem:[#allocation11 + $0x26c] sm:$0xf]  ;;  %v10119_v30 = vor.u32 %v12191_v12, %v10116_v4  ;;  %v10363_v28 = vor.u32 %v12253_v47, %v10360_v26 }
 0x431   :  { %v10175_v16 = vor.u32 %v12205_v6, %v10172_v11  ;;  %v10416_v56 = vld [vmem:[#allocation11 + $0x284] sm:$0xf0]  ;;  %5246 = vmatpush.bf16.msra.mxu2 %v10415_v20  ;;  %v10330_v6 = vld [vmem:[#allocation11 + $0x1c0] sm:$0xf]  ;;  %v12249_v20 = vld [vmem:[#allocation11 + $0x1d8] sm:$0xf0] }
 0x432   :  { %v4435_v48 = vadd.f32 %v4433_v41, %v13266_v61  ;;  %v10419_v55 = vor.u32 %v12267_v1, %v10416_v56  ;;  %v12246_v56 = vld [vmem:[#allocation11 + $0x1c4] sm:$0xf] }
 0x434   :  { %v10101_v42 = vmul.f32 -1.442695, %v4435_v48  ;;  %5312 = vmatpush.bf16.msrb.mxu3 %v10175_v16  ;;  %v10144_v48 = vld [vmem:[#allocation11 + $0x5c] sm:$0xf0]  ;;  %5272 = vmatpush.bf16.msrb.mxu0 %v10419_v55  ;;  %v10331_v16 = vor.u32 %v12249_v20, %v10330_v6  ;;  %v10534_v55 = vld [vmem:[#allocation11 + $0x350] sm:$0xf] }
 0x435   :  { %v4277_v21 = vpop.f32.mrf.mxu2  ;;  %5247 = vmatpush.bf16.msra.mxu2 %v10387_v29 }
 0x436   :  { %v12675_v0 = vpop.eup %12674  ;;  %12676 = vpow2.f32 %v10101_v42  ;;  %v10147_v42 = vor.u32 %v12198_v10, %v10144_v48  ;;  %v10391_v21 = vor.u32 %v12260_v31, %v10388_v46  ;;  %v10535_v10 = vor.u32 %v12299_v25, %v10534_v55  ;;  %v12296_v46 = vld [vmem:[#allocation11 + $0x354] sm:$0xf] }
 0x437   :  { %v13800_v23 = vadd.f32 1.0, %v12675_v0  ;;  %v4301_v24 = vpop.f32.mrf.mxu0 }
 0x438   :  { %v4302_v52 = vadd.f32 %v4301_v24, %v4289_v33  ;;  %5313 = vmatpush.bf16.msrb.mxu3 %v10147_v42  ;;  %5273 = vmatpush.bf16.msrb.mxu0 %v10391_v21  ;;  %v10536_v33 = vld [vmem:[#allocation11 + $0x36c] sm:$0xf0] }
 0x439   :  { %12678 = vrcp.f32 %v13800_v23  ;;  %v4426_v22 = vand.u32 2147483647, %v13800_v23  ;;  %v4428_v37 = vand.u32 2147483648, %v13800_v23  ;;  %vm4422_vm9 = vweird.f32 %v13800_v23  ;;  %5248 = vmatpush.bf16.msra.mxu2 %v10359_v13  ;;  %v10508_v13 = vld [vmem:[#allocation11 + $0x334] sm:$0xf0] }
 0x43a   :  { %v10539_v50 = vor.u32 %v12296_v46, %v10536_v33  ;;  %v10320_v46 = vld [vmem:[#allocation11 + $0x1b4] sm:$0xf0] }
 0x43b   :  { %vm4427_vm11 = vcmp.eq.f32.partialorder %v4426_v22, 8.507059e+37 }
 0x43c   :  { %v12677_v57 = vpop.eup %12676  ;;  %5314 = vmatpush.bf16.msrb.mxu3 %v10119_v30  ;;  %5274 = vmatpush.bf16.msrb.mxu0 %v10363_v28  ;;  %v10478_v30 = vld [vmem:[#allocation11 + $0x2e0] sm:$0xf] }
 0x43d   :  { %v13805_v41 = vadd.f32 1.0, %v12677_v57  ;;  %v4327_v7 = vpop.f32.mrf.mxu2  ;;  %v4456_v57 = vrot.slane %v4302_v52, 4  ;;  %5249 = vmatpush.bf16.msra.mxu2 %v10331_v16  ;;  %v10507_v52 = vor.u32 %v12292_v45, %v10506_v8  ;;  %v10480_v28 = vld [vmem:[#allocation11 + $0x2fc] sm:$0xf0]  ;;  %v12237_v8 = vld [vmem:[#allocation11 + $0x178] sm:$0xf0] }
 0x43e   :  { %v4328_v59 = vadd.f32 %v4327_v7, %v4315_v27  ;;  %v10335_v7 = vor.u32 %v12246_v56, %v10332_v14 }
 0x43f   :  { %v13807_v35 = vpop.eup %12678  ;;  %12680 = vrcp.f32 %v13805_v41  ;;  %v4303_v44 = vpop.f32.mrf.mxu0  ;;  %v4451_v48 = vand.u32 2147483648, %v13805_v41  ;;  %vm4445_vm13 = vweird.f32 %v13805_v41 }
 0x440   :  { %v4418_v32 = vmul.f32 %v13807_v35, %v13800_v23  ;;  %v10102_v2 = vmul.f32 -1.442695, %v4328_v59  ;;  %vm4423_vm8 = vweird.f32 %v13807_v35  ;;  %v4429_v23 = vor.u32 1.1754944e-38, %v4428_v37  ;;  %5275 = vmatpush.bf16.msrb.mxu0 %v10335_v7  ;;  %v10452_v7 = vld [vmem:[#allocation11 + $0x2c4] sm:$0xf0] }
 0x441   :  { %vm13830_vm10 = vmor %vm4422_vm9, %vm4423_vm8  ;;  %5294 = vmatpush.bf16.msrb.mxu2 %v10535_v10  ;;  %v4452_v12 = vor.u32 1.1754944e-38, %v4451_v48  ;;  %v12271_v10 = vld [vmem:[#allocation11 + $0x288] sm:$0xf0] }
 0x442   :  { %v4419_v0 = vsub.f32 1.0, %v4418_v32  ;;  %12682 = vpow2.f32 %v10102_v2 }
 0x444   :  { %v4420_v15 = vmul.f32 %v13807_v35, %v4419_v0  ;;  %5320 = vmatpush.bf16.msra.mxu0 %v10539_v50  ;;  %v12289_v0 = vld [vmem:[#allocation11 + $0x31c] sm:$0xf] }
 0x445   :  { %v13818_v24 = vpop.eup %12680  ;;  %v4329_v53 = vpop.f32.mrf.mxu2  ;;  %v10511_v37 = vor.u32 %v12289_v0, %v10508_v13  ;;  %5295 = vmatpush.bf16.msrb.mxu2 %v10507_v52  ;;  %v10394_v52 = vld [vmem:[#allocation11 + $0x238] sm:$0xf]  ;;  %v12264_v0 = vld [vmem:[#allocation11 + $0x250] sm:$0xf0] }
 0x446   :  { %v4441_v11 = vmul.f32 %v13818_v24, %v13805_v41  ;;  %v4421_v1 = vadd.f32 %v13807_v35, %v4420_v15  ;;  %v13826_v27 = vpop.f32.mrf.mxu3  ;;  %vm4446_vm12 = vweird.f32 %v13818_v24  ;;  %v12285_v15 = vld [vmem:[#allocation11 + $0x2f8] sm:$0xf0]  ;;  %v12282_v53 = vld [vmem:[#allocation11 + $0x2e4] sm:$0xf] }
 0x447   :  { %v4353_v38 = vpop.f32.mrf.mxu0  ;;  %vm13849_vm14 = vmor %vm4445_vm13, %vm4446_vm12  ;;  %v10483_v20 = vor.u32 %v12282_v53, %v10480_v28  ;;  %v12230_v53 = vld [vmem:[#allocation11 + $0x140] sm:$0xf0] }
 0x448   :  { %v12683_v49 = vpop.eup %12682  ;;  %v4442_v51 = vsub.f32 1.0, %v4441_v11  ;;  %v4425_v59 = vsel %vm13830_vm10, %v13807_v35, %v4421_v1  ;;  %v4354_v29 = vadd.f32 %v4353_v38, %v4341_v62  ;;  %v4449_v35 = vand.u32 2147483647, %v13805_v41  ;;  %5321 = vmatpush.bf16.msra.mxu0 %v10511_v37  ;;  %v10450_v1 = vld [vmem:[#allocation11 + $0x2a8] sm:$0xf] }
 0x449   :  { %v4430_v31 = vsel %vm4427_vm11, %v4429_v23, %v4425_v59  ;;  %v13839_v44 = vadd.f32 1.0, %v12683_v49  ;;  %v10479_v62 = vor.u32 %v12285_v15, %v10478_v30  ;;  %v12275_v23 = vld [vmem:[#allocation11 + $0x2ac] sm:$0xf]  ;;  %v10318_v49 = vld [vmem:[#allocation11 + $0x198] sm:$0xf]  ;;  %v10395_v37 = vor.u32 %v12264_v0, %v10394_v52 }
 0x44a   :  { %v4443_v32 = vmul.f32 %v13818_v24, %v4442_v51  ;;  %v4458_v2 = vmul.f32 %v4456_v57, %v4430_v31  ;;  %v10103_v42 = vmul.f32 -1.442695, %v4354_v29  ;;  %vm4450_vm15 = vcmp.eq.f32.partialorder %v4449_v35, 8.507059e+37  ;;  %v12278_v57 = vld [vmem:[#allocation11 + $0x2c0] sm:$0xf0] }
 0x44b   :  { %12684 = vrcp.f32 %v13839_v44  ;;  %5296 = vmatpush.bf16.msrb.mxu2 %v10479_v62  ;;  %v10451_v43 = vor.u32 %v12278_v57, %v10450_v1  ;;  %v12244_v51 = vld [vmem:[#allocation11 + $0x1b0] sm:$0xf0]  ;;  %v10455_v59 = vor.u32 %v12275_v23, %v10452_v7  ;;  %v10422_v29 = vld [vmem:[#allocation11 + $0x270] sm:$0xf]  ;;  %v12241_v31 = vld [vmem:[#allocation11 + $0x19c] sm:$0xf]  ;;  %vm4477_vm1 = vweird.f32 %v13839_v44 }
 0x44c   :  { %v4444_v21 = vadd.f32 %v13818_v24, %v4443_v32  ;;  %v4459_v60 = vadd.f32 %v4458_v2, %v13288_v18  ;;  %12686 = vpow2.f32 %v10103_v42  ;;  %5322 = vmatpush.bf16.msra.mxu0 %v10483_v20  ;;  %v10423_v32 = vor.u32 %v12271_v10, %v10422_v29  ;;  %v12268_v2 = vld [vmem:[#allocation11 + $0x274] sm:$0xf]  ;;  %v10424_v42 = vld [vmem:[#allocation11 + $0x28c] sm:$0xf0]  ;;  %v10290_v35 = vld [vmem:[#allocation11 + $0x160] sm:$0xf] }
 0x44d   :  { %v10323_v45 = vor.u32 %v12241_v31, %v10320_v46  ;;  %v12261_v30 = vld [vmem:[#allocation11 + $0x23c] sm:$0xf]  ;;  %v10396_v15 = vld [vmem:[#allocation11 + $0x254] sm:$0xf0]  ;;  %v10262_v62 = vld [vmem:[#allocation11 + $0x128] sm:$0xf] }
 0x44e   :  { %v4448_v41 = vsel %vm13849_vm14, %v13818_v24, %v4444_v21  ;;  %12688 = vtanh.f32 %v4459_v60  ;;  %v13856_v4 = vpop.f32.mrf.mxu2  ;;  %v4394_v22 = vpop.f32.mrf.mxu3  ;;  %v4464_v24 = vrot.slane %v13709_v3, 7  ;;  %v10427_v21 = vor.u32 %v12268_v2, %v10424_v42  ;;  %v10366_v1 = vld [vmem:[#allocation11 + $0x200] sm:$0xf]  ;;  %v12257_v57 = vld [vmem:[#allocation11 + $0x218] sm:$0xf0] }
 0x44f   :  { %v4355_v47 = vpop.f32.mrf.mxu0  ;;  %v4453_v26 = vsel %vm4450_vm15, %v4452_v12, %v4448_v41  ;;  %5297 = vmatpush.bf16.msrb.mxu2 %v10451_v43  ;;  %v10319_v60 = vor.u32 %v12244_v51, %v10318_v49  ;;  %v10292_v41 = vld [vmem:[#allocation11 + $0x17c] sm:$0xf0]  ;;  %v10399_v28 = vor.u32 %v12261_v30, %v10396_v15  ;;  %v12227_v43 = vld [vmem:[#allocation11 + $0x12c] sm:$0xf]  ;;  %v10264_v23 = vld [vmem:[#allocation11 + $0x144] sm:$0xf0]  ;;  %v10263_v31 = vor.u32 %v12230_v53, %v10262_v62 }
 0x450   :  { %v4461_v16 = vsub.f32 1.0, %v4453_v26  ;;  %v4466_v25 = vmul.f32 %v4464_v24, %v4453_v26  ;;  %5323 = vmatpush.bf16.msra.mxu0 %v10455_v59  ;;  %v4481_v26 = vand.u32 2147483647, %v13839_v44  ;;  %v10295_v24 = vor.u32 %v12234_v54, %v10292_v41  ;;  %v10234_v7 = vld [vmem:[#allocation11 + $0xf0] sm:$0xf] }
 0x451   :  { %v13858_v6 = vpop.eup %12684  ;;  %v12223_v49 = vld [vmem:[#allocation11 + $0x108] sm:$0xf0]  ;;  %v10338_v51 = vld [vmem:[#allocation11 + $0x1c8] sm:$0xf]  ;;  %v12250_v59 = vld [vmem:[#allocation11 + $0x1e0] sm:$0xf0]  ;;  %v10267_v46 = vor.u32 %v12227_v43, %v10264_v23 }
 0x452   :  { %v12687_v11 = vpop.eup %12686  ;;  %v4473_v14 = vmul.f32 %v13858_v6, %v13839_v44  ;;  %vm4478_vm0 = vweird.f32 %v13858_v6  ;;  %v12220_v42 = vld [vmem:[#allocation11 + $0xf4] sm:$0xf]  ;;  %vm4482_vm3 = vcmp.eq.f32.partialorder %v4481_v26, 8.507059e+37  ;;  %v10235_v52 = vor.u32 %v12223_v49, %v10234_v7  ;;  %v10206_v41 = vld [vmem:[#allocation11 + $0xb8] sm:$0xf] }
 0x453   :  { %v13861_v56 = vadd.f32 1.0, %v12687_v11  ;;  %5298 = vmatpush.bf16.msrb.mxu2 %v10423_v32  ;;  %v10291_v11 = vor.u32 %v12237_v8, %v10290_v35  ;;  %vm13887_vm2 = vmor %vm4477_vm1, %vm4478_vm0  ;;  %v10340_v32 = vld [vmem:[#allocation11 + $0x1e4] sm:$0xf0]  ;;  %v10339_v35 = vor.u32 %v12250_v59, %v10338_v51  ;;  %v12213_v15 = vld [vmem:[#allocation11 + $0xbc] sm:$0xf] }
 0x454   :  { %v12689_v38 = vpop.eup %12688  ;;  %v4474_v33 = vsub.f32 1.0, %v4473_v14  ;;  %5324 = vmatpush.bf16.msra.mxu0 %v10427_v21  ;;  %v4483_v14 = vand.u32 2147483648, %v13839_v44  ;;  %v4393_v44 = vadd.f32 %v13826_v27, %v13429_v19  ;;  %v10150_v23 = vld [vmem:[#allocation11 + $0x48] sm:$0xf]  ;;  %v12199_v7 = vld [vmem:[#allocation11 + $0x4c] sm:$0xf] }
 0x455   :  { %v4462_v55 = vmul.f32 %v12689_v38, %v4461_v16  ;;  %12690 = vrcp.f32 %v13861_v56  ;;  %v10367_v38 = vor.u32 %v12257_v57, %v10366_v1  ;;  %vm4496_vm5 = vweird.f32 %v13861_v56  ;;  %v10180_v57 = vld [vmem:[#allocation11 + $0x9c] sm:$0xf0]  ;;  %v10122_v10 = vld [vmem:[#allocation11 + $0x10] sm:$0xf]  ;;  %v12290_v62 = vld [vmem:[#allocation11 + $0x324] sm:$0xf] }
 0x456   :  { %v4381_v3 = vpop.f32.mrf.mxu2  ;;  %v4475_v22 = vmul.f32 %v13858_v6, %v4474_v33  ;;  %v12247_v33 = vld [vmem:[#allocation11 + $0x1cc] sm:$0xf]  ;;  %v4484_v21 = vor.u32 1.1754944e-38, %v4483_v14  ;;  %v4500_v26 = vand.u32 2147483647, %v13861_v56 }
 0x457   :  { %v13866_v48 = vadd.f32 %v4466_v25, %v4462_v55  ;;  %5299 = vmatpush.bf16.msrb.mxu2 %v10395_v37  ;;  %v12254_v55 = vld [vmem:[#allocation11 + $0x204] sm:$0xf]  ;;  %v10368_v25 = vld [vmem:[#allocation11 + $0x21c] sm:$0xf0]  ;;  %v4502_v37 = vand.u32 2147483648, %v13861_v56 }
 0x458   :  { %v4476_v16 = vadd.f32 %v13858_v6, %v4475_v22  ;;  %5325 = vmatpush.bf16.msra.mxu0 %v10399_v28  ;;  %v10371_v3 = vor.u32 %v12254_v55, %v10368_v25  ;;  %v12216_v22 = vld [vmem:[#allocation11 + $0xd0] sm:$0xf0]  ;;  %vm4501_vm7 = vcmp.eq.f32.partialorder %v4500_v26, 8.507059e+37  ;;  %v10152_v55 = vld [vmem:[#allocation11 + $0x64] sm:$0xf0] }
 0x459   :  { %v4514_v50 = vpack.c.bf16 %v13866_v48, %v13866_v48  ;;  %v10207_v28 = vor.u32 %v12216_v22, %v10206_v41  ;;  %v4503_v1 = vor.u32 1.1754944e-38, %v4502_v37  ;;  %v10270_v22 = vld [vmem:[#allocation11 + $0x130] sm:$0xf]  ;;  %v12231_v37 = vld [vmem:[#allocation11 + $0x148] sm:$0xf0] }
 0x45a   :  { %v4480_v2 = vsel %vm13887_vm2, %v13858_v6, %v4476_v16 }
 0x45b   :  { %v13870_v13 = vpop.eup %12690  ;;  %v13872_v12 = vrot.slane %v4514_v50, 2  ;;  %v10236_v50 = vld [vmem:[#allocation11 + $0x10c] sm:$0xf0]  ;;  %5300 = vmatpush.bf16.msrb.mxu2 %v10367_v38  ;;  %v4485_v0 = vsel %vm4482_vm3, %v4484_v21, %v4480_v2  ;;  %v12202_v38 = vld [vmem:[#allocation11 + $0x60] sm:$0xf0] }
 0x45c   :  { %v4492_v47 = vmul.f32 %v13870_v13, %v13861_v56  ;;  %5326 = vmatpush.bf16.msra.mxu0 %v10371_v3  ;;  %vm4497_vm4 = vweird.f32 %v13870_v13  ;;  %v10239_v6 = vor.u32 %v12220_v42, %v10236_v50  ;;  %v12206_v56 = vld [vmem:[#allocation11 + $0x84] sm:$0xf]  ;;  %v10151_v3 = vor.u32 %v12202_v38, %v10150_v23  ;;  %v12245_v2 = vld [vmem:[#allocation11 + $0x1b8] sm:$0xf0]  ;;  %v10298_v21 = vld [vmem:[#allocation11 + $0x168] sm:$0xf] }
 0x45d   :  { %5237 = vmatmul.bf16.vlgmr.msra.gmra.mxu1 %v13872_v12  ;;  %5263 = vmatmul.bf16.vlgmr.msra.gmra.mxu3 %v13872_v12  ;;  %vm13906_vm6 = vmor %vm4496_vm5, %vm4497_vm4  ;;  %v10183_v43 = vor.u32 %v12206_v56, %v10180_v57  ;;  %v12286_v56 = vld [vmem:[#allocation11 + $0x300] sm:$0xf0]  ;;  %v12283_v57 = vld [vmem:[#allocation11 + $0x2ec] sm:$0xf] }
 0x45e   :  { %v4493_v20 = vsub.f32 1.0, %v4492_v47  ;;  %5333 = vmatpush.bf16.msra.mxu1 %v10319_v60  ;;  %5359 = vmatpush.bf16.msra.mxu3 %v10323_v45  ;;  %v10343_v60 = vor.u32 %v12247_v33, %v10340_v32  ;;  %v4367_v45 = vadd.f32 %v13790_v34, %v13421_v40  ;;  %v10208_v34 = vld [vmem:[#allocation11 + $0xd4] sm:$0xf0]  ;;  %v10124_v33 = vld [vmem:[#allocation11 + $0x2c] sm:$0xf0] }
 0x45f   :  { %5301 = vmatpush.bf16.msrb.mxu2 %v10339_v35 }
 0x460   :  { %v4494_v29 = vmul.f32 %v13870_v13, %v4493_v20  ;;  %v4380_v30 = vadd.f32 %v13856_v4, %v4367_v45  ;;  %5327 = vmatpush.bf16.msra.mxu0 %v10343_v60  ;;  %v10211_v20 = vor.u32 %v12213_v15, %v10208_v34  ;;  %v12238_v60 = vld [vmem:[#allocation11 + $0x180] sm:$0xf0]  ;;  %v10542_v45 = vld [vmem:[#allocation11 + $0x358] sm:$0xf]  ;;  %v10514_v15 = vld [vmem:[#allocation11 + $0x320] sm:$0xf] }
 0x461   :  { %v12293_v34 = vld [vmem:[#allocation11 + $0x338] sm:$0xf0] }
 0x462   :  { %5334 = vmatpush.bf16.msra.mxu1 %v10291_v11  ;;  %5360 = vmatpush.bf16.msra.mxu3 %v10295_v24  ;;  %v4495_v27 = vadd.f32 %v13870_v13, %v4494_v29  ;;  %v10178_v11 = vld [vmem:[#allocation11 + $0x80] sm:$0xf]  ;;  %v12209_v24 = vld [vmem:[#allocation11 + $0x98] sm:$0xf0]  ;;  %v10155_v29 = vor.u32 %v12199_v7, %v10152_v55  ;;  %v10458_v7 = vld [vmem:[#allocation11 + $0x2b0] sm:$0xf] }
 0x463   :  { %v12279_v55 = vld [vmem:[#allocation11 + $0x2c8] sm:$0xf0] }
 0x464   :  { %v4499_v4 = vsel %vm13906_vm6, %v13870_v13, %v4495_v27  ;;  %v10179_v13 = vor.u32 %v12209_v24, %v10178_v11  ;;  %v12297_v27 = vld [vmem:[#allocation11 + $0x35c] sm:$0xf]  ;;  %v10515_v11 = vor.u32 %v12293_v34, %v10514_v15 }
 0x465   :  { %v4504_v14 = vsel %vm4501_vm7, %v4503_v1, %v4499_v4  ;;  %v10271_v4 = vor.u32 %v12231_v37, %v10270_v22  ;;  %v10486_v1 = vld [vmem:[#allocation11 + $0x2e8] sm:$0xf]  ;;  %v12258_v22 = vld [vmem:[#allocation11 + $0x220] sm:$0xf0]  ;;  %v12255_v37 = vld [vmem:[#allocation11 + $0x20c] sm:$0xf] }
 0x466   :  { %5335 = vmatpush.bf16.msra.mxu1 %v10263_v31  ;;  %5361 = vmatpush.bf16.msra.mxu3 %v10267_v46  ;;  %v4509_v25 = vsub.f32 1.0, %v4504_v14  ;;  %v4511_v59 = vmul.f32 %v4504_v14, %v13765_v9  ;;  %v12195_v31 = vld [vmem:[#allocation11 + $0x28] sm:$0xf0]  ;;  %v12192_v46 = vld [vmem:[#allocation11 + $0x14] sm:$0xf]  ;;  %v10487_v23 = vor.u32 %v12286_v56, %v10486_v1 }
 0x467   :  { %v4405_v8 = vpop.f32.mrf.mxu0  ;;  %v10123_v50 = vor.u32 %v12195_v31, %v10122_v10  ;;  %v10127_v9 = vor.u32 %v12192_v46, %v10124_v33  ;;  %v10430_v31 = vld [vmem:[#allocation11 + $0x278] sm:$0xf]  ;;  %v12272_v46 = vld [vmem:[#allocation11 + $0x290] sm:$0xf0]  ;;  %v12269_v33 = vld [vmem:[#allocation11 + $0x27c] sm:$0xf] }
 0x468   :  { %v4406_v54 = vadd.f32 %v4405_v8, %v4393_v44  ;;  %v10326_v44 = vld [vmem:[#allocation11 + $0x1a0] sm:$0xf] }
 0x469   :  { %v10327_v35 = vor.u32 %v12245_v2, %v10326_v44  ;;  %v10432_v44 = vld [vmem:[#allocation11 + $0x294] sm:$0xf0] }
 0x46a   :  { %v4506_v47 = vmul.f32 %v4485_v0, %v4406_v54  ;;  %5336 = vmatpush.bf16.msra.mxu1 %v10235_v52  ;;  %5362 = vmatpush.bf16.msra.mxu3 %v10239_v6  ;;  %v12300_v52 = vld [vmem:[#allocation11 + $0x370] sm:$0xf0]  ;;  %v10544_v0 = vld [vmem:[#allocation11 + $0x374] sm:$0xf0]  ;;  %v10299_v6 = vor.u32 %v12238_v60, %v10298_v21  ;;  %v12265_v21 = vld [vmem:[#allocation11 + $0x258] sm:$0xf0] }
 0x46b   :  { %v12262_v60 = vld [vmem:[#allocation11 + $0x244] sm:$0xf] }
 0x46c   :  { %v4507_v53 = vadd.f32 %v4506_v47, %v4380_v30  ;;  %v10543_v30 = vor.u32 %v12300_v52, %v10542_v45  ;;  %v10547_v47 = vor.u32 %v12297_v27, %v10544_v0  ;;  %v10404_v45 = vld [vmem:[#allocation11 + $0x25c] sm:$0xf0]  ;;  %v10130_v52 = vld [vmem:[#allocation11 + $0x18] sm:$0xf]  ;;  %v12196_v27 = vld [vmem:[#allocation11 + $0x30] sm:$0xf0] }
 0x46d   :  { %5289 = vmatmul.bf16.vlgmr.msrb.gmra.mxu1 %v13872_v12  ;;  %5315 = vmatmul.bf16.vlgmr.msrb.gmra.mxu3 %v13872_v12 }
 0x46e   :  { %12692 = vtanh.f32 %v4507_v53  ;;  %5337 = vmatpush.bf16.msra.mxu1 %v10207_v28  ;;  %5363 = vmatpush.bf16.msra.mxu3 %v10211_v20  ;;  %v10516_v53 = vld [vmem:[#allocation11 + $0x33c] sm:$0xf0]  ;;  %v10242_v28 = vld [vmem:[#allocation11 + $0xf8] sm:$0xf]  ;;  %v12224_v20 = vld [vmem:[#allocation11 + $0x110] sm:$0xf0] }
 0x46f   :  { %v4407_v16 = vpop.f32.mrf.mxu0  ;;  %v10519_v24 = vor.u32 %v12290_v62, %v10516_v53  ;;  %v10243_v14 = vor.u32 %v12224_v20, %v10242_v28  ;;  %v10346_v62 = vld [vmem:[#allocation11 + $0x1d0] sm:$0xf]  ;;  %v12251_v53 = vld [vmem:[#allocation11 + $0x1e8] sm:$0xf0]  ;;  %v10550_v20 = vld [vmem:[#allocation11 + $0x360] sm:$0xf] }
 0x470   :  { %v10488_v16 = vld [vmem:[#allocation11 + $0x304] sm:$0xf0]  ;;  %v10348_v28 = vld [vmem:[#allocation11 + $0x1ec] sm:$0xf0] }
 0x471   :  { %v10491_v38 = vor.u32 %v12283_v57, %v10488_v16  ;;  %v10522_v57 = vld [vmem:[#allocation11 + $0x328] sm:$0xf]  ;;  %v12294_v16 = vld [vmem:[#allocation11 + $0x340] sm:$0xf0] }
 0x472   :  { %5338 = vmatpush.bf16.msra.mxu1 %v10179_v13  ;;  %5364 = vmatpush.bf16.msra.mxu3 %v10183_v43  ;;  %v10214_v13 = vld [vmem:[#allocation11 + $0xc0] sm:$0xf]  ;;  %v12217_v43 = vld [vmem:[#allocation11 + $0xd8] sm:$0xf0] }
 0x474   :  { %v12693_v49 = vpop.eup %12692 }
 0x475   :  { %v4510_v51 = vmul.f32 %v12693_v49, %v4509_v25  ;;  %v12276_v25 = vld [vmem:[#allocation11 + $0x2b4] sm:$0xf]  ;;  %v10460_v49 = vld [vmem:[#allocation11 + $0x2cc] sm:$0xf0] }
 0x476   :  { %5339 = vmatpush.bf16.msra.mxu1 %v10151_v3  ;;  %5365 = vmatpush.bf16.msra.mxu3 %v10155_v29  ;;  %v10215_v3 = vor.u32 %v12217_v43, %v10214_v13  ;;  %v10459_v29 = vor.u32 %v12279_v55, %v10458_v7  ;;  %v10463_v10 = vor.u32 %v12276_v25, %v10460_v49  ;;  %v10494_v13 = vld [vmem:[#allocation11 + $0x2f0] sm:$0xf]  ;;  %v12287_v43 = vld [vmem:[#allocation11 + $0x308] sm:$0xf0]  ;;  %v12280_v7 = vld [vmem:[#allocation11 + $0x2d0] sm:$0xf0] }
 0x477   :  { %v13916_v32 = vadd.f32 %v4511_v59, %v4510_v51  ;;  %v10186_v51 = vld [vmem:[#allocation11 + $0x88] sm:$0xf]  ;;  %v12210_v59 = vld [vmem:[#allocation11 + $0xa0] sm:$0xf0]  ;;  %v12273_v25 = vld [vmem:[#allocation11 + $0x298] sm:$0xf0] }
 0x478   :  { %v10187_v2 = vor.u32 %v12210_v59, %v10186_v51  ;;  %v12266_v51 = vld [vmem:[#allocation11 + $0x260] sm:$0xf0] }
 0x479   :  { %4513 = vst [vmem:[#allocation14 + $0x3] sm:$0x1] %v13916_v32  ;;  %v4515_v42 = vpack.c.bf16 %v13916_v32, %v13916_v32 }
 0x47a   :  { %5340 = vmatpush.bf16.msra.mxu1 %v10123_v50  ;;  %5366 = vmatpush.bf16.msra.mxu3 %v10127_v9  ;;  %v12203_v50 = vld [vmem:[#allocation11 + $0x68] sm:$0xf0]  ;;  %v10431_v9 = vor.u32 %v12272_v46, %v10430_v31  ;;  %v10354_v46 = vld [vmem:[#allocation11 + $0x1d8] sm:$0xf] }
 0x47b   :  { %v4517_v8 = vunpack.c.l.b16 %v4515_v42  ;;  %v10158_v42 = vld [vmem:[#allocation11 + $0x50] sm:$0xf] }
 0x47d   :  { %v4518_v54 = vpack.c.b16 %v4517_v8, %v4517_v8  ;;  %5341 = vmatmul.bf16.vlgmr.msra.gmra.mxu1 %v13872_v12  ;;  %5367 = vmatmul.bf16.vlgmr.msra.gmra.mxu3 %v13872_v12  ;;  %v10402_v8 = vld [vmem:[#allocation11 + $0x240] sm:$0xf] }
 0x47e   :  { %5385 = vmatpush.bf16.msrb.mxu1 %v10327_v35  ;;  %v10435_v35 = vor.u32 %v12269_v33, %v10432_v44  ;;  %v10403_v0 = vor.u32 %v12265_v21, %v10402_v8  ;;  %v12252_v33 = vld [vmem:[#allocation11 + $0x1f0] sm:$0xf0]  ;;  %v12351_v21 = vld [vmem:[#allocation11 + $0x18c] sm:$0xf] }
 0x47f   :  { %v4519_v41 = vrot.slane %v4518_v54, 6  ;;  %v10159_v54 = vor.u32 %v12203_v50, %v10158_v42  ;;  %v10355_v44 = vor.u32 %v12252_v33, %v10354_v46  ;;  %v12309_v33 = vld [vmem:[#allocation11 + $0x3c] sm:$0xf] }
 0x481   :  { %v13923_v26 = vrot.slane %v4519_v41, 2  ;;  %v10374_v41 = vld [vmem:[#allocation11 + $0x208] sm:$0xf] }
 0x482   :  { %5386 = vmatpush.bf16.msrb.mxu1 %v10299_v6  ;;  %v10407_v6 = vor.u32 %v12262_v60, %v10404_v45  ;;  %v10375_v15 = vor.u32 %v12258_v22, %v10374_v41  ;;  %v10756_v60 = vld [vmem:[#allocation11 + $0x1a4] sm:$0xf0]  ;;  %v10728_v41 = vld [vmem:[#allocation11 + $0x16c] sm:$0xf0] }
 0x483   :  { %5250 = vmatmul.bf16.vlgmr.msra.gmra.mxu2 %v13923_v26  ;;  %5276 = vmatmul.bf16.vlgmr.msrb.gmra.mxu0 %v13923_v26  ;;  %v10759_v45 = vor.u32 %v12351_v21, %v10756_v60  ;;  %v10558_v21 = vld [vmem:[#allocation11] sm:$0xf]  ;;  %v12305_v60 = vld [vmem:[#allocation11 + $0x18] sm:$0xf0] }
 0x484   :  { %5346 = vmatpush.bf16.msra.mxu2 %v10543_v30  ;;  %5372 = vmatpush.bf16.msrb.mxu0 %v10547_v47  ;;  %v10376_v30 = vld [vmem:[#allocation11 + $0x224] sm:$0xf0]  ;;  %v10131_v47 = vor.u32 %v12196_v27, %v10130_v52  ;;  %v10726_v52 = vld [vmem:[#allocation11 + $0x150] sm:$0xf]  ;;  %v12347_v27 = vld [vmem:[#allocation11 + $0x168] sm:$0xf0] }
 0x485   :  { %v10379_v34 = vor.u32 %v12255_v37, %v10376_v30  ;;  %v10698_v37 = vld [vmem:[#allocation11 + $0x118] sm:$0xf]  ;;  %v12340_v30 = vld [vmem:[#allocation11 + $0x130] sm:$0xf0] }
 0x486   :  { %5387 = vmatpush.bf16.msrb.mxu1 %v10271_v4  ;;  %v12248_v4 = vld [vmem:[#allocation11 + $0x1d4] sm:$0xf] }
 0x487   :  { %v10351_v1 = vor.u32 %v12248_v4, %v10348_v28  ;;  %v10670_v4 = vld [vmem:[#allocation11 + $0xe0] sm:$0xf]  ;;  %v12333_v28 = vld [vmem:[#allocation11 + $0xf8] sm:$0xf0] }
 0x488   :  { %5347 = vmatpush.bf16.msra.mxu2 %v10515_v11  ;;  %5373 = vmatpush.bf16.msrb.mxu0 %v10519_v24  ;;  %v12301_v11 = vld [vmem:[#allocation11 + $0x378] sm:$0xf0]  ;;  %v10347_v24 = vor.u32 %v12251_v53, %v10346_v62 }
 0x489   :  { %v10551_v56 = vor.u32 %v12301_v11, %v10550_v20  ;;  %v10671_v20 = vor.u32 %v12333_v28, %v10670_v4  ;;  %v12330_v11 = vld [vmem:[#allocation11 + $0xe4] sm:$0xf] }
 0x48a   :  { %5388 = vmatpush.bf16.msrb.mxu1 %v10243_v14  ;;  %v10523_v14 = vor.u32 %v12294_v16, %v10522_v57  ;;  %v10642_v57 = vld [vmem:[#allocation11 + $0xa8] sm:$0xf]  ;;  %v12326_v16 = vld [vmem:[#allocation11 + $0xc0] sm:$0xf0] }
 0x48c   :  { %5348 = vmatpush.bf16.msra.mxu2 %v10487_v23  ;;  %5374 = vmatpush.bf16.msrb.mxu0 %v10491_v38  ;;  %v10495_v23 = vor.u32 %v12287_v43, %v10494_v13  ;;  %v10466_v38 = vld [vmem:[#allocation11 + $0x2b8] sm:$0xf]  ;;  %v12323_v13 = vld [vmem:[#allocation11 + $0xac] sm:$0xf]  ;;  %v10644_v43 = vld [vmem:[#allocation11 + $0xc4] sm:$0xf0] }
 0x48d   :  { %v10467_v55 = vor.u32 %v12280_v7, %v10466_v38  ;;  %v10614_v7 = vld [vmem:[#allocation11 + $0x70] sm:$0xf] }
 0x48e   :  { %5389 = vmatpush.bf16.msrb.mxu1 %v10215_v3  ;;  %v10410_v3 = vld [vmem:[#allocation11 + $0x248] sm:$0xf] }
 0x48f   :  { %v10411_v59 = vor.u32 %v12266_v51, %v10410_v3 }
 0x490   :  { %5349 = vmatpush.bf16.msra.mxu2 %v10459_v29  ;;  %5375 = vmatpush.bf16.msrb.mxu0 %v10463_v10  ;;  %v10382_v29 = vld [vmem:[#allocation11 + $0x210] sm:$0xf]  ;;  %v12259_v10 = vld [vmem:[#allocation11 + $0x228] sm:$0xf0] }
 0x491   :  { %v10383_v31 = vor.u32 %v12259_v10, %v10382_v29  ;;  %v10586_v29 = vld [vmem:[#allocation11 + $0x38] sm:$0xf]  ;;  %v12312_v10 = vld [vmem:[#allocation11 + $0x50] sm:$0xf0] }
 0x492   :  { %5390 = vmatpush.bf16.msrb.mxu1 %v10187_v2  ;;  %v10587_v46 = vor.u32 %v12312_v10, %v10586_v29  ;;  %v10708_v10 = vld [vmem:[#allocation11 + $0x13c] sm:$0xf0] }
 0x493   :  { %5302 = vmatmul.bf16.vlgmr.msrb.gmra.mxu2 %v13923_v26  ;;  %5328 = vmatmul.bf16.vlgmr.msra.gmra.mxu0 %v13923_v26 }
 0x494   :  { %5350 = vmatpush.bf16.msra.mxu2 %v10431_v9  ;;  %5376 = vmatpush.bf16.msrb.mxu0 %v10435_v35  ;;  %v10754_v9 = vld [vmem:[#allocation11 + $0x188] sm:$0xf]  ;;  %v12354_v35 = vld [vmem:[#allocation11 + $0x1a0] sm:$0xf0] }
 0x495   :  { %v10755_v8 = vor.u32 %v12354_v35, %v10754_v9 }
 0x496   :  { %5391 = vmatpush.bf16.msrb.mxu1 %v10159_v54 }
 0x497   :  { %6239 = vmatpush.bf16.msrb.mxu3 %v10755_v8 }
 0x498   :  { %5351 = vmatpush.bf16.msra.mxu2 %v10403_v0  ;;  %5377 = vmatpush.bf16.msrb.mxu0 %v10407_v6  ;;  %v10727_v0 = vor.u32 %v12347_v27, %v10726_v52  ;;  %v12344_v6 = vld [vmem:[#allocation11 + $0x154] sm:$0xf]  ;;  %v10560_v52 = vld [vmem:[#allocation11 + $0x1c] sm:$0xf0] }
 0x49a   :  { %5392 = vmatpush.bf16.msrb.mxu1 %v10131_v47  ;;  %v10699_v47 = vor.u32 %v12340_v30, %v10698_v37  ;;  %v12352_v37 = vld [vmem:[#allocation11 + $0x194] sm:$0xf]  ;;  %v10764_v30 = vld [vmem:[#allocation11 + $0x1ac] sm:$0xf0] }
 0x49b   :  { %6240 = vmatpush.bf16.msrb.mxu3 %v10727_v0 }
 0x49c   :  { %5352 = vmatpush.bf16.msra.mxu2 %v10375_v15  ;;  %5378 = vmatpush.bf16.msrb.mxu0 %v10379_v34  ;;  %v12337_v15 = vld [vmem:[#allocation11 + $0x11c] sm:$0xf]  ;;  %v10700_v34 = vld [vmem:[#allocation11 + $0x134] sm:$0xf0] }
 0x49d   :  { %5393 = vmatmul.bf16.vlgmr.msrb.gmra.mxu1 %v13872_v12  ;;  %v10438_v12 = vld [vmem:[#allocation11 + $0x280] sm:$0xf]  ;;  %v10703_v62 = vor.u32 %v12337_v15, %v10700_v34  ;;  %v10767_v34 = vor.u32 %v12352_v37, %v10764_v30  ;;  %v12396_v37 = vld [vmem:[#allocation11 + $0x2f0] sm:$0xf0] }
 0x49e   :  { %v10439_v49 = vor.u32 %v12273_v25, %v10438_v12  ;;  %6265 = vmatpush.bf16.msra.mxu1 %v10759_v45  ;;  %v12316_v25 = vld [vmem:[#allocation11 + $0x74] sm:$0xf]  ;;  %v10559_v45 = vor.u32 %v12305_v60, %v10558_v21  ;;  %v10952_v60 = vld [vmem:[#allocation11 + $0x32c] sm:$0xf0] }
 0x49f   :  { %6241 = vmatpush.bf16.msrb.mxu3 %v10699_v47  ;;  %v12400_v21 = vld [vmem:[#allocation11 + $0x314] sm:$0xf] }
 0x4a0   :  { %5353 = vmatpush.bf16.msra.mxu2 %v10347_v24  ;;  %5379 = vmatpush.bf16.msrb.mxu0 %v10351_v1  ;;  %v10672_v24 = vld [vmem:[#allocation11 + $0xfc] sm:$0xf0] }
 0x4a3   :  { %5354 = vmatmul.bf16.vlgmr.msra.gmra.mxu2 %v13923_v26  ;;  %5380 = vmatmul.bf16.vlgmr.msrb.gmra.mxu0 %v13923_v26 }
 0x4a4   :  { %5398 = vmatpush.bf16.msrb.mxu2 %v10551_v56  ;;  %v10675_v56 = vor.u32 %v12330_v11, %v10672_v24  ;;  %6242 = vmatpush.bf16.msrb.mxu3 %v10671_v20  ;;  %v10734_v20 = vld [vmem:[#allocation11 + $0x158] sm:$0xf]  ;;  %v12348_v11 = vld [vmem:[#allocation11 + $0x170] sm:$0xf0] }
 0x4a5   :  { %v10735_v24 = vor.u32 %v12348_v11, %v10734_v20  ;;  %v12327_v20 = vld [vmem:[#allocation11 + $0xc8] sm:$0xf0] }
 0x4a8   :  { %5399 = vmatpush.bf16.msrb.mxu2 %v10523_v14  ;;  %v10643_v14 = vor.u32 %v12326_v16, %v10642_v57 }
 0x4aa   :  { %6243 = vmatpush.bf16.msrb.mxu3 %v10643_v14 }
 0x4ac   :  { %5400 = vmatpush.bf16.msrb.mxu2 %v10495_v23  ;;  %v10647_v23 = vor.u32 %v12323_v13, %v10644_v43  ;;  %v10978_v13 = vld [vmem:[#allocation11 + $0x348] sm:$0xf]  ;;  %v12410_v43 = vld [vmem:[#allocation11 + $0x360] sm:$0xf0] }
 0x4b0   :  { %5401 = vmatpush.bf16.msrb.mxu2 %v10467_v55  ;;  %v12319_v55 = vld [vmem:[#allocation11 + $0x88] sm:$0xf0] }
 0x4b1   :  { %v10615_v12 = vor.u32 %v12319_v55, %v10614_v7  ;;  %v10980_v7 = vld [vmem:[#allocation11 + $0x364] sm:$0xf0]  ;;  %v10706_v55 = vld [vmem:[#allocation11 + $0x120] sm:$0xf] }
 0x4b3   :  { %6244 = vmatpush.bf16.msrb.mxu3 %v10615_v12 }
 0x4b4   :  { %5402 = vmatpush.bf16.msrb.mxu2 %v10439_v49  ;;  %v10616_v49 = vld [vmem:[#allocation11 + $0x8c] sm:$0xf0] }
 0x4b5   :  { %v10619_v51 = vor.u32 %v12316_v25, %v10616_v49  ;;  %v12341_v49 = vld [vmem:[#allocation11 + $0x138] sm:$0xf0] }
 0x4b6   :  { %v10707_v29 = vor.u32 %v12341_v49, %v10706_v55  ;;  %v10622_v55 = vld [vmem:[#allocation11 + $0x78] sm:$0xf]  ;;  %v12320_v49 = vld [vmem:[#allocation11 + $0x90] sm:$0xf0] }
 0x4b7   :  { %6245 = vmatpush.bf16.msrb.mxu3 %v10587_v46 }
 0x4b8   :  { %5403 = vmatpush.bf16.msrb.mxu2 %v10411_v59 }
 0x4bb   :  { %6246 = vmatpush.bf16.msrb.mxu3 %v10559_v45  ;;  %v10955_v45 = vor.u32 %v12400_v21, %v10952_v60  ;;  %v10594_v21 = vld [vmem:[#allocation11 + $0x40] sm:$0xf]  ;;  %v12313_v60 = vld [vmem:[#allocation11 + $0x58] sm:$0xf0] }
 0x4bc   :  { %5404 = vmatpush.bf16.msrb.mxu2 %v10383_v31 }
 0x4c0   :  { %5405 = vmatpush.bf16.msrb.mxu2 %v10355_v44  ;;  %v10588_v44 = vld [vmem:[#allocation11 + $0x54] sm:$0xf0] }
 0x4c1   :  { %v10591_v9 = vor.u32 %v12309_v33, %v10588_v44  ;;  %v10950_v33 = vld [vmem:[#allocation11 + $0x310] sm:$0xf]  ;;  %v12403_v44 = vld [vmem:[#allocation11 + $0x328] sm:$0xf0] }
 0x4c3   :  { %5406 = vmatmul.bf16.vlgmr.msrb.gmra.mxu2 %v13923_v26  ;;  %v10731_v26 = vor.u32 %v12344_v6, %v10728_v41 }
 0x4c5   :  { %6266 = vmatpush.bf16.msra.mxu1 %v10731_v26  ;;  %v12355_v26 = vld [vmem:[#allocation11 + $0x1a8] sm:$0xf0] }
 0x4c9   :  { %6267 = vmatpush.bf16.msra.mxu1 %v10703_v62 }
 0x4cd   :  { %6268 = vmatpush.bf16.msra.mxu1 %v10675_v56  ;;  %v10736_v56 = vld [vmem:[#allocation11 + $0x174] sm:$0xf0] }
 0x4d1   :  { %6269 = vmatpush.bf16.msra.mxu1 %v10647_v23  ;;  %v10979_v23 = vor.u32 %v12410_v43, %v10978_v13  ;;  %v12386_v43 = vld [vmem:[#allocation11 + $0x2a4] sm:$0xf] }
 0x4d3   :  { %6252 = vmatpush.bf16.msra.mxu0 %v10979_v23 }
 0x4d5   :  { %6270 = vmatpush.bf16.msra.mxu1 %v10619_v51  ;;  %v12338_v51 = vld [vmem:[#allocation11 + $0x124] sm:$0xf] }
 0x4d6   :  { %v10711_v46 = vor.u32 %v12338_v51, %v10708_v10  ;;  %v12317_v51 = vld [vmem:[#allocation11 + $0x7c] sm:$0xf]  ;;  %v10866_v10 = vld [vmem:[#allocation11 + $0x268] sm:$0xf] }
 0x4d9   :  { %6271 = vmatpush.bf16.msra.mxu1 %v10591_v9 }
 0x4da   :  { %v13933_v2 = vpop.f32.mrf.mxu1 }
 0x4db   :  { %v5239_v27 = vadd.f32 %v13933_v2, %v13249_v63 }
 0x4e0   :  { %v5264_v42 = vpop.f32.mrf.mxu3 }
 0x4e1   :  { %v5265_v59 = vadd.f32 %v5264_v42, %v13259_v58  ;;  %v10762_v42 = vld [vmem:[#allocation11 + $0x190] sm:$0xf] }
 0x4e2   :  { %v5240_v50 = vpop.f32.mrf.mxu1  ;;  %v10763_v15 = vor.u32 %v12355_v26, %v10762_v42  ;;  %v12331_v42 = vld [vmem:[#allocation11 + $0xec] sm:$0xf]  ;;  %v10922_v26 = vld [vmem:[#allocation11 + $0x2d8] sm:$0xf] }
 0x4e4   :  { %6291 = vmatpush.bf16.msra.mxu3 %v10763_v15  ;;  %v12393_v15 = vld [vmem:[#allocation11 + $0x2dc] sm:$0xf] }
 0x4e8   :  { %v5266_v54 = vpop.f32.mrf.mxu3  ;;  %6292 = vmatpush.bf16.msra.mxu3 %v10735_v24 }
 0x4e9   :  { %v12302_v54 = vld [vmem:[#allocation11 + $0x4] sm:$0xf] }
 0x4ea   :  { %v13935_v22 = vpop.f32.mrf.mxu1  ;;  %v10563_v41 = vor.u32 %v12302_v54, %v10560_v52  ;;  %v10678_v54 = vld [vmem:[#allocation11 + $0xe8] sm:$0xf]  ;;  %v12334_v52 = vld [vmem:[#allocation11 + $0x100] sm:$0xf0] }
 0x4ec   :  { %6272 = vmatpush.bf16.msra.mxu1 %v10563_v41  ;;  %6293 = vmatpush.bf16.msra.mxu3 %v10707_v29  ;;  %v10624_v29 = vld [vmem:[#allocation11 + $0x94] sm:$0xf0] }
 0x4f0   :  { %v13937_v53 = vpop.f32.mrf.mxu3  ;;  %6317 = vmatpush.bf16.msrb.mxu1 %v10767_v34  ;;  %v10924_v34 = vld [vmem:[#allocation11 + $0x2f4] sm:$0xf0] }
 0x4f2   :  { %v5292_v1 = vpop.f32.mrf.mxu1 }
 0x4f3   :  { %v12345_v1 = vld [vmem:[#allocation11 + $0x15c] sm:$0xf] }
 0x4f4   :  { %v10739_v57 = vor.u32 %v12345_v1, %v10736_v56  ;;  %v10652_v1 = vld [vmem:[#allocation11 + $0xcc] sm:$0xf0] }
 0x4f6   :  { %6318 = vmatpush.bf16.msrb.mxu1 %v10739_v57  ;;  %v10894_v57 = vld [vmem:[#allocation11 + $0x2a0] sm:$0xf] }
 0x4f8   :  { %v5318_v38 = vpop.f32.mrf.mxu3 }
 0x4f9   :  { %v12407_v38 = vld [vmem:[#allocation11 + $0x34c] sm:$0xf] }
 0x4fa   :  { %v13939_v3 = vpop.f32.mrf.mxu1  ;;  %v10983_v25 = vor.u32 %v12407_v38, %v10980_v7  ;;  %6319 = vmatpush.bf16.msrb.mxu1 %v10711_v46  ;;  %v10896_v7 = vld [vmem:[#allocation11 + $0x2bc] sm:$0xf0]  ;;  %v10627_v46 = vor.u32 %v12317_v51, %v10624_v29 }
 0x4fc   :  { %6278 = vmatpush.bf16.msra.mxu2 %v10983_v25  ;;  %v10899_v25 = vor.u32 %v12386_v43, %v10896_v7 }
 0x500   :  { %v5277_v31 = vpop.f32.mrf.mxu0  ;;  %v13942_v8 = vpop.f32.mrf.mxu3  ;;  %6279 = vmatpush.bf16.msra.mxu2 %v10955_v45 }
 0x501   :  { %v5278_v50 = vadd.f32 %v5277_v31, %v5265_v59 }
 0x502   :  { %v5344_v6 = vpop.f32.mrf.mxu1 }
 0x503   :  { %v5435_v35 = vrot.slane %v5278_v50, 3  ;;  %v10679_v6 = vor.u32 %v12334_v52, %v10678_v54 }
 0x505   :  { %v5437_v0 = vadd.f32 %v5435_v35, %v13266_v61  ;;  %v10951_v35 = vor.u32 %v12403_v44, %v10950_v33  ;;  %6294 = vmatpush.bf16.msra.mxu3 %v10679_v6  ;;  %v12382_v33 = vld [vmem:[#allocation11 + $0x280] sm:$0xf0]  ;;  %v12379_v44 = vld [vmem:[#allocation11 + $0x26c] sm:$0xf] }
 0x506   :  { %v5251_v47 = vpop.f32.mrf.mxu2 }
 0x507   :  { %v10553_v62 = vmul.f32 -1.442695, %v5437_v0  ;;  %v5252_v4 = vadd.f32 %v5251_v47, %v5239_v27  ;;  %v5317_v27 = vadd.f32 %v13937_v53, %v13338_v17  ;;  %6253 = vmatpush.bf16.msra.mxu0 %v10951_v35  ;;  %v10680_v0 = vld [vmem:[#allocation11 + $0x104] sm:$0xf0]  ;;  %v10923_v47 = vor.u32 %v12396_v37, %v10922_v26  ;;  %v12324_v53 = vld [vmem:[#allocation11 + $0xb4] sm:$0xf] }
 0x508   :  { %v5279_v28 = vpop.f32.mrf.mxu0  ;;  %v5370_v14 = vpop.f32.mrf.mxu3  ;;  %v10683_v41 = vor.u32 %v12331_v42, %v10680_v0  ;;  %v10655_v56 = vor.u32 %v12324_v53, %v10652_v1  ;;  %v10868_v35 = vld [vmem:[#allocation11 + $0x284] sm:$0xf0]  ;;  %v10595_v42 = vor.u32 %v12313_v60, %v10594_v21  ;;  %v10596_v0 = vld [vmem:[#allocation11 + $0x5c] sm:$0xf0]  ;;  %v10838_v26 = vld [vmem:[#allocation11 + $0x230] sm:$0xf] }
 0x509   :  { %12694 = vpow2.f32 %v10553_v62  ;;  %v5412_v2 = vrot.slane %v5252_v4, 3  ;;  %v10927_v4 = vor.u32 %v12393_v15, %v10924_v34  ;;  %v10650_v28 = vld [vmem:[#allocation11 + $0xb0] sm:$0xf]  ;;  %v10871_v52 = vor.u32 %v12379_v44, %v10868_v35  ;;  %v12375_v37 = vld [vmem:[#allocation11 + $0x248] sm:$0xf0] }
 0x50a   :  { %6320 = vmatpush.bf16.msrb.mxu1 %v10683_v41  ;;  %v10651_v24 = vor.u32 %v12327_v20, %v10650_v28  ;;  %v10839_v34 = vor.u32 %v12375_v37, %v10838_v26  ;;  %v10566_v53 = vld [vmem:[#allocation11 + $0x8] sm:$0xf]  ;;  %v12358_v26 = vld [vmem:[#allocation11 + $0x1c4] sm:$0xf]  ;;  %v10784_v37 = vld [vmem:[#allocation11 + $0x1dc] sm:$0xf0] }
 0x50b   :  { %v5414_v16 = vadd.f32 %v5412_v2, %v13261_v5  ;;  %6254 = vmatpush.bf16.msra.mxu0 %v10923_v47  ;;  %6280 = vmatpush.bf16.msra.mxu2 %v10927_v4  ;;  %v10840_v4 = vld [vmem:[#allocation11 + $0x24c] sm:$0xf0] }
 0x50c   :  { %6295 = vmatpush.bf16.msra.mxu3 %v10651_v24  ;;  %v12306_v24 = vld [vmem:[#allocation11 + $0x20] sm:$0xf0] }
 0x50d   :  { %v10552_v12 = vmul.f32 -1.442695, %v5414_v16  ;;  %v12389_v16 = vld [vmem:[#allocation11 + $0x2b8] sm:$0xf0] }
 0x50e   :  { %v5253_v59 = vpop.f32.mrf.mxu2  ;;  %6321 = vmatpush.bf16.msrb.mxu1 %v10655_v56  ;;  %v10895_v38 = vor.u32 %v12389_v16, %v10894_v57 }
 0x50f   :  { %v12695_v31 = vpop.eup %12694  ;;  %12696 = vpow2.f32 %v10552_v12  ;;  %v10623_v59 = vor.u32 %v12320_v49, %v10622_v55  ;;  %6281 = vmatpush.bf16.msra.mxu2 %v10899_v25  ;;  %v5343_v55 = vadd.f32 %v13939_v3, %v13355_v39  ;;  %v10810_v25 = vld [vmem:[#allocation11 + $0x1f8] sm:$0xf]  ;;  %v12368_v49 = vld [vmem:[#allocation11 + $0x210] sm:$0xf0] }
 0x510   :  { %v13948_v50 = vadd.f32 1.0, %v12695_v31  ;;  %v5329_v9 = vpop.f32.mrf.mxu0  ;;  %6255 = vmatpush.bf16.msra.mxu0 %v10895_v38  ;;  %v10811_v29 = vor.u32 %v12368_v49, %v10810_v25  ;;  %v10930_v49 = vld [vmem:[#allocation11 + $0x2e0] sm:$0xf] }
 0x511   :  { %v5330_v30 = vadd.f32 %v5329_v9, %v5317_v27  ;;  %6296 = vmatpush.bf16.msra.mxu3 %v10623_v59  ;;  %v10867_v9 = vor.u32 %v12382_v33, %v10866_v10  ;;  %v12310_v27 = vld [vmem:[#allocation11 + $0x44] sm:$0xf]  ;;  %v12365_v10 = vld [vmem:[#allocation11 + $0x1fc] sm:$0xf] }
 0x512   :  { %12698 = vrcp.f32 %v13948_v50  ;;  %6322 = vmatpush.bf16.msrb.mxu1 %v10627_v46  ;;  %v10599_v41 = vor.u32 %v12310_v27, %v10596_v0  ;;  %vm5447_vm10 = vweird.f32 %v13948_v50  ;;  %v5453_v35 = vand.u32 2147483648, %v13948_v50  ;;  %v10782_v0 = vld [vmem:[#allocation11 + $0x1c0] sm:$0xf] }
 0x513   :  { %v10554_v14 = vmul.f32 -1.442695, %v5330_v30  ;;  %v5291_v30 = vadd.f32 %v13935_v22, %v13275_v36  ;;  %6282 = vmatpush.bf16.msra.mxu2 %v10871_v52  ;;  %v12303_v22 = vld [vmem:[#allocation11 + $0xc] sm:$0xf] }
 0x514   :  { %6256 = vmatpush.bf16.msra.mxu0 %v10867_v9 }
 0x515   :  { %v12697_v62 = vpop.eup %12696  ;;  %6297 = vmatpush.bf16.msra.mxu3 %v10595_v42 }
 0x516   :  { %v13953_v11 = vadd.f32 1.0, %v12697_v62  ;;  %v5303_v2 = vpop.f32.mrf.mxu2  ;;  %v12372_v62 = vld [vmem:[#allocation11 + $0x234] sm:$0xf]  ;;  %6323 = vmatpush.bf16.msrb.mxu1 %v10599_v41 }
 0x517   :  { %v10843_v20 = vor.u32 %v12372_v62, %v10840_v4  ;;  %v5304_v56 = vadd.f32 %v5303_v2, %v5291_v30  ;;  %v10986_v30 = vld [vmem:[#allocation11 + $0x350] sm:$0xf]  ;;  %v12411_v62 = vld [vmem:[#allocation11 + $0x368] sm:$0xf0] }
 0x518   :  { %12700 = vrcp.f32 %v13953_v11  ;;  %v5331_v13 = vpop.f32.mrf.mxu0  ;;  %v13956_v23 = vpop.eup %12698  ;;  %v5430_v57 = vand.u32 2147483648, %v13953_v11  ;;  %v5428_v38 = vand.u32 2147483647, %v13953_v11  ;;  %6257 = vmatpush.bf16.msra.mxu0 %v10839_v34  ;;  %vm5424_vm9 = vweird.f32 %v13953_v11  ;;  %v10988_v4 = vld [vmem:[#allocation11 + $0x36c] sm:$0xf0] }
 0x519   :  { %v5443_v31 = vmul.f32 %v13956_v23, %v13948_v50  ;;  %12702 = vpow2.f32 %v10554_v14  ;;  %v10567_v14 = vor.u32 %v12306_v24, %v10566_v53  ;;  %v10568_v13 = vld [vmem:[#allocation11 + $0x24] sm:$0xf0]  ;;  %6283 = vmatpush.bf16.msra.mxu2 %v10843_v20  ;;  %vm5448_vm11 = vweird.f32 %v13956_v23 }
 0x51a   :  { %v13958_v12 = vpop.f32.mrf.mxu1  ;;  %v10571_v7 = vor.u32 %v12303_v22, %v10568_v13  ;;  %v5431_v3 = vor.u32 1.1754944e-38, %v5430_v57  ;;  %vm5429_vm13 = vcmp.eq.f32.partialorder %v5428_v38, 8.507059e+37  ;;  %v5458_v9 = vrot.slane %v5304_v56, 3  ;;  %vm13993_vm14 = vmor %vm5447_vm10, %vm5448_vm11  ;;  %v10958_v56 = vld [vmem:[#allocation11 + $0x318] sm:$0xf] }
 0x51b   :  { %v5444_v47 = vsub.f32 1.0, %v5443_v31  ;;  %6298 = vmatpush.bf16.msra.mxu3 %v10567_v14  ;;  %v10812_v31 = vld [vmem:[#allocation11 + $0x214] sm:$0xf0]  ;;  %v10787_v34 = vor.u32 %v12358_v26, %v10784_v37  ;;  %v10987_v20 = vor.u32 %v12411_v62, %v10986_v30  ;;  %v5454_v24 = vor.u32 1.1754944e-38, %v5453_v35  ;;  %v12404_v57 = vld [vmem:[#allocation11 + $0x330] sm:$0xf0] }
 0x51c   :  { %6324 = vmatpush.bf16.msrb.mxu1 %v10571_v7  ;;  %v10815_v33 = vor.u32 %v12365_v10, %v10812_v31  ;;  %6258 = vmatpush.bf16.msra.mxu0 %v10811_v29  ;;  %v10959_v22 = vor.u32 %v12404_v57, %v10958_v56  ;;  %v12401_v13 = vld [vmem:[#allocation11 + $0x31c] sm:$0xf]  ;;  %v5466_v7 = vrot.slane %v13866_v48, 7  ;;  %v12394_v31 = vld [vmem:[#allocation11 + $0x2e4] sm:$0xf] }
 0x51d   :  { %v5445_v2 = vmul.f32 %v13956_v23, %v5444_v47  ;;  %v12390_v35 = vld [vmem:[#allocation11 + $0x2c0] sm:$0xf0]  ;;  %v10742_v30 = vld [vmem:[#allocation11 + $0x160] sm:$0xf] }
 0x51e   :  { %v13962_v45 = vpop.eup %12700  ;;  %v5305_v54 = vpop.f32.mrf.mxu2  ;;  %6284 = vmatpush.bf16.msra.mxu2 %v10815_v33  ;;  %v10744_v56 = vld [vmem:[#allocation11 + $0x17c] sm:$0xf0] }
 0x51f   :  { %v5420_v6 = vmul.f32 %v13962_v45, %v13953_v11  ;;  %v12703_v1 = vpop.eup %12702  ;;  %vm5425_vm8 = vweird.f32 %v13962_v45  ;;  %v5446_v60 = vadd.f32 %v13956_v23, %v5445_v2  ;;  %v5451_v54 = vand.u32 2147483647, %v13948_v50  ;;  %v12408_v50 = vld [vmem:[#allocation11 + $0x354] sm:$0xf] }
 0x520   :  { %v13968_v15 = vpop.f32.mrf.mxu0  ;;  %v13977_v51 = vadd.f32 1.0, %v12703_v1  ;;  %vm5426_vm12 = vmor %vm5424_vm9, %vm5425_vm8  ;;  %v10991_v53 = vor.u32 %v12408_v50, %v10988_v4 }
 0x521   :  { %v5421_v28 = vsub.f32 1.0, %v5420_v6  ;;  %v12361_v6 = vld [vmem:[#allocation11 + $0x1d8] sm:$0xf0]  ;;  %vm5452_vm15 = vcmp.eq.f32.partialorder %v5451_v54, 8.507059e+37  ;;  %v12387_v54 = vld [vmem:[#allocation11 + $0x2ac] sm:$0xf] }
 0x522   :  { %v5396_v16 = vpop.f32.mrf.mxu1  ;;  %12704 = vrcp.f32 %v13977_v51  ;;  %v10783_v41 = vor.u32 %v12361_v6, %v10782_v0  ;;  %6285 = vmatpush.bf16.msra.mxu2 %v10787_v34  ;;  %v10772_v0 = vld [vmem:[#allocation11 + $0x1b4] sm:$0xf0]  ;;  %v12383_v34 = vld [vmem:[#allocation11 + $0x288] sm:$0xf0]  ;;  %vm5479_vm1 = vweird.f32 %v13977_v51 }
 0x523   :  { %v5422_v43 = vmul.f32 %v13962_v45, %v5421_v28  ;;  %v5450_v28 = vsel %vm13993_vm14, %v13956_v23, %v5446_v60 }
 0x524   :  { %6259 = vmatpush.bf16.msra.mxu0 %v10783_v41  ;;  %v5455_v14 = vsel %vm5452_vm15, %v5454_v24, %v5450_v28  ;;  %v12349_v28 = vld [vmem:[#allocation11 + $0x178] sm:$0xf0] }
 0x525   :  { %v5423_v59 = vadd.f32 %v13962_v45, %v5422_v43  ;;  %v10960_v43 = vld [vmem:[#allocation11 + $0x334] sm:$0xf0]  ;;  %v5468_v33 = vmul.f32 %v5466_v7, %v5455_v14  ;;  %v12376_v7 = vld [vmem:[#allocation11 + $0x250] sm:$0xf0] }
 0x526   :  { %v5355_v46 = vpop.f32.mrf.mxu2  ;;  %6330 = vmatpush.bf16.msrb.mxu2 %v10991_v53  ;;  %v10963_v38 = vor.u32 %v12401_v13, %v10960_v43  ;;  %v10876_v53 = vld [vmem:[#allocation11 + $0x28c] sm:$0xf0]  ;;  %v5483_v13 = vand.u32 2147483647, %v13977_v51 }
 0x527   :  { %v5427_v44 = vsel %vm5426_vm12, %v13962_v45, %v5423_v59  ;;  %v5356_v11 = vadd.f32 %v5355_v46, %v5343_v55  ;;  %v5463_v55 = vsub.f32 1.0, %v5455_v14  ;;  %v12397_v59 = vld [vmem:[#allocation11 + $0x2f8] sm:$0xf0] }
 0x528   :  { %v5432_v21 = vsel %vm5429_vm13, %v5431_v3, %v5427_v44  ;;  %v5383_v52 = vpop.f32.mrf.mxu0  ;;  %6304 = vmatpush.bf16.msrb.mxu0 %v10987_v20  ;;  %v14002_v16 = vpop.eup %12704  ;;  %v10931_v10 = vor.u32 %v12397_v59, %v10930_v49  ;;  %v10932_v3 = vld [vmem:[#allocation11 + $0x2fc] sm:$0xf0]  ;;  %v12380_v20 = vld [vmem:[#allocation11 + $0x274] sm:$0xf]  ;;  %v10714_v49 = vld [vmem:[#allocation11 + $0x128] sm:$0xf] }
 0x529   :  { %v5460_v45 = vmul.f32 %v5458_v9, %v5432_v21  ;;  %v10555_v27 = vmul.f32 -1.442695, %v5356_v11  ;;  %v5475_v25 = vmul.f32 %v14002_v16, %v13977_v51  ;;  %v10935_v44 = vor.u32 %v12394_v31, %v10932_v3  ;;  %v10902_v11 = vld [vmem:[#allocation11 + $0x2a8] sm:$0xf]  ;;  %v10770_v21 = vld [vmem:[#allocation11 + $0x198] sm:$0xf] }
 0x52a   :  { %6331 = vmatpush.bf16.msrb.mxu2 %v10963_v38  ;;  %v10903_v60 = vor.u32 %v12390_v35, %v10902_v11  ;;  %v10904_v52 = vld [vmem:[#allocation11 + $0x2c4] sm:$0xf0]  ;;  %v10879_v14 = vor.u32 %v12380_v20, %v10876_v53  ;;  %vm5480_vm0 = vweird.f32 %v14002_v16  ;;  %v5485_v38 = vand.u32 2147483648, %v13977_v51  ;;  %v12373_v59 = vld [vmem:[#allocation11 + $0x23c] sm:$0xf] }
 0x52b   :  { %v5461_v47 = vadd.f32 %v5460_v45, %v13288_v18  ;;  %12706 = vpow2.f32 %v10555_v27  ;;  %v5476_v9 = vsub.f32 1.0, %v5475_v25  ;;  %v12356_v45 = vld [vmem:[#allocation11 + $0x1b0] sm:$0xf0]  ;;  %v12353_v27 = vld [vmem:[#allocation11 + $0x19c] sm:$0xf]  ;;  %v10907_v6 = vor.u32 %v12387_v54, %v10904_v52  ;;  %vm14031_vm2 = vmor %vm5479_vm1, %vm5480_vm0 }
 0x52c   :  { %6305 = vmatpush.bf16.msrb.mxu0 %v10959_v22  ;;  %v10771_v50 = vor.u32 %v12356_v45, %v10770_v21  ;;  %v10775_v4 = vor.u32 %v12353_v27, %v10772_v0  ;;  %v12339_v31 = vld [vmem:[#allocation11 + $0x12c] sm:$0xf]  ;;  %v10716_v3 = vld [vmem:[#allocation11 + $0x144] sm:$0xf0]  ;;  %v10818_v11 = vld [vmem:[#allocation11 + $0x200] sm:$0xf]  ;;  %v5369_v35 = vadd.f32 %v13942_v8, %v13421_v40  ;;  %v5395_v51 = vadd.f32 %v13958_v12, %v13429_v19 }
 0x52d   :  { %12708 = vtanh.f32 %v5461_v47  ;;  %v5477_v37 = vmul.f32 %v14002_v16, %v5476_v9  ;;  %v10874_v47 = vld [vmem:[#allocation11 + $0x270] sm:$0xf]  ;;  %v12366_v54 = vld [vmem:[#allocation11 + $0x204] sm:$0xf]  ;;  %v10820_v52 = vld [vmem:[#allocation11 + $0x21c] sm:$0xf0]  ;;  %v10719_v8 = vor.u32 %v12339_v31, %v10716_v3 }
 0x52e   :  { %v5357_v1 = vpop.f32.mrf.mxu2  ;;  %6332 = vmatpush.bf16.msrb.mxu2 %v10935_v44  ;;  %v10875_v57 = vor.u32 %v12383_v34, %v10874_v47  ;;  %vm14042_vm3 = vcmp.eq.f32.partialorder %v5483_v13, 8.507059e+37  ;;  %v5486_v27 = vor.u32 1.1754944e-38, %v5485_v38  ;;  %v10823_v47 = vor.u32 %v12366_v54, %v10820_v52  ;;  %v10790_v34 = vld [vmem:[#allocation11 + $0x1c8] sm:$0xf]  ;;  %v10658_v13 = vld [vmem:[#allocation11 + $0xb8] sm:$0xf] }
 0x52f   :  { %v12346_v1 = vld [vmem:[#allocation11 + $0x164] sm:$0xf]  ;;  %v5478_v43 = vadd.f32 %v14002_v16, %v5477_v37  ;;  %v12332_v37 = vld [vmem:[#allocation11 + $0xf4] sm:$0xf]  ;;  %v10792_v20 = vld [vmem:[#allocation11 + $0x1e4] sm:$0xf0]  ;;  %v5382_v53 = vadd.f32 %v13968_v15, %v5369_v35 }
 0x530   :  { %6306 = vmatpush.bf16.msrb.mxu0 %v10931_v10  ;;  %v10747_v25 = vor.u32 %v12346_v1, %v10744_v56  ;;  %v12342_v10 = vld [vmem:[#allocation11 + $0x140] sm:$0xf0]  ;;  %v10630_v31 = vld [vmem:[#allocation11 + $0x80] sm:$0xf]  ;;  %v10602_v35 = vld [vmem:[#allocation11 + $0x48] sm:$0xf] }
 0x531   :  { %v12707_v23 = vpop.eup %12706  ;;  %v5482_v21 = vsel %vm14031_vm2, %v14002_v16, %v5478_v43  ;;  %v10715_v0 = vor.u32 %v12342_v10, %v10714_v49  ;;  %v12328_v43 = vld [vmem:[#allocation11 + $0xd0] sm:$0xf0]  ;;  %v10604_v54 = vld [vmem:[#allocation11 + $0x64] sm:$0xf0] }
 0x532   :  { %v14005_v2 = vadd.f32 1.0, %v12707_v23  ;;  %6333 = vmatpush.bf16.msrb.mxu2 %v10907_v6  ;;  %v10846_v23 = vld [vmem:[#allocation11 + $0x238] sm:$0xf]  ;;  %v10686_v6 = vld [vmem:[#allocation11 + $0xf0] sm:$0xf] }
 0x533   :  { %v12709_v29 = vpop.eup %12708 }
 0x534   :  { %v5464_v46 = vmul.f32 %v12709_v29, %v5463_v55  ;;  %12710 = vrcp.f32 %v14005_v2  ;;  %6307 = vmatpush.bf16.msrb.mxu0 %v10903_v60  ;;  %v10743_v55 = vor.u32 %v12349_v28, %v10742_v30  ;;  %v10848_v29 = vld [vmem:[#allocation11 + $0x254] sm:$0xf0]  ;;  %v12369_v60 = vld [vmem:[#allocation11 + $0x218] sm:$0xf0]  ;;  %v10688_v30 = vld [vmem:[#allocation11 + $0x10c] sm:$0xf0]  ;;  %vm5498_vm5 = vweird.f32 %v14005_v2 }
 0x535   :  { %v10819_v16 = vor.u32 %v12369_v60, %v10818_v11  ;;  %v12359_v28 = vld [vmem:[#allocation11 + $0x1cc] sm:$0xf]  ;;  %v5504_v1 = vand.u32 2147483648, %v14005_v2 }
 0x536   :  { %v14010_v48 = vadd.f32 %v5468_v33, %v5464_v46  ;;  %6334 = vmatpush.bf16.msrb.mxu2 %v10879_v14  ;;  %v10847_v46 = vor.u32 %v12376_v7, %v10846_v23  ;;  %v10851_v33 = vor.u32 %v12373_v59, %v10848_v29  ;;  %v12325_v23 = vld [vmem:[#allocation11 + $0xbc] sm:$0xf]  ;;  %v10660_v7 = vld [vmem:[#allocation11 + $0xd4] sm:$0xf0]  ;;  %v10659_v29 = vor.u32 %v12328_v43, %v10658_v13  ;;  %v12311_v60 = vld [vmem:[#allocation11 + $0x4c] sm:$0xf] }
 0x537   :  { %v5505_v49 = vor.u32 1.1754944e-38, %v5504_v1  ;;  %v10663_v10 = vor.u32 %v12325_v23, %v10660_v7  ;;  %v10994_v1 = vld [vmem:[#allocation11 + $0x358] sm:$0xf]  ;;  %v10722_v13 = vld [vmem:[#allocation11 + $0x130] sm:$0xf] }
 0x538   :  { %v5516_v42 = vpack.c.bf16 %v14010_v48, %v14010_v48  ;;  %6308 = vmatpush.bf16.msrb.mxu0 %v10875_v57  ;;  %v5502_v57 = vand.u32 2147483647, %v14005_v2  ;;  %v12343_v43 = vld [vmem:[#allocation11 + $0x148] sm:$0xf0]  ;;  %v10966_v7 = vld [vmem:[#allocation11 + $0x320] sm:$0xf] }
 0x53a   :  { %v14014_v41 = vpop.eup %12710  ;;  %v5654_v26 = vshrl.u32 %v5516_v42, 16  ;;  %6335 = vmatpush.bf16.msrb.mxu2 %v10851_v33  ;;  %vm5503_vm7 = vcmp.eq.f32.partialorder %v5502_v57, 8.507059e+37  ;;  %v12318_v33 = vld [vmem:[#allocation11 + $0x84] sm:$0xf] }
 0x53b   :  { %v5494_v62 = vmul.f32 %v14014_v41, %v14005_v2  ;;  %vm5499_vm4 = vweird.f32 %v14014_v41 }
 0x53c   :  { %v14019_v24 = vrot.slane %v5654_v26, 2  ;;  %v12335_v26 = vld [vmem:[#allocation11 + $0x108] sm:$0xf0]  ;;  %6309 = vmatpush.bf16.msrb.mxu0 %v10847_v46  ;;  %vm14056_vm6 = vmor %vm5498_vm5, %vm5499_vm4  ;;  %v12321_v46 = vld [vmem:[#allocation11 + $0x98] sm:$0xf0] }
 0x53d   :  { %v5495_v22 = vsub.f32 1.0, %v5494_v62  ;;  %v10687_v14 = vor.u32 %v12335_v26, %v10686_v6  ;;  %v10631_v9 = vor.u32 %v12321_v46, %v10630_v31  ;;  %v12307_v6 = vld [vmem:[#allocation11 + $0x28] sm:$0xf0]  ;;  %v12304_v26 = vld [vmem:[#allocation11 + $0x14] sm:$0xf] }
 0x53e   :  { %6247 = vmatmul.bf16.vlgmr.msrb.gmra.mxu3 %v14019_v24  ;;  %6273 = vmatmul.bf16.vlgmr.msra.gmra.mxu1 %v14019_v24  ;;  %v10938_v46 = vld [vmem:[#allocation11 + $0x2e8] sm:$0xf] }
 0x53f   :  { %6343 = vmatpush.bf16.msrb.mxu3 %v10771_v50  ;;  %6369 = vmatpush.bf16.msra.mxu1 %v10775_v4  ;;  %v5496_v44 = vmul.f32 %v14014_v41, %v5495_v22  ;;  %v5487_v50 = vsel %vm14042_vm3, %v5486_v27, %v5482_v21  ;;  %v12362_v4 = vld [vmem:[#allocation11 + $0x1e0] sm:$0xf0]  ;;  %v10691_v22 = vor.u32 %v12332_v37, %v10688_v30  ;;  %v10778_v30 = vld [vmem:[#allocation11 + $0x1a0] sm:$0xf] }
 0x540   :  { %6310 = vmatpush.bf16.msrb.mxu0 %v10819_v16  ;;  %6336 = vmatpush.bf16.msrb.mxu2 %v10823_v47  ;;  %v12314_v21 = vld [vmem:[#allocation11 + $0x60] sm:$0xf0]  ;;  %v12357_v16 = vld [vmem:[#allocation11 + $0x1b8] sm:$0xf0] }
 0x541   :  { %v5497_v62 = vadd.f32 %v14014_v41, %v5496_v44  ;;  %v10632_v44 = vld [vmem:[#allocation11 + $0x9c] sm:$0xf0]  ;;  %v10603_v27 = vor.u32 %v12314_v21, %v10602_v35  ;;  %v12329_v35 = vld [vmem:[#allocation11 + $0xd8] sm:$0xf0] }
 0x542   :  { %v10635_v11 = vor.u32 %v12318_v33, %v10632_v44  ;;  %v12398_v44 = vld [vmem:[#allocation11 + $0x300] sm:$0xf0] }
 0x543   :  { %6344 = vmatpush.bf16.msrb.mxu3 %v10743_v55  ;;  %6370 = vmatpush.bf16.msra.mxu1 %v10747_v25  ;;  %v10791_v55 = vor.u32 %v12362_v4, %v10790_v34  ;;  %v10795_v25 = vor.u32 %v12359_v28, %v10792_v20  ;;  %v5501_v2 = vsel %vm14056_vm6, %v14014_v41, %v5497_v62  ;;  %v10750_v4 = vld [vmem:[#allocation11 + $0x168] sm:$0xf]  ;;  %v12350_v28 = vld [vmem:[#allocation11 + $0x180] sm:$0xf0] }
 0x544   :  { %v5506_v3 = vsel %vm5503_vm7, %v5505_v49, %v5501_v2  ;;  %v10779_v62 = vor.u32 %v12357_v16, %v10778_v30  ;;  %v10723_v2 = vor.u32 %v12343_v43, %v10722_v13  ;;  %v12402_v49 = vld [vmem:[#allocation11 + $0x324] sm:$0xf]  ;;  %v12384_v30 = vld [vmem:[#allocation11 + $0x290] sm:$0xf0]  ;;  %v12381_v16 = vld [vmem:[#allocation11 + $0x27c] sm:$0xf] }
 0x545   :  { %6311 = vmatpush.bf16.msrb.mxu0 %v10791_v55  ;;  %6337 = vmatpush.bf16.msrb.mxu2 %v10795_v25  ;;  %v5511_v41 = vsub.f32 1.0, %v5506_v3  ;;  %v12405_v55 = vld [vmem:[#allocation11 + $0x338] sm:$0xf0]  ;;  %v10826_v43 = vld [vmem:[#allocation11 + $0x208] sm:$0xf] }
 0x546   :  { %v5407_v42 = vpop.f32.mrf.mxu2  ;;  %v10967_v31 = vor.u32 %v12405_v55, %v10966_v7 }
 0x547   :  { %v5408_v12 = vadd.f32 %v5407_v42, %v5395_v51  ;;  %6345 = vmatpush.bf16.msrb.mxu3 %v10715_v0  ;;  %6371 = vmatpush.bf16.msra.mxu1 %v10719_v8  ;;  %v5513_v42 = vmul.f32 %v5506_v3, %v13916_v32  ;;  %v10607_v0 = vor.u32 %v12311_v60, %v10604_v54  ;;  %v10574_v8 = vld [vmem:[#allocation11 + $0x10] sm:$0xf] }
 0x548   :  { %v10575_v32 = vor.u32 %v12307_v6, %v10574_v8  ;;  %v10910_v60 = vld [vmem:[#allocation11 + $0x2b0] sm:$0xf]  ;;  %v12322_v8 = vld [vmem:[#allocation11 + $0xa0] sm:$0xf0] }
 0x549   :  { %v5508_v56 = vmul.f32 %v5487_v50, %v5408_v12  ;;  %v10576_v12 = vld [vmem:[#allocation11 + $0x2c] sm:$0xf0] }
 0x54a   :  { %v10579_v34 = vor.u32 %v12304_v26, %v10576_v12  ;;  %v10882_v12 = vld [vmem:[#allocation11 + $0x278] sm:$0xf] }
 0x54b   :  { %v5509_v15 = vadd.f32 %v5508_v56, %v5382_v53  ;;  %6346 = vmatpush.bf16.msrb.mxu3 %v10687_v14  ;;  %6372 = vmatpush.bf16.msra.mxu1 %v10691_v22  ;;  %v10751_v53 = vor.u32 %v12350_v28, %v10750_v4  ;;  %v12412_v56 = vld [vmem:[#allocation11 + $0x370] sm:$0xf0]  ;;  %v12409_v14 = vld [vmem:[#allocation11 + $0x35c] sm:$0xf]  ;;  %v10996_v22 = vld [vmem:[#allocation11 + $0x374] sm:$0xf0] }
 0x54c   :  { %v10999_v23 = vor.u32 %v12409_v14, %v10996_v22  ;;  %v10854_v4 = vld [vmem:[#allocation11 + $0x240] sm:$0xf] }
 0x54d   :  { %12712 = vtanh.f32 %v5509_v15  ;;  %v10995_v15 = vor.u32 %v12412_v56, %v10994_v1  ;;  %v10856_v1 = vld [vmem:[#allocation11 + $0x25c] sm:$0xf0]  ;;  %v10582_v56 = vld [vmem:[#allocation11 + $0x18] sm:$0xf] }
 0x54e   :  { %v5409_v59 = vpop.f32.mrf.mxu2  ;;  %6299 = vmatmul.bf16.vlgmr.msra.gmra.mxu3 %v14019_v24  ;;  %6325 = vmatmul.bf16.vlgmr.msrb.gmra.mxu1 %v14019_v24 }
 0x54f   :  { %6347 = vmatpush.bf16.msrb.mxu3 %v10659_v29  ;;  %6373 = vmatpush.bf16.msra.mxu1 %v10663_v10  ;;  %v10968_v59 = vld [vmem:[#allocation11 + $0x33c] sm:$0xf0]  ;;  %v10694_v29 = vld [vmem:[#allocation11 + $0xf8] sm:$0xf]  ;;  %v12336_v10 = vld [vmem:[#allocation11 + $0x110] sm:$0xf0] }
 0x550   :  { %v10971_v3 = vor.u32 %v12402_v49, %v10968_v59  ;;  %v10695_v33 = vor.u32 %v12336_v10, %v10694_v29  ;;  %v12363_v49 = vld [vmem:[#allocation11 + $0x1e8] sm:$0xf0]  ;;  %v12360_v59 = vld [vmem:[#allocation11 + $0x1d4] sm:$0xf]  ;;  %v10800_v29 = vld [vmem:[#allocation11 + $0x1ec] sm:$0xf0] }
 0x551   :  { %v11002_v10 = vld [vmem:[#allocation11 + $0x360] sm:$0xf] }
 0x553   :  { %v12713_v51 = vpop.eup %12712  ;;  %6348 = vmatpush.bf16.msrb.mxu3 %v10631_v9  ;;  %6374 = vmatpush.bf16.msra.mxu1 %v10635_v11  ;;  %v10940_v9 = vld [vmem:[#allocation11 + $0x304] sm:$0xf0]  ;;  %v10666_v11 = vld [vmem:[#allocation11 + $0xc0] sm:$0xf] }
 0x554   :  { %v5512_v52 = vmul.f32 %v12713_v51, %v5511_v41  ;;  %v12395_v41 = vld [vmem:[#allocation11 + $0x2ec] sm:$0xf]  ;;  %v10939_v51 = vor.u32 %v12398_v44, %v10938_v46  ;;  %v10667_v54 = vor.u32 %v12329_v35, %v10666_v11  ;;  %v10803_v46 = vor.u32 %v12360_v59, %v10800_v29  ;;  %v10974_v44 = vld [vmem:[#allocation11 + $0x328] sm:$0xf]  ;;  %v10946_v11 = vld [vmem:[#allocation11 + $0x2f0] sm:$0xf] }
 0x555   :  { %v10943_v21 = vor.u32 %v12395_v41, %v10940_v9  ;;  %v12406_v41 = vld [vmem:[#allocation11 + $0x340] sm:$0xf0]  ;;  %v12399_v35 = vld [vmem:[#allocation11 + $0x308] sm:$0xf0]  ;;  %v12445_v59 = vld [vmem:[#allocation11 + $0xf8] sm:$0xf0] }
 0x556   :  { %v14066_v45 = vadd.f32 %v5513_v42, %v5512_v52  ;;  %v12391_v52 = vld [vmem:[#allocation11 + $0x2c8] sm:$0xf0]  ;;  %v12388_v42 = vld [vmem:[#allocation11 + $0x2b4] sm:$0xf]  ;;  %v10975_v9 = vor.u32 %v12406_v41, %v10974_v44 }
 0x557   :  { %6349 = vmatpush.bf16.msrb.mxu3 %v10603_v27  ;;  %6375 = vmatpush.bf16.msra.mxu1 %v10607_v0  ;;  %v10912_v27 = vld [vmem:[#allocation11 + $0x2cc] sm:$0xf0]  ;;  %v10638_v0 = vld [vmem:[#allocation11 + $0x88] sm:$0xf]  ;;  %v10911_v6 = vor.u32 %v12391_v52, %v10910_v60  ;;  %v12385_v52 = vld [vmem:[#allocation11 + $0x298] sm:$0xf0] }
 0x558   :  { %5515 = vst [vmem:[#allocation14 + $0x4] sm:$0x1] %v14066_v45  ;;  %v5517_v37 = vpack.c.bf16 %v14066_v45, %v14066_v45  ;;  %v10915_v26 = vor.u32 %v12388_v42, %v10912_v27  ;;  %v10862_v27 = vld [vmem:[#allocation11 + $0x248] sm:$0xf] }
 0x55a   :  { %v5519_v47 = vunpack.c.l.b16 %v5517_v37  ;;  %v10639_v37 = vor.u32 %v12322_v8, %v10638_v0  ;;  %v12378_v0 = vld [vmem:[#allocation11 + $0x260] sm:$0xf0] }
 0x55b   :  { %6350 = vmatpush.bf16.msrb.mxu3 %v10575_v32  ;;  %6376 = vmatpush.bf16.msra.mxu1 %v10579_v34  ;;  %v10610_v32 = vld [vmem:[#allocation11 + $0x50] sm:$0xf]  ;;  %v12315_v34 = vld [vmem:[#allocation11 + $0x68] sm:$0xf0]  ;;  %v10863_v8 = vor.u32 %v12378_v0, %v10862_v27  ;;  %v11038_v27 = vld [vmem:[#allocation11 + $0x38] sm:$0xf] }
 0x55c   :  { %v5520_v50 = vpack.c.b16 %v5519_v47, %v5519_v47  ;;  %v10884_v47 = vld [vmem:[#allocation11 + $0x294] sm:$0xf0]  ;;  %v10611_v28 = vor.u32 %v12315_v34, %v10610_v32  ;;  %v11206_v32 = vld [vmem:[#allocation11 + $0x188] sm:$0xf]  ;;  %v12466_v34 = vld [vmem:[#allocation11 + $0x1a0] sm:$0xf0] }
 0x55d   :  { %v12424_v0 = vld [vmem:[#allocation11 + $0x50] sm:$0xf0] }
 0x55e   :  { %v5522_v20 = vshll.u32 %v5520_v50, 16  ;;  %6351 = vmatmul.bf16.vlgmr.msrb.gmra.mxu3 %v14019_v24  ;;  %6377 = vmatmul.bf16.vlgmr.msra.gmra.mxu1 %v14019_v24  ;;  %v10887_v50 = vor.u32 %v12381_v16, %v10884_v47 }
 0x55f   :  { %6395 = vmatpush.bf16.msra.mxu3 %v10779_v62  ;;  %v10883_v62 = vor.u32 %v12384_v30, %v10882_v12  ;;  %v12364_v30 = vld [vmem:[#allocation11 + $0x1f0] sm:$0xf0] }
 0x560   :  { %v5524_v57 = vrot.slane %v5522_v20, 6  ;;  %v12377_v20 = vld [vmem:[#allocation11 + $0x258] sm:$0xf0] }
 0x561   :  { %v10855_v14 = vor.u32 %v12377_v20, %v10854_v4  ;;  %v11208_v4 = vld [vmem:[#allocation11 + $0x1a4] sm:$0xf0] }
 0x562   :  { %v5658_v38 = vshrl.u32 %v5524_v57, 16  ;;  %v12308_v57 = vld [vmem:[#allocation11 + $0x30] sm:$0xf0] }
 0x563   :  { %6396 = vmatpush.bf16.msra.mxu3 %v10751_v53  ;;  %v12374_v53 = vld [vmem:[#allocation11 + $0x244] sm:$0xf]  ;;  %v10583_v13 = vor.u32 %v12308_v57, %v10582_v56  ;;  %v12459_v56 = vld [vmem:[#allocation11 + $0x168] sm:$0xf0] }
 0x564   :  { %v14073_v25 = vrot.slane %v5658_v38, 2  ;;  %v10859_v22 = vor.u32 %v12374_v53, %v10856_v1  ;;  %v12370_v38 = vld [vmem:[#allocation11 + $0x220] sm:$0xf0]  ;;  %v11178_v1 = vld [vmem:[#allocation11 + $0x150] sm:$0xf] }
 0x565   :  { %v10827_v7 = vor.u32 %v12370_v38, %v10826_v43  ;;  %v11179_v57 = vor.u32 %v12459_v56, %v11178_v1  ;;  %v12452_v43 = vld [vmem:[#allocation11 + $0x130] sm:$0xf0]  ;;  %v11216_v56 = vld [vmem:[#allocation11 + $0x1ac] sm:$0xf0] }
 0x566   :  { %6260 = vmatmul.bf16.vlgmr.msra.gmra.mxu0 %v14073_v25  ;;  %6286 = vmatmul.bf16.vlgmr.msra.gmra.mxu2 %v14073_v25  ;;  %v12464_v1 = vld [vmem:[#allocation11 + $0x194] sm:$0xf] }
 0x567   :  { %6356 = vmatpush.bf16.msra.mxu0 %v10995_v15  ;;  %6382 = vmatpush.bf16.msra.mxu2 %v10999_v23  ;;  %v12367_v15 = vld [vmem:[#allocation11 + $0x20c] sm:$0xf]  ;;  %v10828_v23 = vld [vmem:[#allocation11 + $0x224] sm:$0xf0] }
 0x568   :  { %6397 = vmatpush.bf16.msra.mxu3 %v10723_v2  ;;  %v10831_v55 = vor.u32 %v12367_v15, %v10828_v23  ;;  %v10798_v2 = vld [vmem:[#allocation11 + $0x1d0] sm:$0xf]  ;;  %v12449_v23 = vld [vmem:[#allocation11 + $0x11c] sm:$0xf] }
 0x56b   :  { %6357 = vmatpush.bf16.msra.mxu0 %v10967_v31  ;;  %6383 = vmatpush.bf16.msra.mxu2 %v10971_v3  ;;  %v12413_v31 = vld [vmem:[#allocation11 + $0x378] sm:$0xf0]  ;;  %v10799_v3 = vor.u32 %v12363_v49, %v10798_v2  ;;  %v11122_v49 = vld [vmem:[#allocation11 + $0xe0] sm:$0xf] }
 0x56c   :  { %6398 = vmatpush.bf16.msra.mxu3 %v10695_v33  ;;  %v11003_v33 = vor.u32 %v12413_v31, %v11002_v10  ;;  %v11123_v29 = vor.u32 %v12445_v59, %v11122_v49  ;;  %v12442_v10 = vld [vmem:[#allocation11 + $0xe4] sm:$0xf]  ;;  %v11124_v31 = vld [vmem:[#allocation11 + $0xfc] sm:$0xf0]  ;;  %v12457_v49 = vld [vmem:[#allocation11 + $0x15c] sm:$0xf] }
 0x56f   :  { %6358 = vmatpush.bf16.msra.mxu0 %v10939_v51  ;;  %6384 = vmatpush.bf16.msra.mxu2 %v10943_v21  ;;  %v10947_v51 = vor.u32 %v12399_v35, %v10946_v11  ;;  %v10918_v21 = vld [vmem:[#allocation11 + $0x2b8] sm:$0xf]  ;;  %v11096_v11 = vld [vmem:[#allocation11 + $0xc4] sm:$0xf0] }
 0x570   :  { %6399 = vmatpush.bf16.msra.mxu3 %v10667_v54  ;;  %v10890_v54 = vld [vmem:[#allocation11 + $0x280] sm:$0xf] }
 0x571   :  { %v10891_v42 = vor.u32 %v12385_v52, %v10890_v54  ;;  %v12428_v54 = vld [vmem:[#allocation11 + $0x74] sm:$0xf]  ;;  %v11068_v52 = vld [vmem:[#allocation11 + $0x8c] sm:$0xf0] }
 0x573   :  { %6359 = vmatpush.bf16.msra.mxu0 %v10911_v6  ;;  %6385 = vmatpush.bf16.msra.mxu2 %v10915_v26  ;;  %v10834_v6 = vld [vmem:[#allocation11 + $0x210] sm:$0xf]  ;;  %v12371_v26 = vld [vmem:[#allocation11 + $0x228] sm:$0xf0] }
 0x574   :  { %6400 = vmatpush.bf16.msra.mxu3 %v10639_v37  ;;  %v10835_v12 = vor.u32 %v12371_v26, %v10834_v6  ;;  %v10806_v37 = vld [vmem:[#allocation11 + $0x1d8] sm:$0xf]  ;;  %v11039_v6 = vor.u32 %v12424_v0, %v11038_v27  ;;  %v12421_v26 = vld [vmem:[#allocation11 + $0x3c] sm:$0xf]  ;;  %v11160_v0 = vld [vmem:[#allocation11 + $0x13c] sm:$0xf0] }
 0x575   :  { %v10807_v16 = vor.u32 %v12364_v30, %v10806_v37 }
 0x576   :  { %6312 = vmatmul.bf16.vlgmr.msrb.gmra.mxu0 %v14073_v25  ;;  %6338 = vmatmul.bf16.vlgmr.msrb.gmra.mxu2 %v14073_v25 }
 0x577   :  { %6360 = vmatpush.bf16.msra.mxu0 %v10883_v62  ;;  %6386 = vmatpush.bf16.msra.mxu2 %v10887_v50  ;;  %v12463_v62 = vld [vmem:[#allocation11 + $0x18c] sm:$0xf]  ;;  %v11207_v50 = vor.u32 %v12466_v34, %v11206_v32  ;;  %v12417_v32 = vld [vmem:[#allocation11 + $0x18] sm:$0xf0] }
 0x578   :  { %6401 = vmatpush.bf16.msra.mxu3 %v10611_v28  ;;  %v11211_v28 = vor.u32 %v12463_v62, %v11208_v4  ;;  %v12414_v62 = vld [vmem:[#allocation11 + $0x4] sm:$0xf]  ;;  %v11214_v4 = vld [vmem:[#allocation11 + $0x190] sm:$0xf] }
 0x579   :  { %7241 = vmatpush.bf16.msrb.mxu1 %v11207_v50  ;;  %v11012_v50 = vld [vmem:[#allocation11 + $0x1c] sm:$0xf0] }
 0x57b   :  { %6361 = vmatpush.bf16.msra.mxu0 %v10855_v14  ;;  %6387 = vmatpush.bf16.msra.mxu2 %v10859_v22  ;;  %v12456_v14 = vld [vmem:[#allocation11 + $0x154] sm:$0xf]  ;;  %v11180_v22 = vld [vmem:[#allocation11 + $0x16c] sm:$0xf0] }
 0x57c   :  { %6402 = vmatpush.bf16.msra.mxu3 %v10583_v13  ;;  %v11183_v13 = vor.u32 %v12456_v14, %v11180_v22  ;;  %v11219_v22 = vor.u32 %v12464_v1, %v11216_v56  ;;  %v11132_v56 = vld [vmem:[#allocation11 + $0x104] sm:$0xf0] }
 0x57d   :  { %7242 = vmatpush.bf16.msrb.mxu1 %v11179_v57 }
 0x57f   :  { %6362 = vmatpush.bf16.msra.mxu0 %v10827_v7  ;;  %6403 = vmatmul.bf16.vlgmr.msra.gmra.mxu3 %v14019_v24  ;;  %v12392_v24 = vld [vmem:[#allocation11 + $0x2d0] sm:$0xf0]  ;;  %v11152_v7 = vld [vmem:[#allocation11 + $0x134] sm:$0xf0] }
 0x580   :  { %6388 = vmatpush.bf16.msra.mxu2 %v10831_v55  ;;  %v10919_v60 = vor.u32 %v12392_v24, %v10918_v21  ;;  %7267 = vmatpush.bf16.msrb.mxu3 %v11211_v28  ;;  %v11155_v55 = vor.u32 %v12449_v23, %v11152_v7  ;;  %v11066_v21 = vld [vmem:[#allocation11 + $0x70] sm:$0xf]  ;;  %v12431_v24 = vld [vmem:[#allocation11 + $0x88] sm:$0xf0]  ;;  %v11015_v28 = vor.u32 %v12414_v62, %v11012_v50  ;;  %v11430_v7 = vld [vmem:[#allocation11 + $0x348] sm:$0xf] }
 0x581   :  { %v11374_v50 = vld [vmem:[#allocation11 + $0x2d8] sm:$0xf] }
 0x583   :  { %6363 = vmatpush.bf16.msra.mxu0 %v10799_v3  ;;  %v11127_v3 = vor.u32 %v12442_v10, %v11124_v31  ;;  %v12519_v31 = vld [vmem:[#allocation11 + $0x34c] sm:$0xf] }
 0x584   :  { %6389 = vmatpush.bf16.msra.mxu2 %v10803_v46  ;;  %7268 = vmatpush.bf16.msrb.mxu3 %v11183_v13  ;;  %v11094_v46 = vld [vmem:[#allocation11 + $0xa8] sm:$0xf] }
 0x586   :  { %6364 = vmatmul.bf16.vlgmr.msra.gmra.mxu0 %v14073_v25 }
 0x587   :  { %6408 = vmatpush.bf16.msrb.mxu0 %v11003_v33  ;;  %6390 = vmatmul.bf16.vlgmr.msra.gmra.mxu2 %v14073_v25  ;;  %v12438_v33 = vld [vmem:[#allocation11 + $0xc0] sm:$0xf0] }
 0x588   :  { %7269 = vmatpush.bf16.msrb.mxu3 %v11155_v55  ;;  %v11095_v41 = vor.u32 %v12438_v33, %v11094_v46  ;;  %v12522_v55 = vld [vmem:[#allocation11 + $0x360] sm:$0xf0]  ;;  %v11432_v46 = vld [vmem:[#allocation11 + $0x364] sm:$0xf0] }
 0x589   :  { %v11431_v10 = vor.u32 %v12522_v55, %v11430_v7  ;;  %v11346_v55 = vld [vmem:[#allocation11 + $0x2a0] sm:$0xf] }
 0x58b   :  { %6409 = vmatpush.bf16.msrb.mxu0 %v10975_v9  ;;  %v12435_v9 = vld [vmem:[#allocation11 + $0xac] sm:$0xf]  ;;  %7254 = vmatpush.bf16.msrb.mxu2 %v11431_v10 }
 0x58c   :  { %7270 = vmatpush.bf16.msrb.mxu3 %v11127_v3  ;;  %v11099_v35 = vor.u32 %v12435_v9, %v11096_v11  ;;  %v11435_v9 = vor.u32 %v12519_v31, %v11432_v46  ;;  %v11158_v11 = vld [vmem:[#allocation11 + $0x120] sm:$0xf]  ;;  %v12498_v31 = vld [vmem:[#allocation11 + $0x2a4] sm:$0xf] }
 0x58f   :  { %6410 = vmatpush.bf16.msrb.mxu0 %v10947_v51 }
 0x590   :  { %7271 = vmatpush.bf16.msrb.mxu3 %v11099_v35  ;;  %v12453_v35 = vld [vmem:[#allocation11 + $0x138] sm:$0xf0] }
 0x593   :  { %6411 = vmatpush.bf16.msrb.mxu0 %v10919_v60  ;;  %v11067_v60 = vor.u32 %v12431_v24, %v11066_v21  ;;  %v11159_v21 = vor.u32 %v12453_v35, %v11158_v11  ;;  %v11402_v24 = vld [vmem:[#allocation11 + $0x310] sm:$0xf]  ;;  %v11074_v11 = vld [vmem:[#allocation11 + $0x78] sm:$0xf]  ;;  %v12432_v35 = vld [vmem:[#allocation11 + $0x90] sm:$0xf0] }
 0x597   :  { %6412 = vmatpush.bf16.msrb.mxu0 %v10891_v42  ;;  %v11071_v42 = vor.u32 %v12428_v54, %v11068_v52  ;;  %v12450_v54 = vld [vmem:[#allocation11 + $0x124] sm:$0xf] }
 0x599   :  { %7272 = vmatpush.bf16.msrb.mxu3 %v11071_v42 }
 0x59b   :  { %6413 = vmatpush.bf16.msrb.mxu0 %v10863_v8 }
 0x59f   :  { %6414 = vmatpush.bf16.msrb.mxu0 %v10835_v12  ;;  %v11040_v12 = vld [vmem:[#allocation11 + $0x54] sm:$0xf0] }
 0x5a0   :  { %v11043_v37 = vor.u32 %v12421_v26, %v11040_v12  ;;  %v11404_v26 = vld [vmem:[#allocation11 + $0x32c] sm:$0xf0] }
 0x5a2   :  { %7273 = vmatpush.bf16.msrb.mxu3 %v11043_v37 }
 0x5a3   :  { %6415 = vmatpush.bf16.msrb.mxu0 %v10807_v16  ;;  %v11010_v16 = vld [vmem:[#allocation11] sm:$0xf] }
 0x5a4   :  { %v11011_v34 = vor.u32 %v12417_v32, %v11010_v16  ;;  %v11130_v32 = vld [vmem:[#allocation11 + $0xe8] sm:$0xf] }
 0x5a6   :  { %6416 = vmatmul.bf16.vlgmr.msrb.gmra.mxu0 %v14073_v25  ;;  %v11150_v25 = vld [vmem:[#allocation11 + $0x118] sm:$0xf]  ;;  %7274 = vmatpush.bf16.msrb.mxu3 %v11015_v28  ;;  %v12443_v28 = vld [vmem:[#allocation11 + $0xec] sm:$0xf] }
 0x5a7   :  { %v11151_v15 = vor.u32 %v12452_v43, %v11150_v25  ;;  %7280 = vmatpush.bf16.msra.mxu0 %v11435_v9 }
 0x5a9   :  { %7243 = vmatpush.bf16.msrb.mxu1 %v11151_v15  ;;  %v12460_v15 = vld [vmem:[#allocation11 + $0x170] sm:$0xf0] }
 0x5aa   :  { %7319 = vmatpush.bf16.msra.mxu3 %v11219_v22  ;;  %v11135_v22 = vor.u32 %v12443_v28, %v11132_v56  ;;  %v12422_v28 = vld [vmem:[#allocation11 + $0x44] sm:$0xf] }
 0x5ad   :  { %7244 = vmatpush.bf16.msrb.mxu1 %v11123_v29 }
 0x5b1   :  { %7245 = vmatpush.bf16.msrb.mxu1 %v11095_v41 }
 0x5b5   :  { %7246 = vmatpush.bf16.msrb.mxu1 %v11067_v60  ;;  %v12515_v60 = vld [vmem:[#allocation11 + $0x328] sm:$0xf0] }
 0x5b6   :  { %v11403_v27 = vor.u32 %v12515_v60, %v11402_v24  ;;  %v12494_v24 = vld [vmem:[#allocation11 + $0x280] sm:$0xf0]  ;;  %v12429_v60 = vld [vmem:[#allocation11 + $0x7c] sm:$0xf] }
 0x5b8   :  { %7255 = vmatpush.bf16.msrb.mxu2 %v11403_v27 }
 0x5b9   :  { %7247 = vmatpush.bf16.msrb.mxu1 %v11039_v6  ;;  %v11163_v6 = vor.u32 %v12450_v54, %v11160_v0 }
 0x5bb   :  { %v14083_v47 = vpop.f32.mrf.mxu1 }
 0x5bc   :  { %v6275_v33 = vadd.f32 %v14083_v47, %v13259_v58 }
 0x5bd   :  { %7248 = vmatpush.bf16.msrb.mxu1 %v11011_v34  ;;  %v12446_v34 = vld [vmem:[#allocation11 + $0x100] sm:$0xf0] }
 0x5be   :  { %v11131_v62 = vor.u32 %v12446_v34, %v11130_v32  ;;  %v11290_v34 = vld [vmem:[#allocation11 + $0x230] sm:$0xf] }
 0x5c1   :  { %v14085_v20 = vpop.f32.mrf.mxu3 }
 0x5c2   :  { %v6249_v57 = vadd.f32 %v14085_v20, %v13249_v63  ;;  %v11188_v20 = vld [vmem:[#allocation11 + $0x174] sm:$0xf0] }
 0x5c3   :  { %v6276_v53 = vpop.f32.mrf.mxu1  ;;  %v11191_v3 = vor.u32 %v12457_v49, %v11188_v20  ;;  %v12501_v49 = vld [vmem:[#allocation11 + $0x2b8] sm:$0xf0]  ;;  %v11104_v20 = vld [vmem:[#allocation11 + $0xcc] sm:$0xf0] }
 0x5c4   :  { %v12467_v53 = vld [vmem:[#allocation11 + $0x1a8] sm:$0xf0]  ;;  %v11347_v10 = vor.u32 %v12501_v49, %v11346_v55  ;;  %v11262_v55 = vld [vmem:[#allocation11 + $0x1f8] sm:$0xf]  ;;  %v12480_v49 = vld [vmem:[#allocation11 + $0x210] sm:$0xf0] }
 0x5c5   :  { %v11215_v14 = vor.u32 %v12467_v53, %v11214_v4  ;;  %7320 = vmatpush.bf16.msra.mxu3 %v11191_v3  ;;  %v12508_v4 = vld [vmem:[#allocation11 + $0x2f0] sm:$0xf0]  ;;  %v11348_v3 = vld [vmem:[#allocation11 + $0x2bc] sm:$0xf0] }
 0x5c6   :  { %v11375_v1 = vor.u32 %v12508_v4, %v11374_v50  ;;  %v11351_v9 = vor.u32 %v12498_v31, %v11348_v3 }
 0x5c7   :  { %7293 = vmatpush.bf16.msra.mxu1 %v11215_v14  ;;  %v11376_v14 = vld [vmem:[#allocation11 + $0x2f4] sm:$0xf0] }
 0x5c8   :  { %7256 = vmatpush.bf16.msrb.mxu2 %v11375_v1  ;;  %v12484_v1 = vld [vmem:[#allocation11 + $0x234] sm:$0xf] }
 0x5c9   :  { %v6250_v38 = vpop.f32.mrf.mxu3  ;;  %7321 = vmatpush.bf16.msra.mxu3 %v11163_v6  ;;  %v11046_v6 = vld [vmem:[#allocation11 + $0x40] sm:$0xf] }
 0x5ca   :  { %v11186_v38 = vld [vmem:[#allocation11 + $0x158] sm:$0xf] }
 0x5cb   :  { %v14087_v2 = vpop.f32.mrf.mxu1  ;;  %v11187_v23 = vor.u32 %v12460_v15, %v11186_v38  ;;  %v11102_v38 = vld [vmem:[#allocation11 + $0xb0] sm:$0xf]  ;;  %v12439_v15 = vld [vmem:[#allocation11 + $0xc8] sm:$0xf0] }
 0x5cc   :  { %v11103_v7 = vor.u32 %v12439_v15, %v11102_v38  ;;  %7257 = vmatpush.bf16.msrb.mxu2 %v11347_v10  ;;  %v6327_v0 = vadd.f32 %v14087_v2, %v13338_v17  ;;  %v11018_v38 = vld [vmem:[#allocation11 + $0x8] sm:$0xf]  ;;  %v12418_v15 = vld [vmem:[#allocation11 + $0x20] sm:$0xf0]  ;;  %v11263_v10 = vor.u32 %v12480_v49, %v11262_v55  ;;  %v12516_v55 = vld [vmem:[#allocation11 + $0x330] sm:$0xf0] }
 0x5cd   :  { %7294 = vmatpush.bf16.msra.mxu1 %v11187_v23  ;;  %7322 = vmatpush.bf16.msra.mxu3 %v11135_v22  ;;  %v12458_v49 = vld [vmem:[#allocation11 + $0x164] sm:$0xf] }
 0x5d1   :  { %v14089_v44 = vpop.f32.mrf.mxu3  ;;  %7295 = vmatpush.bf16.msra.mxu1 %v11159_v21  ;;  %v11075_v21 = vor.u32 %v12432_v35, %v11074_v11  ;;  %v11264_v35 = vld [vmem:[#allocation11 + $0x214] sm:$0xf0] }
 0x5d3   :  { %v6328_v51 = vpop.f32.mrf.mxu1 }
 0x5d5   :  { %7296 = vmatpush.bf16.msra.mxu1 %v11131_v62  ;;  %v12487_v62 = vld [vmem:[#allocation11 + $0x248] sm:$0xf0] }
 0x5d6   :  { %v11291_v4 = vor.u32 %v12487_v62, %v11290_v34 }
 0x5d9   :  { %v6302_v8 = vpop.f32.mrf.mxu3  ;;  %7297 = vmatpush.bf16.msra.mxu1 %v11103_v7  ;;  %v11019_v7 = vor.u32 %v12418_v15, %v11018_v38  ;;  %v11410_v15 = vld [vmem:[#allocation11 + $0x318] sm:$0xf] }
 0x5da   :  { %v12512_v8 = vld [vmem:[#allocation11 + $0x314] sm:$0xf] }
 0x5db   :  { %v14091_v30 = vpop.f32.mrf.mxu1  ;;  %v11407_v16 = vor.u32 %v12512_v8, %v11404_v26  ;;  %v12425_v26 = vld [vmem:[#allocation11 + $0x58] sm:$0xf0] }
 0x5dc   :  { %v11047_v32 = vor.u32 %v12425_v26, %v11046_v6  ;;  %v11236_v6 = vld [vmem:[#allocation11 + $0x1dc] sm:$0xf0] }
 0x5dd   :  { %7281 = vmatpush.bf16.msra.mxu0 %v11407_v16  ;;  %7298 = vmatpush.bf16.msra.mxu1 %v11075_v21 }
 0x5e1   :  { %v14095_v43 = vpop.f32.mrf.mxu3  ;;  %7299 = vmatpush.bf16.msra.mxu1 %v11047_v32  ;;  %v12523_v32 = vld [vmem:[#allocation11 + $0x368] sm:$0xf0] }
 0x5e3   :  { %v6261_v13 = vpop.f32.mrf.mxu0  ;;  %v6380_v29 = vpop.f32.mrf.mxu1 }
 0x5e4   :  { %v6262_v25 = vadd.f32 %v6261_v13, %v6249_v57  ;;  %v12505_v57 = vld [vmem:[#allocation11 + $0x2dc] sm:$0xf] }
 0x5e5   :  { %v11379_v13 = vor.u32 %v12505_v57, %v11376_v14  ;;  %v11292_v57 = vld [vmem:[#allocation11 + $0x24c] sm:$0xf0]  ;;  %v6301_v14 = vadd.f32 %v14089_v44, %v13275_v36  ;;  %v11020_v44 = vld [vmem:[#allocation11 + $0x24] sm:$0xf0]  ;;  %7300 = vmatpush.bf16.msra.mxu1 %v11019_v7 }
 0x5e6   :  { %v6422_v59 = vrot.slane %v6262_v25, 2 }
 0x5e7   :  { %7282 = vmatpush.bf16.msra.mxu0 %v11379_v13 }
 0x5e8   :  { %v6424_v41 = vadd.f32 %v6422_v59, %v13261_v5  ;;  %v12436_v59 = vld [vmem:[#allocation11 + $0xb4] sm:$0xf] }
 0x5e9   :  { %v6287_v51 = vpop.f32.mrf.mxu2  ;;  %v6354_v37 = vpop.f32.mrf.mxu3 }
 0x5ea   :  { %v11004_v52 = vmul.f32 -1.442695, %v6424_v41  ;;  %v6288_v42 = vadd.f32 %v6287_v51, %v6275_v33  ;;  %v11107_v41 = vor.u32 %v12436_v59, %v11104_v20  ;;  %v11318_v51 = vld [vmem:[#allocation11 + $0x268] sm:$0xf]  ;;  %v12415_v20 = vld [vmem:[#allocation11 + $0xc] sm:$0xf] }
 0x5eb   :  { %v6263_v47 = vpop.f32.mrf.mxu0  ;;  %7283 = vmatpush.bf16.msra.mxu0 %v11351_v9  ;;  %v11319_v54 = vor.u32 %v12494_v24, %v11318_v51  ;;  %v12477_v9 = vld [vmem:[#allocation11 + $0x1fc] sm:$0xf]  ;;  %v6353_v51 = vadd.f32 %v14095_v43, %v13355_v39 }
 0x5ec   :  { %12714 = vpow2.f32 %v11004_v52  ;;  %v6445_v12 = vrot.slane %v6288_v42, 2  ;;  %7323 = vmatpush.bf16.msra.mxu3 %v11107_v41  ;;  %v11076_v52 = vld [vmem:[#allocation11 + $0x94] sm:$0xf0]  ;;  %v12491_v42 = vld [vmem:[#allocation11 + $0x26c] sm:$0xf]  ;;  %v11023_v41 = vor.u32 %v12415_v20, %v11020_v44  ;;  %v11267_v24 = vor.u32 %v12477_v9, %v11264_v35 }
 0x5ed   :  { %v11079_v8 = vor.u32 %v12429_v60, %v11076_v52  ;;  %v11320_v47 = vld [vmem:[#allocation11 + $0x284] sm:$0xf0]  ;;  %7258 = vmatpush.bf16.msrb.mxu2 %v11319_v54  ;;  %v11234_v60 = vld [vmem:[#allocation11 + $0x1c0] sm:$0xf]  ;;  %v12473_v54 = vld [vmem:[#allocation11 + $0x1d8] sm:$0xf0] }
 0x5ee   :  { %v6447_v53 = vadd.f32 %v6445_v12, %v13266_v61  ;;  %v11323_v16 = vor.u32 %v12491_v42, %v11320_v47  ;;  %v12470_v47 = vld [vmem:[#allocation11 + $0x1c4] sm:$0xf] }
 0x5f0   :  { %v11005_v25 = vmul.f32 -1.442695, %v6447_v53  ;;  %7324 = vmatpush.bf16.msra.mxu3 %v11079_v8  ;;  %v11048_v53 = vld [vmem:[#allocation11 + $0x5c] sm:$0xf0]  ;;  %7284 = vmatpush.bf16.msra.mxu0 %v11323_v16  ;;  %v11235_v8 = vor.u32 %v12473_v54, %v11234_v60  ;;  %v11438_v16 = vld [vmem:[#allocation11 + $0x350] sm:$0xf] }
 0x5f1   :  { %v6289_v23 = vpop.f32.mrf.mxu2  ;;  %7259 = vmatpush.bf16.msrb.mxu2 %v11291_v4 }
 0x5f2   :  { %v12715_v29 = vpop.eup %12714  ;;  %12716 = vpow2.f32 %v11005_v25  ;;  %v11051_v25 = vor.u32 %v12422_v28, %v11048_v53  ;;  %v11295_v23 = vor.u32 %v12484_v1, %v11292_v57  ;;  %v11439_v28 = vor.u32 %v12523_v32, %v11438_v16  ;;  %v12520_v57 = vld [vmem:[#allocation11 + $0x354] sm:$0xf] }
 0x5f3   :  { %v14101_v46 = vadd.f32 1.0, %v12715_v29  ;;  %v6313_v33 = vpop.f32.mrf.mxu0 }
 0x5f4   :  { %v6314_v59 = vadd.f32 %v6313_v33, %v6301_v14  ;;  %7325 = vmatpush.bf16.msra.mxu3 %v11051_v25  ;;  %7285 = vmatpush.bf16.msra.mxu0 %v11295_v23  ;;  %v11440_v14 = vld [vmem:[#allocation11 + $0x36c] sm:$0xf0] }
 0x5f5   :  { %12718 = vrcp.f32 %v14101_v46  ;;  %v6438_v31 = vand.u32 2147483647, %v14101_v46  ;;  %v6440_v3 = vand.u32 2147483648, %v14101_v46  ;;  %vm6434_vm9 = vweird.f32 %v14101_v46  ;;  %7260 = vmatpush.bf16.msrb.mxu2 %v11263_v10  ;;  %v11412_v10 = vld [vmem:[#allocation11 + $0x334] sm:$0xf0] }
 0x5f6   :  { %v11443_v38 = vor.u32 %v12520_v57, %v11440_v14  ;;  %v11224_v57 = vld [vmem:[#allocation11 + $0x1b4] sm:$0xf0] }
 0x5f7   :  { %vm6439_vm11 = vcmp.eq.f32.partialorder %v6438_v31, 8.507059e+37 }
 0x5f8   :  { %v12717_v27 = vpop.eup %12716  ;;  %7326 = vmatpush.bf16.msra.mxu3 %v11023_v41  ;;  %7286 = vmatpush.bf16.msra.mxu0 %v11267_v24  ;;  %v11382_v41 = vld [vmem:[#allocation11 + $0x2e0] sm:$0xf] }
 0x5f9   :  { %v14106_v12 = vadd.f32 1.0, %v12717_v27  ;;  %v6339_v37 = vpop.f32.mrf.mxu2  ;;  %v6468_v27 = vrot.slane %v6314_v59, 2  ;;  %7261 = vmatpush.bf16.msrb.mxu2 %v11235_v8  ;;  %v11411_v59 = vor.u32 %v12516_v55, %v11410_v15  ;;  %v11384_v24 = vld [vmem:[#allocation11 + $0x2fc] sm:$0xf0]  ;;  %v12461_v15 = vld [vmem:[#allocation11 + $0x178] sm:$0xf0] }
 0x5fa   :  { %v6340_v50 = vadd.f32 %v6339_v37, %v6327_v0  ;;  %v11239_v37 = vor.u32 %v12470_v47, %v11236_v6 }
 0x5fb   :  { %v14108_v2 = vpop.eup %12718  ;;  %12720 = vrcp.f32 %v14106_v12  ;;  %v6315_v56 = vpop.f32.mrf.mxu0  ;;  %v6463_v53 = vand.u32 2147483648, %v14106_v12  ;;  %vm6457_vm13 = vweird.f32 %v14106_v12 }
 0x5fc   :  { %v6430_v22 = vmul.f32 %v14108_v2, %v14101_v46  ;;  %v11006_v13 = vmul.f32 -1.442695, %v6340_v50  ;;  %vm6435_vm8 = vweird.f32 %v14108_v2  ;;  %v6441_v46 = vor.u32 1.1754944e-38, %v6440_v3  ;;  %7287 = vmatpush.bf16.msra.mxu0 %v11239_v37  ;;  %v11356_v37 = vld [vmem:[#allocation11 + $0x2c4] sm:$0xf0] }
 0x5fd   :  { %vm14131_vm10 = vmor %vm6434_vm9, %vm6435_vm8  ;;  %7306 = vmatpush.bf16.msra.mxu2 %v11439_v28  ;;  %v6464_v20 = vor.u32 1.1754944e-38, %v6463_v53  ;;  %v12495_v28 = vld [vmem:[#allocation11 + $0x288] sm:$0xf0] }
 0x5fe   :  { %v6431_v29 = vsub.f32 1.0, %v6430_v22  ;;  %12722 = vpow2.f32 %v11006_v13 }
 0x600   :  { %v6432_v11 = vmul.f32 %v14108_v2, %v6431_v29  ;;  %7332 = vmatpush.bf16.msrb.mxu0 %v11443_v38  ;;  %v12513_v29 = vld [vmem:[#allocation11 + $0x31c] sm:$0xf] }
 0x601   :  { %v14119_v33 = vpop.eup %12720  ;;  %v6341_v21 = vpop.f32.mrf.mxu2  ;;  %v11415_v3 = vor.u32 %v12513_v29, %v11412_v10  ;;  %7307 = vmatpush.bf16.msra.mxu2 %v11411_v59  ;;  %v11298_v59 = vld [vmem:[#allocation11 + $0x238] sm:$0xf]  ;;  %v12488_v29 = vld [vmem:[#allocation11 + $0x250] sm:$0xf0] }
 0x602   :  { %v6453_v52 = vmul.f32 %v14119_v33, %v14106_v12  ;;  %v6433_v42 = vadd.f32 %v14108_v2, %v6432_v11  ;;  %v14127_v0 = vpop.f32.mrf.mxu3  ;;  %vm6458_vm12 = vweird.f32 %v14119_v33  ;;  %v12509_v11 = vld [vmem:[#allocation11 + $0x2f8] sm:$0xf0]  ;;  %v12506_v21 = vld [vmem:[#allocation11 + $0x2e4] sm:$0xf] }
 0x603   :  { %v6365_v26 = vpop.f32.mrf.mxu0  ;;  %vm14150_vm14 = vmor %vm6457_vm13, %vm6458_vm12  ;;  %v11387_v54 = vor.u32 %v12506_v21, %v11384_v24  ;;  %v12454_v21 = vld [vmem:[#allocation11 + $0x140] sm:$0xf0] }
 0x604   :  { %v12723_v34 = vpop.eup %12722  ;;  %v6454_v62 = vsub.f32 1.0, %v6453_v52  ;;  %v6437_v50 = vsel %vm14131_vm10, %v14108_v2, %v6433_v42  ;;  %v6366_v4 = vadd.f32 %v6365_v26, %v6353_v51  ;;  %v6461_v2 = vand.u32 2147483647, %v14106_v12  ;;  %7333 = vmatpush.bf16.msrb.mxu0 %v11415_v3  ;;  %v11354_v42 = vld [vmem:[#allocation11 + $0x2a8] sm:$0xf] }
 0x605   :  { %v6442_v1 = vsel %vm6439_vm11, %v6441_v46, %v6437_v50  ;;  %v14140_v56 = vadd.f32 1.0, %v12723_v34  ;;  %v11383_v51 = vor.u32 %v12509_v11, %v11382_v41  ;;  %v12499_v46 = vld [vmem:[#allocation11 + $0x2ac] sm:$0xf]  ;;  %v11222_v34 = vld [vmem:[#allocation11 + $0x198] sm:$0xf]  ;;  %v11299_v3 = vor.u32 %v12488_v29, %v11298_v59 }
 0x606   :  { %v6455_v22 = vmul.f32 %v14119_v33, %v6454_v62  ;;  %v6470_v13 = vmul.f32 %v6468_v27, %v6442_v1  ;;  %v11007_v25 = vmul.f32 -1.442695, %v6366_v4  ;;  %vm6462_vm15 = vcmp.eq.f32.partialorder %v6461_v2, 8.507059e+37  ;;  %v12502_v27 = vld [vmem:[#allocation11 + $0x2c0] sm:$0xf0] }
 0x607   :  { %12724 = vrcp.f32 %v14140_v56  ;;  %7308 = vmatpush.bf16.msra.mxu2 %v11383_v51  ;;  %v11355_v43 = vor.u32 %v12502_v27, %v11354_v42  ;;  %v12468_v62 = vld [vmem:[#allocation11 + $0x1b0] sm:$0xf0]  ;;  %v11359_v50 = vor.u32 %v12499_v46, %v11356_v37  ;;  %v11326_v4 = vld [vmem:[#allocation11 + $0x270] sm:$0xf]  ;;  %v12465_v1 = vld [vmem:[#allocation11 + $0x19c] sm:$0xf]  ;;  %vm6489_vm1 = vweird.f32 %v14140_v56 }
 0x608   :  { %v6456_v23 = vadd.f32 %v14119_v33, %v6455_v22  ;;  %v6471_v7 = vadd.f32 %v6470_v13, %v13288_v18  ;;  %12726 = vpow2.f32 %v11007_v25  ;;  %7334 = vmatpush.bf16.msrb.mxu0 %v11387_v54  ;;  %v11327_v22 = vor.u32 %v12495_v28, %v11326_v4  ;;  %v12492_v13 = vld [vmem:[#allocation11 + $0x274] sm:$0xf]  ;;  %v11328_v25 = vld [vmem:[#allocation11 + $0x28c] sm:$0xf0]  ;;  %v11194_v2 = vld [vmem:[#allocation11 + $0x160] sm:$0xf] }
 0x609   :  { %v11227_v55 = vor.u32 %v12465_v1, %v11224_v57  ;;  %v12485_v41 = vld [vmem:[#allocation11 + $0x23c] sm:$0xf]  ;;  %v11300_v11 = vld [vmem:[#allocation11 + $0x254] sm:$0xf0]  ;;  %v11166_v51 = vld [vmem:[#allocation11 + $0x128] sm:$0xf] }
 0x60a   :  { %v6460_v12 = vsel %vm14150_vm14, %v14119_v33, %v6456_v23  ;;  %12728 = vtanh.f32 %v6471_v7  ;;  %v14157_v44 = vpop.f32.mrf.mxu2  ;;  %v6406_v31 = vpop.f32.mrf.mxu3  ;;  %v6476_v33 = vrot.slane %v14010_v48, 7  ;;  %v11331_v23 = vor.u32 %v12492_v13, %v11328_v25  ;;  %v11270_v42 = vld [vmem:[#allocation11 + $0x200] sm:$0xf]  ;;  %v12481_v27 = vld [vmem:[#allocation11 + $0x218] sm:$0xf0] }
 0x60b   :  { %v6367_v9 = vpop.f32.mrf.mxu0  ;;  %v6465_v35 = vsel %vm6462_vm15, %v6464_v20, %v6460_v12  ;;  %7309 = vmatpush.bf16.msra.mxu2 %v11355_v43  ;;  %v11223_v7 = vor.u32 %v12468_v62, %v11222_v34  ;;  %v11196_v12 = vld [vmem:[#allocation11 + $0x17c] sm:$0xf0]  ;;  %v11303_v24 = vor.u32 %v12485_v41, %v11300_v11  ;;  %v12451_v43 = vld [vmem:[#allocation11 + $0x12c] sm:$0xf]  ;;  %v11168_v46 = vld [vmem:[#allocation11 + $0x144] sm:$0xf0]  ;;  %v11167_v1 = vor.u32 %v12454_v21, %v11166_v51 }
 0x60c   :  { %v6473_v8 = vsub.f32 1.0, %v6465_v35  ;;  %v6478_v32 = vmul.f32 %v6476_v33, %v6465_v35  ;;  %7335 = vmatpush.bf16.msrb.mxu0 %v11359_v50  ;;  %v6493_v35 = vand.u32 2147483647, %v14140_v56  ;;  %v11199_v33 = vor.u32 %v12458_v49, %v11196_v12  ;;  %v11138_v37 = vld [vmem:[#allocation11 + $0xf0] sm:$0xf] }
 0x60d   :  { %v14159_v60 = vpop.eup %12724  ;;  %v12447_v34 = vld [vmem:[#allocation11 + $0x108] sm:$0xf0]  ;;  %v11242_v62 = vld [vmem:[#allocation11 + $0x1c8] sm:$0xf]  ;;  %v12474_v50 = vld [vmem:[#allocation11 + $0x1e0] sm:$0xf0]  ;;  %v11171_v57 = vor.u32 %v12451_v43, %v11168_v46 }
 0x60e   :  { %v12727_v52 = vpop.eup %12726  ;;  %v6485_v6 = vmul.f32 %v14159_v60, %v14140_v56  ;;  %vm6490_vm0 = vweird.f32 %v14159_v60  ;;  %v12444_v25 = vld [vmem:[#allocation11 + $0xf4] sm:$0xf]  ;;  %vm6494_vm3 = vcmp.eq.f32.partialorder %v6493_v35, 8.507059e+37  ;;  %v11139_v59 = vor.u32 %v12447_v34, %v11138_v37  ;;  %v11110_v12 = vld [vmem:[#allocation11 + $0xb8] sm:$0xf] }
 0x60f   :  { %v14162_v47 = vadd.f32 1.0, %v12727_v52  ;;  %7310 = vmatpush.bf16.msra.mxu2 %v11327_v22  ;;  %v11195_v52 = vor.u32 %v12461_v15, %v11194_v2  ;;  %vm14188_vm2 = vmor %vm6489_vm1, %vm6490_vm0  ;;  %v11244_v22 = vld [vmem:[#allocation11 + $0x1e4] sm:$0xf0]  ;;  %v11243_v2 = vor.u32 %v12474_v50, %v11242_v62  ;;  %v12437_v11 = vld [vmem:[#allocation11 + $0xbc] sm:$0xf] }
 0x610   :  { %v12729_v26 = vpop.eup %12728  ;;  %v6486_v14 = vsub.f32 1.0, %v6485_v6  ;;  %7336 = vmatpush.bf16.msrb.mxu0 %v11331_v23  ;;  %v6495_v6 = vand.u32 2147483648, %v14140_v56  ;;  %v6405_v56 = vadd.f32 %v14127_v0, %v13429_v19  ;;  %v11054_v46 = vld [vmem:[#allocation11 + $0x48] sm:$0xf]  ;;  %v12423_v37 = vld [vmem:[#allocation11 + $0x4c] sm:$0xf] }
 0x611   :  { %v6474_v16 = vmul.f32 %v12729_v26, %v6473_v8  ;;  %12730 = vrcp.f32 %v14162_v47  ;;  %v11271_v26 = vor.u32 %v12481_v27, %v11270_v42  ;;  %vm6508_vm5 = vweird.f32 %v14162_v47  ;;  %v11084_v27 = vld [vmem:[#allocation11 + $0x9c] sm:$0xf0]  ;;  %v11026_v28 = vld [vmem:[#allocation11 + $0x10] sm:$0xf]  ;;  %v12514_v51 = vld [vmem:[#allocation11 + $0x324] sm:$0xf] }
 0x612   :  { %v6393_v48 = vpop.f32.mrf.mxu2  ;;  %v6487_v31 = vmul.f32 %v14159_v60, %v6486_v14  ;;  %v12471_v14 = vld [vmem:[#allocation11 + $0x1cc] sm:$0xf]  ;;  %v6496_v23 = vor.u32 1.1754944e-38, %v6495_v6  ;;  %v6512_v35 = vand.u32 2147483647, %v14162_v47 }
 0x613   :  { %v14167_v53 = vadd.f32 %v6478_v32, %v6474_v16  ;;  %7311 = vmatpush.bf16.msra.mxu2 %v11299_v3  ;;  %v12478_v16 = vld [vmem:[#allocation11 + $0x204] sm:$0xf]  ;;  %v11272_v32 = vld [vmem:[#allocation11 + $0x21c] sm:$0xf0]  ;;  %v6514_v3 = vand.u32 2147483648, %v14162_v47 }
 0x614   :  { %v6488_v8 = vadd.f32 %v14159_v60, %v6487_v31  ;;  %7337 = vmatpush.bf16.msrb.mxu0 %v11303_v24  ;;  %v11275_v48 = vor.u32 %v12478_v16, %v11272_v32  ;;  %v12440_v31 = vld [vmem:[#allocation11 + $0xd0] sm:$0xf0]  ;;  %vm6513_vm7 = vcmp.eq.f32.partialorder %v6512_v35, 8.507059e+37  ;;  %v11056_v16 = vld [vmem:[#allocation11 + $0x64] sm:$0xf0] }
 0x615   :  { %v6526_v38 = vpack.c.bf16 %v14167_v53, %v14167_v53  ;;  %v11111_v24 = vor.u32 %v12440_v31, %v11110_v12  ;;  %v6515_v42 = vor.u32 1.1754944e-38, %v6514_v3  ;;  %v11174_v31 = vld [vmem:[#allocation11 + $0x130] sm:$0xf]  ;;  %v12455_v3 = vld [vmem:[#allocation11 + $0x148] sm:$0xf0] }
 0x616   :  { %v6492_v13 = vsel %vm14188_vm2, %v14159_v60, %v6488_v8 }
 0x617   :  { %v14171_v10 = vpop.eup %12730  ;;  %v14173_v20 = vrot.slane %v6526_v38, 3  ;;  %v11140_v38 = vld [vmem:[#allocation11 + $0x10c] sm:$0xf0]  ;;  %7312 = vmatpush.bf16.msra.mxu2 %v11271_v26  ;;  %v6497_v29 = vsel %vm6494_vm3, %v6496_v23, %v6492_v13  ;;  %v12426_v26 = vld [vmem:[#allocation11 + $0x60] sm:$0xf0] }
 0x618   :  { %v6504_v9 = vmul.f32 %v14171_v10, %v14162_v47  ;;  %7338 = vmatpush.bf16.msrb.mxu0 %v11275_v48  ;;  %vm6509_vm4 = vweird.f32 %v14171_v10  ;;  %v11143_v60 = vor.u32 %v12444_v25, %v11140_v38  ;;  %v12430_v47 = vld [vmem:[#allocation11 + $0x84] sm:$0xf]  ;;  %v11055_v48 = vor.u32 %v12426_v26, %v11054_v46  ;;  %v12469_v13 = vld [vmem:[#allocation11 + $0x1b8] sm:$0xf0]  ;;  %v11202_v23 = vld [vmem:[#allocation11 + $0x168] sm:$0xf] }
 0x619   :  { %7249 = vmatmul.bf16.vlgmr.msrb.gmra.mxu1 %v14173_v20  ;;  %7275 = vmatmul.bf16.vlgmr.msrb.gmra.mxu3 %v14173_v20  ;;  %vm14207_vm6 = vmor %vm6508_vm5, %vm6509_vm4  ;;  %v11087_v43 = vor.u32 %v12430_v47, %v11084_v27  ;;  %v12510_v47 = vld [vmem:[#allocation11 + $0x300] sm:$0xf0]  ;;  %v12507_v27 = vld [vmem:[#allocation11 + $0x2ec] sm:$0xf] }
 0x61a   :  { %v6505_v54 = vsub.f32 1.0, %v6504_v9  ;;  %7345 = vmatpush.bf16.msrb.mxu1 %v11223_v7  ;;  %7371 = vmatpush.bf16.msrb.mxu3 %v11227_v55  ;;  %v11247_v7 = vor.u32 %v12471_v14, %v11244_v22  ;;  %v6379_v55 = vadd.f32 %v14091_v30, %v13421_v40  ;;  %v11112_v30 = vld [vmem:[#allocation11 + $0xd4] sm:$0xf0]  ;;  %v11028_v14 = vld [vmem:[#allocation11 + $0x2c] sm:$0xf0] }
 0x61b   :  { %7313 = vmatpush.bf16.msra.mxu2 %v11243_v2 }
 0x61c   :  { %v6506_v4 = vmul.f32 %v14171_v10, %v6505_v54  ;;  %v6392_v41 = vadd.f32 %v14157_v44, %v6379_v55  ;;  %7339 = vmatpush.bf16.msrb.mxu0 %v11247_v7  ;;  %v11115_v54 = vor.u32 %v12437_v11, %v11112_v30  ;;  %v12462_v7 = vld [vmem:[#allocation11 + $0x180] sm:$0xf0]  ;;  %v11446_v55 = vld [vmem:[#allocation11 + $0x358] sm:$0xf]  ;;  %v11418_v11 = vld [vmem:[#allocation11 + $0x320] sm:$0xf] }
 0x61d   :  { %v12517_v30 = vld [vmem:[#allocation11 + $0x338] sm:$0xf0] }
 0x61e   :  { %7346 = vmatpush.bf16.msrb.mxu1 %v11195_v52  ;;  %7372 = vmatpush.bf16.msrb.mxu3 %v11199_v33  ;;  %v6507_v0 = vadd.f32 %v14171_v10, %v6506_v4  ;;  %v11082_v52 = vld [vmem:[#allocation11 + $0x80] sm:$0xf]  ;;  %v12433_v33 = vld [vmem:[#allocation11 + $0x98] sm:$0xf0]  ;;  %v11059_v4 = vor.u32 %v12423_v37, %v11056_v16  ;;  %v11362_v37 = vld [vmem:[#allocation11 + $0x2b0] sm:$0xf] }
 0x61f   :  { %v12503_v16 = vld [vmem:[#allocation11 + $0x2c8] sm:$0xf0] }
 0x620   :  { %v6511_v44 = vsel %vm14207_vm6, %v14171_v10, %v6507_v0  ;;  %v11083_v10 = vor.u32 %v12433_v33, %v11082_v52  ;;  %v12521_v0 = vld [vmem:[#allocation11 + $0x35c] sm:$0xf]  ;;  %v11419_v52 = vor.u32 %v12517_v30, %v11418_v11 }
 0x621   :  { %v6516_v6 = vsel %vm6513_vm7, %v6515_v42, %v6511_v44  ;;  %v11175_v44 = vor.u32 %v12455_v3, %v11174_v31  ;;  %v11390_v42 = vld [vmem:[#allocation11 + $0x2e8] sm:$0xf]  ;;  %v12482_v31 = vld [vmem:[#allocation11 + $0x220] sm:$0xf0]  ;;  %v12479_v3 = vld [vmem:[#allocation11 + $0x20c] sm:$0xf] }
 0x622   :  { %7347 = vmatpush.bf16.msrb.mxu1 %v11167_v1  ;;  %7373 = vmatpush.bf16.msrb.mxu3 %v11171_v57  ;;  %v6521_v32 = vsub.f32 1.0, %v6516_v6  ;;  %v6523_v50 = vmul.f32 %v6516_v6, %v14066_v45  ;;  %v12419_v1 = vld [vmem:[#allocation11 + $0x28] sm:$0xf0]  ;;  %v12416_v57 = vld [vmem:[#allocation11 + $0x14] sm:$0xf]  ;;  %v11391_v46 = vor.u32 %v12510_v47, %v11390_v42 }
 0x623   :  { %v6417_v15 = vpop.f32.mrf.mxu0  ;;  %v11027_v38 = vor.u32 %v12419_v1, %v11026_v28  ;;  %v11031_v45 = vor.u32 %v12416_v57, %v11028_v14  ;;  %v11334_v1 = vld [vmem:[#allocation11 + $0x278] sm:$0xf]  ;;  %v12496_v57 = vld [vmem:[#allocation11 + $0x290] sm:$0xf0]  ;;  %v12493_v14 = vld [vmem:[#allocation11 + $0x27c] sm:$0xf] }
 0x624   :  { %v6418_v49 = vadd.f32 %v6417_v15, %v6405_v56  ;;  %v11230_v56 = vld [vmem:[#allocation11 + $0x1a0] sm:$0xf] }
 0x625   :  { %v11231_v2 = vor.u32 %v12469_v13, %v11230_v56  ;;  %v11336_v56 = vld [vmem:[#allocation11 + $0x294] sm:$0xf0] }
 0x626   :  { %v6518_v9 = vmul.f32 %v6497_v29, %v6418_v49  ;;  %7348 = vmatpush.bf16.msrb.mxu1 %v11139_v59  ;;  %7374 = vmatpush.bf16.msrb.mxu3 %v11143_v60  ;;  %v12524_v59 = vld [vmem:[#allocation11 + $0x370] sm:$0xf0]  ;;  %v11448_v29 = vld [vmem:[#allocation11 + $0x374] sm:$0xf0]  ;;  %v11203_v60 = vor.u32 %v12462_v7, %v11202_v23  ;;  %v12489_v23 = vld [vmem:[#allocation11 + $0x258] sm:$0xf0] }
 0x627   :  { %v12486_v7 = vld [vmem:[#allocation11 + $0x244] sm:$0xf] }
 0x628   :  { %v6519_v21 = vadd.f32 %v6518_v9, %v6392_v41  ;;  %v11447_v41 = vor.u32 %v12524_v59, %v11446_v55  ;;  %v11451_v9 = vor.u32 %v12521_v0, %v11448_v29  ;;  %v11308_v55 = vld [vmem:[#allocation11 + $0x25c] sm:$0xf0]  ;;  %v11034_v59 = vld [vmem:[#allocation11 + $0x18] sm:$0xf]  ;;  %v12420_v0 = vld [vmem:[#allocation11 + $0x30] sm:$0xf0] }
 0x629   :  { %7301 = vmatmul.bf16.vlgmr.msra.gmra.mxu1 %v14173_v20  ;;  %7327 = vmatmul.bf16.vlgmr.msra.gmra.mxu3 %v14173_v20 }
 0x62a   :  { %12732 = vtanh.f32 %v6519_v21  ;;  %7349 = vmatpush.bf16.msrb.mxu1 %v11111_v24  ;;  %7375 = vmatpush.bf16.msrb.mxu3 %v11115_v54  ;;  %v11420_v21 = vld [vmem:[#allocation11 + $0x33c] sm:$0xf0]  ;;  %v11146_v24 = vld [vmem:[#allocation11 + $0xf8] sm:$0xf]  ;;  %v12448_v54 = vld [vmem:[#allocation11 + $0x110] sm:$0xf0] }
 0x62b   :  { %v6419_v8 = vpop.f32.mrf.mxu0  ;;  %v11423_v33 = vor.u32 %v12514_v51, %v11420_v21  ;;  %v11147_v6 = vor.u32 %v12448_v54, %v11146_v24  ;;  %v11250_v51 = vld [vmem:[#allocation11 + $0x1d0] sm:$0xf]  ;;  %v12475_v21 = vld [vmem:[#allocation11 + $0x1e8] sm:$0xf0]  ;;  %v11454_v54 = vld [vmem:[#allocation11 + $0x360] sm:$0xf] }
 0x62c   :  { %v11392_v8 = vld [vmem:[#allocation11 + $0x304] sm:$0xf0]  ;;  %v11252_v24 = vld [vmem:[#allocation11 + $0x1ec] sm:$0xf0] }
 0x62d   :  { %v11395_v26 = vor.u32 %v12507_v27, %v11392_v8  ;;  %v11426_v27 = vld [vmem:[#allocation11 + $0x328] sm:$0xf]  ;;  %v12518_v8 = vld [vmem:[#allocation11 + $0x340] sm:$0xf0] }
 0x62e   :  { %7350 = vmatpush.bf16.msrb.mxu1 %v11083_v10  ;;  %7376 = vmatpush.bf16.msrb.mxu3 %v11087_v43  ;;  %v11118_v10 = vld [vmem:[#allocation11 + $0xc0] sm:$0xf]  ;;  %v12441_v43 = vld [vmem:[#allocation11 + $0xd8] sm:$0xf0] }
 0x630   :  { %v12733_v34 = vpop.eup %12732 }
 0x631   :  { %v6522_v62 = vmul.f32 %v12733_v34, %v6521_v32  ;;  %v12500_v32 = vld [vmem:[#allocation11 + $0x2b4] sm:$0xf]  ;;  %v11364_v34 = vld [vmem:[#allocation11 + $0x2cc] sm:$0xf0] }
 0x632   :  { %7351 = vmatpush.bf16.msrb.mxu1 %v11055_v48  ;;  %7377 = vmatpush.bf16.msrb.mxu3 %v11059_v4  ;;  %v11119_v48 = vor.u32 %v12441_v43, %v11118_v10  ;;  %v11363_v4 = vor.u32 %v12503_v16, %v11362_v37  ;;  %v11367_v28 = vor.u32 %v12500_v32, %v11364_v34  ;;  %v11398_v10 = vld [vmem:[#allocation11 + $0x2f0] sm:$0xf]  ;;  %v12511_v43 = vld [vmem:[#allocation11 + $0x308] sm:$0xf0]  ;;  %v12504_v37 = vld [vmem:[#allocation11 + $0x2d0] sm:$0xf0] }
 0x633   :  { %v14217_v22 = vadd.f32 %v6523_v50, %v6522_v62  ;;  %v11090_v62 = vld [vmem:[#allocation11 + $0x88] sm:$0xf]  ;;  %v12434_v50 = vld [vmem:[#allocation11 + $0xa0] sm:$0xf0]  ;;  %v12497_v32 = vld [vmem:[#allocation11 + $0x298] sm:$0xf0] }
 0x634   :  { %v11091_v13 = vor.u32 %v12434_v50, %v11090_v62  ;;  %v12490_v62 = vld [vmem:[#allocation11 + $0x260] sm:$0xf0] }
 0x635   :  { %6525 = vst [vmem:[#allocation14 + $0x5] sm:$0x1] %v14217_v22  ;;  %v6527_v25 = vpack.c.bf16 %v14217_v22, %v14217_v22 }
 0x636   :  { %7352 = vmatpush.bf16.msrb.mxu1 %v11027_v38  ;;  %7378 = vmatpush.bf16.msrb.mxu3 %v11031_v45  ;;  %v12427_v38 = vld [vmem:[#allocation11 + $0x68] sm:$0xf0]  ;;  %v11335_v45 = vor.u32 %v12496_v57, %v11334_v1  ;;  %v11258_v57 = vld [vmem:[#allocation11 + $0x1d8] sm:$0xf] }
 0x637   :  { %v6529_v15 = vunpack.c.l.b16 %v6527_v25  ;;  %v11062_v25 = vld [vmem:[#allocation11 + $0x50] sm:$0xf] }
 0x639   :  { %v6530_v49 = vpack.c.b16 %v6529_v15, %v6529_v15  ;;  %7353 = vmatmul.bf16.vlgmr.msrb.gmra.mxu1 %v14173_v20  ;;  %7379 = vmatmul.bf16.vlgmr.msrb.gmra.mxu3 %v14173_v20  ;;  %v11306_v15 = vld [vmem:[#allocation11 + $0x240] sm:$0xf] }
 0x63a   :  { %7397 = vmatpush.bf16.msra.mxu1 %v11231_v2  ;;  %v11339_v2 = vor.u32 %v12493_v14, %v11336_v56  ;;  %v11307_v29 = vor.u32 %v12489_v23, %v11306_v15  ;;  %v12476_v14 = vld [vmem:[#allocation11 + $0x1f0] sm:$0xf0] }
 0x63b   :  { %v6531_v12 = vrot.slane %v6530_v49, 5  ;;  %v11063_v49 = vor.u32 %v12427_v38, %v11062_v25  ;;  %v11259_v56 = vor.u32 %v12476_v14, %v11258_v57 }
 0x63d   :  { %v14224_v35 = vrot.slane %v6531_v12, 3  ;;  %v11278_v12 = vld [vmem:[#allocation11 + $0x208] sm:$0xf] }
 0x63e   :  { %7398 = vmatpush.bf16.msra.mxu1 %v11203_v60  ;;  %v11311_v60 = vor.u32 %v12486_v7, %v11308_v55  ;;  %v11279_v11 = vor.u32 %v12482_v31, %v11278_v12  ;;  %v12554_v7 = vld [vmem:[#allocation11 + $0x194] sm:$0xf]  ;;  %v11572_v55 = vld [vmem:[#allocation11 + $0x1ac] sm:$0xf0]  ;;  %v11556_v12 = vld [vmem:[#allocation11 + $0x174] sm:$0xf0] }
 0x63f   :  { %7262 = vmatmul.bf16.vlgmr.msrb.gmra.mxu2 %v14224_v35  ;;  %7288 = vmatmul.bf16.vlgmr.msra.gmra.mxu0 %v14224_v35 }
 0x640   :  { %7358 = vmatpush.bf16.msrb.mxu2 %v11447_v41  ;;  %7384 = vmatpush.bf16.msra.mxu0 %v11451_v9  ;;  %v11280_v41 = vld [vmem:[#allocation11 + $0x224] sm:$0xf0]  ;;  %v11035_v9 = vor.u32 %v12420_v0, %v11034_v59  ;;  %v11575_v59 = vor.u32 %v12554_v7, %v11572_v55  ;;  %v12556_v0 = vld [vmem:[#allocation11 + $0x1b0] sm:$0xf0]  ;;  %v12530_v55 = vld [vmem:[#allocation11 + $0x44] sm:$0xf] }
 0x641   :  { %v11283_v30 = vor.u32 %v12479_v3, %v11280_v41  ;;  %v12552_v3 = vld [vmem:[#allocation11 + $0x178] sm:$0xf0] }
 0x642   :  { %7399 = vmatpush.bf16.msra.mxu1 %v11175_v44  ;;  %v12472_v44 = vld [vmem:[#allocation11 + $0x1d4] sm:$0xf]  ;;  %7995 = vmatpush.bf16.msra.mxu3 %v11575_v59 }
 0x643   :  { %v11255_v42 = vor.u32 %v12472_v44, %v11252_v24  ;;  %v12548_v24 = vld [vmem:[#allocation11 + $0x140] sm:$0xf0] }
 0x644   :  { %7359 = vmatpush.bf16.msrb.mxu2 %v11419_v52  ;;  %7385 = vmatpush.bf16.msra.mxu0 %v11423_v33  ;;  %v12525_v52 = vld [vmem:[#allocation11 + $0x378] sm:$0xf0]  ;;  %v11251_v33 = vor.u32 %v12475_v21, %v11250_v51  ;;  %v11540_v51 = vld [vmem:[#allocation11 + $0x13c] sm:$0xf0]  ;;  %v11546_v21 = vld [vmem:[#allocation11 + $0x128] sm:$0xf] }
 0x645   :  { %v11455_v47 = vor.u32 %v12525_v52, %v11454_v54  ;;  %v11547_v52 = vor.u32 %v12548_v24, %v11546_v21 }
 0x646   :  { %7400 = vmatpush.bf16.msra.mxu1 %v11147_v6  ;;  %v11427_v6 = vor.u32 %v12518_v8, %v11426_v27  ;;  %v11524_v27 = vld [vmem:[#allocation11 + $0x104] sm:$0xf0]  ;;  %v11530_v8 = vld [vmem:[#allocation11 + $0xf0] sm:$0xf] }
 0x648   :  { %7360 = vmatpush.bf16.msrb.mxu2 %v11391_v46  ;;  %7386 = vmatpush.bf16.msra.mxu0 %v11395_v26  ;;  %v11399_v46 = vor.u32 %v12511_v43, %v11398_v10  ;;  %v11370_v26 = vld [vmem:[#allocation11 + $0x2b8] sm:$0xf]  ;;  %v12544_v10 = vld [vmem:[#allocation11 + $0x108] sm:$0xf0] }
 0x649   :  { %v11371_v16 = vor.u32 %v12504_v37, %v11370_v26  ;;  %v11531_v26 = vor.u32 %v12544_v10, %v11530_v8  ;;  %v12551_v10 = vld [vmem:[#allocation11 + $0x164] sm:$0xf] }
 0x64a   :  { %7401 = vmatpush.bf16.msra.mxu1 %v11119_v48  ;;  %v11314_v48 = vld [vmem:[#allocation11 + $0x248] sm:$0xf] }
 0x64b   :  { %v11315_v50 = vor.u32 %v12490_v62, %v11314_v48 }
 0x64c   :  { %7361 = vmatpush.bf16.msrb.mxu2 %v11363_v4  ;;  %7387 = vmatpush.bf16.msra.mxu0 %v11367_v28  ;;  %v11286_v4 = vld [vmem:[#allocation11 + $0x210] sm:$0xf]  ;;  %v12483_v28 = vld [vmem:[#allocation11 + $0x228] sm:$0xf0] }
 0x64d   :  { %v11287_v1 = vor.u32 %v12483_v28, %v11286_v4 }
 0x64e   :  { %7402 = vmatpush.bf16.msra.mxu1 %v11091_v13 }
 0x64f   :  { %7314 = vmatmul.bf16.vlgmr.msra.gmra.mxu2 %v14224_v35  ;;  %7340 = vmatmul.bf16.vlgmr.msrb.gmra.mxu0 %v14224_v35 }
 0x650   :  { %7362 = vmatpush.bf16.msrb.mxu2 %v11335_v45  ;;  %7388 = vmatpush.bf16.msra.mxu0 %v11339_v2 }
 0x652   :  { %7403 = vmatpush.bf16.msra.mxu1 %v11063_v49  ;;  %v11578_v49 = vld [vmem:[#allocation11 + $0x198] sm:$0xf] }
 0x654   :  { %7363 = vmatpush.bf16.msrb.mxu2 %v11307_v29  ;;  %7389 = vmatpush.bf16.msra.mxu0 %v11311_v60  ;;  %v11579_v29 = vor.u32 %v12556_v0, %v11578_v49  ;;  %v12550_v60 = vld [vmem:[#allocation11 + $0x15c] sm:$0xf]  ;;  %v11476_v49 = vld [vmem:[#allocation11 + $0x5c] sm:$0xf0] }
 0x655   :  { %v11559_v31 = vor.u32 %v12550_v60, %v11556_v12  ;;  %v11479_v0 = vor.u32 %v12530_v55, %v11476_v49  ;;  %v12532_v60 = vld [vmem:[#allocation11 + $0x60] sm:$0xf0] }
 0x656   :  { %7404 = vmatpush.bf16.msra.mxu1 %v11035_v9 }
 0x657   :  { %7996 = vmatpush.bf16.msra.mxu3 %v11559_v31 }
 0x658   :  { %7364 = vmatpush.bf16.msrb.mxu2 %v11279_v11  ;;  %7390 = vmatpush.bf16.msra.mxu0 %v11283_v30  ;;  %v12546_v30 = vld [vmem:[#allocation11 + $0x124] sm:$0xf] }
 0x659   :  { %7405 = vmatmul.bf16.vlgmr.msra.gmra.mxu1 %v14173_v20  ;;  %v11342_v20 = vld [vmem:[#allocation11 + $0x280] sm:$0xf]  ;;  %v11543_v44 = vor.u32 %v12546_v30, %v11540_v51  ;;  %v11466_v30 = vld [vmem:[#allocation11 + $0x10] sm:$0xf]  ;;  %v12528_v51 = vld [vmem:[#allocation11 + $0x28] sm:$0xf0] }
 0x65a   :  { %v11343_v34 = vor.u32 %v12497_v32, %v11342_v20  ;;  %8021 = vmatpush.bf16.msrb.mxu1 %v11579_v29  ;;  %v12538_v20 = vld [vmem:[#allocation11 + $0xb4] sm:$0xf]  ;;  %v11508_v32 = vld [vmem:[#allocation11 + $0xcc] sm:$0xf0]  ;;  %v11482_v29 = vld [vmem:[#allocation11 + $0x48] sm:$0xf]  ;;  %v11467_v24 = vor.u32 %v12528_v51, %v11466_v30 }
 0x65b   :  { %7997 = vmatpush.bf16.msra.mxu3 %v11543_v44  ;;  %v11511_v62 = vor.u32 %v12538_v20, %v11508_v32 }
 0x65c   :  { %7365 = vmatpush.bf16.msrb.mxu2 %v11251_v33  ;;  %7391 = vmatpush.bf16.msra.mxu0 %v11255_v42 }
 0x65f   :  { %7366 = vmatmul.bf16.vlgmr.msrb.gmra.mxu2 %v14224_v35  ;;  %7392 = vmatmul.bf16.vlgmr.msra.gmra.mxu0 %v14224_v35 }
 0x660   :  { %7410 = vmatpush.bf16.msra.mxu2 %v11455_v47  ;;  %v12542_v47 = vld [vmem:[#allocation11 + $0xec] sm:$0xf] }
 0x664   :  { %7411 = vmatpush.bf16.msra.mxu2 %v11427_v6  ;;  %v11527_v6 = vor.u32 %v12542_v47, %v11524_v27  ;;  %v12557_v47 = vld [vmem:[#allocation11 + $0x1b8] sm:$0xf0] }
 0x666   :  { %7998 = vmatpush.bf16.msra.mxu3 %v11527_v6 }
 0x668   :  { %7412 = vmatpush.bf16.msra.mxu2 %v11399_v46 }
 0x66a   :  { %7999 = vmatpush.bf16.msra.mxu3 %v11511_v62  ;;  %v11700_v62 = vld [vmem:[#allocation11 + $0x36c] sm:$0xf0] }
 0x66c   :  { %7413 = vmatpush.bf16.msra.mxu2 %v11371_v16 }
 0x670   :  { %7414 = vmatpush.bf16.msra.mxu2 %v11343_v34  ;;  %v11514_v34 = vld [vmem:[#allocation11 + $0xb8] sm:$0xf] }
 0x674   :  { %7415 = vmatpush.bf16.msra.mxu2 %v11315_v50  ;;  %v12540_v50 = vld [vmem:[#allocation11 + $0xd0] sm:$0xf0] }
 0x678   :  { %7416 = vmatpush.bf16.msra.mxu2 %v11287_v1  ;;  %v11515_v1 = vor.u32 %v12540_v50, %v11514_v34 }
 0x67c   :  { %7417 = vmatpush.bf16.msra.mxu2 %v11259_v56  ;;  %v12534_v56 = vld [vmem:[#allocation11 + $0x7c] sm:$0xf] }
 0x67f   :  { %7418 = vmatmul.bf16.vlgmr.msra.gmra.mxu2 %v14224_v35  ;;  %v11562_v35 = vld [vmem:[#allocation11 + $0x160] sm:$0xf] }
 0x680   :  { %v11563_v9 = vor.u32 %v12552_v3, %v11562_v35  ;;  %v11483_v35 = vor.u32 %v12532_v60, %v11482_v29  ;;  %v12543_v29 = vld [vmem:[#allocation11 + $0xf4] sm:$0xf]  ;;  %v11532_v60 = vld [vmem:[#allocation11 + $0x10c] sm:$0xf0] }
 0x682   :  { %8022 = vmatpush.bf16.msrb.mxu1 %v11563_v9  ;;  %v11460_v9 = vld [vmem:[#allocation11 + $0x24] sm:$0xf0] }
 0x686   :  { %8023 = vmatpush.bf16.msrb.mxu1 %v11547_v52  ;;  %v11580_v52 = vld [vmem:[#allocation11 + $0x1b4] sm:$0xf0] }
 0x68a   :  { %8024 = vmatpush.bf16.msrb.mxu1 %v11531_v26 }
 0x68e   :  { %8025 = vmatpush.bf16.msrb.mxu1 %v11515_v1  ;;  %v12588_v1 = vld [vmem:[#allocation11 + $0x370] sm:$0xf0] }
 0x696   :  { %v7250_v13 = vpop.f32.mrf.mxu1 }
 0x697   :  { %v7251_v37 = vadd.f32 %v7250_v13, %v13249_v63  ;;  %v11492_v63 = vld [vmem:[#allocation11 + $0x94] sm:$0xf0] }
 0x698   :  { %v11495_v13 = vor.u32 %v12534_v56, %v11492_v63  ;;  %v11548_v56 = vld [vmem:[#allocation11 + $0x144] sm:$0xf0] }
 0x69a   :  { %8000 = vmatpush.bf16.msra.mxu3 %v11495_v13 }
 0x69c   :  { %v7276_v25 = vpop.f32.mrf.mxu3 }
 0x69d   :  { %v7277_v54 = vadd.f32 %v7276_v25, %v13259_v58  ;;  %v12536_v25 = vld [vmem:[#allocation11 + $0x98] sm:$0xf0] }
 0x69e   :  { %v7252_v38 = vpop.f32.mrf.mxu1  ;;  %8001 = vmatpush.bf16.msra.mxu3 %v11479_v0  ;;  %v12584_v0 = vld [vmem:[#allocation11 + $0x338] sm:$0xf0] }
 0x6a4   :  { %v7278_v45 = vpop.f32.mrf.mxu3 }
 0x6a6   :  { %v14234_v2 = vpop.f32.mrf.mxu1 }
 0x6ac   :  { %v14236_v15 = vpop.f32.mrf.mxu3 }
 0x6ae   :  { %v7304_v23 = vpop.f32.mrf.mxu1 }
 0x6b4   :  { %v7330_v41 = vpop.f32.mrf.mxu3 }
 0x6b5   :  { %v12526_v41 = vld [vmem:[#allocation11 + $0xc] sm:$0xf] }
 0x6b6   :  { %v14238_v11 = vpop.f32.mrf.mxu1  ;;  %v11463_v44 = vor.u32 %v12526_v41, %v11460_v9  ;;  %v12545_v41 = vld [vmem:[#allocation11 + $0x110] sm:$0xf0] }
 0x6b8   :  { %8002 = vmatpush.bf16.msra.mxu3 %v11463_v44 }
 0x6bc   :  { %v7289_v33 = vpop.f32.mrf.mxu0  ;;  %v14241_v46 = vpop.f32.mrf.mxu3 }
 0x6bd   :  { %v7290_v42 = vadd.f32 %v7289_v33, %v7277_v54  ;;  %v12555_v54 = vld [vmem:[#allocation11 + $0x19c] sm:$0xf] }
 0x6be   :  { %v7356_v58 = vpop.f32.mrf.mxu1  ;;  %v11583_v33 = vor.u32 %v12555_v54, %v11580_v52 }
 0x6bf   :  { %v7447_v43 = vrot.slane %v7290_v42, 1  ;;  %v11586_v42 = vld [vmem:[#allocation11 + $0x1a0] sm:$0xf]  ;;  %v12553_v58 = vld [vmem:[#allocation11 + $0x180] sm:$0xf0] }
 0x6c0   :  { %v11587_v8 = vor.u32 %v12557_v47, %v11586_v42  ;;  %8047 = vmatpush.bf16.msrb.mxu3 %v11583_v33  ;;  %v7355_v33 = vadd.f32 %v14238_v11, %v13355_v39 }
 0x6c1   :  { %v7449_v16 = vadd.f32 %v7447_v43, %v13266_v61  ;;  %v11498_v61 = vld [vmem:[#allocation11 + $0x80] sm:$0xf] }
 0x6c2   :  { %v7263_v48 = vpop.f32.mrf.mxu2  ;;  %v11499_v23 = vor.u32 %v12536_v25, %v11498_v61  ;;  %v11564_v43 = vld [vmem:[#allocation11 + $0x17c] sm:$0xf0]  ;;  %v11554_v61 = vld [vmem:[#allocation11 + $0x130] sm:$0xf]  ;;  %v12549_v25 = vld [vmem:[#allocation11 + $0x148] sm:$0xf0] }
 0x6c3   :  { %v11457_v4 = vmul.f32 -1.442695, %v7449_v16  ;;  %v7264_v28 = vadd.f32 %v7263_v48, %v7251_v37  ;;  %v11567_v37 = vor.u32 %v12551_v10, %v11564_v43  ;;  %v11570_v16 = vld [vmem:[#allocation11 + $0x168] sm:$0xf]  ;;  %v12586_v48 = vld [vmem:[#allocation11 + $0x354] sm:$0xf] }
 0x6c4   :  { %v7291_v57 = vpop.f32.mrf.mxu0  ;;  %v7382_v45 = vpop.f32.mrf.mxu3  ;;  %8026 = vmatpush.bf16.msrb.mxu1 %v11499_v23  ;;  %v11571_v34 = vor.u32 %v12553_v58, %v11570_v16  ;;  %v11684_v23 = vld [vmem:[#allocation11 + $0x334] sm:$0xf0]  ;;  %v12580_v10 = vld [vmem:[#allocation11 + $0x300] sm:$0xf0]  ;;  %v12539_v43 = vld [vmem:[#allocation11 + $0xbc] sm:$0xf] }
 0x6c5   :  { %12734 = vpow2.f32 %v11457_v4  ;;  %v7424_v14 = vrot.slane %v7264_v28, 1  ;;  %8048 = vmatpush.bf16.msrb.mxu3 %v11567_v37  ;;  %v11703_v4 = vor.u32 %v12586_v48, %v11700_v62  ;;  %v11706_v28 = vld [vmem:[#allocation11 + $0x358] sm:$0xf]  ;;  %v12582_v45 = vld [vmem:[#allocation11 + $0x31c] sm:$0xf] }
 0x6c6   :  { %v11707_v57 = vor.u32 %v12588_v1, %v11706_v28  ;;  %v11516_v58 = vld [vmem:[#allocation11 + $0xd4] sm:$0xf0]  ;;  %v12541_v62 = vld [vmem:[#allocation11 + $0xd8] sm:$0xf0]  ;;  %v12574_v1 = vld [vmem:[#allocation11 + $0x2ac] sm:$0xf] }
 0x6c7   :  { %v7426_v38 = vadd.f32 %v7424_v14, %v13261_v5  ;;  %v7329_v5 = vadd.f32 %v14236_v15, %v13338_v17  ;;  %v12547_v14 = vld [vmem:[#allocation11 + $0x12c] sm:$0xf]  ;;  %8008 = vmatpush.bf16.msrb.mxu0 %v11703_v4  ;;  %v11519_v48 = vor.u32 %v12539_v43, %v11516_v58  ;;  %v11620_v43 = vld [vmem:[#allocation11 + $0x254] sm:$0xf0]  ;;  %v12568_v58 = vld [vmem:[#allocation11 + $0x258] sm:$0xf0] }
 0x6c8   :  { %8027 = vmatpush.bf16.msrb.mxu1 %v11483_v35  ;;  %v11551_v13 = vor.u32 %v12547_v14, %v11548_v56  ;;  %8034 = vmatpush.bf16.msrb.mxu2 %v11707_v57  ;;  %v11652_v57 = vld [vmem:[#allocation11 + $0x2c4] sm:$0xf0]  ;;  %v11658_v14 = vld [vmem:[#allocation11 + $0x2b0] sm:$0xf]  ;;  %v12562_v56 = vld [vmem:[#allocation11 + $0x204] sm:$0xf] }
 0x6c9   :  { %v11456_v7 = vmul.f32 -1.442695, %v7426_v38  ;;  %v11555_v38 = vor.u32 %v12549_v25, %v11554_v61  ;;  %v11655_v25 = vor.u32 %v12574_v1, %v11652_v57  ;;  %v7478_v1 = vrot.slane %v14167_v53, 7 }
 0x6ca   :  { %v7265_v59 = vpop.f32.mrf.mxu2  ;;  %8049 = vmatpush.bf16.msrb.mxu3 %v11551_v13 }
 0x6cb   :  { %v12735_v12 = vpop.eup %12734  ;;  %12736 = vpow2.f32 %v11456_v7  ;;  %v11690_v7 = vld [vmem:[#allocation11 + $0x320] sm:$0xf]  ;;  %v11687_v59 = vor.u32 %v12582_v45, %v11684_v23 }
 0x6cc   :  { %v14246_v31 = vadd.f32 1.0, %v12735_v12  ;;  %v7341_v3 = vpop.f32.mrf.mxu0  ;;  %8028 = vmatpush.bf16.msrb.mxu1 %v11467_v24  ;;  %v7303_v12 = vadd.f32 %v14234_v2, %v13275_v36  ;;  %v12578_v36 = vld [vmem:[#allocation11 + $0x2e4] sm:$0xf]  ;;  %v11668_v2 = vld [vmem:[#allocation11 + $0x2fc] sm:$0xf0] }
 0x6cd   :  { %v7342_v21 = vadd.f32 %v7341_v3, %v7329_v5  ;;  %v11691_v3 = vor.u32 %v12584_v0, %v11690_v7  ;;  %v11538_v5 = vld [vmem:[#allocation11 + $0xf8] sm:$0xf]  ;;  %8009 = vmatpush.bf16.msrb.mxu0 %v11687_v59  ;;  %v11506_v59 = vld [vmem:[#allocation11 + $0x88] sm:$0xf] }
 0x6ce   :  { %12738 = vrcp.f32 %v14246_v31  ;;  %v7465_v30 = vand.u32 2147483648, %v14246_v31  ;;  %v11539_v44 = vor.u32 %v12545_v41, %v11538_v5  ;;  %vm7459_vm9 = vweird.f32 %v14246_v31 }
 0x6cf   :  { %v11458_v26 = vmul.f32 -1.442695, %v7342_v21  ;;  %v11535_v21 = vor.u32 %v12543_v29, %v11532_v60  ;;  %8035 = vmatpush.bf16.msrb.mxu2 %v11691_v3  ;;  %v12537_v3 = vld [vmem:[#allocation11 + $0xa0] sm:$0xf0] }
 0x6d0   :  { %8073 = vmatpush.bf16.msra.mxu1 %v11587_v8  ;;  %v11674_v8 = vld [vmem:[#allocation11 + $0x2e8] sm:$0xf]  ;;  %v7466_v0 = vor.u32 1.1754944e-38, %v7465_v30  ;;  %v12570_v30 = vld [vmem:[#allocation11 + $0x274] sm:$0xf] }
 0x6d1   :  { %v12737_v27 = vpop.eup %12736  ;;  %8050 = vmatpush.bf16.msrb.mxu3 %v11535_v21  ;;  %v11675_v16 = vor.u32 %v12580_v10, %v11674_v8  ;;  %v11636_v21 = vld [vmem:[#allocation11 + $0x28c] sm:$0xf0] }
 0x6d2   :  { %v14251_v15 = vadd.f32 1.0, %v12737_v27  ;;  %v7315_v6 = vpop.f32.mrf.mxu2  ;;  %v11671_v27 = vor.u32 %v12578_v36, %v11668_v2  ;;  %v11484_v2 = vld [vmem:[#allocation11 + $0x64] sm:$0xf0] }
 0x6d3   :  { %v7316_v42 = vadd.f32 %v7315_v6, %v7303_v12  ;;  %v7463_v6 = vand.u32 2147483647, %v14246_v31  ;;  %8036 = vmatpush.bf16.msrb.mxu2 %v11675_v16 }
 0x6d4   :  { %12740 = vrcp.f32 %v14251_v15  ;;  %v7343_v20 = vpop.f32.mrf.mxu0  ;;  %v14254_v32 = vpop.eup %12738  ;;  %8074 = vmatpush.bf16.msra.mxu1 %v11571_v34  ;;  %v7442_v52 = vand.u32 2147483648, %v14251_v15  ;;  %v7440_v37 = vand.u32 2147483647, %v14251_v15  ;;  %8010 = vmatpush.bf16.msrb.mxu0 %v11671_v27  ;;  %vm7436_vm10 = vweird.f32 %v14251_v15 }
 0x6d5   :  { %12742 = vpow2.f32 %v11458_v26  ;;  %v7455_v63 = vmul.f32 %v14254_v32, %v14246_v31  ;;  %v11522_v20 = vld [vmem:[#allocation11 + $0xc0] sm:$0xf]  ;;  %vm7460_vm11 = vweird.f32 %v14254_v32  ;;  %v7470_v13 = vrot.slane %v7316_v42, 1  ;;  %8051 = vmatpush.bf16.msrb.mxu3 %v11519_v48  ;;  %v12533_v42 = vld [vmem:[#allocation11 + $0x68] sm:$0xf0] }
 0x6d6   :  { %v14256_v50 = vpop.f32.mrf.mxu1  ;;  %v11523_v28 = vor.u32 %v12541_v62, %v11522_v20  ;;  %vm7441_vm13 = vcmp.eq.f32.partialorder %v7440_v37, 8.507059e+37  ;;  %vm14297_vm14 = vmor %vm7459_vm9, %vm7460_vm11  ;;  %vm14306_vm15 = vcmp.eq.f32.partialorder %v7463_v6, 8.507059e+37  ;;  %v12527_v20 = vld [vmem:[#allocation11 + $0x14] sm:$0xf] }
 0x6d7   :  { %v7456_v9 = vsub.f32 1.0, %v7455_v63  ;;  %v7443_v63 = vor.u32 1.1754944e-38, %v7442_v52  ;;  %v12531_v52 = vld [vmem:[#allocation11 + $0x4c] sm:$0xf] }
 0x6d8   :  { %8075 = vmatpush.bf16.msra.mxu1 %v11555_v38  ;;  %v12576_v38 = vld [vmem:[#allocation11 + $0x2c8] sm:$0xf0]  ;;  %8011 = vmatpush.bf16.msrb.mxu0 %v11655_v25  ;;  %v11487_v8 = vor.u32 %v12531_v52, %v11484_v2  ;;  %v11692_v52 = vld [vmem:[#allocation11 + $0x33c] sm:$0xf0] }
 0x6d9   :  { %v7457_v34 = vmul.f32 %v14254_v32, %v7456_v9  ;;  %v11659_v7 = vor.u32 %v12576_v38, %v11658_v14  ;;  %v11507_v9 = vor.u32 %v12537_v3, %v11506_v59  ;;  %v12558_v59 = vld [vmem:[#allocation11 + $0x1cc] sm:$0xf] }
 0x6da   :  { %v14260_v55 = vpop.eup %12740  ;;  %v7317_v49 = vpop.f32.mrf.mxu2  ;;  %v12560_v3 = vld [vmem:[#allocation11 + $0x1e8] sm:$0xf0] }
 0x6db   :  { %v7432_v35 = vmul.f32 %v14260_v55, %v14251_v15  ;;  %v12743_v24 = vpop.eup %12742  ;;  %vm7437_vm8 = vweird.f32 %v14260_v55  ;;  %v12535_v15 = vld [vmem:[#allocation11 + $0x84] sm:$0xf]  ;;  %v11500_v49 = vld [vmem:[#allocation11 + $0x9c] sm:$0xf0]  ;;  %v7458_v60 = vadd.f32 %v14254_v32, %v7457_v34  ;;  %8037 = vmatpush.bf16.msrb.mxu2 %v11659_v7  ;;  %v11468_v34 = vld [vmem:[#allocation11 + $0x2c] sm:$0xf0] }
 0x6dc   :  { %v14267_v51 = vpop.f32.mrf.mxu0  ;;  %8076 = vmatpush.bf16.msra.mxu1 %v11539_v44  ;;  %v14276_v11 = vadd.f32 1.0, %v12743_v24  ;;  %vm14285_vm12 = vmor %vm7436_vm10, %vm7437_vm8  ;;  %v11639_v44 = vor.u32 %v12570_v30, %v11636_v21  ;;  %v11642_v24 = vld [vmem:[#allocation11 + $0x278] sm:$0xf]  ;;  %v11471_v62 = vor.u32 %v12527_v20, %v11468_v34  ;;  %v11714_v21 = vld [vmem:[#allocation11 + $0x360] sm:$0xf] }
 0x6dd   :  { %v7433_v54 = vsub.f32 1.0, %v7432_v35  ;;  %v11503_v35 = vor.u32 %v12535_v15, %v11500_v49 }
 0x6de   :  { %v7408_v47 = vpop.f32.mrf.mxu1  ;;  %12744 = vrcp.f32 %v14276_v11  ;;  %8012 = vmatpush.bf16.msrb.mxu0 %v11639_v44  ;;  %v12589_v44 = vld [vmem:[#allocation11 + $0x378] sm:$0xf0]  ;;  %v7495_v20 = vand.u32 2147483647, %v14276_v11  ;;  %v7497_v34 = vand.u32 2147483648, %v14276_v11  ;;  %vm7491_vm1 = vweird.f32 %v14276_v11 }
 0x6df   :  { %v7434_v26 = vmul.f32 %v14260_v55, %v7433_v54  ;;  %8052 = vmatpush.bf16.msrb.mxu3 %v11503_v35  ;;  %v12572_v54 = vld [vmem:[#allocation11 + $0x290] sm:$0xf0]  ;;  %v7462_v47 = vsel %vm14297_vm14, %v14254_v32, %v7458_v60  ;;  %v11594_v35 = vld [vmem:[#allocation11 + $0x1d0] sm:$0xf] }
 0x6e0   :  { %8077 = vmatpush.bf16.msra.mxu1 %v11523_v28  ;;  %v11643_v31 = vor.u32 %v12572_v54, %v11642_v24  ;;  %v7467_v32 = vsel %vm14306_vm15, %v7466_v0, %v7462_v47  ;;  %v12529_v28 = vld [vmem:[#allocation11 + $0x30] sm:$0xf0]  ;;  %v11588_v0 = vld [vmem:[#allocation11 + $0x1e4] sm:$0xf0]  ;;  %v11715_v24 = vor.u32 %v12589_v44, %v11714_v21  ;;  %v12583_v54 = vld [vmem:[#allocation11 + $0x324] sm:$0xf] }
 0x6e1   :  { %v7435_v4 = vadd.f32 %v14260_v55, %v7434_v26  ;;  %v11626_v26 = vld [vmem:[#allocation11 + $0x240] sm:$0xf]  ;;  %v7480_v49 = vmul.f32 %v7478_v1, %v7467_v32  ;;  %v11695_v27 = vor.u32 %v12583_v54, %v11692_v52  ;;  %v12577_v1 = vld [vmem:[#allocation11 + $0x2d0] sm:$0xf0]  ;;  %vm7496_vm3 = vcmp.eq.f32.partialorder %v7495_v20, 8.507059e+37 }
 0x6e2   :  { %v7367_v61 = vpop.f32.mrf.mxu2  ;;  %8038 = vmatpush.bf16.msrb.mxu2 %v11643_v31  ;;  %v11627_v6 = vor.u32 %v12568_v58, %v11626_v26  ;;  %v11682_v26 = vld [vmem:[#allocation11 + $0x2f0] sm:$0xf]  ;;  %v11612_v52 = vld [vmem:[#allocation11 + $0x224] sm:$0xf0] }
 0x6e3   :  { %v7439_v45 = vsel %vm14285_vm12, %v14260_v55, %v7435_v4  ;;  %v7368_v23 = vadd.f32 %v7367_v61, %v7355_v33  ;;  %v11490_v33 = vld [vmem:[#allocation11 + $0x50] sm:$0xf]  ;;  %8053 = vmatpush.bf16.msrb.mxu3 %v11487_v8  ;;  %v11474_v4 = vld [vmem:[#allocation11 + $0x18] sm:$0xf]  ;;  %v7475_v61 = vsub.f32 1.0, %v7467_v32  ;;  %v11595_v55 = vor.u32 %v12560_v3, %v11594_v35 }
 0x6e4   :  { %v7444_v29 = vsel %vm7441_vm13, %v7443_v63, %v7439_v45  ;;  %v7395_v12 = vpop.f32.mrf.mxu0  ;;  %8078 = vmatpush.bf16.msra.mxu1 %v11507_v9  ;;  %v11491_v10 = vor.u32 %v12533_v42, %v11490_v33  ;;  %v14310_v48 = vpop.eup %12744  ;;  %v11475_v57 = vor.u32 %v12529_v28, %v11474_v4  ;;  %v11604_v63 = vld [vmem:[#allocation11 + $0x21c] sm:$0xf0]  ;;  %v12564_v45 = vld [vmem:[#allocation11 + $0x220] sm:$0xf0]  ;;  %v11660_v4 = vld [vmem:[#allocation11 + $0x2cc] sm:$0xf0] }
 0x6e5   :  { %v7472_v5 = vmul.f32 %v7470_v13, %v7444_v29  ;;  %v11459_v41 = vmul.f32 -1.442695, %v7368_v23  ;;  %v11610_v13 = vld [vmem:[#allocation11 + $0x208] sm:$0xf]  ;;  %v7487_v38 = vmul.f32 %v14310_v48, %v14276_v11  ;;  %v11607_v15 = vor.u32 %v12562_v56, %v11604_v63  ;;  %v12585_v42 = vld [vmem:[#allocation11 + $0x340] sm:$0xf0] }
 0x6e6   :  { %8039 = vmatpush.bf16.msrb.mxu2 %v11627_v6  ;;  %v11611_v7 = vor.u32 %v12564_v45, %v11610_v13  ;;  %v11591_v12 = vor.u32 %v12558_v59, %v11588_v0  ;;  %vm7492_vm0 = vweird.f32 %v14310_v48  ;;  %v11666_v28 = vld [vmem:[#allocation11 + $0x2b8] sm:$0xf]  ;;  %v7407_v56 = vadd.f32 %v14256_v50, %v13429_v19  ;;  %v11650_v50 = vld [vmem:[#allocation11 + $0x280] sm:$0xf]  ;;  %v12567_v3 = vld [vmem:[#allocation11 + $0x244] sm:$0xf] }
 0x6e7   :  { %v7473_v36 = vadd.f32 %v7472_v5, %v13288_v18  ;;  %12746 = vpow2.f32 %v11459_v41  ;;  %v12566_v18 = vld [vmem:[#allocation11 + $0x23c] sm:$0xf]  ;;  %8054 = vmatpush.bf16.msrb.mxu3 %v11471_v62  ;;  %v7488_v60 = vsub.f32 1.0, %v7487_v38  ;;  %v11708_v41 = vld [vmem:[#allocation11 + $0x374] sm:$0xf0]  ;;  %vm14335_vm2 = vmor %vm7491_vm1, %vm7492_vm0  ;;  %v11667_v38 = vor.u32 %v12577_v1, %v11666_v28 }
 0x6e8   :  { %v11623_v16 = vor.u32 %v12566_v18, %v11620_v43  ;;  %8079 = vmatpush.bf16.msra.mxu1 %v11491_v10  ;;  %v12587_v5 = vld [vmem:[#allocation11 + $0x35c] sm:$0xf]  ;;  %v12579_v10 = vld [vmem:[#allocation11 + $0x2ec] sm:$0xf]  ;;  %v11676_v18 = vld [vmem:[#allocation11 + $0x304] sm:$0xf0]  ;;  %v7381_v45 = vadd.f32 %v14241_v46, %v13421_v40 }
 0x6e9   :  { %12748 = vtanh.f32 %v7473_v36  ;;  %v11711_v30 = vor.u32 %v12587_v5, %v11708_v41  ;;  %v11698_v36 = vld [vmem:[#allocation11 + $0x328] sm:$0xf]  ;;  %v7489_v33 = vmul.f32 %v14310_v48, %v7488_v60  ;;  %v11679_v32 = vor.u32 %v12579_v10, %v11676_v18  ;;  %v12575_v62 = vld [vmem:[#allocation11 + $0x2b4] sm:$0xf]  ;;  %v11628_v5 = vld [vmem:[#allocation11 + $0x25c] sm:$0xf0] }
 0x6ea   :  { %v7369_v37 = vpop.f32.mrf.mxu2  ;;  %8013 = vmatpush.bf16.msrb.mxu0 %v11623_v16  ;;  %8040 = vmatpush.bf16.msrb.mxu2 %v11611_v7  ;;  %v11699_v8 = vor.u32 %v12585_v42, %v11698_v36  ;;  %v11663_v11 = vor.u32 %v12575_v62, %v11660_v4  ;;  %v11644_v7 = vld [vmem:[#allocation11 + $0x294] sm:$0xf0]  ;;  %v7394_v59 = vadd.f32 %v14267_v51, %v7381_v45  ;;  %v11634_v41 = vld [vmem:[#allocation11 + $0x248] sm:$0xf]  ;;  %v12569_v51 = vld [vmem:[#allocation11 + $0x260] sm:$0xf0] }
 0x6eb   :  { %v12581_v37 = vld [vmem:[#allocation11 + $0x308] sm:$0xf0]  ;;  %v7490_v58 = vadd.f32 %v14310_v48, %v7489_v33  ;;  %v11635_v44 = vor.u32 %v12569_v51, %v11634_v41  ;;  %v11618_v36 = vld [vmem:[#allocation11 + $0x210] sm:$0xf]  ;;  %v11602_v10 = vld [vmem:[#allocation11 + $0x1d8] sm:$0xf] }
 0x6ec   :  { %8080 = vmatpush.bf16.msra.mxu1 %v11475_v57  ;;  %v11683_v6 = vor.u32 %v12581_v37, %v11682_v26  ;;  %v12561_v18 = vld [vmem:[#allocation11 + $0x1f0] sm:$0xf0] }
 0x6ed   :  { %v12747_v14 = vpop.eup %12746  ;;  %v7494_v63 = vsel %vm14335_vm2, %v14310_v48, %v7490_v58  ;;  %v11603_v20 = vor.u32 %v12561_v18, %v11602_v10 }
 0x6ee   :  { %v14315_v25 = vadd.f32 1.0, %v12747_v14  ;;  %8014 = vmatpush.bf16.msrb.mxu0 %v11607_v15  ;;  %8041 = vmatpush.bf16.msrb.mxu2 %v11595_v55  ;;  %v12571_v15 = vld [vmem:[#allocation11 + $0x27c] sm:$0xf] }
 0x6ef   :  { %v12749_v23 = vpop.eup %12748 }
 0x6f0   :  { %v7476_v53 = vmul.f32 %v12749_v23, %v7475_v61  ;;  %12750 = vrcp.f32 %v14315_v25  ;;  %v7498_v61 = vor.u32 1.1754944e-38, %v7497_v34  ;;  %vm7510_vm5 = vweird.f32 %v14315_v25 }
 0x6f1   :  { %v7516_v0 = vand.u32 2147483648, %v14315_v25  ;;  %v7514_v46 = vand.u32 2147483647, %v14315_v25 }
 0x6f2   :  { %v7481_v29 = vadd.f32 %v7480_v49, %v7476_v53  ;;  %8015 = vmatpush.bf16.msrb.mxu0 %v11591_v12  ;;  %8086 = vmatpush.bf16.msra.mxu2 %v11715_v24  ;;  %v12573_v53 = vld [vmem:[#allocation11 + $0x298] sm:$0xf0]  ;;  %v7499_v48 = vsel %vm7496_vm3, %v7498_v61, %v7494_v63  ;;  %v11647_v12 = vor.u32 %v12571_v15, %v11644_v7  ;;  %v12563_v24 = vld [vmem:[#allocation11 + $0x20c] sm:$0xf] }
 0x6f3   :  { %v11651_v35 = vor.u32 %v12573_v53, %v11650_v50  ;;  %vm7515_vm7 = vcmp.eq.f32.partialorder %v7514_v46, 8.507059e+37 }
 0x6f4   :  { %8145 = vst [vmem:[#allocation15 - $0x7] sm:$0x80] %v7481_v29  ;;  %v7528_v9 = vpack.c.bf16 %v7481_v29, %v7481_v29 }
 0x6f6   :  { %v14320_v31 = vpop.eup %12750  ;;  %v7634_v2 = vshrl.u32 %v7528_v9, 16  ;;  %8060 = vmatpush.bf16.msra.mxu0 %v11711_v30  ;;  %8087 = vmatpush.bf16.msra.mxu2 %v11699_v8  ;;  %v7517_v30 = vor.u32 1.1754944e-38, %v7516_v0  ;;  %v11596_v8 = vld [vmem:[#allocation11 + $0x1ec] sm:$0xf0] }
 0x6f7   :  { %v7506_v47 = vmul.f32 %v14320_v31, %v14315_v25  ;;  %vm7511_vm4 = vweird.f32 %v14320_v31  ;;  %v11631_v25 = vor.u32 %v12567_v3, %v11628_v5 }
 0x6f8   :  { %v14325_v43 = vrot.slane %v7634_v2, 3  ;;  %vm14351_vm6 = vmor %vm7510_vm5, %vm7511_vm4  ;;  %v12565_v2 = vld [vmem:[#allocation11 + $0x228] sm:$0xf0] }
 0x6f9   :  { %v7507_v16 = vsub.f32 1.0, %v7506_v47  ;;  %v11619_v42 = vor.u32 %v12565_v2, %v11618_v36  ;;  %v12559_v47 = vld [vmem:[#allocation11 + $0x1d4] sm:$0xf] }
 0x6fa   :  { %8003 = vmatmul.bf16.vlgmr.msra.gmra.mxu3 %v14325_v43  ;;  %8029 = vmatmul.bf16.vlgmr.msrb.gmra.mxu1 %v14325_v43  ;;  %v11599_v58 = vor.u32 %v12559_v47, %v11596_v8 }
 0x6fb   :  { %8061 = vmatpush.bf16.msra.mxu0 %v11695_v27  ;;  %v7508_v57 = vmul.f32 %v14320_v31, %v7507_v16  ;;  %8088 = vmatpush.bf16.msra.mxu2 %v11683_v6 }
 0x6fd   :  { %v7509_v49 = vadd.f32 %v14320_v31, %v7508_v57 }
 0x6ff   :  { %8062 = vmatpush.bf16.msra.mxu0 %v11679_v32  ;;  %8089 = vmatpush.bf16.msra.mxu2 %v11667_v38  ;;  %v7513_v9 = vsel %vm14351_vm6, %v14320_v31, %v7509_v49  ;;  %v11615_v31 = vor.u32 %v12563_v24, %v11612_v52 }
 0x700   :  { %v7518_v54 = vsel %vm7515_vm7, %v7517_v30, %v7513_v9 }
 0x701   :  { %v7523_v33 = vsub.f32 1.0, %v7518_v54  ;;  %v7525_v37 = vmul.f32 %v7518_v54, %v14217_v22 }
 0x702   :  { %v7419_v13 = vpop.f32.mrf.mxu2 }
 0x703   :  { %v7420_v23 = vadd.f32 %v7419_v13, %v7407_v56  ;;  %8063 = vmatpush.bf16.msra.mxu0 %v11663_v11  ;;  %8090 = vmatpush.bf16.msra.mxu2 %v11651_v35 }
 0x705   :  { %v7520_v29 = vmul.f32 %v7499_v48, %v7420_v23 }
 0x707   :  { %v7521_v55 = vadd.f32 %v7520_v29, %v7394_v59  ;;  %8064 = vmatpush.bf16.msra.mxu0 %v11647_v12  ;;  %8091 = vmatpush.bf16.msra.mxu2 %v11635_v44 }
 0x709   :  { %12752 = vtanh.f32 %v7521_v55 }
 0x70a   :  { %v7421_v21 = vpop.f32.mrf.mxu2  ;;  %8055 = vmatmul.bf16.vlgmr.msrb.gmra.mxu3 %v14325_v43  ;;  %8081 = vmatmul.bf16.vlgmr.msra.gmra.mxu1 %v14325_v43 }
 0x70b   :  { %8065 = vmatpush.bf16.msra.mxu0 %v11631_v25  ;;  %8092 = vmatpush.bf16.msra.mxu2 %v11619_v42 }
 0x70f   :  { %v12753_v27 = vpop.eup %12752  ;;  %8066 = vmatpush.bf16.msra.mxu0 %v11615_v31  ;;  %8093 = vmatpush.bf16.msra.mxu2 %v11603_v20 }
 0x710   :  { %v7524_v26 = vmul.f32 %v12753_v27, %v7523_v33 }
 0x712   :  { %v14362_v16 = vadd.f32 %v7525_v37, %v7524_v26 }
 0x713   :  { %8067 = vmatpush.bf16.msra.mxu0 %v11599_v58 }
 0x714   :  { %7527 = vst [vmem:[#allocation14 + $0x6] sm:$0x1] %v14362_v16  ;;  %v7529_v43 = vpack.c.bf16 %v14362_v16, %v14362_v16 }
 0x716   :  { %v7531_v34 = vunpack.c.l.b16 %v7529_v43 }
 0x718   :  { %v7532_v32 = vpack.c.b16 %v7531_v34, %v7531_v34 }
 0x71a   :  { %v7534_v6 = vshll.u32 %v7532_v32, 16 }
 0x71c   :  { %v7536_v62 = vrot.slane %v7534_v6, 5 }
 0x71e   :  { %v7638_v4 = vshrl.u32 %v7536_v62, 16 }
 0x720   :  { %v7640_v28 = vrot.slane %v7638_v4, 3 }
 0x722   :  { %8016 = vmatmul.bf16.vlgmr.msrb.gmra.mxu0 %v7640_v28  ;;  %8042 = vmatmul.bf16.vlgmr.msrb.gmra.mxu2 %v7640_v28 }
 0x732   :  { %8068 = vmatmul.bf16.vlgmr.msra.gmra.mxu0 %v7640_v28  ;;  %8094 = vmatmul.bf16.vlgmr.msra.gmra.mxu2 %v7640_v28 }
 0x777   :  { %v8030_v22 = vpop.f32.mrf.mxu1 }
 0x778   :  { %v8031_v23 = vadd.f32 %v8030_v22, %v13355_v39 }
 0x77d   :  { %v8004_v1 = vpop.f32.mrf.mxu3 }
 0x77e   :  { %v8005_v11 = vadd.f32 %v8004_v1, %v13338_v17 }
 0x77f   :  { %v8032_v57 = vpop.f32.mrf.mxu1 }
 0x785   :  { %v8006_v14 = vpop.f32.mrf.mxu3 }
 0x787   :  { %v8082_v56 = vpop.f32.mrf.mxu1 }
 0x788   :  { %v8083_v9 = vadd.f32 %v8082_v56, %v13429_v19 }
 0x78d   :  { %v8056_v63 = vpop.f32.mrf.mxu3 }
 0x78e   :  { %v8057_v25 = vadd.f32 %v8056_v63, %v13421_v40 }
 0x78f   :  { %v8084_v13 = vpop.f32.mrf.mxu1 }
 0x795   :  { %v8058_v61 = vpop.f32.mrf.mxu3 }
 0x79f   :  { %v8017_v38 = vpop.f32.mrf.mxu0 }
 0x7a0   :  { %v8018_v15 = vadd.f32 %v8017_v38, %v8005_v11 }
 0x7a2   :  { %v11716_v45 = vmul.f32 -1.442695, %v8018_v15 }
 0x7a4   :  { %12754 = vpow2.f32 %v11716_v45 }
 0x7a5   :  { %v8043_v7 = vpop.f32.mrf.mxu2 }
 0x7a6   :  { %v8044_v50 = vadd.f32 %v8043_v7, %v8031_v23 }
 0x7a7   :  { %v8019_v53 = vpop.f32.mrf.mxu0 }
 0x7a8   :  { %v11717_v49 = vmul.f32 -1.442695, %v8044_v50 }
 0x7aa   :  { %v12755_v48 = vpop.eup %12754  ;;  %12756 = vpow2.f32 %v11717_v49 }
 0x7ab   :  { %v8102_v59 = vadd.f32 1.0, %v12755_v48 }
 0x7ad   :  { %12758 = vrcp.f32 %v8102_v59  ;;  %v8045_v0 = vpop.f32.mrf.mxu2  ;;  %v8114_v55 = vand.u32 2147483648, %v8102_v59  ;;  %v8112_v41 = vand.u32 2147483647, %v8102_v59  ;;  %vm8108_vm9 = vweird.f32 %v8102_v59 }
 0x7af   :  { %v8069_v29 = vpop.f32.mrf.mxu0  ;;  %v8115_v44 = vor.u32 1.1754944e-38, %v8114_v55  ;;  %vm8113_vm11 = vcmp.eq.f32.partialorder %v8112_v41, 8.507059e+37 }
 0x7b0   :  { %v12757_v60 = vpop.eup %12756  ;;  %v8070_v36 = vadd.f32 %v8069_v29, %v8057_v25 }
 0x7b1   :  { %v8121_v46 = vadd.f32 1.0, %v12757_v60 }
 0x7b3   :  { %v12759_v12 = vpop.eup %12758  ;;  %12760 = vrcp.f32 %v8121_v46  ;;  %v8133_v42 = vand.u32 2147483648, %v8121_v46  ;;  %v8131_v27 = vand.u32 2147483647, %v8121_v46  ;;  %vm8127_vm13 = vweird.f32 %v8121_v46 }
 0x7b4   :  { %v8104_v17 = vmul.f32 %v12759_v12, %v8102_v59  ;;  %vm8109_vm8 = vweird.f32 %v12759_v12 }
 0x7b5   :  { %v8095_v35 = vpop.f32.mrf.mxu2  ;;  %vm8110_vm10 = vmor %vm8108_vm9, %vm8109_vm8  ;;  %v8134_v10 = vor.u32 1.1754944e-38, %v8133_v42  ;;  %vm8132_vm15 = vcmp.eq.f32.partialorder %v8131_v27, 8.507059e+37 }
 0x7b6   :  { %v8105_v3 = vsub.f32 1.0, %v8104_v17  ;;  %v8096_v54 = vadd.f32 %v8095_v35, %v8083_v9 }
 0x7b7   :  { %v8071_v39 = vpop.f32.mrf.mxu0 }
 0x7b8   :  { %v8106_v5 = vmul.f32 %v12759_v12, %v8105_v3 }
 0x7b9   :  { %v12761_v51 = vpop.eup %12760 }
 0x7ba   :  { %v8123_v30 = vmul.f32 %v12761_v51, %v8121_v46  ;;  %v8107_v21 = vadd.f32 %v12759_v12, %v8106_v5  ;;  %vm8128_vm12 = vweird.f32 %v12761_v51 }
 0x7bb   :  { %vm8129_vm14 = vmor %vm8127_vm13, %vm8128_vm12 }
 0x7bc   :  { %v8124_v24 = vsub.f32 1.0, %v8123_v30  ;;  %v8111_v52 = vsel %vm8110_vm10, %v12759_v12, %v8107_v21 }
 0x7bd   :  { %v8116_v2 = vsel %vm8113_vm11, %v8115_v44, %v8111_v52  ;;  %v8097_v33 = vpop.f32.mrf.mxu2 }
 0x7be   :  { %v8125_v31 = vmul.f32 %v12761_v51, %v8124_v24  ;;  %v8137_v47 = vmul.f32 %v8116_v2, %v8096_v54 }
 0x7c0   :  { %v8126_v19 = vadd.f32 %v12761_v51, %v8125_v31  ;;  %v8138_v8 = vadd.f32 %v8137_v47, %v8070_v36 }
 0x7c2   :  { %v8130_v40 = vsel %vm8129_vm14, %v12761_v51, %v8126_v19  ;;  %12762 = vtanh.f32 %v8138_v8 }
 0x7c3   :  { %v8135_v18 = vsel %vm8132_vm15, %v8134_v10, %v8130_v40 }
 0x7c4   :  { %v8140_v26 = vsub.f32 1.0, %v8135_v18  ;;  %v8142_v20 = vmul.f32 %v8135_v18, %v14362_v16 }
 0x7c8   :  { %v12763_v37 = vpop.eup %12762 }
 0x7c9   :  { %v8141_v58 = vmul.f32 %v12763_v37, %v8140_v26 }
 0x7cb   :  { %v8143_v43 = vadd.f32 %v8142_v20, %v8141_v58 }
 0x7cd   :  { %8144 = vst [vmem:[#allocation14 + $0x7] sm:$0x1] %v8143_v43 }
 0x7ce   :  { %8146 = vst [vmem:[#allocation15 + $0x1] sm:$0x1] %v8143_v43  ;;  %8157 = dma.vmem_to_hbm [thread:$0]  %s8153_s28, 128, %s8155_s30, [#allocation5]  }
 0x7cf   :  { %8168 = dma.vmem_to_hbm [thread:$0]  %s8164_s1, 32, %s8166_s12, [#allocation16]  }
 0x7d0   :  { %12954 = dma.done.wait [#allocation5], 128  }
 0x7d1   :  { %12955 = vsyncadd [#allocation5], 4294967168 }
 0x7d2   :  { %12956 = dma.done.wait [#allocation16], 32  }
 0x7d3   :  { %12957 = vsyncadd [#allocation16], 4294967264 }
 0x7d4   :  { %8177 = vsyncpa [#allocation4], 1 }
 0x7d5   :  { %8178 = vsyncpa [#allocation9], 1 }
 0x7d6   :  { %8179 = vsyncpa [#allocation12], 1 }
 0x7d7   :  { %8180 = vsyncpa [#allocation5], 1 }
 0x7d8   :  { %8181 = vsyncpa [#allocation16], 1 }
 0x7d9   :  { %8182 = vsyncpa [#allocation6], 1 }

</bundles_post_ra>
